<compile_context>
chip_gen: v6e
topology: v6e:2x2x1
jax: 0.10.0
libtpu: 0.0.40
codegen_flags: <defaults>
</compile_context>

<pallas_src>
import math
from functools import partial

import numpy as np
import jax
import jax.numpy as jnp
from jax import lax
from jax.experimental import pallas as pl
from jax.experimental.pallas import tpu as pltpu


# ----------------------------------------------------------------------------
# In-kernel helpers
# ----------------------------------------------------------------------------
def _standardise_block(x):
    """torch Standardisation over dim=1 (sequence axis) of a (B, S, D) block:
    (x - mean) / std with torch's unbiased std.  Reductions are done per batch
    element on 2-D (S, D) tiles (plain sublane reductions), per the review.
    No epsilon -- identical to the torch module (zero-variance features would
    be inf/NaN in torch as well)."""
    B, S, _ = x.shape
    inv_nm1 = 1.0 / (S - 1)
    outs = []
    for b in range(B):
        xb = x[b]                                              # (S, D)
        mean = jnp.mean(xb, axis=0, keepdims=True)
        var = jnp.sum((xb - mean) ** 2, axis=0, keepdims=True) * inv_nm1
        outs.append(((xb - mean) * lax.rsqrt(var))[None])
    return outs[0] if B == 1 else jnp.concatenate(outs, axis=0)


def decoder_stack_kernel(pos_ref, xm_ref, pe_ref,
                         wqkv_ref, bqkv_ref, wo_ref, bo_ref,
                         w1_ref, b1_ref, w2_ref, b2_ref,
                         o_ref, x_scr,
                         *, num_heads, depth, batch_block, n_keep):
    """Token un-shuffle + cls concat + PE add + full decoder stack + final
    Standardisation for a block of `batch_block` batch elements."""
    B = batch_block
    S = o_ref.shape[1]
    D = xm_ref.shape[2]
    BS = B * S
    d_k = D // num_heads
    inv_sqrt_dk = 1.0 / math.sqrt(d_k)
    g = pl.program_id(0)

    # ---- fused mask un-shuffle (scatter) + cls token placement ------------
    # pad rows default to zero; kept token j of batch row gb lands at
    # sequence position 1 + pos[gb, j]  (row 0 is the cls token).
    x_scr[...] = jnp.zeros(x_scr.shape, x_scr.dtype)
    for b in range(B):
        gb = g * B + b
        x_scr[pl.ds(b, 1), pl.ds(0, 1), :] = xm_ref[pl.ds(b, 1), pl.ds(0, 1), :]
        for j in range(n_keep):
            dest = pos_ref[gb, j] + 1
            x_scr[pl.ds(b, 1), pl.ds(dest, 1), :] = \
                xm_ref[pl.ds(b, 1), pl.ds(j + 1, 1), :]

    # ---- fused positional-encoding add -------------------------------------
    x = x_scr[...].astype(jnp.float32) + pe_ref[...].astype(jnp.float32)[None]

    # ---- decoder layers (static unroll; weights resident in VMEM) ----------
    for l in range(depth):
        wqkv = wqkv_ref[l]                                   # (D, 3D)
        bqkv = bqkv_ref[l]                                   # (1, 3D)
        wo = wo_ref[l]                                       # (D, D)
        bo = bo_ref[l]                                       # (1, D)
        w1 = w1_ref[l]                                       # (D, H)
        b1 = b1_ref[l]                                       # (1, H)
        w2 = w2_ref[l]                                       # (H, D)
        b2 = b2_ref[l]                                       # (1, D)

        # ---- attention sublayer ----
        sc = _standardise_block(x)                           # (B, S, D)
        # single fused QKV projection on the folded (B*S, D) view
        qkv = jnp.dot(sc.reshape(BS, D), wqkv,
                      preferred_element_type=jnp.float32) + bqkv       # (BS, 3D)
        qkv = qkv.reshape(B, S, 3 * D)
        q = qkv[..., :D]                                     # sliced once per layer
        k = qkv[..., D:2 * D]
        v = qkv[..., 2 * D:]

        ctx_heads = []
        for h in range(num_heads):                           # static unrolled heads
            lo = h * d_k
            qh = q[..., lo:lo + d_k]                         # (B, S, d_k)
            kh = k[..., lo:lo + d_k]
            vh = v[..., lo:lo + d_k]
            scores = jnp.einsum('bqd,bkd->bqk', qh, kh,
                                preferred_element_type=jnp.float32) * inv_sqrt_dk
            scores = scores - jnp.max(scores, axis=-1, keepdims=True)
            p = jnp.exp(scores)
            # approx reciprocal -> EUP slot (inference-grade accuracy)
            p = p * pl.reciprocal(jnp.sum(p, axis=-1, keepdims=True), approx=True)
            ctx_heads.append(jnp.einsum('bqk,bkd->bqd', p, vh,
                                        preferred_element_type=jnp.float32))
        # heads concatenated along lanes (contiguous 32-lane block), then ONE
        # merged output projection instead of 4 per-head K=8 matmuls.
        ctx = jnp.concatenate(ctx_heads, axis=-1)            # (B, S, D)
        attn = jnp.dot(ctx.reshape(BS, D), wo,
                       preferred_element_type=jnp.float32) + bo
        x = x + attn.reshape(B, S, D)

        # ---- MLP sublayer ----
        sc2 = _standardise_block(x)
        h1 = jnp.dot(sc2.reshape(BS, D), w1,
                     preferred_element_type=jnp.float32) + b1
        h1 = jnp.maximum(h1, 0.0)
        mlp = jnp.dot(h1, w2, preferred_element_type=jnp.float32) + b2
        x = x + mlp.reshape(B, S, D)

    # ---- final Standardisation (Decoder.norm) -------------------------------
    o_ref[...] = _standardise_block(x).astype(o_ref.dtype)


# ----------------------------------------------------------------------------
# Pallas wrapper
# ----------------------------------------------------------------------------
def _pick_batch_block(n_batch):
    """Single-TC chips (v5e/v6e): fold the whole batch into one grid step.
    Multi-TC chips (v7x): keep >= 2 grid steps so dimension_semantics can
    shard the batch across TensorCores."""
    try:
        kind = jax.devices()[0].device_kind.lower().replace(" ", "")
    except Exception:
        kind = ""
    multi_tc = ("v7" in kind) or ("tpu7" in kind)
    if multi_tc and n_batch >= 2:
        return n_batch // 2 if n_batch % 2 == 0 else 1
    return n_batch


def run_decoder_stack(x_masked, pe, pos, packed, num_heads):
    N, K1, D = x_masked.shape
    S = pe.shape[0]
    n_keep = K1 - 1
    depth = packed["wqkv"].shape[0]
    H = packed["w1"].shape[2]

    B = _pick_batch_block(N)
    G = N // B

    kern = partial(decoder_stack_kernel, num_heads=num_heads, depth=depth,
                   batch_block=B, n_keep=n_keep)
    # whole stacked weight arrays resident in VMEM (constant block index)
    w3 = lambda shp: pl.BlockSpec(shp, lambda g, pos_r: (0, 0, 0))

    grid_spec = pltpu.PrefetchScalarGridSpec(
        num_scalar_prefetch=1,                        # pos -> SMEM
        grid=(G,),
        in_specs=[
            pl.BlockSpec((B, K1, D), lambda g, pos_r: (g, 0, 0)),   # x_masked
            pl.BlockSpec((S, D), lambda g, pos_r: (0, 0)),          # positional enc.
            w3((depth, D, 3 * D)), w3((depth, 1, 3 * D)),           # fused qkv
            w3((depth, D, D)),     w3((depth, 1, D)),               # out proj
            w3((depth, D, H)),     w3((depth, 1, H)),               # mlp l1
            w3((depth, H, D)),     w3((depth, 1, D)),               # mlp l2
        ],
        out_specs=pl.BlockSpec((B, S, D), lambda g, pos_r: (g, 0, 0)),
        scratch_shapes=[pltpu.VMEM((B, S, D), jnp.float32)],
    )
    return pl.pallas_call(
        kern,
        out_shape=jax.ShapeDtypeStruct((N, S, D), x_masked.dtype),
        grid_spec=grid_spec,
        compiler_params=pltpu.CompilerParams(
            dimension_semantics=("parallel",),
            vmem_limit_bytes=32 * 1024 * 1024),
    )(pos, x_masked, pe,
      packed["wqkv"], packed["bqkv"], packed["wo"], packed["bo"],
      packed["w1"], packed["b1"], packed["w2"], packed["b2"])


# ----------------------------------------------------------------------------
# Full forward (jitted end-to-end)
# ----------------------------------------------------------------------------
@partial(jax.jit, static_argnames=("num_heads",))
def decoder_forward(x_masked, m, pe, packed, num_heads):
    """Mirrors Decoder.forward.  Only a tiny int32 index computation (which
    slot each kept token goes to) stays in the wrapper; the scatter, cls
    concat and PE add are fused into the Pallas kernel via scalar prefetch."""
    # NOTE: `x = self.embed(x_masked)` in the reference is immediately
    # overwritten (dead code), so it is skipped here.
    N, K1, D = x_masked.shape
    n_keep = K1 - 1
    L = m.shape[1]

    m_i = m.astype(jnp.int32)                                 # (N, L)
    rank = jnp.cumsum(m_i, axis=1) - 1                        # rank of each kept slot
    j_ids = jnp.arange(n_keep, dtype=jnp.int32)[None, None, :]
    l_ids = jnp.arange(L, dtype=jnp.int32)[None, :, None]
    hit = (m_i[:, :, None] == 1) & (rank[:, :, None] == j_ids)   # (N, L, n_keep)
    pos = jnp.sum(jnp.where(hit, l_ids, 0), axis=1).astype(jnp.int32)  # (N, n_keep)

    return run_decoder_stack(x_masked, pe, pos, packed, num_heads)


# ----------------------------------------------------------------------------
# Parameter init / constants
# ----------------------------------------------------------------------------
def init_params(key, depth, D, H):
    """Per-layer weights; Q/K/V fused into one (D, 3D) weight (columns laid
    out [Q | K | V], each head's d_k columns contiguous), all layers stacked
    along a leading depth axis so a single pallas_call sees everything."""
    lin = lambda k, fi, fo: jax.random.normal(k, (fi, fo), jnp.float32) * 0.05
    vec = lambda k, fo: jax.random.normal(k, (1, fo), jnp.float32) * 0.01
    wqkv, bqkv, wo, bo, w1, b1, w2, b2 = ([] for _ in range(8))
    for l in range(depth):
        ks = jax.random.split(jax.random.fold_in(key, l), 12)
        wq, wk, wv = lin(ks[0], D, D), lin(ks[2], D, D), lin(ks[4], D, D)
        bq, bk, bv = vec(ks[1], D), vec(ks[3], D), vec(ks[5], D)
        wqkv.append(jnp.concatenate([wq, wk, wv], axis=1))
        bqkv.append(jnp.concatenate([bq, bk, bv], axis=1))
        wo.append(lin(ks[6], D, D)); bo.append(vec(ks[7], D))
        w1.append(lin(ks[8], D, H)); b1.append(vec(ks[9], H))
        w2.append(lin(ks[10], H, D)); b2.append(vec(ks[11], D))
    st = lambda xs: jnp.stack(xs, axis=0)
    return {"wqkv": st(wqkv), "bqkv": st(bqkv), "wo": st(wo), "bo": st(bo),
            "w1": st(w1), "b1": st(b1), "w2": st(w2), "b2": st(b2)}


def sinusoidal_pe(n_pos, d):
    pos = np.arange(n_pos, dtype=np.float32)[:, None]
    i = np.arange(d, dtype=np.float32)[None, :]
    angle = pos / np.power(10000.0, (2.0 * np.floor(i / 2.0)) / d)
    pe = np.zeros((n_pos, d), dtype=np.float32)
    pe[:, 0::2] = np.sin(angle[:, 0::2])
    pe[:, 1::2] = np.cos(angle[:, 1::2])
    return pe


# ----------------------------------------------------------------------------
if __name__ == "__main__":
    key = jax.random.PRNGKey(0)
    N = 2            # batch
    L = 16           # Decoder.dim (number of maskable tokens)
    D = 32           # embed_dim == decoder_embed_dim
    H = 100          # MLP hidden (PyTorch default hiden=100)
    depth = 2        # decoder_depth
    heads = 4        # num_heads
    n_keep = 8       # kept (unmasked) tokens per sample

    kx, kp = jax.random.split(key)
    # x_masked = [cls token] + kept tokens
    x_masked = jax.random.normal(kx, (N, n_keep + 1, D), jnp.float32)

    # deterministic binary mask with exactly n_keep ones per row
    m_np = np.zeros((N, L), dtype=np.int32)
    m_np[0, 0:2 * n_keep:2] = 1
    m_np[1, 1:2 * n_keep:2] = 1
    m = jnp.asarray(m_np)

    # TODO(synk): PositionalEncoding class body is not given in the reference;
    # a standard fixed sinusoidal PE with a zero cls-token slot is used here.
    pe = jnp.asarray(np.concatenate([np.zeros((1, D), np.float32),
                                     sinusoidal_pe(L, D)], axis=0))

    params = init_params(kp, depth, D, H)
    out = decoder_forward(x_masked, m, pe, params, num_heads=heads)
    out = jax.block_until_ready(out)

    assert out.shape == (N, L + 1, D), out.shape
    assert bool(jnp.all(jnp.isfinite(out)))
    print("KERNEL_OK")
</pallas_src>

<mosaic_0001>
module attributes {stable_mosaic.version = 11 : i64} {
  func.func @decoder_stack_kernel(%arg0: i32, %arg1: memref<2x8xi32, #tpu.memory_space<smem>>, %arg2: memref<2x9x32xf32, #tpu.memory_space<vmem>>, %arg3: memref<17x32xf32, #tpu.memory_space<vmem>>, %arg4: memref<2x32x96xf32, #tpu.memory_space<vmem>>, %arg5: memref<2x1x96xf32, #tpu.memory_space<vmem>>, %arg6: memref<2x32x32xf32, #tpu.memory_space<vmem>>, %arg7: memref<2x1x32xf32, #tpu.memory_space<vmem>>, %arg8: memref<2x32x100xf32, #tpu.memory_space<vmem>>, %arg9: memref<2x1x100xf32, #tpu.memory_space<vmem>>, %arg10: memref<2x100x32xf32, #tpu.memory_space<vmem>>, %arg11: memref<2x1x32xf32, #tpu.memory_space<vmem>>, %arg12: memref<2x17x32xf32, #tpu.memory_space<vmem>>, %arg13: memref<2x17x32xf32, #tpu.memory_space<vmem>>) attributes {dimension_semantics = [#tpu.dimension_semantics<parallel>], iteration_bounds = array<i64: 1>, scalar_prefetch = 1 : i64, scratch_operands = 1 : i64, tpu.core_type = #tpu.core_type<tc>, window_params = [{transform_indices = @transform_0, window_bounds = array<i64: 2, 9, 32>}, {pipeline_mode = #tpu.pipeline_mode<synchronous>, transform_indices = @transform_1, window_bounds = array<i64: 17, 32>}, {pipeline_mode = #tpu.pipeline_mode<synchronous>, transform_indices = @transform_2, window_bounds = array<i64: 2, 32, 96>}, {pipeline_mode = #tpu.pipeline_mode<synchronous>, transform_indices = @transform_3, window_bounds = array<i64: 2, 1, 96>}, {pipeline_mode = #tpu.pipeline_mode<synchronous>, transform_indices = @transform_4, window_bounds = array<i64: 2, 32, 32>}, {pipeline_mode = #tpu.pipeline_mode<synchronous>, transform_indices = @transform_5, window_bounds = array<i64: 2, 1, 32>}, {pipeline_mode = #tpu.pipeline_mode<synchronous>, transform_indices = @transform_6, window_bounds = array<i64: 2, 32, 100>}, {pipeline_mode = #tpu.pipeline_mode<synchronous>, transform_indices = @transform_7, window_bounds = array<i64: 2, 1, 100>}, {pipeline_mode = #tpu.pipeline_mode<synchronous>, transform_indices = @transform_8, window_bounds = array<i64: 2, 100, 32>}, {pipeline_mode = #tpu.pipeline_mode<synchronous>, transform_indices = @transform_9, window_bounds = array<i64: 2, 1, 32>}, {transform_indices = @transform_10, window_bounds = array<i64: 2, 17, 32>}]} {
    %cst = arith.constant 0.000000e+00 : f32
    %0 = vector.broadcast %cst : f32 to vector<2x17x32xf32>
    %c0 = arith.constant 0 : index
    %c0_0 = arith.constant 0 : index
    %c0_1 = arith.constant 0 : index
    %1 = vector.load %arg13[%c0, %c0_0, %c0_1] : memref<2x17x32xf32, #tpu.memory_space<vmem>>, vector<2x17x32xf32>
    tpu.vector_store %arg13[%c0, %c0_0, %c0_1], %0 {strides = array<i32>} : memref<2x17x32xf32, #tpu.memory_space<vmem>>, vector<2x17x32xf32>,
    %c2_i32 = arith.constant 2 : i32
    %2 = arith.muli %arg0, %c2_i32 : i32
    %c0_i32 = arith.constant 0 : i32
    %3 = arith.addi %2, %c0_i32 : i32
    %c0_2 = arith.constant 0 : index
    %c0_3 = arith.constant 0 : index
    %c0_4 = arith.constant 0 : index
    %4 = vector.load %arg2[%c0_2, %c0_3, %c0_4] : memref<2x9x32xf32, #tpu.memory_space<vmem>>, vector<1x1x32xf32>
    %c0_5 = arith.constant 0 : index
    %c0_6 = arith.constant 0 : index
    %c0_7 = arith.constant 0 : index
    %5 = vector.load %arg13[%c0_5, %c0_6, %c0_7] : memref<2x17x32xf32, #tpu.memory_space<vmem>>, vector<1x1x32xf32>
    tpu.vector_store %arg13[%c0_5, %c0_6, %c0_7], %4 {strides = array<i32>} : memref<2x17x32xf32, #tpu.memory_space<vmem>>, vector<1x1x32xf32>,
    %6 = arith.index_cast %3 : i32 to index
    %c0_8 = arith.constant 0 : index
    %7 = memref.load %arg1[%6, %c0_8] : memref<2x8xi32, #tpu.memory_space<smem>>
    %c1_i32 = arith.constant 1 : i32
    %8 = arith.addi %7, %c1_i32 : i32
    %c0_9 = arith.constant 0 : index
    %c1 = arith.constant 1 : index
    %c0_10 = arith.constant 0 : index
    %9 = vector.load %arg2[%c0_9, %c1, %c0_10] : memref<2x9x32xf32, #tpu.memory_space<vmem>>, vector<1x1x32xf32>
    %c0_11 = arith.constant 0 : index
    %10 = arith.index_cast %8 : i32 to index
    %c0_12 = arith.constant 0 : index
    %11 = vector.load %arg13[%c0_11, %10, %c0_12] : memref<2x17x32xf32, #tpu.memory_space<vmem>>, vector<1x1x32xf32>
    tpu.vector_store %arg13[%c0_11, %10, %c0_12], %9 {strides = array<i32>} : memref<2x17x32xf32, #tpu.memory_space<vmem>>, vector<1x1x32xf32>,
    %12 = arith.index_cast %3 : i32 to index
    %c1_13 = arith.constant 1 : index
    %13 = memref.load %arg1[%12, %c1_13] : memref<2x8xi32, #tpu.memory_space<smem>>
    %c1_i32_14 = arith.constant 1 : i32
    %14 = arith.addi %13, %c1_i32_14 : i32
    %c0_15 = arith.constant 0 : index
    %c2 = arith.constant 2 : index
    %c0_16 = arith.constant 0 : index
    %15 = vector.load %arg2[%c0_15, %c2, %c0_16] : memref<2x9x32xf32, #tpu.memory_space<vmem>>, vector<1x1x32xf32>
    %c0_17 = arith.constant 0 : index
    %16 = arith.index_cast %14 : i32 to index
    %c0_18 = arith.constant 0 : index
    %17 = vector.load %arg13[%c0_17, %16, %c0_18] : memref<2x17x32xf32, #tpu.memory_space<vmem>>, vector<1x1x32xf32>
    tpu.vector_store %arg13[%c0_17, %16, %c0_18], %15 {strides = array<i32>} : memref<2x17x32xf32, #tpu.memory_space<vmem>>, vector<1x1x32xf32>,
    %18 = arith.index_cast %3 : i32 to index
    %c2_19 = arith.constant 2 : index
    %19 = memref.load %arg1[%18, %c2_19] : memref<2x8xi32, #tpu.memory_space<smem>>
    %c1_i32_20 = arith.constant 1 : i32
    %20 = arith.addi %19, %c1_i32_20 : i32
    %c0_21 = arith.constant 0 : index
    %c3 = arith.constant 3 : index
    %c0_22 = arith.constant 0 : index
    %21 = vector.load %arg2[%c0_21, %c3, %c0_22] : memref<2x9x32xf32, #tpu.memory_space<vmem>>, vector<1x1x32xf32>
    %c0_23 = arith.constant 0 : index
    %22 = arith.index_cast %20 : i32 to index
    %c0_24 = arith.constant 0 : index
    %23 = vector.load %arg13[%c0_23, %22, %c0_24] : memref<2x17x32xf32, #tpu.memory_space<vmem>>, vector<1x1x32xf32>
    tpu.vector_store %arg13[%c0_23, %22, %c0_24], %21 {strides = array<i32>} : memref<2x17x32xf32, #tpu.memory_space<vmem>>, vector<1x1x32xf32>,
    %24 = arith.index_cast %3 : i32 to index
    %c3_25 = arith.constant 3 : index
    %25 = memref.load %arg1[%24, %c3_25] : memref<2x8xi32, #tpu.memory_space<smem>>
    %c1_i32_26 = arith.constant 1 : i32
    %26 = arith.addi %25, %c1_i32_26 : i32
    %c0_27 = arith.constant 0 : index
    %c4 = arith.constant 4 : index
    %c0_28 = arith.constant 0 : index
    %27 = vector.load %arg2[%c0_27, %c4, %c0_28] : memref<2x9x32xf32, #tpu.memory_space<vmem>>, vector<1x1x32xf32>
    %c0_29 = arith.constant 0 : index
    %28 = arith.index_cast %26 : i32 to index
    %c0_30 = arith.constant 0 : index
    %29 = vector.load %arg13[%c0_29, %28, %c0_30] : memref<2x17x32xf32, #tpu.memory_space<vmem>>, vector<1x1x32xf32>
    tpu.vector_store %arg13[%c0_29, %28, %c0_30], %27 {strides = array<i32>} : memref<2x17x32xf32, #tpu.memory_space<vmem>>, vector<1x1x32xf32>,
    %30 = arith.index_cast %3 : i32 to index
    %c4_31 = arith.constant 4 : index
    %31 = memref.load %arg1[%30, %c4_31] : memref<2x8xi32, #tpu.memory_space<smem>>
    %c1_i32_32 = arith.constant 1 : i32
    %32 = arith.addi %31, %c1_i32_32 : i32
    %c0_33 = arith.constant 0 : index
    %c5 = arith.constant 5 : index
    %c0_34 = arith.constant 0 : index
    %33 = vector.load %arg2[%c0_33, %c5, %c0_34] : memref<2x9x32xf32, #tpu.memory_space<vmem>>, vector<1x1x32xf32>
    %c0_35 = arith.constant 0 : index
    %34 = arith.index_cast %32 : i32 to index
    %c0_36 = arith.constant 0 : index
    %35 = vector.load %arg13[%c0_35, %34, %c0_36] : memref<2x17x32xf32, #tpu.memory_space<vmem>>, vector<1x1x32xf32>
    tpu.vector_store %arg13[%c0_35, %34, %c0_36], %33 {strides = array<i32>} : memref<2x17x32xf32, #tpu.memory_space<vmem>>, vector<1x1x32xf32>,
    %36 = arith.index_cast %3 : i32 to index
    %c5_37 = arith.constant 5 : index
    %37 = memref.load %arg1[%36, %c5_37] : memref<2x8xi32, #tpu.memory_space<smem>>
    %c1_i32_38 = arith.constant 1 : i32
    %38 = arith.addi %37, %c1_i32_38 : i32
    %c0_39 = arith.constant 0 : index
    %c6 = arith.constant 6 : index
    %c0_40 = arith.constant 0 : index
    %39 = vector.load %arg2[%c0_39, %c6, %c0_40] : memref<2x9x32xf32, #tpu.memory_space<vmem>>, vector<1x1x32xf32>
    %c0_41 = arith.constant 0 : index
    %40 = arith.index_cast %38 : i32 to index
    %c0_42 = arith.constant 0 : index
    %41 = vector.load %arg13[%c0_41, %40, %c0_42] : memref<2x17x32xf32, #tpu.memory_space<vmem>>, vector<1x1x32xf32>
    tpu.vector_store %arg13[%c0_41, %40, %c0_42], %39 {strides = array<i32>} : memref<2x17x32xf32, #tpu.memory_space<vmem>>, vector<1x1x32xf32>,
    %42 = arith.index_cast %3 : i32 to index
    %c6_43 = arith.constant 6 : index
    %43 = memref.load %arg1[%42, %c6_43] : memref<2x8xi32, #tpu.memory_space<smem>>
    %c1_i32_44 = arith.constant 1 : i32
    %44 = arith.addi %43, %c1_i32_44 : i32
    %c0_45 = arith.constant 0 : index
    %c7 = arith.constant 7 : index
    %c0_46 = arith.constant 0 : index
    %45 = vector.load %arg2[%c0_45, %c7, %c0_46] : memref<2x9x32xf32, #tpu.memory_space<vmem>>, vector<1x1x32xf32>
    %c0_47 = arith.constant 0 : index
    %46 = arith.index_cast %44 : i32 to index
    %c0_48 = arith.constant 0 : index
    %47 = vector.load %arg13[%c0_47, %46, %c0_48] : memref<2x17x32xf32, #tpu.memory_space<vmem>>, vector<1x1x32xf32>
    tpu.vector_store %arg13[%c0_47, %46, %c0_48], %45 {strides = array<i32>} : memref<2x17x32xf32, #tpu.memory_space<vmem>>, vector<1x1x32xf32>,
    %48 = arith.index_cast %3 : i32 to index
    %c7_49 = arith.constant 7 : index
    %49 = memref.load %arg1[%48, %c7_49] : memref<2x8xi32, #tpu.memory_space<smem>>
    %c1_i32_50 = arith.constant 1 : i32
    %50 = arith.addi %49, %c1_i32_50 : i32
    %c0_51 = arith.constant 0 : index
    %c8 = arith.constant 8 : index
    %c0_52 = arith.constant 0 : index
    %51 = vector.load %arg2[%c0_51, %c8, %c0_52] : memref<2x9x32xf32, #tpu.memory_space<vmem>>, vector<1x1x32xf32>
    %c0_53 = arith.constant 0 : index
    %52 = arith.index_cast %50 : i32 to index
    %c0_54 = arith.constant 0 : index
    %53 = vector.load %arg13[%c0_53, %52, %c0_54] : memref<2x17x32xf32, #tpu.memory_space<vmem>>, vector<1x1x32xf32>
    tpu.vector_store %arg13[%c0_53, %52, %c0_54], %51 {strides = array<i32>} : memref<2x17x32xf32, #tpu.memory_space<vmem>>, vector<1x1x32xf32>,
    %c2_i32_55 = arith.constant 2 : i32
    %54 = arith.muli %arg0, %c2_i32_55 : i32
    %c1_i32_56 = arith.constant 1 : i32
    %55 = arith.addi %54, %c1_i32_56 : i32
    %c1_57 = arith.constant 1 : index
    %c0_58 = arith.constant 0 : index
    %c0_59 = arith.constant 0 : index
    %56 = vector.load %arg2[%c1_57, %c0_58, %c0_59] : memref<2x9x32xf32, #tpu.memory_space<vmem>>, vector<1x1x32xf32>
    %c1_60 = arith.constant 1 : index
    %c0_61 = arith.constant 0 : index
    %c0_62 = arith.constant 0 : index
    %57 = vector.load %arg13[%c1_60, %c0_61, %c0_62] : memref<2x17x32xf32, #tpu.memory_space<vmem>>, vector<1x1x32xf32>
    tpu.vector_store %arg13[%c1_60, %c0_61, %c0_62], %56 {strides = array<i32>} : memref<2x17x32xf32, #tpu.memory_space<vmem>>, vector<1x1x32xf32>,
    %58 = arith.index_cast %55 : i32 to index
    %c0_63 = arith.constant 0 : index
    %59 = memref.load %arg1[%58, %c0_63] : memref<2x8xi32, #tpu.memory_space<smem>>
    %c1_i32_64 = arith.constant 1 : i32
    %60 = arith.addi %59, %c1_i32_64 : i32
    %c1_65 = arith.constant 1 : index
    %c1_66 = arith.constant 1 : index
    %c0_67 = arith.constant 0 : index
    %61 = vector.load %arg2[%c1_65, %c1_66, %c0_67] : memref<2x9x32xf32, #tpu.memory_space<vmem>>, vector<1x1x32xf32>
    %c1_68 = arith.constant 1 : index
    %62 = arith.index_cast %60 : i32 to index
    %c0_69 = arith.constant 0 : index
    %63 = vector.load %arg13[%c1_68, %62, %c0_69] : memref<2x17x32xf32, #tpu.memory_space<vmem>>, vector<1x1x32xf32>
    tpu.vector_store %arg13[%c1_68, %62, %c0_69], %61 {strides = array<i32>} : memref<2x17x32xf32, #tpu.memory_space<vmem>>, vector<1x1x32xf32>,
    %64 = arith.index_cast %55 : i32 to index
    %c1_70 = arith.constant 1 : index
    %65 = memref.load %arg1[%64, %c1_70] : memref<2x8xi32, #tpu.memory_space<smem>>
    %c1_i32_71 = arith.constant 1 : i32
    %66 = arith.addi %65, %c1_i32_71 : i32
    %c1_72 = arith.constant 1 : index
    %c2_73 = arith.constant 2 : index
    %c0_74 = arith.constant 0 : index
    %67 = vector.load %arg2[%c1_72, %c2_73, %c0_74] : memref<2x9x32xf32, #tpu.memory_space<vmem>>, vector<1x1x32xf32>
    %c1_75 = arith.constant 1 : index
    %68 = arith.index_cast %66 : i32 to index
    %c0_76 = arith.constant 0 : index
    %69 = vector.load %arg13[%c1_75, %68, %c0_76] : memref<2x17x32xf32, #tpu.memory_space<vmem>>, vector<1x1x32xf32>
    tpu.vector_store %arg13[%c1_75, %68, %c0_76], %67 {strides = array<i32>} : memref<2x17x32xf32, #tpu.memory_space<vmem>>, vector<1x1x32xf32>,
    %70 = arith.index_cast %55 : i32 to index
    %c2_77 = arith.constant 2 : index
    %71 = memref.load %arg1[%70, %c2_77] : memref<2x8xi32, #tpu.memory_space<smem>>
    %c1_i32_78 = arith.constant 1 : i32
    %72 = arith.addi %71, %c1_i32_78 : i32
    %c1_79 = arith.constant 1 : index
    %c3_80 = arith.constant 3 : index
    %c0_81 = arith.constant 0 : index
    %73 = vector.load %arg2[%c1_79, %c3_80, %c0_81] : memref<2x9x32xf32, #tpu.memory_space<vmem>>, vector<1x1x32xf32>
    %c1_82 = arith.constant 1 : index
    %74 = arith.index_cast %72 : i32 to index
    %c0_83 = arith.constant 0 : index
    %75 = vector.load %arg13[%c1_82, %74, %c0_83] : memref<2x17x32xf32, #tpu.memory_space<vmem>>, vector<1x1x32xf32>
    tpu.vector_store %arg13[%c1_82, %74, %c0_83], %73 {strides = array<i32>} : memref<2x17x32xf32, #tpu.memory_space<vmem>>, vector<1x1x32xf32>,
    %76 = arith.index_cast %55 : i32 to index
    %c3_84 = arith.constant 3 : index
    %77 = memref.load %arg1[%76, %c3_84] : memref<2x8xi32, #tpu.memory_space<smem>>
    %c1_i32_85 = arith.constant 1 : i32
    %78 = arith.addi %77, %c1_i32_85 : i32
    %c1_86 = arith.constant 1 : index
    %c4_87 = arith.constant 4 : index
    %c0_88 = arith.constant 0 : index
    %79 = vector.load %arg2[%c1_86, %c4_87, %c0_88] : memref<2x9x32xf32, #tpu.memory_space<vmem>>, vector<1x1x32xf32>
    %c1_89 = arith.constant 1 : index
    %80 = arith.index_cast %78 : i32 to index
    %c0_90 = arith.constant 0 : index
    %81 = vector.load %arg13[%c1_89, %80, %c0_90] : memref<2x17x32xf32, #tpu.memory_space<vmem>>, vector<1x1x32xf32>
    tpu.vector_store %arg13[%c1_89, %80, %c0_90], %79 {strides = array<i32>} : memref<2x17x32xf32, #tpu.memory_space<vmem>>, vector<1x1x32xf32>,
    %82 = arith.index_cast %55 : i32 to index
    %c4_91 = arith.constant 4 : index
    %83 = memref.load %arg1[%82, %c4_91] : memref<2x8xi32, #tpu.memory_space<smem>>
    %c1_i32_92 = arith.constant 1 : i32
    %84 = arith.addi %83, %c1_i32_92 : i32
    %c1_93 = arith.constant 1 : index
    %c5_94 = arith.constant 5 : index
    %c0_95 = arith.constant 0 : index
    %85 = vector.load %arg2[%c1_93, %c5_94, %c0_95] : memref<2x9x32xf32, #tpu.memory_space<vmem>>, vector<1x1x32xf32>
    %c1_96 = arith.constant 1 : index
    %86 = arith.index_cast %84 : i32 to index
    %c0_97 = arith.constant 0 : index
    %87 = vector.load %arg13[%c1_96, %86, %c0_97] : memref<2x17x32xf32, #tpu.memory_space<vmem>>, vector<1x1x32xf32>
    tpu.vector_store %arg13[%c1_96, %86, %c0_97], %85 {strides = array<i32>} : memref<2x17x32xf32, #tpu.memory_space<vmem>>, vector<1x1x32xf32>,
    %88 = arith.index_cast %55 : i32 to index
    %c5_98 = arith.constant 5 : index
    %89 = memref.load %arg1[%88, %c5_98] : memref<2x8xi32, #tpu.memory_space<smem>>
    %c1_i32_99 = arith.constant 1 : i32
    %90 = arith.addi %89, %c1_i32_99 : i32
    %c1_100 = arith.constant 1 : index
    %c6_101 = arith.constant 6 : index
    %c0_102 = arith.constant 0 : index
    %91 = vector.load %arg2[%c1_100, %c6_101, %c0_102] : memref<2x9x32xf32, #tpu.memory_space<vmem>>, vector<1x1x32xf32>
    %c1_103 = arith.constant 1 : index
    %92 = arith.index_cast %90 : i32 to index
    %c0_104 = arith.constant 0 : index
    %93 = vector.load %arg13[%c1_103, %92, %c0_104] : memref<2x17x32xf32, #tpu.memory_space<vmem>>, vector<1x1x32xf32>
    tpu.vector_store %arg13[%c1_103, %92, %c0_104], %91 {strides = array<i32>} : memref<2x17x32xf32, #tpu.memory_space<vmem>>, vector<1x1x32xf32>,
    %94 = arith.index_cast %55 : i32 to index
    %c6_105 = arith.constant 6 : index
    %95 = memref.load %arg1[%94, %c6_105] : memref<2x8xi32, #tpu.memory_space<smem>>
    %c1_i32_106 = arith.constant 1 : i32
    %96 = arith.addi %95, %c1_i32_106 : i32
    %c1_107 = arith.constant 1 : index
    %c7_108 = arith.constant 7 : index
    %c0_109 = arith.constant 0 : index
    %97 = vector.load %arg2[%c1_107, %c7_108, %c0_109] : memref<2x9x32xf32, #tpu.memory_space<vmem>>, vector<1x1x32xf32>
    %c1_110 = arith.constant 1 : index
    %98 = arith.index_cast %96 : i32 to index
    %c0_111 = arith.constant 0 : index
    %99 = vector.load %arg13[%c1_110, %98, %c0_111] : memref<2x17x32xf32, #tpu.memory_space<vmem>>, vector<1x1x32xf32>
    tpu.vector_store %arg13[%c1_110, %98, %c0_111], %97 {strides = array<i32>} : memref<2x17x32xf32, #tpu.memory_space<vmem>>, vector<1x1x32xf32>,
    %100 = arith.index_cast %55 : i32 to index
    %c7_112 = arith.constant 7 : index
    %101 = memref.load %arg1[%100, %c7_112] : memref<2x8xi32, #tpu.memory_space<smem>>
    %c1_i32_113 = arith.constant 1 : i32
    %102 = arith.addi %101, %c1_i32_113 : i32
    %c1_114 = arith.constant 1 : index
    %c8_115 = arith.constant 8 : index
    %c0_116 = arith.constant 0 : index
    %103 = vector.load %arg2[%c1_114, %c8_115, %c0_116] : memref<2x9x32xf32, #tpu.memory_space<vmem>>, vector<1x1x32xf32>
    %c1_117 = arith.constant 1 : index
    %104 = arith.index_cast %102 : i32 to index
    %c0_118 = arith.constant 0 : index
    %105 = vector.load %arg13[%c1_117, %104, %c0_118] : memref<2x17x32xf32, #tpu.memory_space<vmem>>, vector<1x1x32xf32>
    tpu.vector_store %arg13[%c1_117, %104, %c0_118], %103 {strides = array<i32>} : memref<2x17x32xf32, #tpu.memory_space<vmem>>, vector<1x1x32xf32>,
    %c0_119 = arith.constant 0 : index
    %c0_120 = arith.constant 0 : index
    %c0_121 = arith.constant 0 : index
    %106 = vector.load %arg13[%c0_119, %c0_120, %c0_121] : memref<2x17x32xf32, #tpu.memory_space<vmem>>, vector<2x17x32xf32>
    %c0_122 = arith.constant 0 : index
    %c0_123 = arith.constant 0 : index
    %107 = vector.load %arg3[%c0_122, %c0_123] : memref<17x32xf32, #tpu.memory_space<vmem>>, vector<17x32xf32>
    %108 = vector.shape_cast %107 : vector<17x32xf32> to vector<1x17x32xf32>
    %109 = vector.broadcast %108 : vector<1x17x32xf32> to vector<2x17x32xf32>
    %110 = arith.addf %106, %109 : vector<2x17x32xf32>
    %c0_124 = arith.constant 0 : index
    %c0_125 = arith.constant 0 : index
    %c0_126 = arith.constant 0 : index
    %111 = vector.load %arg4[%c0_124, %c0_125, %c0_126] : memref<2x32x96xf32, #tpu.memory_space<vmem>>, vector<1x32x96xf32>
    %112 = vector.shape_cast %111 : vector<1x32x96xf32> to vector<32x96xf32>
    %c0_127 = arith.constant 0 : index
    %c0_128 = arith.constant 0 : index
    %c0_129 = arith.constant 0 : index
    %113 = vector.load %arg5[%c0_127, %c0_128, %c0_129] : memref<2x1x96xf32, #tpu.memory_space<vmem>>, vector<1x1x96xf32>
    %114 = vector.shape_cast %113 : vector<1x1x96xf32> to vector<1x96xf32>
    %c0_130 = arith.constant 0 : index
    %c0_131 = arith.constant 0 : index
    %c0_132 = arith.constant 0 : index
    %115 = vector.load %arg6[%c0_130, %c0_131, %c0_132] : memref<2x32x32xf32, #tpu.memory_space<vmem>>, vector<1x32x32xf32>
    %116 = vector.shape_cast %115 : vector<1x32x32xf32> to vector<32x32xf32>
    %c0_133 = arith.constant 0 : index
    %c0_134 = arith.constant 0 : index
    %c0_135 = arith.constant 0 : index
    %117 = vector.load %arg7[%c0_133, %c0_134, %c0_135] : memref<2x1x32xf32, #tpu.memory_space<vmem>>, vector<1x1x32xf32>
    %118 = vector.shape_cast %117 : vector<1x1x32xf32> to vector<1x32xf32>
    %c0_136 = arith.constant 0 : index
    %c0_137 = arith.constant 0 : index
    %c0_138 = arith.constant 0 : index
    %119 = vector.load %arg8[%c0_136, %c0_137, %c0_138] : memref<2x32x100xf32, #tpu.memory_space<vmem>>, vector<1x32x100xf32>
    %120 = vector.shape_cast %119 : vector<1x32x100xf32> to vector<32x100xf32>
    %c0_139 = arith.constant 0 : index
    %c0_140 = arith.constant 0 : index
    %c0_141 = arith.constant 0 : index
    %121 = vector.load %arg9[%c0_139, %c0_140, %c0_141] : memref<2x1x100xf32, #tpu.memory_space<vmem>>, vector<1x1x100xf32>
    %122 = vector.shape_cast %121 : vector<1x1x100xf32> to vector<1x100xf32>
    %c0_142 = arith.constant 0 : index
    %c0_143 = arith.constant 0 : index
    %c0_144 = arith.constant 0 : index
    %123 = vector.load %arg10[%c0_142, %c0_143, %c0_144] : memref<2x100x32xf32, #tpu.memory_space<vmem>>, vector<1x100x32xf32>
    %124 = vector.shape_cast %123 : vector<1x100x32xf32> to vector<100x32xf32>
    %c0_145 = arith.constant 0 : index
    %c0_146 = arith.constant 0 : index
    %c0_147 = arith.constant 0 : index
    %125 = vector.load %arg11[%c0_145, %c0_146, %c0_147] : memref<2x1x32xf32, #tpu.memory_space<vmem>>, vector<1x1x32xf32>
    %126 = vector.shape_cast %125 : vector<1x1x32xf32> to vector<1x32xf32>
    %127 = vector.extract_strided_slice %110 {offsets = [0, 0, 0], sizes = [1, 17, 32], strides = [1, 1, 1]} : vector<2x17x32xf32> to vector<1x17x32xf32>
    %128 = vector.shape_cast %127 : vector<1x17x32xf32> to vector<17x32xf32>
    %cst_148 = arith.constant dense<0.000000e+00> : vector<32xf32>
    %129 = vector.multi_reduction <add>, %128, %cst_148 [0] : vector<17x32xf32> to vector<32xf32>
    %130 = vector.shape_cast %129 : vector<32xf32> to vector<1x32xf32>
    %cst_149 = arith.constant 1.700000e+01 : f32
    %131 = vector.broadcast %cst_149 : f32 to vector<1x32xf32>
    %132 = arith.divf %130, %131 : vector<1x32xf32>
    %133 = vector.broadcast %132 : vector<1x32xf32> to vector<17x32xf32>
    %134 = arith.subf %128, %133 : vector<17x32xf32>
    %135 = arith.mulf %134, %134 : vector<17x32xf32>
    %cst_150 = arith.constant dense<0.000000e+00> : vector<32xf32>
    %136 = vector.multi_reduction <add>, %135, %cst_150 [0] : vector<17x32xf32> to vector<32xf32>
    %137 = vector.shape_cast %136 : vector<32xf32> to vector<1x32xf32>
    %cst_151 = arith.constant 6.250000e-02 : f32
    %138 = vector.broadcast %cst_151 : f32 to vector<1x32xf32>
    %139 = arith.mulf %137, %138 : vector<1x32xf32>
    %140 = vector.broadcast %132 : vector<1x32xf32> to vector<17x32xf32>
    %141 = arith.subf %128, %140 : vector<17x32xf32>
    %142 = math.rsqrt %139 : vector<1x32xf32>
    %143 = vector.broadcast %142 : vector<1x32xf32> to vector<17x32xf32>
    %144 = arith.mulf %141, %143 : vector<17x32xf32>
    %145 = vector.shape_cast %144 : vector<17x32xf32> to vector<1x17x32xf32>
    %146 = vector.extract_strided_slice %110 {offsets = [1, 0, 0], sizes = [1, 17, 32], strides = [1, 1, 1]} : vector<2x17x32xf32> to vector<1x17x32xf32>
    %147 = vector.shape_cast %146 : vector<1x17x32xf32> to vector<17x32xf32>
    %cst_152 = arith.constant dense<0.000000e+00> : vector<32xf32>
    %148 = vector.multi_reduction <add>, %147, %cst_152 [0] : vector<17x32xf32> to vector<32xf32>
    %149 = vector.shape_cast %148 : vector<32xf32> to vector<1x32xf32>
    %cst_153 = arith.constant 1.700000e+01 : f32
    %150 = vector.broadcast %cst_153 : f32 to vector<1x32xf32>
    %151 = arith.divf %149, %150 : vector<1x32xf32>
    %152 = vector.broadcast %151 : vector<1x32xf32> to vector<17x32xf32>
    %153 = arith.subf %147, %152 : vector<17x32xf32>
    %154 = arith.mulf %153, %153 : vector<17x32xf32>
    %cst_154 = arith.constant dense<0.000000e+00> : vector<32xf32>
    %155 = vector.multi_reduction <add>, %154, %cst_154 [0] : vector<17x32xf32> to vector<32xf32>
    %156 = vector.shape_cast %155 : vector<32xf32> to vector<1x32xf32>
    %cst_155 = arith.constant 6.250000e-02 : f32
    %157 = vector.broadcast %cst_155 : f32 to vector<1x32xf32>
    %158 = arith.mulf %156, %157 : vector<1x32xf32>
    %159 = vector.broadcast %151 : vector<1x32xf32> to vector<17x32xf32>
    %160 = arith.subf %147, %159 : vector<17x32xf32>
    %161 = math.rsqrt %158 : vector<1x32xf32>
    %162 = vector.broadcast %161 : vector<1x32xf32> to vector<17x32xf32>
    %163 = arith.mulf %160, %162 : vector<17x32xf32>
    %164 = vector.shape_cast %163 : vector<17x32xf32> to vector<1x17x32xf32>
    %165 = tpu.concatenate %145, %164 in 0 : vector<1x17x32xf32>, vector<1x17x32xf32> -> vector<2x17x32xf32>
    %166 = vector.shape_cast %165 : vector<2x17x32xf32> to vector<34x32xf32>
    %cst_156 = arith.constant dense<0.000000e+00> : vector<34x96xf32>
    %167 = tpu.matmul %166, %112, %cst_156 {dimension_numbers = #tpu.dot_dimension_numbers<[1], [0], [0], [1], [0, 0, 1, 1], [], []>} : vector<34x32xf32>, vector<32x96xf32>, vector<34x96xf32> -> vector<34x96xf32>
    %168 = vector.broadcast %114 : vector<1x96xf32> to vector<34x96xf32>
    %169 = arith.addf %167, %168 : vector<34x96xf32>
    %170 = vector.shape_cast %169 : vector<34x96xf32> to vector<2x17x96xf32>
    %171 = vector.extract_strided_slice %170 {offsets = [0, 0, 0], sizes = [2, 17, 32], strides = [1, 1, 1]} : vector<2x17x96xf32> to vector<2x17x32xf32>
    %172 = vector.extract_strided_slice %170 {offsets = [0, 0, 32], sizes = [2, 17, 32], strides = [1, 1, 1]} : vector<2x17x96xf32> to vector<2x17x32xf32>
    %173 = vector.extract_strided_slice %170 {offsets = [0, 0, 64], sizes = [2, 17, 32], strides = [1, 1, 1]} : vector<2x17x96xf32> to vector<2x17x32xf32>
    %174 = vector.extract_strided_slice %171 {offsets = [0, 0, 0], sizes = [2, 17, 8], strides = [1, 1, 1]} : vector<2x17x32xf32> to vector<2x17x8xf32>
    %175 = vector.extract_strided_slice %172 {offsets = [0, 0, 0], sizes = [2, 17, 8], strides = [1, 1, 1]} : vector<2x17x32xf32> to vector<2x17x8xf32>
    %176 = vector.extract_strided_slice %173 {offsets = [0, 0, 0], sizes = [2, 17, 8], strides = [1, 1, 1]} : vector<2x17x32xf32> to vector<2x17x8xf32>
    "tpu.trace_start"() <{level = 10 : i32, message = "bqd,bkd->bqk"}> : () -> ()
    %cst_157 = arith.constant dense<0.000000e+00> : vector<2x17x17xf32>
    %177 = tpu.matmul %174, %175, %cst_157 {dimension_numbers = #tpu.dot_dimension_numbers<[2], [2], [1], [1], [0, 0, 0, 1, 1, 1], [0], [0]>} : vector<2x17x8xf32>, vector<2x17x8xf32>, vector<2x17x17xf32> -> vector<2x17x17xf32>
    "tpu.trace_stop"() : () -> ()
    %cst_158 = arith.constant 0.353553385 : f32
    %178 = vector.broadcast %cst_158 : f32 to vector<2x17x17xf32>
    %179 = arith.mulf %177, %178 : vector<2x17x17xf32>
    %cst_159 = arith.constant dense<0xFF800000> : vector<2x17xf32>
    %180 = vector.multi_reduction <maximumf>, %179, %cst_159 [2] : vector<2x17x17xf32> to vector<2x17xf32>
    %181 = vector.shape_cast %180 : vector<2x17xf32> to vector<2x17x1xf32>
    %182 = vector.broadcast %181 : vector<2x17x1xf32> to vector<2x17x17xf32>
    %183 = arith.subf %179, %182 : vector<2x17x17xf32>
    %184 = math.exp %183 : vector<2x17x17xf32>
    %cst_160 = arith.constant dense<0.000000e+00> : vector<2x17xf32>
    %185 = vector.multi_reduction <add>, %184, %cst_160 [2] : vector<2x17x17xf32> to vector<2x17xf32>
    %186 = vector.shape_cast %185 : vector<2x17xf32> to vector<2x17x1xf32>
    %187 = tpu.reciprocal %186 {approx = true} : vector<2x17x1xf32> -> vector<2x17x1xf32>
    %188 = vector.broadcast %187 : vector<2x17x1xf32> to vector<2x17x17xf32>
    %189 = arith.mulf %184, %188 : vector<2x17x17xf32>
    "tpu.trace_start"() <{level = 10 : i32, message = "bqk,bkd->bqd"}> : () -> ()
    %cst_161 = arith.constant dense<0.000000e+00> : vector<2x17x8xf32>
    %190 = tpu.matmul %189, %176, %cst_161 {dimension_numbers = #tpu.dot_dimension_numbers<[2], [1], [1], [2], [0, 0, 0, 1, 1, 2], [0], [0]>} : vector<2x17x17xf32>, vector<2x17x8xf32>, vector<2x17x8xf32> -> vector<2x17x8xf32>
    "tpu.trace_stop"() : () -> ()
    %191 = vector.extract_strided_slice %171 {offsets = [0, 0, 8], sizes = [2, 17, 8], strides = [1, 1, 1]} : vector<2x17x32xf32> to vector<2x17x8xf32>
    %192 = vector.extract_strided_slice %172 {offsets = [0, 0, 8], sizes = [2, 17, 8], strides = [1, 1, 1]} : vector<2x17x32xf32> to vector<2x17x8xf32>
    %193 = vector.extract_strided_slice %173 {offsets = [0, 0, 8], sizes = [2, 17, 8], strides = [1, 1, 1]} : vector<2x17x32xf32> to vector<2x17x8xf32>
    "tpu.trace_start"() <{level = 10 : i32, message = "bqd,bkd->bqk"}> : () -> ()
    %cst_162 = arith.constant dense<0.000000e+00> : vector<2x17x17xf32>
    %194 = tpu.matmul %191, %192, %cst_162 {dimension_numbers = #tpu.dot_dimension_numbers<[2], [2], [1], [1], [0, 0, 0, 1, 1, 1], [0], [0]>} : vector<2x17x8xf32>, vector<2x17x8xf32>, vector<2x17x17xf32> -> vector<2x17x17xf32>
    "tpu.trace_stop"() : () -> ()
    %cst_163 = arith.constant 0.353553385 : f32
    %195 = vector.broadcast %cst_163 : f32 to vector<2x17x17xf32>
    %196 = arith.mulf %194, %195 : vector<2x17x17xf32>
    %cst_164 = arith.constant dense<0xFF800000> : vector<2x17xf32>
    %197 = vector.multi_reduction <maximumf>, %196, %cst_164 [2] : vector<2x17x17xf32> to vector<2x17xf32>
    %198 = vector.shape_cast %197 : vector<2x17xf32> to vector<2x17x1xf32>
    %199 = vector.broadcast %198 : vector<2x17x1xf32> to vector<2x17x17xf32>
    %200 = arith.subf %196, %199 : vector<2x17x17xf32>
    %201 = math.exp %200 : vector<2x17x17xf32>
    %cst_165 = arith.constant dense<0.000000e+00> : vector<2x17xf32>
    %202 = vector.multi_reduction <add>, %201, %cst_165 [2] : vector<2x17x17xf32> to vector<2x17xf32>
    %203 = vector.shape_cast %202 : vector<2x17xf32> to vector<2x17x1xf32>
    %204 = tpu.reciprocal %203 {approx = true} : vector<2x17x1xf32> -> vector<2x17x1xf32>
    %205 = vector.broadcast %204 : vector<2x17x1xf32> to vector<2x17x17xf32>
    %206 = arith.mulf %201, %205 : vector<2x17x17xf32>
    "tpu.trace_start"() <{level = 10 : i32, message = "bqk,bkd->bqd"}> : () -> ()
    %cst_166 = arith.constant dense<0.000000e+00> : vector<2x17x8xf32>
    %207 = tpu.matmul %206, %193, %cst_166 {dimension_numbers = #tpu.dot_dimension_numbers<[2], [1], [1], [2], [0, 0, 0, 1, 1, 2], [0], [0]>} : vector<2x17x17xf32>, vector<2x17x8xf32>, vector<2x17x8xf32> -> vector<2x17x8xf32>
    "tpu.trace_stop"() : () -> ()
    %208 = vector.extract_strided_slice %171 {offsets = [0, 0, 16], sizes = [2, 17, 8], strides = [1, 1, 1]} : vector<2x17x32xf32> to vector<2x17x8xf32>
    %209 = vector.extract_strided_slice %172 {offsets = [0, 0, 16], sizes = [2, 17, 8], strides = [1, 1, 1]} : vector<2x17x32xf32> to vector<2x17x8xf32>
    %210 = vector.extract_strided_slice %173 {offsets = [0, 0, 16], sizes = [2, 17, 8], strides = [1, 1, 1]} : vector<2x17x32xf32> to vector<2x17x8xf32>
    "tpu.trace_start"() <{level = 10 : i32, message = "bqd,bkd->bqk"}> : () -> ()
    %cst_167 = arith.constant dense<0.000000e+00> : vector<2x17x17xf32>
    %211 = tpu.matmul %208, %209, %cst_167 {dimension_numbers = #tpu.dot_dimension_numbers<[2], [2], [1], [1], [0, 0, 0, 1, 1, 1], [0], [0]>} : vector<2x17x8xf32>, vector<2x17x8xf32>, vector<2x17x17xf32> -> vector<2x17x17xf32>
    "tpu.trace_stop"() : () -> ()
    %cst_168 = arith.constant 0.353553385 : f32
    %212 = vector.broadcast %cst_168 : f32 to vector<2x17x17xf32>
    %213 = arith.mulf %211, %212 : vector<2x17x17xf32>
    %cst_169 = arith.constant dense<0xFF800000> : vector<2x17xf32>
    %214 = vector.multi_reduction <maximumf>, %213, %cst_169 [2] : vector<2x17x17xf32> to vector<2x17xf32>
    %215 = vector.shape_cast %214 : vector<2x17xf32> to vector<2x17x1xf32>
    %216 = vector.broadcast %215 : vector<2x17x1xf32> to vector<2x17x17xf32>
    %217 = arith.subf %213, %216 : vector<2x17x17xf32>
    %218 = math.exp %217 : vector<2x17x17xf32>
    %cst_170 = arith.constant dense<0.000000e+00> : vector<2x17xf32>
    %219 = vector.multi_reduction <add>, %218, %cst_170 [2] : vector<2x17x17xf32> to vector<2x17xf32>
    %220 = vector.shape_cast %219 : vector<2x17xf32> to vector<2x17x1xf32>
    %221 = tpu.reciprocal %220 {approx = true} : vector<2x17x1xf32> -> vector<2x17x1xf32>
    %222 = vector.broadcast %221 : vector<2x17x1xf32> to vector<2x17x17xf32>
    %223 = arith.mulf %218, %222 : vector<2x17x17xf32>
    "tpu.trace_start"() <{level = 10 : i32, message = "bqk,bkd->bqd"}> : () -> ()
    %cst_171 = arith.constant dense<0.000000e+00> : vector<2x17x8xf32>
    %224 = tpu.matmul %223, %210, %cst_171 {dimension_numbers = #tpu.dot_dimension_numbers<[2], [1], [1], [2], [0, 0, 0, 1, 1, 2], [0], [0]>} : vector<2x17x17xf32>, vector<2x17x8xf32>, vector<2x17x8xf32> -> vector<2x17x8xf32>
    "tpu.trace_stop"() : () -> ()
    %225 = vector.extract_strided_slice %171 {offsets = [0, 0, 24], sizes = [2, 17, 8], strides = [1, 1, 1]} : vector<2x17x32xf32> to vector<2x17x8xf32>
    %226 = vector.extract_strided_slice %172 {offsets = [0, 0, 24], sizes = [2, 17, 8], strides = [1, 1, 1]} : vector<2x17x32xf32> to vector<2x17x8xf32>
    %227 = vector.extract_strided_slice %173 {offsets = [0, 0, 24], sizes = [2, 17, 8], strides = [1, 1, 1]} : vector<2x17x32xf32> to vector<2x17x8xf32>
    "tpu.trace_start"() <{level = 10 : i32, message = "bqd,bkd->bqk"}> : () -> ()
    %cst_172 = arith.constant dense<0.000000e+00> : vector<2x17x17xf32>
    %228 = tpu.matmul %225, %226, %cst_172 {dimension_numbers = #tpu.dot_dimension_numbers<[2], [2], [1], [1], [0, 0, 0, 1, 1, 1], [0], [0]>} : vector<2x17x8xf32>, vector<2x17x8xf32>, vector<2x17x17xf32> -> vector<2x17x17xf32>
    "tpu.trace_stop"() : () -> ()
    %cst_173 = arith.constant 0.353553385 : f32
    %229 = vector.broadcast %cst_173 : f32 to vector<2x17x17xf32>
    %230 = arith.mulf %228, %229 : vector<2x17x17xf32>
    %cst_174 = arith.constant dense<0xFF800000> : vector<2x17xf32>
    %231 = vector.multi_reduction <maximumf>, %230, %cst_174 [2] : vector<2x17x17xf32> to vector<2x17xf32>
    %232 = vector.shape_cast %231 : vector<2x17xf32> to vector<2x17x1xf32>
    %233 = vector.broadcast %232 : vector<2x17x1xf32> to vector<2x17x17xf32>
    %234 = arith.subf %230, %233 : vector<2x17x17xf32>
    %235 = math.exp %234 : vector<2x17x17xf32>
    %cst_175 = arith.constant dense<0.000000e+00> : vector<2x17xf32>
    %236 = vector.multi_reduction <add>, %235, %cst_175 [2] : vector<2x17x17xf32> to vector<2x17xf32>
    %237 = vector.shape_cast %236 : vector<2x17xf32> to vector<2x17x1xf32>
    %238 = tpu.reciprocal %237 {approx = true} : vector<2x17x1xf32> -> vector<2x17x1xf32>
    %239 = vector.broadcast %238 : vector<2x17x1xf32> to vector<2x17x17xf32>
    %240 = arith.mulf %235, %239 : vector<2x17x17xf32>
    "tpu.trace_start"() <{level = 10 : i32, message = "bqk,bkd->bqd"}> : () -> ()
    %cst_176 = arith.constant dense<0.000000e+00> : vector<2x17x8xf32>
    %241 = tpu.matmul %240, %227, %cst_176 {dimension_numbers = #tpu.dot_dimension_numbers<[2], [1], [1], [2], [0, 0, 0, 1, 1, 2], [0], [0]>} : vector<2x17x17xf32>, vector<2x17x8xf32>, vector<2x17x8xf32> -> vector<2x17x8xf32>
    "tpu.trace_stop"() : () -> ()
    %242 = tpu.concatenate %190, %207, %224, %241 in 2 : vector<2x17x8xf32>, vector<2x17x8xf32>, vector<2x17x8xf32>, vector<2x17x8xf32> -> vector<2x17x32xf32>
    %243 = vector.shape_cast %242 : vector<2x17x32xf32> to vector<34x32xf32>
    %cst_177 = arith.constant dense<0.000000e+00> : vector<34x32xf32>
    %244 = tpu.matmul %243, %116, %cst_177 {dimension_numbers = #tpu.dot_dimension_numbers<[1], [0], [0], [1], [0, 0, 1, 1], [], []>} : vector<34x32xf32>, vector<32x32xf32>, vector<34x32xf32> -> vector<34x32xf32>
    %245 = vector.broadcast %118 : vector<1x32xf32> to vector<34x32xf32>
    %246 = arith.addf %244, %245 : vector<34x32xf32>
    %247 = vector.shape_cast %246 : vector<34x32xf32> to vector<2x17x32xf32>
    %248 = arith.addf %110, %247 : vector<2x17x32xf32>
    %249 = vector.extract_strided_slice %248 {offsets = [0, 0, 0], sizes = [1, 17, 32], strides = [1, 1, 1]} : vector<2x17x32xf32> to vector<1x17x32xf32>
    %250 = vector.shape_cast %249 : vector<1x17x32xf32> to vector<17x32xf32>
    %cst_178 = arith.constant dense<0.000000e+00> : vector<32xf32>
    %251 = vector.multi_reduction <add>, %250, %cst_178 [0] : vector<17x32xf32> to vector<32xf32>
    %252 = vector.shape_cast %251 : vector<32xf32> to vector<1x32xf32>
    %cst_179 = arith.constant 1.700000e+01 : f32
    %253 = vector.broadcast %cst_179 : f32 to vector<1x32xf32>
    %254 = arith.divf %252, %253 : vector<1x32xf32>
    %255 = vector.broadcast %254 : vector<1x32xf32> to vector<17x32xf32>
    %256 = arith.subf %250, %255 : vector<17x32xf32>
    %257 = arith.mulf %256, %256 : vector<17x32xf32>
    %cst_180 = arith.constant dense<0.000000e+00> : vector<32xf32>
    %258 = vector.multi_reduction <add>, %257, %cst_180 [0] : vector<17x32xf32> to vector<32xf32>
    %259 = vector.shape_cast %258 : vector<32xf32> to vector<1x32xf32>
    %cst_181 = arith.constant 6.250000e-02 : f32
    %260 = vector.broadcast %cst_181 : f32 to vector<1x32xf32>
    %261 = arith.mulf %259, %260 : vector<1x32xf32>
    %262 = vector.broadcast %254 : vector<1x32xf32> to vector<17x32xf32>
    %263 = arith.subf %250, %262 : vector<17x32xf32>
    %264 = math.rsqrt %261 : vector<1x32xf32>
    %265 = vector.broadcast %264 : vector<1x32xf32> to vector<17x32xf32>
    %266 = arith.mulf %263, %265 : vector<17x32xf32>
    %267 = vector.shape_cast %266 : vector<17x32xf32> to vector<1x17x32xf32>
    %268 = vector.extract_strided_slice %248 {offsets = [1, 0, 0], sizes = [1, 17, 32], strides = [1, 1, 1]} : vector<2x17x32xf32> to vector<1x17x32xf32>
    %269 = vector.shape_cast %268 : vector<1x17x32xf32> to vector<17x32xf32>
    %cst_182 = arith.constant dense<0.000000e+00> : vector<32xf32>
    %270 = vector.multi_reduction <add>, %269, %cst_182 [0] : vector<17x32xf32> to vector<32xf32>
    %271 = vector.shape_cast %270 : vector<32xf32> to vector<1x32xf32>
    %cst_183 = arith.constant 1.700000e+01 : f32
    %272 = vector.broadcast %cst_183 : f32 to vector<1x32xf32>
    %273 = arith.divf %271, %272 : vector<1x32xf32>
    %274 = vector.broadcast %273 : vector<1x32xf32> to vector<17x32xf32>
    %275 = arith.subf %269, %274 : vector<17x32xf32>
    %276 = arith.mulf %275, %275 : vector<17x32xf32>
    %cst_184 = arith.constant dense<0.000000e+00> : vector<32xf32>
    %277 = vector.multi_reduction <add>, %276, %cst_184 [0] : vector<17x32xf32> to vector<32xf32>
    %278 = vector.shape_cast %277 : vector<32xf32> to vector<1x32xf32>
    %cst_185 = arith.constant 6.250000e-02 : f32
    %279 = vector.broadcast %cst_185 : f32 to vector<1x32xf32>
    %280 = arith.mulf %278, %279 : vector<1x32xf32>
    %281 = vector.broadcast %273 : vector<1x32xf32> to vector<17x32xf32>
    %282 = arith.subf %269, %281 : vector<17x32xf32>
    %283 = math.rsqrt %280 : vector<1x32xf32>
    %284 = vector.broadcast %283 : vector<1x32xf32> to vector<17x32xf32>
    %285 = arith.mulf %282, %284 : vector<17x32xf32>
    %286 = vector.shape_cast %285 : vector<17x32xf32> to vector<1x17x32xf32>
    %287 = tpu.concatenate %267, %286 in 0 : vector<1x17x32xf32>, vector<1x17x32xf32> -> vector<2x17x32xf32>
    %288 = vector.shape_cast %287 : vector<2x17x32xf32> to vector<34x32xf32>
    %cst_186 = arith.constant dense<0.000000e+00> : vector<34x100xf32>
    %289 = tpu.matmul %288, %120, %cst_186 {dimension_numbers = #tpu.dot_dimension_numbers<[1], [0], [0], [1], [0, 0, 1, 1], [], []>} : vector<34x32xf32>, vector<32x100xf32>, vector<34x100xf32> -> vector<34x100xf32>
    %290 = vector.broadcast %122 : vector<1x100xf32> to vector<34x100xf32>
    %291 = arith.addf %289, %290 : vector<34x100xf32>
    %cst_187 = arith.constant 0.000000e+00 : f32
    %292 = vector.broadcast %cst_187 : f32 to vector<34x100xf32>
    %293 = arith.maximumf %291, %292 : vector<34x100xf32>
    %cst_188 = arith.constant dense<0.000000e+00> : vector<34x32xf32>
    %294 = tpu.matmul %293, %124, %cst_188 {dimension_numbers = #tpu.dot_dimension_numbers<[1], [0], [0], [1], [0, 0, 1, 1], [], []>} : vector<34x100xf32>, vector<100x32xf32>, vector<34x32xf32> -> vector<34x32xf32>
    %295 = vector.broadcast %126 : vector<1x32xf32> to vector<34x32xf32>
    %296 = arith.addf %294, %295 : vector<34x32xf32>
    %297 = vector.shape_cast %296 : vector<34x32xf32> to vector<2x17x32xf32>
    %298 = arith.addf %248, %297 : vector<2x17x32xf32>
    %c1_189 = arith.constant 1 : index
    %c0_190 = arith.constant 0 : index
    %c0_191 = arith.constant 0 : index
    %299 = vector.load %arg4[%c1_189, %c0_190, %c0_191] : memref<2x32x96xf32, #tpu.memory_space<vmem>>, vector<1x32x96xf32>
    %300 = vector.shape_cast %299 : vector<1x32x96xf32> to vector<32x96xf32>
    %c1_192 = arith.constant 1 : index
    %c0_193 = arith.constant 0 : index
    %c0_194 = arith.constant 0 : index
    %301 = vector.load %arg5[%c1_192, %c0_193, %c0_194] : memref<2x1x96xf32, #tpu.memory_space<vmem>>, vector<1x1x96xf32>
    %302 = vector.shape_cast %301 : vector<1x1x96xf32> to vector<1x96xf32>
    %c1_195 = arith.constant 1 : index
    %c0_196 = arith.constant 0 : index
    %c0_197 = arith.constant 0 : index
    %303 = vector.load %arg6[%c1_195, %c0_196, %c0_197] : memref<2x32x32xf32, #tpu.memory_space<vmem>>, vector<1x32x32xf32>
    %304 = vector.shape_cast %303 : vector<1x32x32xf32> to vector<32x32xf32>
    %c1_198 = arith.constant 1 : index
    %c0_199 = arith.constant 0 : index
    %c0_200 = arith.constant 0 : index
    %305 = vector.load %arg7[%c1_198, %c0_199, %c0_200] : memref<2x1x32xf32, #tpu.memory_space<vmem>>, vector<1x1x32xf32>
    %306 = vector.shape_cast %305 : vector<1x1x32xf32> to vector<1x32xf32>
    %c1_201 = arith.constant 1 : index
    %c0_202 = arith.constant 0 : index
    %c0_203 = arith.constant 0 : index
    %307 = vector.load %arg8[%c1_201, %c0_202, %c0_203] : memref<2x32x100xf32, #tpu.memory_space<vmem>>, vector<1x32x100xf32>
    %308 = vector.shape_cast %307 : vector<1x32x100xf32> to vector<32x100xf32>
    %c1_204 = arith.constant 1 : index
    %c0_205 = arith.constant 0 : index
    %c0_206 = arith.constant 0 : index
    %309 = vector.load %arg9[%c1_204, %c0_205, %c0_206] : memref<2x1x100xf32, #tpu.memory_space<vmem>>, vector<1x1x100xf32>
    %310 = vector.shape_cast %309 : vector<1x1x100xf32> to vector<1x100xf32>
    %c1_207 = arith.constant 1 : index
    %c0_208 = arith.constant 0 : index
    %c0_209 = arith.constant 0 : index
    %311 = vector.load %arg10[%c1_207, %c0_208, %c0_209] : memref<2x100x32xf32, #tpu.memory_space<vmem>>, vector<1x100x32xf32>
    %312 = vector.shape_cast %311 : vector<1x100x32xf32> to vector<100x32xf32>
    %c1_210 = arith.constant 1 : index
    %c0_211 = arith.constant 0 : index
    %c0_212 = arith.constant 0 : index
    %313 = vector.load %arg11[%c1_210, %c0_211, %c0_212] : memref<2x1x32xf32, #tpu.memory_space<vmem>>, vector<1x1x32xf32>
    %314 = vector.shape_cast %313 : vector<1x1x32xf32> to vector<1x32xf32>
    %315 = vector.extract_strided_slice %298 {offsets = [0, 0, 0], sizes = [1, 17, 32], strides = [1, 1, 1]} : vector<2x17x32xf32> to vector<1x17x32xf32>
    %316 = vector.shape_cast %315 : vector<1x17x32xf32> to vector<17x32xf32>
    %cst_213 = arith.constant dense<0.000000e+00> : vector<32xf32>
    %317 = vector.multi_reduction <add>, %316, %cst_213 [0] : vector<17x32xf32> to vector<32xf32>
    %318 = vector.shape_cast %317 : vector<32xf32> to vector<1x32xf32>
    %cst_214 = arith.constant 1.700000e+01 : f32
    %319 = vector.broadcast %cst_214 : f32 to vector<1x32xf32>
    %320 = arith.divf %318, %319 : vector<1x32xf32>
    %321 = vector.broadcast %320 : vector<1x32xf32> to vector<17x32xf32>
    %322 = arith.subf %316, %321 : vector<17x32xf32>
    %323 = arith.mulf %322, %322 : vector<17x32xf32>
    %cst_215 = arith.constant dense<0.000000e+00> : vector<32xf32>
    %324 = vector.multi_reduction <add>, %323, %cst_215 [0] : vector<17x32xf32> to vector<32xf32>
    %325 = vector.shape_cast %324 : vector<32xf32> to vector<1x32xf32>
    %cst_216 = arith.constant 6.250000e-02 : f32
    %326 = vector.broadcast %cst_216 : f32 to vector<1x32xf32>
    %327 = arith.mulf %325, %326 : vector<1x32xf32>
    %328 = vector.broadcast %320 : vector<1x32xf32> to vector<17x32xf32>
    %329 = arith.subf %316, %328 : vector<17x32xf32>
    %330 = math.rsqrt %327 : vector<1x32xf32>
    %331 = vector.broadcast %330 : vector<1x32xf32> to vector<17x32xf32>
    %332 = arith.mulf %329, %331 : vector<17x32xf32>
    %333 = vector.shape_cast %332 : vector<17x32xf32> to vector<1x17x32xf32>
    %334 = vector.extract_strided_slice %298 {offsets = [1, 0, 0], sizes = [1, 17, 32], strides = [1, 1, 1]} : vector<2x17x32xf32> to vector<1x17x32xf32>
    %335 = vector.shape_cast %334 : vector<1x17x32xf32> to vector<17x32xf32>
    %cst_217 = arith.constant dense<0.000000e+00> : vector<32xf32>
    %336 = vector.multi_reduction <add>, %335, %cst_217 [0] : vector<17x32xf32> to vector<32xf32>
    %337 = vector.shape_cast %336 : vector<32xf32> to vector<1x32xf32>
    %cst_218 = arith.constant 1.700000e+01 : f32
    %338 = vector.broadcast %cst_218 : f32 to vector<1x32xf32>
    %339 = arith.divf %337, %338 : vector<1x32xf32>
    %340 = vector.broadcast %339 : vector<1x32xf32> to vector<17x32xf32>
    %341 = arith.subf %335, %340 : vector<17x32xf32>
    %342 = arith.mulf %341, %341 : vector<17x32xf32>
    %cst_219 = arith.constant dense<0.000000e+00> : vector<32xf32>
    %343 = vector.multi_reduction <add>, %342, %cst_219 [0] : vector<17x32xf32> to vector<32xf32>
    %344 = vector.shape_cast %343 : vector<32xf32> to vector<1x32xf32>
    %cst_220 = arith.constant 6.250000e-02 : f32
    %345 = vector.broadcast %cst_220 : f32 to vector<1x32xf32>
    %346 = arith.mulf %344, %345 : vector<1x32xf32>
    %347 = vector.broadcast %339 : vector<1x32xf32> to vector<17x32xf32>
    %348 = arith.subf %335, %347 : vector<17x32xf32>
    %349 = math.rsqrt %346 : vector<1x32xf32>
    %350 = vector.broadcast %349 : vector<1x32xf32> to vector<17x32xf32>
    %351 = arith.mulf %348, %350 : vector<17x32xf32>
    %352 = vector.shape_cast %351 : vector<17x32xf32> to vector<1x17x32xf32>
    %353 = tpu.concatenate %333, %352 in 0 : vector<1x17x32xf32>, vector<1x17x32xf32> -> vector<2x17x32xf32>
    %354 = vector.shape_cast %353 : vector<2x17x32xf32> to vector<34x32xf32>
    %cst_221 = arith.constant dense<0.000000e+00> : vector<34x96xf32>
    %355 = tpu.matmul %354, %300, %cst_221 {dimension_numbers = #tpu.dot_dimension_numbers<[1], [0], [0], [1], [0, 0, 1, 1], [], []>} : vector<34x32xf32>, vector<32x96xf32>, vector<34x96xf32> -> vector<34x96xf32>
    %356 = vector.broadcast %302 : vector<1x96xf32> to vector<34x96xf32>
    %357 = arith.addf %355, %356 : vector<34x96xf32>
    %358 = vector.shape_cast %357 : vector<34x96xf32> to vector<2x17x96xf32>
    %359 = vector.extract_strided_slice %358 {offsets = [0, 0, 0], sizes = [2, 17, 32], strides = [1, 1, 1]} : vector<2x17x96xf32> to vector<2x17x32xf32>
    %360 = vector.extract_strided_slice %358 {offsets = [0, 0, 32], sizes = [2, 17, 32], strides = [1, 1, 1]} : vector<2x17x96xf32> to vector<2x17x32xf32>
    %361 = vector.extract_strided_slice %358 {offsets = [0, 0, 64], sizes = [2, 17, 32], strides = [1, 1, 1]} : vector<2x17x96xf32> to vector<2x17x32xf32>
    %362 = vector.extract_strided_slice %359 {offsets = [0, 0, 0], sizes = [2, 17, 8], strides = [1, 1, 1]} : vector<2x17x32xf32> to vector<2x17x8xf32>
    %363 = vector.extract_strided_slice %360 {offsets = [0, 0, 0], sizes = [2, 17, 8], strides = [1, 1, 1]} : vector<2x17x32xf32> to vector<2x17x8xf32>
    %364 = vector.extract_strided_slice %361 {offsets = [0, 0, 0], sizes = [2, 17, 8], strides = [1, 1, 1]} : vector<2x17x32xf32> to vector<2x17x8xf32>
    "tpu.trace_start"() <{level = 10 : i32, message = "bqd,bkd->bqk"}> : () -> ()
    %cst_222 = arith.constant dense<0.000000e+00> : vector<2x17x17xf32>
    %365 = tpu.matmul %362, %363, %cst_222 {dimension_numbers = #tpu.dot_dimension_numbers<[2], [2], [1], [1], [0, 0, 0, 1, 1, 1], [0], [0]>} : vector<2x17x8xf32>, vector<2x17x8xf32>, vector<2x17x17xf32> -> vector<2x17x17xf32>
    "tpu.trace_stop"() : () -> ()
    %cst_223 = arith.constant 0.353553385 : f32
    %366 = vector.broadcast %cst_223 : f32 to vector<2x17x17xf32>
    %367 = arith.mulf %365, %366 : vector<2x17x17xf32>
    %cst_224 = arith.constant dense<0xFF800000> : vector<2x17xf32>
    %368 = vector.multi_reduction <maximumf>, %367, %cst_224 [2] : vector<2x17x17xf32> to vector<2x17xf32>
    %369 = vector.shape_cast %368 : vector<2x17xf32> to vector<2x17x1xf32>
    %370 = vector.broadcast %369 : vector<2x17x1xf32> to vector<2x17x17xf32>
    %371 = arith.subf %367, %370 : vector<2x17x17xf32>
    %372 = math.exp %371 : vector<2x17x17xf32>
    %cst_225 = arith.constant dense<0.000000e+00> : vector<2x17xf32>
    %373 = vector.multi_reduction <add>, %372, %cst_225 [2] : vector<2x17x17xf32> to vector<2x17xf32>
    %374 = vector.shape_cast %373 : vector<2x17xf32> to vector<2x17x1xf32>
    %375 = tpu.reciprocal %374 {approx = true} : vector<2x17x1xf32> -> vector<2x17x1xf32>
    %376 = vector.broadcast %375 : vector<2x17x1xf32> to vector<2x17x17xf32>
    %377 = arith.mulf %372, %376 : vector<2x17x17xf32>
    "tpu.trace_start"() <{level = 10 : i32, message = "bqk,bkd->bqd"}> : () -> ()
    %cst_226 = arith.constant dense<0.000000e+00> : vector<2x17x8xf32>
    %378 = tpu.matmul %377, %364, %cst_226 {dimension_numbers = #tpu.dot_dimension_numbers<[2], [1], [1], [2], [0, 0, 0, 1, 1, 2], [0], [0]>} : vector<2x17x17xf32>, vector<2x17x8xf32>, vector<2x17x8xf32> -> vector<2x17x8xf32>
    "tpu.trace_stop"() : () -> ()
    %379 = vector.extract_strided_slice %359 {offsets = [0, 0, 8], sizes = [2, 17, 8], strides = [1, 1, 1]} : vector<2x17x32xf32> to vector<2x17x8xf32>
    %380 = vector.extract_strided_slice %360 {offsets = [0, 0, 8], sizes = [2, 17, 8], strides = [1, 1, 1]} : vector<2x17x32xf32> to vector<2x17x8xf32>
    %381 = vector.extract_strided_slice %361 {offsets = [0, 0, 8], sizes = [2, 17, 8], strides = [1, 1, 1]} : vector<2x17x32xf32> to vector<2x17x8xf32>
    "tpu.trace_start"() <{level = 10 : i32, message = "bqd,bkd->bqk"}> : () -> ()
    %cst_227 = arith.constant dense<0.000000e+00> : vector<2x17x17xf32>
    %382 = tpu.matmul %379, %380, %cst_227 {dimension_numbers = #tpu.dot_dimension_numbers<[2], [2], [1], [1], [0, 0, 0, 1, 1, 1], [0], [0]>} : vector<2x17x8xf32>, vector<2x17x8xf32>, vector<2x17x17xf32> -> vector<2x17x17xf32>
    "tpu.trace_stop"() : () -> ()
    %cst_228 = arith.constant 0.353553385 : f32
    %383 = vector.broadcast %cst_228 : f32 to vector<2x17x17xf32>
    %384 = arith.mulf %382, %383 : vector<2x17x17xf32>
    %cst_229 = arith.constant dense<0xFF800000> : vector<2x17xf32>
    %385 = vector.multi_reduction <maximumf>, %384, %cst_229 [2] : vector<2x17x17xf32> to vector<2x17xf32>
    %386 = vector.shape_cast %385 : vector<2x17xf32> to vector<2x17x1xf32>
    %387 = vector.broadcast %386 : vector<2x17x1xf32> to vector<2x17x17xf32>
    %388 = arith.subf %384, %387 : vector<2x17x17xf32>
    %389 = math.exp %388 : vector<2x17x17xf32>
    %cst_230 = arith.constant dense<0.000000e+00> : vector<2x17xf32>
    %390 = vector.multi_reduction <add>, %389, %cst_230 [2] : vector<2x17x17xf32> to vector<2x17xf32>
    %391 = vector.shape_cast %390 : vector<2x17xf32> to vector<2x17x1xf32>
    %392 = tpu.reciprocal %391 {approx = true} : vector<2x17x1xf32> -> vector<2x17x1xf32>
    %393 = vector.broadcast %392 : vector<2x17x1xf32> to vector<2x17x17xf32>
    %394 = arith.mulf %389, %393 : vector<2x17x17xf32>
    "tpu.trace_start"() <{level = 10 : i32, message = "bqk,bkd->bqd"}> : () -> ()
    %cst_231 = arith.constant dense<0.000000e+00> : vector<2x17x8xf32>
    %395 = tpu.matmul %394, %381, %cst_231 {dimension_numbers = #tpu.dot_dimension_numbers<[2], [1], [1], [2], [0, 0, 0, 1, 1, 2], [0], [0]>} : vector<2x17x17xf32>, vector<2x17x8xf32>, vector<2x17x8xf32> -> vector<2x17x8xf32>
    "tpu.trace_stop"() : () -> ()
    %396 = vector.extract_strided_slice %359 {offsets = [0, 0, 16], sizes = [2, 17, 8], strides = [1, 1, 1]} : vector<2x17x32xf32> to vector<2x17x8xf32>
    %397 = vector.extract_strided_slice %360 {offsets = [0, 0, 16], sizes = [2, 17, 8], strides = [1, 1, 1]} : vector<2x17x32xf32> to vector<2x17x8xf32>
    %398 = vector.extract_strided_slice %361 {offsets = [0, 0, 16], sizes = [2, 17, 8], strides = [1, 1, 1]} : vector<2x17x32xf32> to vector<2x17x8xf32>
    "tpu.trace_start"() <{level = 10 : i32, message = "bqd,bkd->bqk"}> : () -> ()
    %cst_232 = arith.constant dense<0.000000e+00> : vector<2x17x17xf32>
    %399 = tpu.matmul %396, %397, %cst_232 {dimension_numbers = #tpu.dot_dimension_numbers<[2], [2], [1], [1], [0, 0, 0, 1, 1, 1], [0], [0]>} : vector<2x17x8xf32>, vector<2x17x8xf32>, vector<2x17x17xf32> -> vector<2x17x17xf32>
    "tpu.trace_stop"() : () -> ()
    %cst_233 = arith.constant 0.353553385 : f32
    %400 = vector.broadcast %cst_233 : f32 to vector<2x17x17xf32>
    %401 = arith.mulf %399, %400 : vector<2x17x17xf32>
    %cst_234 = arith.constant dense<0xFF800000> : vector<2x17xf32>
    %402 = vector.multi_reduction <maximumf>, %401, %cst_234 [2] : vector<2x17x17xf32> to vector<2x17xf32>
    %403 = vector.shape_cast %402 : vector<2x17xf32> to vector<2x17x1xf32>
    %404 = vector.broadcast %403 : vector<2x17x1xf32> to vector<2x17x17xf32>
    %405 = arith.subf %401, %404 : vector<2x17x17xf32>
    %406 = math.exp %405 : vector<2x17x17xf32>
    %cst_235 = arith.constant dense<0.000000e+00> : vector<2x17xf32>
    %407 = vector.multi_reduction <add>, %406, %cst_235 [2] : vector<2x17x17xf32> to vector<2x17xf32>
    %408 = vector.shape_cast %407 : vector<2x17xf32> to vector<2x17x1xf32>
    %409 = tpu.reciprocal %408 {approx = true} : vector<2x17x1xf32> -> vector<2x17x1xf32>
    %410 = vector.broadcast %409 : vector<2x17x1xf32> to vector<2x17x17xf32>
    %411 = arith.mulf %406, %410 : vector<2x17x17xf32>
    "tpu.trace_start"() <{level = 10 : i32, message = "bqk,bkd->bqd"}> : () -> ()
    %cst_236 = arith.constant dense<0.000000e+00> : vector<2x17x8xf32>
    %412 = tpu.matmul %411, %398, %cst_236 {dimension_numbers = #tpu.dot_dimension_numbers<[2], [1], [1], [2], [0, 0, 0, 1, 1, 2], [0], [0]>} : vector<2x17x17xf32>, vector<2x17x8xf32>, vector<2x17x8xf32> -> vector<2x17x8xf32>
    "tpu.trace_stop"() : () -> ()
    %413 = vector.extract_strided_slice %359 {offsets = [0, 0, 24], sizes = [2, 17, 8], strides = [1, 1, 1]} : vector<2x17x32xf32> to vector<2x17x8xf32>
    %414 = vector.extract_strided_slice %360 {offsets = [0, 0, 24], sizes = [2, 17, 8], strides = [1, 1, 1]} : vector<2x17x32xf32> to vector<2x17x8xf32>
    %415 = vector.extract_strided_slice %361 {offsets = [0, 0, 24], sizes = [2, 17, 8], strides = [1, 1, 1]} : vector<2x17x32xf32> to vector<2x17x8xf32>
    "tpu.trace_start"() <{level = 10 : i32, message = "bqd,bkd->bqk"}> : () -> ()
    %cst_237 = arith.constant dense<0.000000e+00> : vector<2x17x17xf32>
    %416 = tpu.matmul %413, %414, %cst_237 {dimension_numbers = #tpu.dot_dimension_numbers<[2], [2], [1], [1], [0, 0, 0, 1, 1, 1], [0], [0]>} : vector<2x17x8xf32>, vector<2x17x8xf32>, vector<2x17x17xf32> -> vector<2x17x17xf32>
    "tpu.trace_stop"() : () -> ()
    %cst_238 = arith.constant 0.353553385 : f32
    %417 = vector.broadcast %cst_238 : f32 to vector<2x17x17xf32>
    %418 = arith.mulf %416, %417 : vector<2x17x17xf32>
    %cst_239 = arith.constant dense<0xFF800000> : vector<2x17xf32>
    %419 = vector.multi_reduction <maximumf>, %418, %cst_239 [2] : vector<2x17x17xf32> to vector<2x17xf32>
    %420 = vector.shape_cast %419 : vector<2x17xf32> to vector<2x17x1xf32>
    %421 = vector.broadcast %420 : vector<2x17x1xf32> to vector<2x17x17xf32>
    %422 = arith.subf %418, %421 : vector<2x17x17xf32>
    %423 = math.exp %422 : vector<2x17x17xf32>
    %cst_240 = arith.constant dense<0.000000e+00> : vector<2x17xf32>
    %424 = vector.multi_reduction <add>, %423, %cst_240 [2] : vector<2x17x17xf32> to vector<2x17xf32>
    %425 = vector.shape_cast %424 : vector<2x17xf32> to vector<2x17x1xf32>
    %426 = tpu.reciprocal %425 {approx = true} : vector<2x17x1xf32> -> vector<2x17x1xf32>
    %427 = vector.broadcast %426 : vector<2x17x1xf32> to vector<2x17x17xf32>
    %428 = arith.mulf %423, %427 : vector<2x17x17xf32>
    "tpu.trace_start"() <{level = 10 : i32, message = "bqk,bkd->bqd"}> : () -> ()
    %cst_241 = arith.constant dense<0.000000e+00> : vector<2x17x8xf32>
    %429 = tpu.matmul %428, %415, %cst_241 {dimension_numbers = #tpu.dot_dimension_numbers<[2], [1], [1], [2], [0, 0, 0, 1, 1, 2], [0], [0]>} : vector<2x17x17xf32>, vector<2x17x8xf32>, vector<2x17x8xf32> -> vector<2x17x8xf32>
    "tpu.trace_stop"() : () -> ()
    %430 = tpu.concatenate %378, %395, %412, %429 in 2 : vector<2x17x8xf32>, vector<2x17x8xf32>, vector<2x17x8xf32>, vector<2x17x8xf32> -> vector<2x17x32xf32>
    %431 = vector.shape_cast %430 : vector<2x17x32xf32> to vector<34x32xf32>
    %cst_242 = arith.constant dense<0.000000e+00> : vector<34x32xf32>
    %432 = tpu.matmul %431, %304, %cst_242 {dimension_numbers = #tpu.dot_dimension_numbers<[1], [0], [0], [1], [0, 0, 1, 1], [], []>} : vector<34x32xf32>, vector<32x32xf32>, vector<34x32xf32> -> vector<34x32xf32>
    %433 = vector.broadcast %306 : vector<1x32xf32> to vector<34x32xf32>
    %434 = arith.addf %432, %433 : vector<34x32xf32>
    %435 = vector.shape_cast %434 : vector<34x32xf32> to vector<2x17x32xf32>
    %436 = arith.addf %298, %435 : vector<2x17x32xf32>
    %437 = vector.extract_strided_slice %436 {offsets = [0, 0, 0], sizes = [1, 17, 32], strides = [1, 1, 1]} : vector<2x17x32xf32> to vector<1x17x32xf32>
    %438 = vector.shape_cast %437 : vector<1x17x32xf32> to vector<17x32xf32>
    %cst_243 = arith.constant dense<0.000000e+00> : vector<32xf32>
    %439 = vector.multi_reduction <add>, %438, %cst_243 [0] : vector<17x32xf32> to vector<32xf32>
    %440 = vector.shape_cast %439 : vector<32xf32> to vector<1x32xf32>
    %cst_244 = arith.constant 1.700000e+01 : f32
    %441 = vector.broadcast %cst_244 : f32 to vector<1x32xf32>
    %442 = arith.divf %440, %441 : vector<1x32xf32>
    %443 = vector.broadcast %442 : vector<1x32xf32> to vector<17x32xf32>
    %444 = arith.subf %438, %443 : vector<17x32xf32>
    %445 = arith.mulf %444, %444 : vector<17x32xf32>
    %cst_245 = arith.constant dense<0.000000e+00> : vector<32xf32>
    %446 = vector.multi_reduction <add>, %445, %cst_245 [0] : vector<17x32xf32> to vector<32xf32>
    %447 = vector.shape_cast %446 : vector<32xf32> to vector<1x32xf32>
    %cst_246 = arith.constant 6.250000e-02 : f32
    %448 = vector.broadcast %cst_246 : f32 to vector<1x32xf32>
    %449 = arith.mulf %447, %448 : vector<1x32xf32>
    %450 = vector.broadcast %442 : vector<1x32xf32> to vector<17x32xf32>
    %451 = arith.subf %438, %450 : vector<17x32xf32>
    %452 = math.rsqrt %449 : vector<1x32xf32>
    %453 = vector.broadcast %452 : vector<1x32xf32> to vector<17x32xf32>
    %454 = arith.mulf %451, %453 : vector<17x32xf32>
    %455 = vector.shape_cast %454 : vector<17x32xf32> to vector<1x17x32xf32>
    %456 = vector.extract_strided_slice %436 {offsets = [1, 0, 0], sizes = [1, 17, 32], strides = [1, 1, 1]} : vector<2x17x32xf32> to vector<1x17x32xf32>
    %457 = vector.shape_cast %456 : vector<1x17x32xf32> to vector<17x32xf32>
    %cst_247 = arith.constant dense<0.000000e+00> : vector<32xf32>
    %458 = vector.multi_reduction <add>, %457, %cst_247 [0] : vector<17x32xf32> to vector<32xf32>
    %459 = vector.shape_cast %458 : vector<32xf32> to vector<1x32xf32>
    %cst_248 = arith.constant 1.700000e+01 : f32
    %460 = vector.broadcast %cst_248 : f32 to vector<1x32xf32>
    %461 = arith.divf %459, %460 : vector<1x32xf32>
    %462 = vector.broadcast %461 : vector<1x32xf32> to vector<17x32xf32>
    %463 = arith.subf %457, %462 : vector<17x32xf32>
    %464 = arith.mulf %463, %463 : vector<17x32xf32>
    %cst_249 = arith.constant dense<0.000000e+00> : vector<32xf32>
    %465 = vector.multi_reduction <add>, %464, %cst_249 [0] : vector<17x32xf32> to vector<32xf32>
    %466 = vector.shape_cast %465 : vector<32xf32> to vector<1x32xf32>
    %cst_250 = arith.constant 6.250000e-02 : f32
    %467 = vector.broadcast %cst_250 : f32 to vector<1x32xf32>
    %468 = arith.mulf %466, %467 : vector<1x32xf32>
    %469 = vector.broadcast %461 : vector<1x32xf32> to vector<17x32xf32>
    %470 = arith.subf %457, %469 : vector<17x32xf32>
    %471 = math.rsqrt %468 : vector<1x32xf32>
    %472 = vector.broadcast %471 : vector<1x32xf32> to vector<17x32xf32>
    %473 = arith.mulf %470, %472 : vector<17x32xf32>
    %474 = vector.shape_cast %473 : vector<17x32xf32> to vector<1x17x32xf32>
    %475 = tpu.concatenate %455, %474 in 0 : vector<1x17x32xf32>, vector<1x17x32xf32> -> vector<2x17x32xf32>
    %476 = vector.shape_cast %475 : vector<2x17x32xf32> to vector<34x32xf32>
    %cst_251 = arith.constant dense<0.000000e+00> : vector<34x100xf32>
    %477 = tpu.matmul %476, %308, %cst_251 {dimension_numbers = #tpu.dot_dimension_numbers<[1], [0], [0], [1], [0, 0, 1, 1], [], []>} : vector<34x32xf32>, vector<32x100xf32>, vector<34x100xf32> -> vector<34x100xf32>
    %478 = vector.broadcast %310 : vector<1x100xf32> to vector<34x100xf32>
    %479 = arith.addf %477, %478 : vector<34x100xf32>
    %cst_252 = arith.constant 0.000000e+00 : f32
    %480 = vector.broadcast %cst_252 : f32 to vector<34x100xf32>
    %481 = arith.maximumf %479, %480 : vector<34x100xf32>
    %cst_253 = arith.constant dense<0.000000e+00> : vector<34x32xf32>
    %482 = tpu.matmul %481, %312, %cst_253 {dimension_numbers = #tpu.dot_dimension_numbers<[1], [0], [0], [1], [0, 0, 1, 1], [], []>} : vector<34x100xf32>, vector<100x32xf32>, vector<34x32xf32> -> vector<34x32xf32>
    %483 = vector.broadcast %314 : vector<1x32xf32> to vector<34x32xf32>
    %484 = arith.addf %482, %483 : vector<34x32xf32>
    %485 = vector.shape_cast %484 : vector<34x32xf32> to vector<2x17x32xf32>
    %486 = arith.addf %436, %485 : vector<2x17x32xf32>
    %487 = vector.extract_strided_slice %486 {offsets = [0, 0, 0], sizes = [1, 17, 32], strides = [1, 1, 1]} : vector<2x17x32xf32> to vector<1x17x32xf32>
    %488 = vector.shape_cast %487 : vector<1x17x32xf32> to vector<17x32xf32>
    %cst_254 = arith.constant dense<0.000000e+00> : vector<32xf32>
    %489 = vector.multi_reduction <add>, %488, %cst_254 [0] : vector<17x32xf32> to vector<32xf32>
    %490 = vector.shape_cast %489 : vector<32xf32> to vector<1x32xf32>
    %cst_255 = arith.constant 1.700000e+01 : f32
    %491 = vector.broadcast %cst_255 : f32 to vector<1x32xf32>
    %492 = arith.divf %490, %491 : vector<1x32xf32>
    %493 = vector.broadcast %492 : vector<1x32xf32> to vector<17x32xf32>
    %494 = arith.subf %488, %493 : vector<17x32xf32>
    %495 = arith.mulf %494, %494 : vector<17x32xf32>
    %cst_256 = arith.constant dense<0.000000e+00> : vector<32xf32>
    %496 = vector.multi_reduction <add>, %495, %cst_256 [0] : vector<17x32xf32> to vector<32xf32>
    %497 = vector.shape_cast %496 : vector<32xf32> to vector<1x32xf32>
    %cst_257 = arith.constant 6.250000e-02 : f32
    %498 = vector.broadcast %cst_257 : f32 to vector<1x32xf32>
    %499 = arith.mulf %497, %498 : vector<1x32xf32>
    %500 = vector.broadcast %492 : vector<1x32xf32> to vector<17x32xf32>
    %501 = arith.subf %488, %500 : vector<17x32xf32>
    %502 = math.rsqrt %499 : vector<1x32xf32>
    %503 = vector.broadcast %502 : vector<1x32xf32> to vector<17x32xf32>
    %504 = arith.mulf %501, %503 : vector<17x32xf32>
    %505 = vector.shape_cast %504 : vector<17x32xf32> to vector<1x17x32xf32>
    %506 = vector.extract_strided_slice %486 {offsets = [1, 0, 0], sizes = [1, 17, 32], strides = [1, 1, 1]} : vector<2x17x32xf32> to vector<1x17x32xf32>
    %507 = vector.shape_cast %506 : vector<1x17x32xf32> to vector<17x32xf32>
    %cst_258 = arith.constant dense<0.000000e+00> : vector<32xf32>
    %508 = vector.multi_reduction <add>, %507, %cst_258 [0] : vector<17x32xf32> to vector<32xf32>
    %509 = vector.shape_cast %508 : vector<32xf32> to vector<1x32xf32>
    %cst_259 = arith.constant 1.700000e+01 : f32
    %510 = vector.broadcast %cst_259 : f32 to vector<1x32xf32>
    %511 = arith.divf %509, %510 : vector<1x32xf32>
    %512 = vector.broadcast %511 : vector<1x32xf32> to vector<17x32xf32>
    %513 = arith.subf %507, %512 : vector<17x32xf32>
    %514 = arith.mulf %513, %513 : vector<17x32xf32>
    %cst_260 = arith.constant dense<0.000000e+00> : vector<32xf32>
    %515 = vector.multi_reduction <add>, %514, %cst_260 [0] : vector<17x32xf32> to vector<32xf32>
    %516 = vector.shape_cast %515 : vector<32xf32> to vector<1x32xf32>
    %cst_261 = arith.constant 6.250000e-02 : f32
    %517 = vector.broadcast %cst_261 : f32 to vector<1x32xf32>
    %518 = arith.mulf %516, %517 : vector<1x32xf32>
    %519 = vector.broadcast %511 : vector<1x32xf32> to vector<17x32xf32>
    %520 = arith.subf %507, %519 : vector<17x32xf32>
    %521 = math.rsqrt %518 : vector<1x32xf32>
    %522 = vector.broadcast %521 : vector<1x32xf32> to vector<17x32xf32>
    %523 = arith.mulf %520, %522 : vector<17x32xf32>
    %524 = vector.shape_cast %523 : vector<17x32xf32> to vector<1x17x32xf32>
    %525 = tpu.concatenate %505, %524 in 0 : vector<1x17x32xf32>, vector<1x17x32xf32> -> vector<2x17x32xf32>
    %c0_262 = arith.constant 0 : index
    %c0_263 = arith.constant 0 : index
    %c0_264 = arith.constant 0 : index
    %526 = vector.load %arg12[%c0_262, %c0_263, %c0_264] : memref<2x17x32xf32, #tpu.memory_space<vmem>>, vector<2x17x32xf32>
    tpu.vector_store %arg12[%c0_262, %c0_263, %c0_264], %525 {strides = array<i32>} : memref<2x17x32xf32, #tpu.memory_space<vmem>>, vector<2x17x32xf32>,
    return
  }
  func.func @transform_0(%arg0: i32, %arg1: memref<2x8xi32, #tpu.memory_space<smem>>) -> (i32, i32, i32) {
    %c0_i32 = arith.constant 0 : i32
    %c0_i32_0 = arith.constant 0 : i32
    %c0_i32_1 = arith.constant 0 : i32
    return %arg0, %c0_i32, %c0_i32_0 : i32, i32, i32
  }
  func.func @transform_1(%arg0: i32, %arg1: memref<2x8xi32, #tpu.memory_space<smem>>) -> (i32, i32) {
    %c0_i32 = arith.constant 0 : i32
    %c0_i32_0 = arith.constant 0 : i32
    %c0_i32_1 = arith.constant 0 : i32
    return %c0_i32, %c0_i32_0 : i32, i32
  }
  func.func @transform_2(%arg0: i32, %arg1: memref<2x8xi32, #tpu.memory_space<smem>>) -> (i32, i32, i32) {
    %c0_i32 = arith.constant 0 : i32
    %c0_i32_0 = arith.constant 0 : i32
    %c0_i32_1 = arith.constant 0 : i32
    %c0_i32_2 = arith.constant 0 : i32
    return %c0_i32, %c0_i32_0, %c0_i32_1 : i32, i32, i32
  }
  func.func @transform_3(%arg0: i32, %arg1: memref<2x8xi32, #tpu.memory_space<smem>>) -> (i32, i32, i32) {
    %c0_i32 = arith.constant 0 : i32
    %c0_i32_0 = arith.constant 0 : i32
    %c0_i32_1 = arith.constant 0 : i32
    %c0_i32_2 = arith.constant 0 : i32
    return %c0_i32, %c0_i32_0, %c0_i32_1 : i32, i32, i32
  }
  func.func @transform_4(%arg0: i32, %arg1: memref<2x8xi32, #tpu.memory_space<smem>>) -> (i32, i32, i32) {
    %c0_i32 = arith.constant 0 : i32
    %c0_i32_0 = arith.constant 0 : i32
    %c0_i32_1 = arith.constant 0 : i32
    %c0_i32_2 = arith.constant 0 : i32
    return %c0_i32, %c0_i32_0, %c0_i32_1 : i32, i32, i32
  }
  func.func @transform_5(%arg0: i32, %arg1: memref<2x8xi32, #tpu.memory_space<smem>>) -> (i32, i32, i32) {
    %c0_i32 = arith.constant 0 : i32
    %c0_i32_0 = arith.constant 0 : i32
    %c0_i32_1 = arith.constant 0 : i32
    %c0_i32_2 = arith.constant 0 : i32
    return %c0_i32, %c0_i32_0, %c0_i32_1 : i32, i32, i32
  }
  func.func @transform_6(%arg0: i32, %arg1: memref<2x8xi32, #tpu.memory_space<smem>>) -> (i32, i32, i32) {
    %c0_i32 = arith.constant 0 : i32
    %c0_i32_0 = arith.constant 0 : i32
    %c0_i32_1 = arith.constant 0 : i32
    %c0_i32_2 = arith.constant 0 : i32
    return %c0_i32, %c0_i32_0, %c0_i32_1 : i32, i32, i32
  }
  func.func @transform_7(%arg0: i32, %arg1: memref<2x8xi32, #tpu.memory_space<smem>>) -> (i32, i32, i32) {
    %c0_i32 = arith.constant 0 : i32
    %c0_i32_0 = arith.constant 0 : i32
    %c0_i32_1 = arith.constant 0 : i32
    %c0_i32_2 = arith.constant 0 : i32
    return %c0_i32, %c0_i32_0, %c0_i32_1 : i32, i32, i32
  }
  func.func @transform_8(%arg0: i32, %arg1: memref<2x8xi32, #tpu.memory_space<smem>>) -> (i32, i32, i32) {
    %c0_i32 = arith.constant 0 : i32
    %c0_i32_0 = arith.constant 0 : i32
    %c0_i32_1 = arith.constant 0 : i32
    %c0_i32_2 = arith.constant 0 : i32
    return %c0_i32, %c0_i32_0, %c0_i32_1 : i32, i32, i32
  }
  func.func @transform_9(%arg0: i32, %arg1: memref<2x8xi32, #tpu.memory_space<smem>>) -> (i32, i32, i32) {
    %c0_i32 = arith.constant 0 : i32
    %c0_i32_0 = arith.constant 0 : i32
    %c0_i32_1 = arith.constant 0 : i32
    %c0_i32_2 = arith.constant 0 : i32
    return %c0_i32, %c0_i32_0, %c0_i32_1 : i32, i32, i32
  }
  func.func @transform_10(%arg0: i32, %arg1: memref<2x8xi32, #tpu.memory_space<smem>>) -> (i32, i32, i32) {
    %c0_i32 = arith.constant 0 : i32
    %c0_i32_0 = arith.constant 0 : i32
    %c0_i32_1 = arith.constant 0 : i32
    return %arg0, %c0_i32, %c0_i32_0 : i32, i32, i32
  }
}

</mosaic_0001>

<bundles_post_ra>
// kernel: decoder_forward.1
= control target key start
LH: loop header
LB: loop body
LE: loop exit
PB: predicated region body
PF: predicated region fallthrough
CT: control target
= control target key end

     0   :  { %s15135_s0 = inlined_call_operand.vmem [shape: s32[2,8], index: 0, kind: input, shape index: {}]   ;;  %s15136_s1 = inlined_call_operand.vmem [shape: f32[2,9,32], index: 1, kind: input, shape index: {}]   ;;  %s15137_s2 = inlined_call_operand.vmem [shape: f32[17,32], index: 2, kind: input, shape index: {}]   ;;  %s15138_s3 = inlined_call_operand.vmem [shape: f32[2,32,96], index: 3, kind: input, shape index: {}]   ;;  %s15139_s4 = inlined_call_operand.vmem [shape: f32[2,1,96], index: 4, kind: input, shape index: {}]   ;;  %s15140_s5 = inlined_call_operand.vmem [shape: f32[2,32,32], index: 5, kind: input, shape index: {}]   ;;  %s15141_s6 = inlined_call_operand.vmem [shape: f32[2,1,32], index: 6, kind: input, shape index: {}]   ;;  %s15142_s7 = inlined_call_operand.vmem [shape: f32[2,32,100], index: 7, kind: input, shape index: {}]   ;;  %s15143_s8 = inlined_call_operand.vmem [shape: f32[2,1,100], index: 8, kind: input, shape index: {}]   ;;  %s15144_s9 = inlined_call_operand.vmem [shape: f32[2,100,32], index: 9, kind: input, shape index: {}]   ;;  %s15145_s10 = inlined_call_operand.vmem [shape: f32[2,1,32], index: 10, kind: input, shape index: {}]   ;;  %s15146_s11 = inlined_call_operand.vmem [shape: f32[2,17,32], index: 11, kind: output, shape index: {}]  }
   0x1   :  { %s16_s19 = sshll.u32 %s15135_s0, 4  ;;  %s17_s19 = int_to_ptr.vmem [resolvable:$true] %s16_s19 }
   0x2   :  { %s12411_s20 = scalar_lea.vmem %s17_s19, 32  ;;  %p12416_p1 = scmp.lt.s32.totalorder %s17_s19, %s17_s19 }
   0x3   :  { %p12412_p0 = scmp.ne.s32.totalorder %s17_s19, %s12411_s20  ;;  %p12417_p2 = scmp.lt.s32.totalorder %s12411_s20, %s12411_s20 }
   0x5   :  { %p12418_p3 = por %p12417_p2, %p12416_p1 }
   0x7   :  { %p12419_p4 = pnand %p12418_p3, %p12412_p0 }
   0x9   :  { %12422 = shalt.err (!%p12419_p4)  }
   0xa   :  { %s12425_s21 = smov [#allocation4]  }
   0xb   :  { %19 = dma.vmem_to_smem %s17_s19, 32, %s12425_s21, [#allocation3] }
   0xc   :  { %12423 = dma.done.wait [#allocation3], 32 }
   0xd   :  { %12424 = vsyncadd [#allocation3], 4294967264 }
   0xe   :  { %21 = sfence }
   0xf   :  { %v180_v0 = vld [vmem:[%s15138_s3 + $0x18] sm:$0xff]  ;;  %vm42_vm0 = vcmask 261120   ;;  %v12426_v1 = vmov 0.0   ;;  %v179_v2 = vld [vmem:[%s15138_s3 + $0x10] sm:$0xff]  ;;  %vm45_vm1 = vcmask 253952   ;;  %s12525_s27 = sld [smem:[#allocation4]] }
  0x10   :  { %11473 = vmatprep.subr.mxu0 %v12426_v1  ;;  %12173 = vmatprep.subr.mxu1 %v12426_v1  ;;  %43 = vst.msk [vmem:[#allocation2] sm:$0xff] %vm42_vm0, %v12426_v1  ;;  %44 = vst.msk [vmem:[#allocation2 + $0x8] sm:$0xff] %vm42_vm0, %v12426_v1  ;;  %v51_v3 = vld [vmem:[%s15136_s1] sm:$0x1]  ;;  %s12532_s28 = sld [smem:[#allocation4 + $0x1]]  ;;  %v178_v4 = vld [vmem:[%s15138_s3 + $0x8] sm:$0xff] }
  0x11   :  { %47 = vst.msk [vmem:[#allocation2 + $0x18] sm:$0xff] %vm42_vm0, %v12426_v1  ;;  %48 = vst.msk [vmem:[#allocation2 + $0x20] sm:$0xff] %vm42_vm0, %v12426_v1  ;;  %11474 = vmatpush3.msra.mxu0 %v180_v0  ;;  %12177 = vmatpush3.msra.mxu1 %v180_v0  ;;  %s12539_s12 = sld [smem:[#allocation4 + $0x2]]  ;;  %v177_v5 = vld [vmem:[%s15138_s3] sm:$0xff]  ;;  %vm12427_vm2 = vmmov 0   ;;  %v169_v24 = vld [vmem:[%s15137_s2 + $0x8] sm:$0xff] }
  0x12   :  { %46 = vst.msk [vmem:[#allocation2 + $0x10] sm:$0x1] %vm45_vm1, %v12426_v1  ;;  %49 = vst.msk [vmem:[#allocation2 + $0x28] sm:$0x1] %vm45_vm1, %v12426_v1  ;;  %11475 = vmatprep.subr.mxu0 %v12426_v1  ;;  %12174 = vmatprep.subr.mxu1 %v12426_v1  ;;  %s12541_s13 = sld [smem:[#allocation4 + $0x3]]  ;;  %v168_v23 = vld [vmem:[%s15137_s2] sm:$0xff] }
  0x13   :  { %52 = vst.msk [vmem:[#allocation2] sm:$0x1] %vm45_vm1, %v51_v3  ;;  %11476 = vmatpush3.msra.mxu0 %v179_v2  ;;  %12178 = vmatpush3.msra.mxu1 %v179_v2  ;;  %v56_v6 = vld [vmem:[%s15136_s1 + $0x1] sm:$0x1]  ;;  %s12551_s18 = sld [smem:[#allocation4 + $0x4]]  ;;  %vm1163_vm3 = vcmask 64512  }
  0x14   :  { %11477 = vmatprep.subr.mxu0 %v12426_v1  ;;  %12175 = vmatprep.subr.mxu1 %v12426_v1  ;;  %v62_v7 = vld [vmem:[%s15136_s1 + $0x2] sm:$0x1]  ;;  %s12556_s21 = sld [smem:[#allocation4 + $0x5]]  ;;  %v68_v8 = vld [vmem:[%s15136_s1 + $0x3] sm:$0x1]  ;;  %vm1557_vm4 = vcmask 1040384  }
  0x15   :  { %11478 = vmatpush3.msra.mxu0 %v178_v4  ;;  %12179 = vmatpush3.msra.mxu1 %v178_v4  ;;  %s12564_s0 = sld [smem:[#allocation4 + $0x6]]  ;;  %s10832_s24 = scalar_lea.vmem [#allocation2], %s12525_s27  ;;  %v74_v9 = vld [vmem:[%s15136_s1 + $0x4] sm:$0x1]  ;;  %v80_v10 = vld [vmem:[%s15136_s1 + $0x5] sm:$0x1] }
  0x16   :  { %11479 = vmatprep.subr.mxu0 %v12426_v1  ;;  %11481 = vmatprep.mubr.msk.f32.mxu0 %vm12427_vm2, %v12426_v1  ;;  %10864 = vst.msk [vmem:[%s10832_s24 + $0x1] sm:$0x1] %vm45_vm1, %v56_v6  ;;  %s12572_s29 = sld [smem:[#allocation4 + $0x7]]  ;;  %s10834_s30 = scalar_lea.vmem [#allocation2], %s12532_s28  ;;  %v86_v11 = vld [vmem:[%s15136_s1 + $0x6] sm:$0x1] }
  0x17   :  { %11480 = vmatpush3.msra.mxu0 %v177_v5  ;;  %12176 = vmatprep.subr.mxu1 %v12426_v1  ;;  %10866 = vst.msk [vmem:[%s10834_s30 + $0x1] sm:$0x1] %vm45_vm1, %v62_v7  ;;  %s12579_s16 = sld [smem:[#allocation4 + $0x80]]  ;;  %s10836_s27 = scalar_lea.vmem [#allocation2], %s12539_s12  ;;  %v92_v12 = vld [vmem:[%s15136_s1 + $0x7] sm:$0x1] }
  0x18   :  { %12180 = vmatpush3.msra.mxu1 %v177_v5  ;;  %11487 = vmatprep.mubr.msk.f32.mxu1 %vm12427_vm2, %v12426_v1  ;;  %10868 = vst.msk [vmem:[%s10836_s27 + $0x1] sm:$0x1] %vm45_vm1, %v68_v8  ;;  %s12588_s28 = sld [smem:[#allocation4 + $0x81]]  ;;  %s10838_s20 = scalar_lea.vmem [#allocation2], %s12541_s13  ;;  %v98_v13 = vld [vmem:[%s15136_s1 + $0x8] sm:$0x1] }
  0x19   :  { %11496 = vmatprep.subr.mxu1 %v12426_v1  ;;  %11526 = vmatprep.subr.mxu0 %v12426_v1  ;;  %10870 = vst.msk [vmem:[%s10838_s20 + $0x1] sm:$0x1] %vm45_vm1, %v74_v9  ;;  %s10886_s12 = sld [smem:[#allocation4 + $0x82]]  ;;  %s10840_s24 = scalar_lea.vmem [#allocation2], %s12551_s18  ;;  %v10879_v14 = vld [vmem:[%s15136_s1 + $0x10] sm:$0x1] }
  0x1a   :  { %10872 = vst.msk [vmem:[%s10840_s24 + $0x1] sm:$0x1] %vm45_vm1, %v80_v10  ;;  %s10889_s30 = sld [smem:[#allocation4 + $0x83]]  ;;  %s10842_s14 = scalar_lea.vmem [#allocation2], %s12556_s21  ;;  %v10881_v15 = vld [vmem:[%s15136_s1 + $0x11] sm:$0x1] }
  0x1b   :  { %10874 = vst.msk [vmem:[%s10842_s14 + $0x1] sm:$0x1] %vm45_vm1, %v86_v11  ;;  %s10892_s27 = sld [smem:[#allocation4 + $0x84]]  ;;  %s10844_s17 = scalar_lea.vmem [#allocation2], %s12564_s0  ;;  %v10884_v16 = vld [vmem:[%s15136_s1 + $0x12] sm:$0x1] }
  0x1c   :  { %10876 = vst.msk [vmem:[%s10844_s17 + $0x1] sm:$0x1] %vm45_vm1, %v92_v12  ;;  %s10895_s20 = sld [smem:[#allocation4 + $0x85]]  ;;  %s10846_s22 = scalar_lea.vmem [#allocation2], %s12572_s29  ;;  %v10887_v17 = vld [vmem:[%s15136_s1 + $0x13] sm:$0x1] }
  0x1d   :  { %10878 = vst.msk [vmem:[%s10846_s22 + $0x1] sm:$0x1] %vm45_vm1, %v98_v13  ;;  %s10898_s24 = sld [smem:[#allocation4 + $0x86]]  ;;  %s10848_s14 = scalar_lea.vmem [#allocation2], %s12579_s16  ;;  %v10890_v18 = vld [vmem:[%s15136_s1 + $0x14] sm:$0x1] }
  0x1e   :  { %105 = vst.msk [vmem:[#allocation2 + $0x18] sm:$0x1] %vm45_vm1, %v10879_v14  ;;  %s10901_s0 = sld [smem:[#allocation4 + $0x87]]  ;;  %s10850_s29 = scalar_lea.vmem [#allocation2], %s12588_s28  ;;  %v10893_v19 = vld [vmem:[%s15136_s1 + $0x15] sm:$0x1] }
  0x1f   :  { %10882 = vst.msk [vmem:[%s10848_s14 + $0x19] sm:$0x1] %vm45_vm1, %v10881_v15  ;;  %s10852_s19 = scalar_lea.vmem [#allocation2], %s10886_s12  ;;  %v10896_v20 = vld [vmem:[%s15136_s1 + $0x16] sm:$0x1]  ;;  %vm1472_vm5 = vcmask 138240  }
  0x20   :  { %10885 = vst.msk [vmem:[%s10850_s29 + $0x19] sm:$0x1] %vm45_vm1, %v10884_v16  ;;  %s10854_s16 = scalar_lea.vmem [#allocation2], %s10889_s30  ;;  %v10899_v21 = vld [vmem:[%s15136_s1 + $0x17] sm:$0x1]  ;;  %vm1479_vm6 = vcmask 131072  }
  0x21   :  { %10888 = vst.msk [vmem:[%s10852_s19 + $0x19] sm:$0x1] %vm45_vm1, %v10887_v17  ;;  %s10856_s28 = scalar_lea.vmem [#allocation2], %s10892_s27  ;;  %v10902_v22 = vld [vmem:[%s15136_s1 + $0x18] sm:$0x1]  ;;  %s12432_s22 = smov 120  }
  0x22   :  { %10891 = vst.msk [vmem:[%s10854_s16 + $0x19] sm:$0x1] %vm45_vm1, %v10890_v18  ;;  %s10858_s12 = scalar_lea.vmem [#allocation2], %s10895_s20  ;;  %v170_v25 = vld [vmem:[%s15137_s2 + $0x10] sm:$0x1]  ;;  %s12429_s20 = smov 96  }
  0x23   :  { %10894 = vst.msk [vmem:[%s10856_s28 + $0x19] sm:$0x1] %vm45_vm1, %v10893_v19  ;;  %s10860_s13 = scalar_lea.vmem [#allocation2], %s10898_s24  ;;  %s12430_s24 = smov 64   ;;  %vm3251_vm7 = vcmask 130048   ;;  %vm3258_vm8 = vcmask 195584  }
  0x24   :  { %10897 = vst.msk [vmem:[%s10858_s12 + $0x19] sm:$0x1] %vm45_vm1, %v10896_v20  ;;  %s10862_s30 = scalar_lea.vmem [#allocation2], %s10901_s0  ;;  %s12431_s0 = smov 88   ;;  %vm4913_vm9 = vcmask 1043456   ;;  %vm4897_vm10 = vcmask 818176  }
  0x25   :  { %10900 = vst.msk [vmem:[%s10860_s13 + $0x19] sm:$0x1] %vm45_vm1, %v10899_v21  ;;  %s12433_s21 = smov 56   ;;  %s12434_s16 = smov 80  }
  0x26   :  { %10903 = vst.msk [vmem:[%s10862_s30 + $0x19] sm:$0x1] %vm45_vm1, %v10902_v22  ;;  %s12435_s23 = smov 112   ;;  %s12436_s25 = smov 48  }
  0x27   :  { %s12437_s28 = smov 72   ;;  %s12438_s26 = smov 104  }
  0x28   :  { %s12439_s14 = smov 40   ;;  %s12440_s12 = smov 8  }
  0x29   :  { %s12441_s13 = smov 16   ;;  %s12442_s30 = smov 24  }
  0x2d   :  { %v162_v26 = vld [vmem:[#allocation2] sm:$0xff]  ;;  %v163_v27 = vld [vmem:[#allocation2 + $0x8] sm:$0xff]  ;;  %v164_v28 = vld [vmem:[#allocation2 + $0x10] sm:$0x1] }
  0x2e   :  { %v12655_v29 = vadd.f32 %v168_v23, %v162_v26  ;;  %v12657_v30 = vadd.f32 %v169_v24, %v163_v27  ;;  %v12659_v31 = vadd.f32 %v170_v25, %v164_v28  ;;  %v165_v32 = vld [vmem:[#allocation2 + $0x18] sm:$0xff]  ;;  %v166_v33 = vld [vmem:[#allocation2 + $0x20] sm:$0xff]  ;;  %v167_v34 = vld [vmem:[#allocation2 + $0x28] sm:$0x1] }
  0x2f   :  { %v12661_v35 = vadd.f32 %v168_v23, %v165_v32  ;;  %v12663_v36 = vadd.f32 %v169_v24, %v166_v33  ;;  %v12665_v37 = vadd.f32 %v170_v25, %v167_v34 }
  0x30   :  { %v206_v38 = vsel %vm42_vm0, %v12655_v29, 0.0  ;;  %v207_v39 = vsel %vm42_vm0, %v12657_v30, 0.0  ;;  %v209_v40 = vsel %vm45_vm1, %v12659_v31, 0.0 }
  0x31   :  { %v208_v41 = vadd.f32 %v207_v39, %v206_v38  ;;  %v241_v42 = vsel %vm42_vm0, %v12661_v35, 0.0  ;;  %v242_v43 = vsel %vm42_vm0, %v12663_v36, 0.0  ;;  %v244_v44 = vsel %vm45_vm1, %v12665_v37, 0.0 }
  0x32   :  { %v243_v45 = vadd.f32 %v242_v43, %v241_v42  ;;  %v285_v43 = vlaneseq }
  0x33   :  { %v210_v46 = vadd.f32 %v209_v40, %v208_v41  ;;  %v12428_v41 = vmov 1966171168  }
  0x34   :  { %v245_v47 = vadd.f32 %v244_v44, %v243_v45  ;;  %v283_v42 = vunpack.c.l.s4 %v12428_v41  ;;  %v286_v45 = vshrl.u32 %v285_v43, 7 }
  0x35   :  { %v211_v48 = vrot.slane %v210_v46, 4 }
  0x36   :  { %v246_v49 = vrot.slane %v245_v47, 4  ;;  %v284_v44 = vunpack.c.0.s8 %v283_v42 }
  0x37   :  { %v212_v50 = vadd.f32 %v211_v48, %v210_v46 }
  0x38   :  { %v247_v51 = vadd.f32 %v246_v49, %v245_v47  ;;  %v12691_v46 = vsub.s32 %v284_v44, %v286_v45 }
  0x39   :  { %v213_v52 = vrot.slane %v212_v50, 2 }
  0x3a   :  { %v248_v53 = vrot.slane %v247_v51, 2 }
  0x3b   :  { %v214_v54 = vadd.f32 %v213_v52, %v212_v50 }
  0x3c   :  { %v249_v55 = vadd.f32 %v248_v53, %v247_v51 }
  0x3d   :  { %v215_v56 = vrot.slane %v214_v54, 1 }
  0x3e   :  { %v250_v57 = vrot.slane %v249_v55, 1 }
  0x3f   :  { %v216_v58 = vadd.f32 %v215_v56, %v214_v54 }
  0x40   :  { %v251_v59 = vadd.f32 %v250_v57, %v249_v55 }
  0x41   :  { %v218_v60 = vmul.f32 0.05882353, %v216_v58 }
  0x42   :  { %v252_v61 = vmul.f32 0.05882353, %v251_v59 }
  0x43   :  { %v219_v62 = vsub.f32 %v12655_v29, %v218_v60  ;;  %v220_v63 = vsub.f32 %v12657_v30, %v218_v60  ;;  %v221_v0 = vsub.f32 %v12659_v31, %v218_v60 }
  0x44   :  { %v253_v2 = vsub.f32 %v12661_v35, %v252_v61  ;;  %v254_v3 = vsub.f32 %v12663_v36, %v252_v61  ;;  %v255_v4 = vsub.f32 %v12665_v37, %v252_v61 }
  0x45   :  { %v222_v5 = vmul.f32 %v219_v62, %v219_v62  ;;  %v223_v6 = vmul.f32 %v220_v63, %v220_v63  ;;  %v224_v7 = vmul.f32 %v221_v0, %v221_v0 }
  0x46   :  { %v256_v8 = vmul.f32 %v253_v2, %v253_v2  ;;  %v257_v9 = vmul.f32 %v254_v3, %v254_v3  ;;  %v258_v10 = vmul.f32 %v255_v4, %v255_v4 }
  0x47   :  { %v225_v11 = vsel %vm42_vm0, %v222_v5, 0.0  ;;  %v226_v12 = vsel %vm42_vm0, %v223_v6, 0.0  ;;  %v228_v13 = vsel %vm45_vm1, %v224_v7, 0.0 }
  0x48   :  { %v227_v14 = vadd.f32 %v226_v12, %v225_v11  ;;  %v259_v15 = vsel %vm42_vm0, %v256_v8, 0.0  ;;  %v260_v16 = vsel %vm42_vm0, %v257_v9, 0.0  ;;  %v262_v17 = vsel %vm45_vm1, %v258_v10, 0.0 }
  0x49   :  { %v261_v18 = vadd.f32 %v260_v16, %v259_v15 }
  0x4a   :  { %v229_v19 = vadd.f32 %v228_v13, %v227_v14 }
  0x4b   :  { %v263_v20 = vadd.f32 %v262_v17, %v261_v18 }
  0x4c   :  { %v230_v21 = vrot.slane %v229_v19, 4 }
  0x4d   :  { %v264_v22 = vrot.slane %v263_v20, 4 }
  0x4e   :  { %v231_v23 = vadd.f32 %v230_v21, %v229_v19 }
  0x4f   :  { %v265_v24 = vadd.f32 %v264_v22, %v263_v20 }
  0x50   :  { %v232_v25 = vrot.slane %v231_v23, 2 }
  0x51   :  { %v266_v26 = vrot.slane %v265_v24, 2 }
  0x52   :  { %v233_v27 = vadd.f32 %v232_v25, %v231_v23 }
  0x53   :  { %v267_v28 = vadd.f32 %v266_v26, %v265_v24 }
  0x54   :  { %v234_v32 = vrot.slane %v233_v27, 1 }
  0x55   :  { %v268_v33 = vrot.slane %v267_v28, 1 }
  0x56   :  { %v235_v34 = vadd.f32 %v234_v32, %v233_v27 }
  0x57   :  { %v269_v38 = vadd.f32 %v268_v33, %v267_v28 }
  0x58   :  { %v236_v39 = vmul.f32 0.0625, %v235_v34 }
  0x59   :  { %v270_v40 = vmul.f32 0.0625, %v269_v38 }
  0x5a   :  { %12199 = vrsqrt.f32 %v236_v39 }
  0x5b   :  { %12201 = vrsqrt.f32 %v270_v40 }
  0x67   :  { %v12200_v47 = vpop.eup %12199 }
  0x68   :  { %v12202_v48 = vpop.eup %12201  ;;  %v238_v49 = vmul.f32 %v12200_v47, %v219_v62  ;;  %v240_v50 = vmul.f32 %v12200_v47, %v221_v0  ;;  %v239_v51 = vmul.f32 %v12200_v47, %v220_v63 }
  0x69   :  { %v272_v52 = vmul.f32 %v12202_v48, %v253_v2  ;;  %v12693_v53 = vmul.f32 %v12202_v48, %v254_v3  ;;  %v12695_v54 = vmul.f32 %v12202_v48, %v255_v4 }
  0x6a   :  { %v281_v55 = vcombine.high %v238_v49, %v238_v49  ;;  %v288_v56 = vrot.slane %v238_v49, %v12691_v46  ;;  %v385_v57 = vrot.slane %v240_v50, %v12691_v46  ;;  %v330_v58 = vcombine.high %v239_v51, %v239_v51 }
  0x6b   :  { %v393_v59 = vcombine.high %v272_v52, %v272_v52  ;;  %v400_v60 = vrot.slane %v272_v52, %v12691_v46  ;;  %v337_v61 = vrot.slane %v239_v51, %v12691_v46  ;;  %v442_v62 = vcombine.high %v12693_v53, %v12693_v53 }
  0x6c   :  { %v295_v63 = vrot.slane %v281_v55, %v12691_v46  ;;  %v296_v0 = vcombine.high %v288_v56, %v288_v56  ;;  %v304_v2 = vrot.slane %v288_v56, %v12691_v46  ;;  %v392_v3 = vrot.slane %v385_v57, %v12691_v46 }
  0x6d   :  { %v407_v4 = vrot.slane %v393_v59, %v12691_v46  ;;  %v408_v5 = vcombine.high %v400_v60, %v400_v60  ;;  %v416_v6 = vrot.slane %v400_v60, %v12691_v46  ;;  %v344_v7 = vrot.slane %v330_v58, %v12691_v46 }
  0x6e   :  { %v297_v8 = vcombine.high %v295_v63, %v295_v63  ;;  %v311_v9 = vrot.slane %v295_v63, %v12691_v46  ;;  %v318_v10 = vrot.slane %v296_v0, %v12691_v46  ;;  %v345_v11 = vcombine.high %v337_v61, %v337_v61 }
  0x6f   :  { %v409_v12 = vcombine.high %v407_v4, %v407_v4  ;;  %v423_v13 = vrot.slane %v407_v4, %v12691_v46  ;;  %v430_v14 = vrot.slane %v408_v5, %v12691_v46  ;;  %v438_v15 = vcombine.high %v416_v6, %v416_v6 }
  0x70   :  { %v325_v16 = vrot.slane %v297_v8, %v12691_v46  ;;  %v511_v17 = vcombine.low %v304_v2, %v318_v10  ;;  %v10905_v18 = vcombine.high %v304_v2, %v318_v10  ;;  %v609_v19 = vcombine.low %v392_v3, %v416_v6 }
  0x71   :  { %v437_v20 = vrot.slane %v409_v12, %v12691_v46  ;;  %v439_v21 = vcombine.high %v423_v13, %v423_v13  ;;  %v440_v22 = vcombine.high %v430_v14, %v430_v14  ;;  %v610_v23 = vcombine.low %v430_v14, %v438_v15 }
  0x72   :  { %v513_v24 = vcombine.low %v311_v9, %v325_v16  ;;  %v10906_v25 = vcombine.high %v311_v9, %v325_v16  ;;  %v521_v26 = vrot.slane %v511_v17, %v12691_v46  ;;  %v528_v27 = vrot.slane %v10905_v18, %v12691_v46 }
  0x73   :  { %v611_v28 = vcombine.low %v440_v22, %v423_v13  ;;  %v612_v32 = vcombine.low %v437_v20, %v439_v21  ;;  %v619_v33 = vrot.slane %v609_v19, %v12691_v46  ;;  %v626_v34 = vrot.slane %v610_v23, %v12691_v46 }
  0x74   :  { %v535_v38 = vrot.slane %v513_v24, %v12691_v46  ;;  %v542_v39 = vrot.slane %v10906_v25, %v12691_v46  ;;  %v543_v40 = vcombine.low %v521_v26, %v528_v27  ;;  %v346_v41 = vcombine.high %v344_v7, %v344_v7 }
  0x75   :  { %v633_v42 = vrot.slane %v611_v28, %v12691_v46  ;;  %v640_v43 = vrot.slane %v612_v32, %v12691_v46  ;;  %v641_v44 = vcombine.low %v619_v33, %v626_v34  ;;  %v353_v45 = vrot.slane %v337_v61, %v12691_v46 }
  0x76   :  { %v544_v47 = vcombine.low %v535_v38, %v542_v39  ;;  %v551_v48 = vrot.slane %v543_v40, %v12691_v46  ;;  %v360_v49 = vrot.slane %v344_v7, %v12691_v46  ;;  %v367_v50 = vrot.slane %v345_v11, %v12691_v46 }
  0x77   :  { %v642_v51 = vcombine.low %v633_v42, %v640_v43  ;;  %v649_v52 = vrot.slane %v641_v44, %v12691_v46  ;;  %v374_v55 = vrot.slane %v346_v41, %v12691_v46  ;;  %v441_v56 = vcombine.high %v437_v20, %v437_v20 }
  0x78   :  { %v558_v57 = vrot.slane %v544_v47, %v12691_v46  ;;  %v560_v58 = vcombine.low %v353_v45, %v367_v50  ;;  %v10907_v59 = vcombine.high %v353_v45, %v367_v50  ;;  %v449_v60 = vrot.slane %v12693_v53, %v12691_v46  ;;  %v12773_v45 = vld [vmem:[%s15139_s4] ss:$0 sm:$0xff] }
  0x79   :  { %v656_v61 = vrot.slane %v642_v51, %v12691_v46  ;;  %v562_v63 = vcombine.low %v360_v49, %v374_v55  ;;  %v10908_v0 = vcombine.high %v360_v49, %v374_v55  ;;  %v456_v2 = vrot.slane %v442_v62, %v12691_v46 }
  0x7a   :  { %v559_v3 = vcombine.low %v551_v48, %v558_v57  ;;  %v570_v4 = vrot.slane %v560_v58, %v12691_v46  ;;  %v577_v5 = vrot.slane %v10907_v59, %v12691_v46  ;;  %v457_v6 = vcombine.high %v449_v60, %v449_v60 }
  0x7b   :  { %v657_v7 = vcombine.low %v649_v52, %v656_v61  ;;  %v584_v8 = vrot.slane %v562_v63, %v12691_v46  ;;  %v591_v9 = vrot.slane %v10908_v0, %v12691_v46  ;;  %v458_v10 = vcombine.high %v456_v2, %v456_v2 }
  0x7c   :  { %11482 = vmatmul.mubr.msk.f32.vlgmr.msra.gmra.mxu0 %vm42_vm0, %v559_v3  ;;  %v592_v53 = vcombine.low %v570_v4, %v577_v5  ;;  %v465_v11 = vrot.slane %v449_v60, %v12691_v46  ;;  %v472_v12 = vrot.slane %v456_v2, %v12691_v46  ;;  %v479_v62 = vrot.slane %v457_v6, %v12691_v46 }
  0x7d   :  { %11488 = vmatmul.mubr.msk.f32.vlgmr.msra.gmra.mxu1 %vm42_vm0, %v657_v7  ;;  %11484 = vmatprep.mubr.msk.f32.mxu0 %vm12427_vm2, %v12426_v1  ;;  %v593_v13 = vcombine.low %v584_v8, %v591_v9  ;;  %v486_v14 = vrot.slane %v458_v10, %v12691_v46  ;;  %v497_v15 = vrot.slane %v12695_v54, %v12691_v46 }
  0x7e   :  { %v600_v16 = vrot.slane %v592_v53, %v12691_v46  ;;  %11490 = vmatprep.mubr.msk.f32.mxu1 %vm12427_vm2, %v12426_v1  ;;  %v487_v17 = vcombine.high %v465_v11, %v465_v11  ;;  %v488_v18 = vcombine.high %v472_v12, %v472_v12  ;;  %v489_v19 = vcombine.high %v479_v62, %v479_v62 }
  0x7f   :  { %v607_v20 = vrot.slane %v593_v13, %v12691_v46  ;;  %v658_v21 = vcombine.low %v441_v56, %v465_v11  ;;  %v490_v22 = vcombine.high %v486_v14, %v486_v14  ;;  %v504_v23 = vrot.slane %v497_v15, %v12691_v46 }
  0x80   :  { %v659_v24 = vcombine.low %v479_v62, %v487_v17  ;;  %v660_v25 = vcombine.low %v489_v19, %v472_v12  ;;  %v661_v26 = vcombine.low %v486_v14, %v488_v18 }
  0x81   :  { %v608_v27 = vcombine.low %v600_v16, %v607_v20  ;;  %v668_v54 = vrot.slane %v658_v21, %v12691_v46  ;;  %v707_v34 = vcombine.low %v490_v22, %v504_v23 }
  0x82   :  { %v675_v28 = vrot.slane %v659_v24, %v12691_v46  ;;  %v682_v32 = vrot.slane %v660_v25, %v12691_v46  ;;  %v689_v33 = vrot.slane %v661_v26, %v12691_v46 }
  0x83   :  { %11485 = vmatmul.mubr.msk.f32.gmra.mxu0 %vm42_vm0, %v608_v27  ;;  %v714_v42 = vrot.slane %v707_v34, %v12691_v46 }
  0x84   :  { %v690_v38 = vcombine.low %v668_v54, %v675_v28  ;;  %v691_v39 = vcombine.low %v682_v32, %v689_v33  ;;  %11532 = vmatprep.mubr.msk.f32.mxu0 %vm12427_vm2, %v12426_v1 }
  0x85   :  { %v721_v44 = vrot.slane %v714_v42, %v12691_v46 }
  0x86   :  { %v698_v40 = vrot.slane %v690_v38, %v12691_v46  ;;  %v705_v41 = vrot.slane %v691_v39, %v12691_v46 }
  0x88   :  { %v706_v43 = vcombine.low %v698_v40, %v705_v41 }
  0x8a   :  { %11491 = vmatmul.mubr.msk.f32.gmra.mxu1 %vm42_vm0, %v706_v43 }
  0x8b   :  { %11493 = vmatprep.mubr.msk.f32.mxu1 %vm12427_vm2, %v12426_v1 }
  0x8e   :  { %11494 = vmatmul.mubr.msk.f32.gmra.mxu1 %vm42_vm0, %v721_v44 }
  0x8f   :  { %11502 = vmatprep.mubr.msk.f32.mxu1 %vm12427_vm2, %v12426_v1 }
 0x13c   :  { %v798_v47 = vpop.f32.mrf.mxu0 }
 0x13d   :  { %v799_v48 = vadd.f32 %v12773_v45, %v798_v47  ;;  %v808_v49 = vpop.f32.mrf.mxu1 }
 0x13e   :  { %v11483_v50 = vpop.f32.mrf.mxu0  ;;  %v809_v51 = vadd.f32 %v12773_v45, %v808_v49 }
 0x13f   :  { %v827_v52 = vcombine.high %v799_v48, %v799_v48  ;;  %v834_v55 = vrot.slane %v799_v48, %v12691_v46  ;;  %v11489_v56 = vpop.f32.mrf.mxu1 }
 0x140   :  { %v925_v57 = vcombine.high %v809_v51, %v809_v51  ;;  %v932_v58 = vrot.slane %v809_v51, %v12691_v46 }
 0x141   :  { %v841_v59 = vrot.slane %v827_v52, %v12691_v46  ;;  %v842_v60 = vcombine.high %v834_v55, %v834_v55  ;;  %v850_v3 = vrot.slane %v834_v55, %v12691_v46 }
 0x142   :  { %v939_v61 = vrot.slane %v925_v57, %v12691_v46  ;;  %v940_v63 = vcombine.high %v932_v58, %v932_v58  ;;  %v948_v0 = vrot.slane %v932_v58, %v12691_v46 }
 0x143   :  { %v843_v2 = vcombine.high %v841_v59, %v841_v59  ;;  %v857_v4 = vrot.slane %v841_v59, %v12691_v46  ;;  %v864_v5 = vrot.slane %v842_v60, %v12691_v46  ;;  %v803_v6 = vpop.f32.mrf.mxu0 }
 0x144   :  { %v941_v7 = vcombine.high %v939_v61, %v939_v61  ;;  %v955_v8 = vrot.slane %v939_v61, %v12691_v46  ;;  %v962_v9 = vrot.slane %v940_v63, %v12691_v46  ;;  %v970_v10 = vcombine.high %v948_v0, %v948_v0 }
 0x145   :  { %v871_v53 = vrot.slane %v843_v2, %v12691_v46  ;;  %v1045_v11 = vcombine.low %v850_v3, %v864_v5  ;;  %v10914_v12 = vcombine.high %v850_v3, %v864_v5  ;;  %v1149_v62 = vrot.slane %v948_v0, %v12691_v46  ;;  %v11486_v13 = vpop.f32.mrf.mxu0 }
 0x146   :  { %v971_v14 = vcombine.high %v955_v8, %v955_v8  ;;  %v972_v15 = vcombine.high %v962_v9, %v962_v9  ;;  %v969_v20 = vrot.slane %v941_v7, %v12691_v46  ;;  %v12795_v22 = vcombine.low %v962_v9, %v970_v10 }
 0x147   :  { %v1047_v16 = vcombine.low %v857_v4, %v871_v53  ;;  %v10915_v17 = vcombine.high %v857_v4, %v871_v53  ;;  %v1055_v18 = vrot.slane %v1045_v11, %v12691_v46  ;;  %v1062_v19 = vrot.slane %v10914_v12, %v12691_v46 }
 0x148   :  { %v12793_v21 = vrot.slane %v1149_v62, %v12691_v46  ;;  %v12797_v23 = vcombine.low %v972_v15, %v955_v8  ;;  %v804_v27 = vadd.f32 %v12773_v45, %v803_v6  ;;  %v1258_v54 = vcombine.low %v969_v20, %v971_v14 }
 0x149   :  { %v1069_v24 = vrot.slane %v1047_v16, %v12691_v46  ;;  %v1076_v25 = vrot.slane %v10915_v17, %v12691_v46  ;;  %v1077_v26 = vcombine.low %v1055_v18, %v1062_v19  ;;  %v1266_v38 = vrot.slane %v12795_v22, %v12691_v46 }
 0x14a   :  { %v813_v28 = vpop.f32.mrf.mxu1  ;;  %1161 = vrot.lane.b32.xlu0 %v12793_v21, %s12429_s20  ;;  %v876_v33 = vcombine.high %v804_v27, %v804_v27  ;;  %v883_v34 = vrot.slane %v804_v27, %v12691_v46  ;;  %v1273_v39 = vrot.slane %v12797_v23, %v12691_v46  ;;  %v973_v48 = vcombine.high %v969_v20, %v969_v20 }
 0x14b   :  { %v1078_v32 = vcombine.low %v1069_v24, %v1076_v25  ;;  %v814_v40 = vadd.f32 %v12773_v45, %v813_v28  ;;  %v1085_v42 = vrot.slane %v1077_v26, %v12691_v46  ;;  %v1280_v51 = vrot.slane %v1258_v54, %v12691_v46 }
 0x14c   :  { %v11492_v41 = vpop.f32.mrf.mxu1  ;;  %v890_v44 = vrot.slane %v876_v33, %v12691_v46  ;;  %v891_v47 = vcombine.high %v883_v34, %v883_v34  ;;  %v899_v57 = vrot.slane %v883_v34, %v12691_v46  ;;  %v1288_v27 = vcombine.low %v1266_v38, %v1273_v39 }
 0x14d   :  { %v1092_v43 = vrot.slane %v1078_v32, %v12691_v46  ;;  %v974_v49 = vcombine.high %v814_v40, %v814_v40  ;;  %v981_v50 = vrot.slane %v814_v40, %v12691_v46 }
 0x14e   :  { %v818_v52 = vpop.f32.mrf.mxu1  ;;  %v892_v56 = vcombine.high %v890_v44, %v890_v44  ;;  %v913_v58 = vrot.slane %v891_v47, %v12691_v46  ;;  %v906_v59 = vrot.slane %v890_v44, %v12691_v46  ;;  %v1296_v38 = vrot.slane %v1288_v27, %v12691_v46 }
 0x14f   :  { %v12815_v55 = vcombine.low %v1085_v42, %v1092_v43  ;;  %v988_v60 = vrot.slane %v974_v49, %v12691_v46  ;;  %v989_v61 = vcombine.high %v981_v50, %v981_v50  ;;  %v997_v63 = vrot.slane %v981_v50, %v12691_v46 }
 0x150   :  { %v11495_v0 = vpop.f32.mrf.mxu1  ;;  %v920_v2 = vrot.slane %v892_v56, %v12691_v46  ;;  %v1094_v3 = vcombine.low %v899_v57, %v913_v58  ;;  %v10916_v4 = vcombine.high %v899_v57, %v913_v58  ;;  %v819_v5 = vadd.f32 %v12773_v45, %v818_v52 }
 0x151   :  { %1157 = vrot.lane.b32.xlu1 %v12815_v55, %s12429_s20  ;;  %v990_v6 = vcombine.high %v988_v60, %v988_v60  ;;  %v1004_v7 = vrot.slane %v988_v60, %v12691_v46  ;;  %v1011_v8 = vrot.slane %v989_v61, %v12691_v46  ;;  %v1019_v9 = vcombine.high %v997_v63, %v997_v63 }
 0x152   :  { %v1096_v10 = vcombine.low %v906_v59, %v920_v2  ;;  %v10917_v53 = vcombine.high %v906_v59, %v920_v2  ;;  %v1104_v11 = vrot.slane %v1094_v3, %v12691_v46  ;;  %v1111_v12 = vrot.slane %v10916_v4, %v12691_v46 }
 0x153   :  { %v1018_v62 = vrot.slane %v990_v6, %v12691_v46  ;;  %v1020_v13 = vcombine.high %v1004_v7, %v1004_v7  ;;  %v1021_v14 = vcombine.high %v1011_v8, %v1011_v8  ;;  %v1259_v45 = vcombine.low %v973_v48, %v997_v63 }
 0x154   :  { %v1118_v15 = vrot.slane %v1096_v10, %v12691_v46  ;;  %v1125_v16 = vrot.slane %v10917_v53, %v12691_v46  ;;  %v1126_v17 = vcombine.low %v1104_v11, %v1111_v12  ;;  %v1305_v18 = vcombine.low %v1011_v8, %v1019_v9 }
 0x155   :  { %v1287_v19 = vrot.slane %v1259_v45, %v12691_v46  ;;  %v1306_v20 = vcombine.low %v1021_v14, %v1004_v7  ;;  %v1307_v22 = vcombine.low %v1018_v62, %v1020_v13  ;;  %v1022_v25 = vcombine.high %v1018_v62, %v1018_v62 }
 0x156   :  { %v1127_v23 = vcombine.low %v1118_v15, %v1125_v16  ;;  %v1315_v24 = vrot.slane %v1305_v18, %v12691_v46  ;;  %v1029_v26 = vrot.slane %v819_v5, %v12691_v46  ;;  %v1134_v54 = vrot.slane %v1126_v17, %v12691_v46 }
 0x157   :  { %v1322_v28 = vrot.slane %v1306_v20, %v12691_v46  ;;  %v1289_v33 = vcombine.low %v1280_v51, %v1287_v19  ;;  %v1329_v41 = vrot.slane %v1307_v22, %v12691_v46 }
 0x158   :  { %v1141_v32 = vrot.slane %v1127_v23, %v12691_v46  ;;  %v1030_v34 = vcombine.high %v1029_v26, %v1029_v26  ;;  %v1037_v40 = vrot.slane %v1029_v26, %v12691_v46 }
 0x159   :  { %v1337_v43 = vcombine.low %v1315_v24, %v1322_v28  ;;  %v1303_v39 = vrot.slane %v1289_v33, %v12691_v46 }
 0x15a   :  { %v12841_v42 = vcombine.low %v1134_v54, %v1141_v32  ;;  %v1044_v44 = vrot.slane %v1030_v34, %v12691_v46  ;;  %v1308_v47 = vcombine.low %v1022_v25, %v1037_v40 }
 0x15b   :  { %v1345_v50 = vrot.slane %v1337_v43, %v12691_v46  ;;  %v12854_v56 = vcombine.low %v1296_v38, %v1303_v39 }
 0x15c   :  { %v1336_v48 = vrot.slane %v1308_v47, %v12691_v46  ;;  %v1360_v49 = vrot.slane %v1044_v44, %v12691_v46  ;;  %1159 = vrot.lane.b32.xlu0 %v12841_v42, %s12429_s20 }
 0x15e   :  { %v1338_v51 = vcombine.low %v1329_v41, %v1336_v48  ;;  %v12852_v52 = vrot.slane %v1360_v49, %v12691_v46 }
 0x160   :  { %v1352_v57 = vrot.slane %v1338_v51, %v12691_v46  ;;  %1372 = vrot.lane.b32.xlu1 %v12852_v52, %s12429_s20 }
 0x162   :  { %v12859_v58 = vcombine.low %v1345_v50, %v1352_v57 }
 0x164   :  { %1368 = vrot.lane.b32.xlu1 %v12854_v56, %s12429_s20  ;;  %1370 = vrot.lane.b32.xlu0 %v12859_v58, %s12429_s20 }
 0x168   :  { %1544 = vrot.lane.b32.xlu1 %v12793_v21, %s12430_s24  ;;  %1542 = vrot.lane.b32.xlu0 %v12841_v42, %s12430_s24 }
 0x16c   :  { %1540 = vrot.lane.b32.xlu1 %v12815_v55, %s12430_s24  ;;  %1644 = vrot.lane.b32.xlu0 %v12852_v52, %s12430_s24 }
 0x170   :  { %1749 = vrot.lane.b32.xlu1 %v12793_v21, %s12431_s0  ;;  %1747 = vrot.lane.b32.xlu0 %v12841_v42, %s12431_s0 }
 0x174   :  { %1640 = vrot.lane.b32.xlu1 %v12854_v56, %s12430_s24 }
 0x178   :  { %1642 = vrot.lane.b32.xlu1 %v12859_v58, %s12430_s24 }
 0x1bc   :  { %v1162_v59 = vpop.permute.xlu0 %1161 }
 0x1bd   :  { %11497 = vmatpush3.xpose.msk.msra.mxu1 %vm1163_vm3, %v1162_v59 }
 0x1be   :  { %11498 = vmatprep.subr.mxu1 %v12426_v1 }
 0x1c3   :  { %v1158_v60 = vpop.permute.xlu1 %1157 }
 0x1ce   :  { %v1160_v61 = vpop.permute.xlu0 %1159 }
 0x1cf   :  { %11499 = vmatpush3.xpose.msk.msra.mxu1 %vm1163_vm3, %v1160_v61 }
 0x1d0   :  { %11500 = vmatprep.subr.mxu1 %v12426_v1 }
 0x1d2   :  { %v1373_v63 = vpop.permute.xlu1 %1372 }
 0x1d3   :  { %11501 = vmatpush3.xpose.msk.msra.mxu1 %vm1163_vm3, %v1158_v60 }
 0x1d4   :  { %11511 = vmatprep.subr.mxu1 %v12426_v1 }
 0x1d6   :  { %v1369_v0 = vpop.permute.xlu1 %1368  ;;  %v1371_v2 = vpop.permute.xlu0 %1370  ;;  %11503 = vmatmul.mubr.msk.f32.vlgmr.msra.gmra.mxu1 %vm1163_vm3, %v12815_v55 }
 0x1d7   :  { %11512 = vmatpush3.xpose.msk.msra.mxu1 %vm1163_vm3, %v1373_v63  ;;  %11505 = vmatprep.mubr.msk.f32.mxu1 %vm12427_vm2, %v12426_v1 }
 0x1d8   :  { %11513 = vmatprep.subr.mxu1 %v12426_v1 }
 0x1da   :  { %v1545_v3 = vpop.permute.xlu1 %1544  ;;  %11506 = vmatmul.mubr.msk.f32.gmra.mxu1 %vm1163_vm3, %v12841_v42  ;;  %v1543_v4 = vpop.permute.xlu0 %1542 }
 0x1db   :  { %11527 = vmatpush3.msk.msra.mxu0 %vm1557_vm4, %v1545_v3  ;;  %11514 = vmatpush3.xpose.msk.msra.mxu1 %vm1163_vm3, %v1371_v2 }
 0x1dc   :  { %11528 = vmatprep.subr.mxu0 %v12426_v1  ;;  %11508 = vmatprep.mubr.msk.f32.mxu1 %vm12427_vm2, %v12426_v1 }
 0x1dd   :  { %11529 = vmatpush3.msra.mxu0 %v1543_v4  ;;  %11515 = vmatprep.subr.mxu1 %v12426_v1 }
 0x1de   :  { %v1541_v5 = vpop.permute.xlu1 %1540  ;;  %11530 = vmatprep.subr.mxu0 %v12426_v1  ;;  %11509 = vmatmul.mubr.msk.f32.gmra.mxu1 %vm1163_vm3, %v12793_v21  ;;  %v1645_v6 = vpop.permute.xlu0 %1644 }
 0x1df   :  { %11531 = vmatpush3.msra.mxu0 %v1541_v5  ;;  %11516 = vmatpush3.xpose.msk.msra.mxu1 %vm1163_vm3, %v1369_v0 }
 0x1e0   :  { %11517 = vmatprep.mubr.msk.f32.mxu1 %vm12427_vm2, %v12426_v1  ;;  %11541 = vmatprep.subr.mxu1 %v12426_v1 }
 0x1e1   :  { %11556 = vmatprep.subr.mxu0 %v12426_v1 }
 0x1e2   :  { %v12909_v7 = vpop.permute.xlu1 %1749  ;;  %11518 = vmatmul.mubr.msk.f32.vlgmr.msra.gmra.mxu1 %vm1163_vm3, %v12854_v56  ;;  %v12937_v34 = vpop.permute.xlu0 %1747 }
 0x1e3   :  { %11542 = vmatpush3.msk.msra.mxu1 %vm1557_vm4, %v1645_v6  ;;  %11520 = vmatprep.mubr.msk.f32.mxu1 %vm12427_vm2, %v12426_v1 }
 0x1e4   :  { %11543 = vmatprep.subr.mxu1 %v12426_v1 }
 0x1e6   :  { %v1641_v8 = vpop.permute.xlu1 %1640  ;;  %11521 = vmatmul.mubr.msk.f32.gmra.mxu1 %vm1163_vm3, %v12859_v58 }
 0x1e7   :  { %11523 = vmatprep.mubr.msk.f32.mxu1 %vm12427_vm2, %v12426_v1 }
 0x1ea   :  { %v1643_v9 = vpop.permute.xlu1 %1642  ;;  %11524 = vmatmul.mubr.msk.f32.gmra.mxu1 %vm1163_vm3, %v12852_v52 }
 0x1eb   :  { %11544 = vmatpush3.msra.mxu1 %v1643_v9  ;;  %11547 = vmatprep.mubr.msk.f32.mxu1 %vm12427_vm2, %v12426_v1 }
 0x1ec   :  { %11545 = vmatprep.subr.mxu1 %v12426_v1 }
 0x1ed   :  { %11546 = vmatpush3.msra.mxu1 %v1641_v8 }
 0x1ee   :  { %11571 = vmatprep.subr.mxu1 %v12426_v1 }
 0x296   :  { %v1242_v10 = vpop.f32.mrf.mxu1 }
 0x297   :  { %v1466_v53 = vmul.f32 0.35355338, %v1242_v10 }
 0x298   :  { %v11504_v11 = vpop.f32.mrf.mxu1 }
 0x299   :  { %v1473_v12 = vsel %vm1472_vm5, %v1466_v53, -inf }
 0x29a   :  { %1474 = vmax.xlane.f32.xlu0 %v1473_v12  ;;  %v1247_v62 = vpop.f32.mrf.mxu1 }
 0x29b   :  { %v1467_v13 = vmul.f32 0.35355338, %v1247_v62 }
 0x29c   :  { %v11507_v14 = vpop.f32.mrf.mxu1 }
 0x29d   :  { %v1476_v45 = vsel %vm1472_vm5, %v1467_v13, -inf }
 0x29e   :  { %1477 = vmax.xlane.f32.xlu1 %v1476_v45  ;;  %v1252_v15 = vpop.f32.mrf.mxu1 }
 0x29f   :  { %v1468_v16 = vmul.f32 0.35355338, %v1252_v15 }
 0x2a0   :  { %v11510_v17 = vpop.f32.mrf.mxu1 }
 0x2a1   :  { %v1480_v18 = vsel %vm1479_vm6, %v1468_v16, -inf }
 0x2a2   :  { %1481 = vmax.xlane.f32.xlu0 %v1480_v18  ;;  %v1452_v19 = vpop.f32.mrf.mxu1 }
 0x2a3   :  { %v1469_v20 = vmul.f32 0.35355338, %v1452_v19 }
 0x2a4   :  { %v11519_v22 = vpop.f32.mrf.mxu1 }
 0x2a5   :  { %v1483_v23 = vsel %vm1472_vm5, %v1469_v20, -inf }
 0x2a6   :  { %1484 = vmax.xlane.f32.xlu0 %v1483_v23  ;;  %v1457_v24 = vpop.f32.mrf.mxu1 }
 0x2a7   :  { %v1470_v25 = vmul.f32 0.35355338, %v1457_v24 }
 0x2a8   :  { %v11522_v26 = vpop.f32.mrf.mxu1 }
 0x2a9   :  { %v1486_v27 = vsel %vm1472_vm5, %v1470_v25, -inf }
 0x2aa   :  { %1487 = vmax.xlane.f32.xlu1 %v1486_v27  ;;  %v1462_v54 = vpop.f32.mrf.mxu1 }
 0x2ab   :  { %v1471_v28 = vmul.f32 0.35355338, %v1462_v54 }
 0x2ac   :  { %v11525_v32 = vpop.f32.mrf.mxu1 }
 0x2ad   :  { %v1489_v33 = vsel %vm1479_vm6, %v1471_v28, -inf }
 0x2ae   :  { %1490 = vmax.xlane.f32.xlu0 %v1489_v33 }
 0x2bb   :  { %1853 = vrot.lane.b32.xlu1 %v12852_v52, %s12431_s0 }
 0x2c4   :  { %1745 = vrot.lane.b32.xlu0 %v12815_v55, %s12431_s0 }
 0x323   :  { %v1475_v40 = vpop.xlane.xlu0 %1474 }
 0x324   :  { %v1492_v41 = vsub.f32 %v1466_v53, %v1475_v40 }
 0x326   :  { %v1498_v43 = vmul.f32 1.442695, %v1492_v41 }
 0x327   :  { %v1478_v44 = vpop.xlane.xlu1 %1477 }
 0x328   :  { %12203 = vpow2.f32 %v1498_v43  ;;  %v1493_v47 = vsub.f32 %v1467_v13, %v1478_v44 }
 0x32a   :  { %v1500_v38 = vmul.f32 1.442695, %v1493_v47 }
 0x32b   :  { %v1482_v39 = vpop.xlane.xlu0 %1481 }
 0x32c   :  { %12205 = vpow2.f32 %v1500_v38  ;;  %v1494_v48 = vsub.f32 %v1468_v16, %v1482_v39 }
 0x32e   :  { %v1502_v49 = vmul.f32 1.442695, %v1494_v48 }
 0x32f   :  { %v1485_v50 = vpop.xlane.xlu0 %1484 }
 0x330   :  { %12207 = vpow2.f32 %v1502_v49  ;;  %v1495_v51 = vsub.f32 %v1469_v20, %v1485_v50 }
 0x332   :  { %v1504_v57 = vmul.f32 1.442695, %v1495_v51 }
 0x333   :  { %v1488_v5 = vpop.xlane.xlu1 %1487 }
 0x334   :  { %12209 = vpow2.f32 %v1504_v57  ;;  %v1496_v6 = vsub.f32 %v1470_v25, %v1488_v5 }
 0x335   :  { %v12204_v59 = vpop.eup %12203 }
 0x336   :  { %v1510_v60 = vsel %vm1472_vm5, %v12204_v59, 0.0  ;;  %v1506_v9 = vmul.f32 1.442695, %v1496_v6 }
 0x337   :  { %1511 = vadd.xlane.f32.xlu1 %v1510_v60  ;;  %v1491_v8 = vpop.xlane.xlu0 %1490  ;;  %v1854_v14 = vpop.permute.xlu1 %1853 }
 0x338   :  { %v1497_v10 = vsub.f32 %v1471_v28, %v1491_v8  ;;  %12211 = vpow2.f32 %v1506_v9 }
 0x339   :  { %v12206_v61 = vpop.eup %12205 }
 0x33a   :  { %v1513_v63 = vsel %vm1472_vm5, %v12206_v61, 0.0  ;;  %v1508_v53 = vmul.f32 1.442695, %v1497_v10 }
 0x33b   :  { %1514 = vadd.xlane.f32.xlu0 %v1513_v63  ;;  %v1746_v45 = vpop.permute.xlu0 %1745 }
 0x33c   :  { %12213 = vpow2.f32 %v1508_v53 }
 0x33d   :  { %v12208_v0 = vpop.eup %12207 }
 0x33e   :  { %v1516_v2 = vsel %vm1479_vm6, %v12208_v0, 0.0 }
 0x33f   :  { %1517 = vadd.xlane.f32.xlu1 %v1516_v2 }
 0x341   :  { %v12942_v3 = vpop.eup %12209 }
 0x342   :  { %v1519_v4 = vsel %vm1472_vm5, %v12942_v3, 0.0 }
 0x343   :  { %1520 = vadd.xlane.f32.xlu0 %v1519_v4 }
 0x345   :  { %v12950_v11 = vpop.eup %12211 }
 0x346   :  { %v1522_v12 = vsel %vm1472_vm5, %v12950_v11, 0.0 }
 0x349   :  { %v12954_v62 = vpop.eup %12213 }
 0x34a   :  { %v1525_v13 = vsel %vm1479_vm6, %v12954_v62, 0.0 }
 0x350   :  { %1851 = vrot.lane.b32.xlu1 %v12859_v58, %s12431_s0 }
 0x359   :  { %1739 = vrot.lane.b32.xlu0 %v12815_v55, %s12432_s22 }
 0x374   :  { %1523 = vadd.xlane.f32.xlu1 %v1522_v12 }
 0x378   :  { %1526 = vadd.xlane.f32.xlu0 %v1525_v13 }
 0x385   :  { %1849 = vrot.lane.b32.xlu1 %v12854_v56, %s12431_s0 }
 0x389   :  { %1843 = vrot.lane.b32.xlu1 %v12854_v56, %s12432_s22 }
 0x38d   :  { %1847 = vrot.lane.b32.xlu1 %v12852_v52, %s12432_s22 }
 0x38e   :  { %1741 = vrot.lane.b32.xlu0 %v12841_v42, %s12432_s22 }
 0x391   :  { %2023 = vrot.lane.b32.xlu1 %v12793_v21, %s12433_s21 }
 0x392   :  { %1743 = vrot.lane.b32.xlu0 %v12793_v21, %s12432_s22 }
 0x395   :  { %2019 = vrot.lane.b32.xlu1 %v12815_v55, %s12433_s21 }
 0x396   :  { %1845 = vrot.lane.b32.xlu0 %v12859_v58, %s12432_s22 }
 0x399   :  { %2227 = vrot.lane.b32.xlu1 %v12793_v21, %s12434_s16 }
 0x39a   :  { %2021 = vrot.lane.b32.xlu0 %v12841_v42, %s12433_s21 }
 0x39d   :  { %2120 = vrot.lane.b32.xlu1 %v12859_v58, %s12433_s21 }
 0x39e   :  { %2122 = vrot.lane.b32.xlu0 %v12852_v52, %s12433_s21 }
 0x3a1   :  { %2118 = vrot.lane.b32.xlu1 %v12854_v56, %s12433_s21 }
 0x3a2   :  { %2225 = vrot.lane.b32.xlu0 %v12841_v42, %s12434_s16 }
 0x3c0   :  { %v1512_v15 = vpop.xlane.xlu1 %1511 }
 0x3c1   :  { %12215 = vrcp.f32 %v1512_v15 }
 0x3c4   :  { %v1515_v16 = vpop.xlane.xlu0 %1514 }
 0x3c5   :  { %12217 = vrcp.f32 %v1515_v16 }
 0x3c8   :  { %v1518_v17 = vpop.xlane.xlu1 %1517 }
 0x3c9   :  { %12219 = vrcp.f32 %v1518_v17 }
 0x3cc   :  { %v1521_v18 = vpop.xlane.xlu0 %1520  ;;  %v1852_v54 = vpop.permute.xlu1 %1851 }
 0x3cd   :  { %12221 = vrcp.f32 %v1521_v18 }
 0x3ce   :  { %v12216_v19 = vpop.eup %12215 }
 0x3cf   :  { %v1534_v20 = vmul.f32 %v12216_v19, %v12204_v59 }
 0x3d0   :  { %v1740_v27 = vpop.permute.xlu0 %1739 }
 0x3d1   :  { %11533 = vmatmul.mubr.msk.f32.vlgmr.msra.gmra.mxu0 %vm1472_vm5, %v1534_v20 }
 0x3d2   :  { %v12218_v22 = vpop.eup %12217  ;;  %11557 = vmatpush3.xpose.msk.msra.mxu0 %vm1163_vm3, %v12909_v7  ;;  %11535 = vmatprep.mubr.msk.f32.mxu0 %vm12427_vm2, %v12426_v1 }
 0x3d3   :  { %11558 = vmatprep.subr.mxu0 %v12426_v1  ;;  %v1535_v23 = vmul.f32 %v12218_v22, %v12206_v61 }
 0x3d5   :  { %11536 = vmatmul.mubr.msk.f32.gmra.mxu0 %vm1472_vm5, %v1535_v23 }
 0x3d6   :  { %v12220_v24 = vpop.eup %12219  ;;  %11559 = vmatpush3.xpose.msk.msra.mxu0 %vm1163_vm3, %v12937_v34  ;;  %11538 = vmatprep.mubr.msk.f32.mxu0 %vm12427_vm2, %v12426_v1 }
 0x3d7   :  { %11560 = vmatprep.subr.mxu0 %v12426_v1  ;;  %v1536_v25 = vmul.f32 %v12220_v24, %v12208_v0 }
 0x3d9   :  { %11539 = vmatmul.mubr.msk.f32.gmra.mxu0 %vm1472_vm5, %v1536_v25 }
 0x3da   :  { %v12222_v7 = vpop.eup %12221  ;;  %11561 = vmatpush3.xpose.msk.msra.mxu0 %vm1163_vm3, %v1746_v45  ;;  %11562 = vmatprep.mubr.msk.f32.mxu0 %vm12427_vm2, %v12426_v1 }
 0x3db   :  { %v1537_v26 = vmul.f32 %v12222_v7, %v12942_v3  ;;  %11586 = vmatprep.subr.mxu0 %v12426_v1 }
 0x3dd   :  { %11548 = vmatmul.mubr.msk.f32.vlgmr.msra.gmra.mxu1 %vm1472_vm5, %v1537_v26  ;;  %11563 = vmatmul.mubr.msk.f32.vlgmr.msra.gmra.mxu0 %vm1163_vm3, %v1740_v27 }
 0x3de   :  { %11572 = vmatpush3.xpose.msk.msra.mxu1 %vm1163_vm3, %v1854_v14  ;;  %11565 = vmatprep.mubr.msk.f32.mxu0 %vm12427_vm2, %v12426_v1 }
 0x3df   :  { %11573 = vmatprep.subr.mxu1 %v12426_v1  ;;  %11550 = vmatprep.mubr.msk.f32.mxu1 %vm12427_vm2, %v12426_v1 }
 0x3e2   :  { %11574 = vmatpush3.xpose.msk.msra.mxu1 %vm1163_vm3, %v1852_v54 }
 0x3e3   :  { %11575 = vmatprep.subr.mxu1 %v12426_v1 }
 0x3fd   :  { %v1524_v28 = vpop.xlane.xlu1 %1523 }
 0x3fe   :  { %12223 = vrcp.f32 %v1524_v28 }
 0x401   :  { %v1850_v32 = vpop.permute.xlu1 %1849  ;;  %v1527_v33 = vpop.xlane.xlu0 %1526 }
 0x402   :  { %12225 = vrcp.f32 %v1527_v33  ;;  %11576 = vmatpush3.xpose.msk.msra.mxu1 %vm1163_vm3, %v1850_v32 }
 0x403   :  { %11601 = vmatprep.subr.mxu1 %v12426_v1 }
 0x405   :  { %v1844_v34 = vpop.permute.xlu1 %1843  ;;  %v1742_v40 = vpop.permute.xlu0 %1741 }
 0x406   :  { %11566 = vmatmul.mubr.msk.f32.gmra.mxu0 %vm1163_vm3, %v1742_v40 }
 0x407   :  { %11568 = vmatprep.mubr.msk.f32.mxu0 %vm12427_vm2, %v12426_v1 }
 0x409   :  { %v1848_v41 = vpop.permute.xlu1 %1847  ;;  %v1744_v43 = vpop.permute.xlu0 %1743 }
 0x40a   :  { %11569 = vmatmul.mubr.msk.f32.gmra.mxu0 %vm1163_vm3, %v1744_v43 }
 0x40b   :  { %v12224_v44 = vpop.eup %12223  ;;  %11592 = vmatprep.mubr.msk.f32.mxu0 %vm12427_vm2, %v12426_v1 }
 0x40c   :  { %v1538_v47 = vmul.f32 %v12224_v44, %v12950_v11 }
 0x40d   :  { %v2024_v38 = vpop.permute.xlu1 %2023  ;;  %v1846_v39 = vpop.permute.xlu0 %1845 }
 0x40e   :  { %11551 = vmatmul.mubr.msk.f32.gmra.mxu1 %vm1472_vm5, %v1538_v47  ;;  %11587 = vmatpush3.msk.msra.mxu0 %vm1557_vm4, %v2024_v38 }
 0x40f   :  { %v12226_v48 = vpop.eup %12225  ;;  %11553 = vmatprep.mubr.msk.f32.mxu1 %vm12427_vm2, %v12426_v1  ;;  %11588 = vmatprep.subr.mxu0 %v12426_v1 }
 0x410   :  { %v1539_v49 = vmul.f32 %v12226_v48, %v12954_v62 }
 0x411   :  { %v2020_v50 = vpop.permute.xlu1 %2019  ;;  %v2022_v51 = vpop.permute.xlu0 %2021 }
 0x412   :  { %11554 = vmatmul.mubr.msk.f32.gmra.mxu1 %vm1472_vm5, %v1539_v49  ;;  %11589 = vmatpush3.msra.mxu0 %v2022_v51 }
 0x413   :  { %11590 = vmatprep.subr.mxu0 %v12426_v1  ;;  %11577 = vmatprep.mubr.msk.f32.mxu1 %vm12427_vm2, %v12426_v1 }
 0x414   :  { %11591 = vmatpush3.msra.mxu0 %v2020_v50 }
 0x415   :  { %v13033_v57 = vpop.permute.xlu1 %2227  ;;  %v2123_v59 = vpop.permute.xlu0 %2122  ;;  %11616 = vmatprep.subr.mxu0 %v12426_v1 }
 0x416   :  { %11578 = vmatmul.mubr.msk.f32.vlgmr.msra.gmra.mxu1 %vm1163_vm3, %v1844_v34 }
 0x417   :  { %11602 = vmatpush3.msk.msra.mxu1 %vm1557_vm4, %v2123_v59  ;;  %11580 = vmatprep.mubr.msk.f32.mxu1 %vm12427_vm2, %v12426_v1 }
 0x418   :  { %11603 = vmatprep.subr.mxu1 %v12426_v1 }
 0x419   :  { %v2121_v60 = vpop.permute.xlu1 %2120 }
 0x41a   :  { %11581 = vmatmul.mubr.msk.f32.gmra.mxu1 %vm1163_vm3, %v1846_v39 }
 0x41b   :  { %11604 = vmatpush3.msra.mxu1 %v2121_v60  ;;  %11583 = vmatprep.mubr.msk.f32.mxu1 %vm12427_vm2, %v12426_v1 }
 0x41c   :  { %11605 = vmatprep.subr.mxu1 %v12426_v1 }
 0x41d   :  { %v2119_v61 = vpop.permute.xlu1 %2118 }
 0x41e   :  { %11584 = vmatmul.mubr.msk.f32.gmra.mxu1 %vm1163_vm3, %v1848_v41  ;;  %v13071_v41 = vpop.permute.xlu0 %2225 }
 0x41f   :  { %11606 = vmatpush3.msra.mxu1 %v2119_v61  ;;  %11607 = vmatprep.mubr.msk.f32.mxu1 %vm12427_vm2, %v12426_v1 }
 0x420   :  { %11631 = vmatprep.subr.mxu1 %v12426_v1 }
 0x491   :  { %v13049_v63 = vpop.f32.mrf.mxu0 }
 0x493   :  { %v11534_v0 = vpop.f32.mrf.mxu0 }
 0x495   :  { %v13051_v2 = vpop.f32.mrf.mxu0 }
 0x497   :  { %v11537_v3 = vpop.f32.mrf.mxu0 }
 0x499   :  { %v13053_v4 = vpop.f32.mrf.mxu0 }
 0x49b   :  { %v11540_v5 = vpop.f32.mrf.mxu0 }
 0x49d   :  { %v13055_v6 = vpop.f32.mrf.mxu1  ;;  %v1829_v8 = vpop.f32.mrf.mxu0 }
 0x49e   :  { %v1947_v9 = vmul.f32 0.35355338, %v1829_v8 }
 0x49f   :  { %v11549_v10 = vpop.f32.mrf.mxu1  ;;  %v11564_v53 = vpop.f32.mrf.mxu0 }
 0x4a0   :  { %v1953_v11 = vsel %vm1472_vm5, %v1947_v9, -inf }
 0x4a1   :  { %1954 = vmax.xlane.f32.xlu0 %v1953_v11 }
 0x4c6   :  { %v1834_v12 = vpop.f32.mrf.mxu0 }
 0x4c7   :  { %v1948_v62 = vmul.f32 0.35355338, %v1834_v12 }
 0x4c8   :  { %v11567_v13 = vpop.f32.mrf.mxu0 }
 0x4c9   :  { %v1956_v14 = vsel %vm1472_vm5, %v1948_v62, -inf }
 0x4ca   :  { %1957 = vmax.xlane.f32.xlu1 %v1956_v14  ;;  %v1839_v45 = vpop.f32.mrf.mxu0 }
 0x4cb   :  { %v1949_v15 = vmul.f32 0.35355338, %v1839_v45 }
 0x4cc   :  { %v11570_v16 = vpop.f32.mrf.mxu0 }
 0x4cd   :  { %v1959_v17 = vsel %vm1479_vm6, %v1949_v15, -inf }
 0x4ce   :  { %v13060_v18 = vpop.f32.mrf.mxu1  ;;  %1960 = vmax.xlane.f32.xlu0 %v1959_v17 }
 0x4d0   :  { %v11552_v19 = vpop.f32.mrf.mxu1 }
 0x4d2   :  { %v13062_v20 = vpop.f32.mrf.mxu1 }
 0x4d4   :  { %v11555_v22 = vpop.f32.mrf.mxu1 }
 0x4d6   :  { %v1933_v23 = vpop.f32.mrf.mxu1 }
 0x4d7   :  { %v1950_v24 = vmul.f32 0.35355338, %v1933_v23 }
 0x4d8   :  { %v11579_v25 = vpop.f32.mrf.mxu1 }
 0x4d9   :  { %v1962_v7 = vsel %vm1472_vm5, %v1950_v24, -inf }
 0x4da   :  { %v1938_v26 = vpop.f32.mrf.mxu1  ;;  %1963 = vmax.xlane.f32.xlu0 %v1962_v7 }
 0x4db   :  { %v1951_v27 = vmul.f32 0.35355338, %v1938_v26 }
 0x4dc   :  { %v11582_v54 = vpop.f32.mrf.mxu1 }
 0x4dd   :  { %v1965_v28 = vsel %vm1472_vm5, %v1951_v27, -inf }
 0x4de   :  { %v1943_v32 = vpop.f32.mrf.mxu1  ;;  %1966 = vmax.xlane.f32.xlu1 %v1965_v28 }
 0x4df   :  { %v1952_v33 = vmul.f32 0.35355338, %v1943_v32 }
 0x4e0   :  { %v11585_v34 = vpop.f32.mrf.mxu1 }
 0x4e1   :  { %v1968_v40 = vsel %vm1479_vm6, %v1952_v33, -inf }
 0x4e2   :  { %1969 = vmax.xlane.f32.xlu0 %v1968_v40 }
 0x4ef   :  { %2331 = vrot.lane.b32.xlu1 %v12852_v52, %s12434_s16 }
 0x4f8   :  { %2223 = vrot.lane.b32.xlu0 %v12815_v55, %s12434_s16 }
 0x52a   :  { %v1955_v43 = vpop.xlane.xlu0 %1954 }
 0x52b   :  { %v1971_v44 = vsub.f32 %v1947_v9, %v1955_v43 }
 0x52d   :  { %v1977_v47 = vmul.f32 1.442695, %v1971_v44 }
 0x52f   :  { %12227 = vpow2.f32 %v1977_v47 }
 0x53c   :  { %v12228_v38 = vpop.eup %12227 }
 0x53d   :  { %v1989_v39 = vsel %vm1472_vm5, %v12228_v38, 0.0 }
 0x53e   :  { %1990 = vadd.xlane.f32.xlu1 %v1989_v39 }
 0x553   :  { %v1958_v48 = vpop.xlane.xlu1 %1957 }
 0x554   :  { %v1972_v49 = vsub.f32 %v1948_v62, %v1958_v48 }
 0x556   :  { %v1979_v50 = vmul.f32 1.442695, %v1972_v49 }
 0x557   :  { %v1961_v51 = vpop.xlane.xlu0 %1960 }
 0x558   :  { %12229 = vpow2.f32 %v1979_v50  ;;  %v1973_v59 = vsub.f32 %v1949_v15, %v1961_v51 }
 0x55a   :  { %v1981_v60 = vmul.f32 1.442695, %v1973_v59 }
 0x55c   :  { %12231 = vpow2.f32 %v1981_v60 }
 0x563   :  { %v1964_v61 = vpop.xlane.xlu0 %1963 }
 0x564   :  { %v1974_v0 = vsub.f32 %v1950_v24, %v1964_v61 }
 0x565   :  { %v13074_v3 = vpop.eup %12229 }
 0x566   :  { %v1983_v5 = vmul.f32 1.442695, %v1974_v0  ;;  %v1992_v8 = vsel %vm1472_vm5, %v13074_v3, 0.0 }
 0x567   :  { %1993 = vadd.xlane.f32.xlu0 %v1992_v8  ;;  %v1967_v12 = vpop.xlane.xlu1 %1966 }
 0x568   :  { %12233 = vpow2.f32 %v1983_v5  ;;  %v1975_v62 = vsub.f32 %v1951_v27, %v1967_v12 }
 0x569   :  { %v13078_v9 = vpop.eup %12231 }
 0x56a   :  { %v1995_v10 = vsel %vm1479_vm6, %v13078_v9, 0.0  ;;  %v1985_v13 = vmul.f32 1.442695, %v1975_v62 }
 0x56b   :  { %1996 = vadd.xlane.f32.xlu1 %v1995_v10  ;;  %v1970_v14 = vpop.xlane.xlu0 %1969  ;;  %v2332_v23 = vpop.permute.xlu1 %2331 }
 0x56c   :  { %12235 = vpow2.f32 %v1985_v13  ;;  %v1976_v45 = vsub.f32 %v1952_v33, %v1970_v14 }
 0x56e   :  { %v1987_v15 = vmul.f32 1.442695, %v1976_v45 }
 0x56f   :  { %v2224_v26 = vpop.permute.xlu0 %2223 }
 0x570   :  { %12237 = vpow2.f32 %v1987_v15 }
 0x575   :  { %v13082_v53 = vpop.eup %12233 }
 0x576   :  { %v1998_v11 = vsel %vm1472_vm5, %v13082_v53, 0.0 }
 0x577   :  { %1999 = vadd.xlane.f32.xlu0 %v1998_v11 }
 0x579   :  { %v13090_v16 = vpop.eup %12235 }
 0x57a   :  { %v2001_v17 = vsel %vm1472_vm5, %v13090_v16, 0.0 }
 0x57c   :  { %2329 = vrot.lane.b32.xlu1 %v12859_v58, %s12434_s16 }
 0x57d   :  { %v13094_v19 = vpop.eup %12237 }
 0x57e   :  { %v2004_v22 = vsel %vm1479_vm6, %v13094_v19, 0.0 }
 0x58d   :  { %2217 = vrot.lane.b32.xlu0 %v12815_v55, %s12435_s23 }
 0x5a0   :  { %2002 = vadd.xlane.f32.xlu1 %v2001_v17 }
 0x5ac   :  { %2005 = vadd.xlane.f32.xlu0 %v2004_v22 }
 0x5b1   :  { %2327 = vrot.lane.b32.xlu1 %v12854_v56, %s12434_s16 }
 0x5b5   :  { %2321 = vrot.lane.b32.xlu1 %v12854_v56, %s12435_s23 }
 0x5b9   :  { %2325 = vrot.lane.b32.xlu1 %v12852_v52, %s12435_s23 }
 0x5bd   :  { %2501 = vrot.lane.b32.xlu1 %v12793_v21, %s12436_s25 }
 0x5c1   :  { %2497 = vrot.lane.b32.xlu1 %v12815_v55, %s12436_s25 }
 0x5c2   :  { %2219 = vrot.lane.b32.xlu0 %v12841_v42, %s12435_s23 }
 0x5c5   :  { %2705 = vrot.lane.b32.xlu1 %v12793_v21, %s12437_s28 }
 0x5c6   :  { %2221 = vrot.lane.b32.xlu0 %v12793_v21, %s12435_s23 }
 0x5c7   :  { %v1991_v24 = vpop.xlane.xlu1 %1990 }
 0x5c8   :  { %12239 = vrcp.f32 %v1991_v24 }
 0x5c9   :  { %2598 = vrot.lane.b32.xlu1 %v12859_v58, %s12436_s25 }
 0x5ca   :  { %2323 = vrot.lane.b32.xlu0 %v12859_v58, %s12435_s23 }
 0x5cd   :  { %2596 = vrot.lane.b32.xlu1 %v12854_v56, %s12436_s25 }
 0x5ce   :  { %2499 = vrot.lane.b32.xlu0 %v12841_v42, %s12436_s25 }
 0x5d2   :  { %2600 = vrot.lane.b32.xlu0 %v12852_v52, %s12436_s25 }
 0x5d5   :  { %v12240_v25 = vpop.eup %12239 }
 0x5d6   :  { %v2013_v7 = vmul.f32 %v12240_v25, %v12228_v38  ;;  %2703 = vrot.lane.b32.xlu0 %v12841_v42, %s12437_s28 }
 0x5d8   :  { %11593 = vmatmul.mubr.msk.f32.vlgmr.msra.gmra.mxu0 %vm1472_vm5, %v2013_v7 }
 0x5d9   :  { %11617 = vmatpush3.xpose.msk.msra.mxu0 %vm1163_vm3, %v13033_v57  ;;  %11595 = vmatprep.mubr.msk.f32.mxu0 %vm12427_vm2, %v12426_v1 }
 0x5da   :  { %11618 = vmatprep.subr.mxu0 %v12426_v1 }
 0x5dd   :  { %11619 = vmatpush3.xpose.msk.msra.mxu0 %vm1163_vm3, %v13071_v41 }
 0x5de   :  { %11620 = vmatprep.subr.mxu0 %v12426_v1 }
 0x5e1   :  { %11621 = vmatpush3.xpose.msk.msra.mxu0 %vm1163_vm3, %v2224_v26 }
 0x5e2   :  { %11646 = vmatprep.subr.mxu0 %v12426_v1 }
 0x5f0   :  { %v1994_v27 = vpop.xlane.xlu0 %1993 }
 0x5f1   :  { %12241 = vrcp.f32 %v1994_v27 }
 0x5f4   :  { %v1997_v54 = vpop.xlane.xlu1 %1996 }
 0x5f5   :  { %12243 = vrcp.f32 %v1997_v54 }
 0x5f8   :  { %v2330_v44 = vpop.permute.xlu1 %2329 }
 0x5fe   :  { %v12242_v57 = vpop.eup %12241 }
 0x5ff   :  { %v2014_v28 = vmul.f32 %v12242_v57, %v13074_v3 }
 0x600   :  { %v2000_v32 = vpop.xlane.xlu0 %1999 }
 0x601   :  { %12245 = vrcp.f32 %v2000_v32  ;;  %11596 = vmatmul.mubr.msk.f32.gmra.mxu0 %vm1472_vm5, %v2014_v28 }
 0x602   :  { %v12244_v33 = vpop.eup %12243  ;;  %11598 = vmatprep.mubr.msk.f32.mxu0 %vm12427_vm2, %v12426_v1 }
 0x603   :  { %v2015_v34 = vmul.f32 %v12244_v33, %v13078_v9 }
 0x604   :  { %v2218_v40 = vpop.permute.xlu0 %2217 }
 0x605   :  { %11599 = vmatmul.mubr.msk.f32.gmra.mxu0 %vm1472_vm5, %v2015_v34 }
 0x606   :  { %11622 = vmatprep.mubr.msk.f32.mxu0 %vm12427_vm2, %v12426_v1 }
 0x609   :  { %11623 = vmatmul.mubr.msk.f32.vlgmr.msra.gmra.mxu0 %vm1163_vm3, %v2218_v40 }
 0x60a   :  { %11625 = vmatprep.mubr.msk.f32.mxu0 %vm12427_vm2, %v12426_v1 }
 0x60e   :  { %v12246_v41 = vpop.eup %12245 }
 0x60f   :  { %v2016_v43 = vmul.f32 %v12246_v41, %v13082_v53 }
 0x611   :  { %11608 = vmatmul.mubr.msk.f32.vlgmr.msra.gmra.mxu1 %vm1472_vm5, %v2016_v43 }
 0x612   :  { %11632 = vmatpush3.xpose.msk.msra.mxu1 %vm1163_vm3, %v2332_v23  ;;  %11610 = vmatprep.mubr.msk.f32.mxu1 %vm12427_vm2, %v12426_v1 }
 0x613   :  { %11633 = vmatprep.subr.mxu1 %v12426_v1 }
 0x616   :  { %11634 = vmatpush3.xpose.msk.msra.mxu1 %vm1163_vm3, %v2330_v44 }
 0x617   :  { %11635 = vmatprep.subr.mxu1 %v12426_v1 }
 0x629   :  { %v2003_v47 = vpop.xlane.xlu1 %2002 }
 0x62a   :  { %12247 = vrcp.f32 %v2003_v47 }
 0x62d   :  { %v2328_v38 = vpop.permute.xlu1 %2327 }
 0x62e   :  { %11636 = vmatpush3.xpose.msk.msra.mxu1 %vm1163_vm3, %v2328_v38 }
 0x62f   :  { %11661 = vmatprep.subr.mxu1 %v12426_v1 }
 0x631   :  { %v2322_v39 = vpop.permute.xlu1 %2321 }
 0x635   :  { %v2326_v48 = vpop.permute.xlu1 %2325  ;;  %v2006_v49 = vpop.xlane.xlu0 %2005 }
 0x636   :  { %12249 = vrcp.f32 %v2006_v49 }
 0x637   :  { %v12248_v50 = vpop.eup %12247 }
 0x638   :  { %v2017_v51 = vmul.f32 %v12248_v50, %v13090_v16 }
 0x639   :  { %v2502_v59 = vpop.permute.xlu1 %2501  ;;  %v2220_v60 = vpop.permute.xlu0 %2219 }
 0x63a   :  { %11611 = vmatmul.mubr.msk.f32.gmra.mxu1 %vm1472_vm5, %v2017_v51  ;;  %11626 = vmatmul.mubr.msk.f32.gmra.mxu0 %vm1163_vm3, %v2220_v60 }
 0x63b   :  { %11647 = vmatpush3.msk.msra.mxu0 %vm1557_vm4, %v2502_v59  ;;  %11628 = vmatprep.mubr.msk.f32.mxu0 %vm12427_vm2, %v12426_v1 }
 0x63c   :  { %11613 = vmatprep.mubr.msk.f32.mxu1 %vm12427_vm2, %v12426_v1  ;;  %11648 = vmatprep.subr.mxu0 %v12426_v1 }
 0x63d   :  { %v2498_v61 = vpop.permute.xlu1 %2497  ;;  %v2222_v0 = vpop.permute.xlu0 %2221 }
 0x63e   :  { %11629 = vmatmul.mubr.msk.f32.gmra.mxu0 %vm1163_vm3, %v2222_v0 }
 0x63f   :  { %11652 = vmatprep.mubr.msk.f32.mxu0 %vm12427_vm2, %v12426_v1 }
 0x641   :  { %v2324_v3 = vpop.permute.xlu0 %2323  ;;  %v13170_v5 = vpop.permute.xlu1 %2705 }
 0x643   :  { %v12250_v8 = vpop.eup %12249 }
 0x644   :  { %v2018_v9 = vmul.f32 %v12250_v8, %v13094_v19 }
 0x645   :  { %v2500_v10 = vpop.permute.xlu0 %2499  ;;  %v2599_v53 = vpop.permute.xlu1 %2598 }
 0x646   :  { %11614 = vmatmul.mubr.msk.f32.gmra.mxu1 %vm1472_vm5, %v2018_v9  ;;  %11649 = vmatpush3.msra.mxu0 %v2500_v10 }
 0x647   :  { %11650 = vmatprep.subr.mxu0 %v12426_v1  ;;  %11637 = vmatprep.mubr.msk.f32.mxu1 %vm12427_vm2, %v12426_v1 }
 0x648   :  { %11651 = vmatpush3.msra.mxu0 %v2498_v61 }
 0x649   :  { %v2601_v11 = vpop.permute.xlu0 %2600  ;;  %11676 = vmatprep.subr.mxu0 %v12426_v1  ;;  %v2597_v12 = vpop.permute.xlu1 %2596 }
 0x64a   :  { %11638 = vmatmul.mubr.msk.f32.vlgmr.msra.gmra.mxu1 %vm1163_vm3, %v2322_v39 }
 0x64b   :  { %11662 = vmatpush3.msk.msra.mxu1 %vm1557_vm4, %v2601_v11  ;;  %11640 = vmatprep.mubr.msk.f32.mxu1 %vm12427_vm2, %v12426_v1 }
 0x64c   :  { %11663 = vmatprep.subr.mxu1 %v12426_v1 }
 0x64d   :  { %11664 = vmatpush3.msra.mxu1 %v2599_v53 }
 0x64e   :  { %11665 = vmatprep.subr.mxu1 %v12426_v1  ;;  %11641 = vmatmul.mubr.msk.f32.gmra.mxu1 %vm1163_vm3, %v2324_v3  ;;  %v2704_v3 = vpop.permute.xlu0 %2703 }
 0x64f   :  { %11666 = vmatpush3.msra.mxu1 %v2597_v12  ;;  %11643 = vmatprep.mubr.msk.f32.mxu1 %vm12427_vm2, %v12426_v1 }
 0x650   :  { %11691 = vmatprep.subr.mxu1 %v12426_v1 }
 0x652   :  { %11644 = vmatmul.mubr.msk.f32.gmra.mxu1 %vm1163_vm3, %v2326_v48 }
 0x653   :  { %11667 = vmatprep.mubr.msk.f32.mxu1 %vm12427_vm2, %v12426_v1 }
 0x698   :  { %v13191_v62 = vpop.f32.mrf.mxu0 }
 0x69a   :  { %v11594_v13 = vpop.f32.mrf.mxu0 }
 0x6c1   :  { %v13193_v14 = vpop.f32.mrf.mxu0 }
 0x6c3   :  { %v11597_v45 = vpop.f32.mrf.mxu0 }
 0x6c5   :  { %v13195_v15 = vpop.f32.mrf.mxu0 }
 0x6c7   :  { %v11600_v16 = vpop.f32.mrf.mxu0 }
 0x6c9   :  { %v2307_v17 = vpop.f32.mrf.mxu0 }
 0x6ca   :  { %v2425_v19 = vmul.f32 0.35355338, %v2307_v17 }
 0x6cb   :  { %v11624_v22 = vpop.f32.mrf.mxu0 }
 0x6cc   :  { %v2431_v23 = vsel %vm1472_vm5, %v2425_v19, -inf }
 0x6cd   :  { %2432 = vmax.xlane.f32.xlu0 %v2431_v23 }
 0x6d1   :  { %v13198_v24 = vpop.f32.mrf.mxu1 }
 0x6d3   :  { %v11609_v25 = vpop.f32.mrf.mxu1 }
 0x6fa   :  { %v13200_v7 = vpop.f32.mrf.mxu1  ;;  %v2312_v26 = vpop.f32.mrf.mxu0 }
 0x6fb   :  { %v2426_v27 = vmul.f32 0.35355338, %v2312_v26 }
 0x6fc   :  { %v11612_v54 = vpop.f32.mrf.mxu1  ;;  %v11627_v57 = vpop.f32.mrf.mxu0 }
 0x6fd   :  { %v2434_v28 = vsel %vm1472_vm5, %v2426_v27, -inf }
 0x6fe   :  { %2435 = vmax.xlane.f32.xlu1 %v2434_v28  ;;  %v2317_v32 = vpop.f32.mrf.mxu0 }
 0x6ff   :  { %v2427_v33 = vmul.f32 0.35355338, %v2317_v32 }
 0x700   :  { %v11630_v34 = vpop.f32.mrf.mxu0 }
 0x701   :  { %v2437_v40 = vsel %vm1479_vm6, %v2427_v33, -inf }
 0x702   :  { %2438 = vmax.xlane.f32.xlu0 %v2437_v40 }
 0x706   :  { %v13204_v41 = vpop.f32.mrf.mxu1 }
 0x708   :  { %v11615_v43 = vpop.f32.mrf.mxu1 }
 0x70a   :  { %v2411_v44 = vpop.f32.mrf.mxu1 }
 0x70b   :  { %v2428_v47 = vmul.f32 0.35355338, %v2411_v44 }
 0x70c   :  { %v11639_v38 = vpop.f32.mrf.mxu1 }
 0x70d   :  { %v2440_v39 = vsel %vm1472_vm5, %v2428_v47, -inf }
 0x70e   :  { %v2416_v48 = vpop.f32.mrf.mxu1  ;;  %2441 = vmax.xlane.f32.xlu0 %v2440_v39 }
 0x70f   :  { %v2429_v49 = vmul.f32 0.35355338, %v2416_v48 }
 0x710   :  { %v11642_v50 = vpop.f32.mrf.mxu1 }
 0x711   :  { %v2443_v51 = vsel %vm1472_vm5, %v2429_v49, -inf }
 0x712   :  { %v2421_v59 = vpop.f32.mrf.mxu1  ;;  %2444 = vmax.xlane.f32.xlu1 %v2443_v51 }
 0x713   :  { %v2430_v60 = vmul.f32 0.35355338, %v2421_v59 }
 0x714   :  { %v11645_v61 = vpop.f32.mrf.mxu1 }
 0x715   :  { %v2446_v0 = vsel %vm1479_vm6, %v2430_v60, -inf }
 0x716   :  { %2447 = vmax.xlane.f32.xlu0 %v2446_v0 }
 0x723   :  { %2809 = vrot.lane.b32.xlu1 %v12852_v52, %s12437_s28 }
 0x72c   :  { %2701 = vrot.lane.b32.xlu0 %v12815_v55, %s12437_s28 }
 0x756   :  { %v2433_v8 = vpop.xlane.xlu0 %2432 }
 0x757   :  { %v2449_v9 = vsub.f32 %v2425_v19, %v2433_v8 }
 0x759   :  { %v2455_v10 = vmul.f32 1.442695, %v2449_v9 }
 0x75b   :  { %12251 = vpow2.f32 %v2455_v10 }
 0x768   :  { %v12252_v53 = vpop.eup %12251 }
 0x769   :  { %v2467_v11 = vsel %vm1472_vm5, %v12252_v53, 0.0 }
 0x76a   :  { %2468 = vadd.xlane.f32.xlu1 %v2467_v11 }
 0x787   :  { %v2436_v12 = vpop.xlane.xlu1 %2435 }
 0x788   :  { %v2450_v13 = vsub.f32 %v2426_v27, %v2436_v12 }
 0x78a   :  { %v2457_v45 = vmul.f32 1.442695, %v2450_v13 }
 0x78b   :  { %v2439_v16 = vpop.xlane.xlu0 %2438 }
 0x78c   :  { %12253 = vpow2.f32 %v2457_v45  ;;  %v2451_v17 = vsub.f32 %v2427_v33, %v2439_v16 }
 0x78e   :  { %v2459_v22 = vmul.f32 1.442695, %v2451_v17 }
 0x790   :  { %12255 = vpow2.f32 %v2459_v22 }
 0x797   :  { %v2442_v23 = vpop.xlane.xlu0 %2441 }
 0x798   :  { %v2452_v25 = vsub.f32 %v2428_v47, %v2442_v23 }
 0x799   :  { %v12254_v26 = vpop.eup %12253 }
 0x79a   :  { %v2461_v54 = vmul.f32 1.442695, %v2452_v25  ;;  %v2470_v19 = vsel %vm1472_vm5, %v12254_v26, 0.0 }
 0x79b   :  { %2471 = vadd.xlane.f32.xlu0 %v2470_v19  ;;  %v2445_v33 = vpop.xlane.xlu1 %2444 }
 0x79c   :  { %12257 = vpow2.f32 %v2461_v54  ;;  %v2453_v34 = vsub.f32 %v2429_v49, %v2445_v33 }
 0x79d   :  { %v12256_v57 = vpop.eup %12255 }
 0x79e   :  { %v2473_v28 = vsel %vm1479_vm6, %v12256_v57, 0.0  ;;  %v2463_v40 = vmul.f32 1.442695, %v2453_v34 }
 0x79f   :  { %2474 = vadd.xlane.f32.xlu1 %v2473_v28  ;;  %v2448_v43 = vpop.xlane.xlu0 %2447  ;;  %v2810_v49 = vpop.permute.xlu1 %2809 }
 0x7a0   :  { %12259 = vpow2.f32 %v2463_v40  ;;  %v2454_v44 = vsub.f32 %v2430_v60, %v2448_v43 }
 0x7a2   :  { %v2465_v47 = vmul.f32 1.442695, %v2454_v44 }
 0x7a3   :  { %v2702_v61 = vpop.permute.xlu0 %2701 }
 0x7a4   :  { %12261 = vpow2.f32 %v2465_v47 }
 0x7a9   :  { %v12258_v32 = vpop.eup %12257 }
 0x7aa   :  { %v2476_v27 = vsel %vm1472_vm5, %v12258_v32, 0.0 }
 0x7ab   :  { %2477 = vadd.xlane.f32.xlu0 %v2476_v27 }
 0x7ad   :  { %v12260_v38 = vpop.eup %12259 }
 0x7ae   :  { %v2479_v39 = vsel %vm1472_vm5, %v12260_v38, 0.0 }
 0x7b0   :  { %2807 = vrot.lane.b32.xlu1 %v12859_v58, %s12437_s28 }
 0x7b1   :  { %v13222_v48 = vpop.eup %12261 }
 0x7b2   :  { %v2482_v50 = vsel %vm1479_vm6, %v13222_v48, 0.0 }
 0x7c1   :  { %2695 = vrot.lane.b32.xlu0 %v12815_v55, %s12438_s26 }
 0x7d4   :  { %2480 = vadd.xlane.f32.xlu1 %v2479_v39 }
 0x7e0   :  { %2483 = vadd.xlane.f32.xlu0 %v2482_v50 }
 0x7e5   :  { %2805 = vrot.lane.b32.xlu1 %v12854_v56, %s12437_s28 }
 0x7e9   :  { %2699 = vrot.lane.b32.xlu1 %v12793_v21, %s12438_s26 }
 0x7ed   :  { %2803 = vrot.lane.b32.xlu1 %v12852_v52, %s12438_s26 }
 0x7f3   :  { %v2469_v51 = vpop.xlane.xlu1 %2468 }
 0x7f4   :  { %12263 = vrcp.f32 %v2469_v51 }
 0x7f6   :  { %2697 = vrot.lane.b32.xlu0 %v12841_v42, %s12438_s26 }
 0x7fa   :  { %2799 = vrot.lane.b32.xlu0 %v12854_v56, %s12438_s26 }
 0x7fe   :  { %2801 = vrot.lane.b32.xlu0 %v12859_v58, %s12438_s26 }
 0x801   :  { %v12264_v59 = vpop.eup %12263 }
 0x802   :  { %v2491_v60 = vmul.f32 %v12264_v59, %v12252_v53 }
 0x804   :  { %11653 = vmatmul.mubr.msk.f32.vlgmr.msra.gmra.mxu0 %vm1472_vm5, %v2491_v60 }
 0x805   :  { %11677 = vmatpush3.xpose.msk.msra.mxu0 %vm1163_vm3, %v13170_v5  ;;  %11655 = vmatprep.mubr.msk.f32.mxu0 %vm12427_vm2, %v12426_v1 }
 0x806   :  { %11678 = vmatprep.subr.mxu0 %v12426_v1 }
 0x809   :  { %11679 = vmatpush3.xpose.msk.msra.mxu0 %vm1163_vm3, %v2704_v3 }
 0x80a   :  { %11680 = vmatprep.subr.mxu0 %v12426_v1 }
 0x80d   :  { %11681 = vmatpush3.xpose.msk.msra.mxu0 %vm1163_vm3, %v2702_v61 }
 0x80e   :  { %11706 = vmatprep.subr.mxu0 %v12426_v1 }
 0x824   :  { %v2472_v0 = vpop.xlane.xlu0 %2471 }
 0x825   :  { %12265 = vrcp.f32 %v2472_v0 }
 0x828   :  { %v2475_v8 = vpop.xlane.xlu1 %2474 }
 0x829   :  { %12267 = vrcp.f32 %v2475_v8 }
 0x82c   :  { %v2808_v45 = vpop.permute.xlu1 %2807 }
 0x832   :  { %v12266_v9 = vpop.eup %12265 }
 0x833   :  { %v2492_v5 = vmul.f32 %v12266_v9, %v12254_v26 }
 0x834   :  { %v2478_v10 = vpop.xlane.xlu0 %2477 }
 0x835   :  { %12269 = vrcp.f32 %v2478_v10  ;;  %11656 = vmatmul.mubr.msk.f32.gmra.mxu0 %vm1472_vm5, %v2492_v5 }
 0x836   :  { %v12268_v53 = vpop.eup %12267  ;;  %11658 = vmatprep.mubr.msk.f32.mxu0 %vm12427_vm2, %v12426_v1 }
 0x837   :  { %v2493_v3 = vmul.f32 %v12268_v53, %v12256_v57 }
 0x838   :  { %v2696_v11 = vpop.permute.xlu0 %2695 }
 0x839   :  { %11659 = vmatmul.mubr.msk.f32.gmra.mxu0 %vm1472_vm5, %v2493_v3 }
 0x83a   :  { %11682 = vmatprep.mubr.msk.f32.mxu0 %vm12427_vm2, %v12426_v1 }
 0x83d   :  { %11683 = vmatmul.mubr.msk.f32.vlgmr.msra.gmra.mxu0 %vm1163_vm3, %v2696_v11 }
 0x83e   :  { %11685 = vmatprep.mubr.msk.f32.mxu0 %vm12427_vm2, %v12426_v1 }
 0x842   :  { %v12270_v12 = vpop.eup %12269 }
 0x843   :  { %v2494_v13 = vmul.f32 %v12270_v12, %v12258_v32 }
 0x845   :  { %11668 = vmatmul.mubr.msk.f32.vlgmr.msra.gmra.mxu1 %vm1472_vm5, %v2494_v13 }
 0x846   :  { %11692 = vmatpush3.xpose.msk.msra.mxu1 %vm1163_vm3, %v2810_v49  ;;  %11670 = vmatprep.mubr.msk.f32.mxu1 %vm12427_vm2, %v12426_v1 }
 0x847   :  { %11693 = vmatprep.subr.mxu1 %v12426_v1 }
 0x84a   :  { %11694 = vmatpush3.xpose.msk.msra.mxu1 %vm1163_vm3, %v2808_v45 }
 0x84b   :  { %11695 = vmatprep.subr.mxu1 %v12426_v1 }
 0x85d   :  { %v2481_v16 = vpop.xlane.xlu1 %2480 }
 0x85e   :  { %12271 = vrcp.f32 %v2481_v16 }
 0x861   :  { %v2806_v17 = vpop.permute.xlu1 %2805 }
 0x862   :  { %11696 = vmatpush3.xpose.msk.msra.mxu1 %vm1163_vm3, %v2806_v17 }
 0x863   :  { %11721 = vmatprep.subr.mxu1 %v12426_v1 }
 0x865   :  { %v2700_v54 = vpop.permute.xlu1 %2699 }
 0x869   :  { %v2484_v22 = vpop.xlane.xlu0 %2483  ;;  %v2804_v27 = vpop.permute.xlu1 %2803 }
 0x86a   :  { %12273 = vrcp.f32 %v2484_v22 }
 0x86b   :  { %v12272_v23 = vpop.eup %12271 }
 0x86c   :  { %v2495_v25 = vmul.f32 %v12272_v23, %v12260_v38 }
 0x86d   :  { %v2698_v26 = vpop.permute.xlu0 %2697 }
 0x86e   :  { %11671 = vmatmul.mubr.msk.f32.gmra.mxu1 %vm1472_vm5, %v2495_v25  ;;  %11686 = vmatmul.mubr.msk.f32.gmra.mxu0 %vm1163_vm3, %v2698_v26 }
 0x86f   :  { %11688 = vmatprep.mubr.msk.f32.mxu0 %vm12427_vm2, %v12426_v1  ;;  %11673 = vmatprep.mubr.msk.f32.mxu1 %vm12427_vm2, %v12426_v1 }
 0x871   :  { %v2800_v28 = vpop.permute.xlu0 %2799 }
 0x872   :  { %11689 = vmatmul.mubr.msk.f32.gmra.mxu0 %vm1163_vm3, %v2700_v54 }
 0x873   :  { %11712 = vmatprep.mubr.msk.f32.mxu0 %vm12427_vm2, %v12426_v1 }
 0x875   :  { %v2802_v32 = vpop.permute.xlu0 %2801 }
 0x877   :  { %v12274_v19 = vpop.eup %12273 }
 0x878   :  { %v2496_v57 = vmul.f32 %v12274_v19, %v13222_v48 }
 0x87a   :  { %11674 = vmatmul.mubr.msk.f32.gmra.mxu1 %vm1472_vm5, %v2496_v57 }
 0x87b   :  { %11697 = vmatprep.mubr.msk.f32.mxu1 %vm12427_vm2, %v12426_v1 }
 0x87e   :  { %11698 = vmatmul.mubr.msk.f32.vlgmr.msra.gmra.mxu1 %vm1163_vm3, %v2800_v28 }
 0x87f   :  { %11700 = vmatprep.mubr.msk.f32.mxu1 %vm12427_vm2, %v12426_v1 }
 0x882   :  { %11701 = vmatmul.mubr.msk.f32.gmra.mxu1 %vm1163_vm3, %v2802_v32 }
 0x883   :  { %11703 = vmatprep.mubr.msk.f32.mxu1 %vm12427_vm2, %v12426_v1 }
 0x886   :  { %11704 = vmatmul.mubr.msk.f32.gmra.mxu1 %vm1163_vm3, %v2804_v27 }
 0x887   :  { %11727 = vmatprep.mubr.msk.f32.mxu1 %vm12427_vm2, %v12426_v1 }
 0x8c4   :  { %v13288_v33 = vpop.f32.mrf.mxu0 }
 0x8c6   :  { %v11654_v34 = vpop.f32.mrf.mxu0 }
 0x8f5   :  { %v13290_v40 = vpop.f32.mrf.mxu0 }
 0x8f7   :  { %v11657_v43 = vpop.f32.mrf.mxu0 }
 0x8f9   :  { %v13292_v44 = vpop.f32.mrf.mxu0 }
 0x8fb   :  { %v11660_v47 = vpop.f32.mrf.mxu0 }
 0x8fd   :  { %v2785_v38 = vpop.f32.mrf.mxu0 }
 0x8fe   :  { %v2903_v39 = vmul.f32 0.35355338, %v2785_v38 }
 0x8ff   :  { %v11684_v48 = vpop.f32.mrf.mxu0 }
 0x900   :  { %v2909_v50 = vsel %vm1472_vm5, %v2903_v39, -inf }
 0x901   :  { %2910 = vmax.xlane.f32.xlu0 %v2909_v50 }
 0x905   :  { %v13295_v49 = vpop.f32.mrf.mxu1 }
 0x907   :  { %v11669_v51 = vpop.f32.mrf.mxu1 }
 0x92e   :  { %v13297_v59 = vpop.f32.mrf.mxu1  ;;  %v2790_v60 = vpop.f32.mrf.mxu0 }
 0x92f   :  { %v2904_v61 = vmul.f32 0.35355338, %v2790_v60 }
 0x930   :  { %v11672_v0 = vpop.f32.mrf.mxu1  ;;  %v11687_v8 = vpop.f32.mrf.mxu0 }
 0x931   :  { %v2912_v9 = vsel %vm1472_vm5, %v2904_v61, -inf }
 0x932   :  { %2913 = vmax.xlane.f32.xlu1 %v2912_v9  ;;  %v2795_v5 = vpop.f32.mrf.mxu0 }
 0x933   :  { %v2905_v45 = vmul.f32 0.35355338, %v2795_v5 }
 0x934   :  { %v11690_v10 = vpop.f32.mrf.mxu0 }
 0x935   :  { %v2915_v26 = vsel %vm1479_vm6, %v2905_v45, -inf }
 0x93a   :  { %v13300_v53 = vpop.f32.mrf.mxu1 }
 0x93c   :  { %v11675_v3 = vpop.f32.mrf.mxu1 }
 0x93e   :  { %v2889_v11 = vpop.f32.mrf.mxu1 }
 0x93f   :  { %v2906_v12 = vmul.f32 0.35355338, %v2889_v11 }
 0x940   :  { %v11699_v13 = vpop.f32.mrf.mxu1 }
 0x941   :  { %v2918_v16 = vsel %vm1472_vm5, %v2906_v12, -inf }
 0x942   :  { %v2894_v17 = vpop.f32.mrf.mxu1  ;;  %2919 = vmax.xlane.f32.xlu0 %v2918_v16 }
 0x943   :  { %v2907_v22 = vmul.f32 0.35355338, %v2894_v17 }
 0x944   :  { %v11702_v23 = vpop.f32.mrf.mxu1 }
 0x945   :  { %v2921_v25 = vsel %vm1472_vm5, %v2907_v22, -inf }
 0x946   :  { %v2899_v54 = vpop.f32.mrf.mxu1  ;;  %2922 = vmax.xlane.f32.xlu1 %v2921_v25  ;;  %2916 = vmax.xlane.f32.xlu0 %v2915_v26 }
 0x947   :  { %v2908_v19 = vmul.f32 0.35355338, %v2899_v54 }
 0x948   :  { %v11705_v57 = vpop.f32.mrf.mxu1 }
 0x949   :  { %v2924_v28 = vsel %vm1479_vm6, %v2908_v19, -inf }
 0x94a   :  { %2925 = vmax.xlane.f32.xlu0 %v2924_v28 }
 0x960   :  { %2979 = vrot.lane.b32.xlu0 %v12793_v21, %s12439_s14 }
 0x98a   :  { %v2911_v32 = vpop.xlane.xlu0 %2910 }
 0x98b   :  { %v2927_v27 = vsub.f32 %v2903_v39, %v2911_v32 }
 0x98d   :  { %v2933_v34 = vmul.f32 1.442695, %v2927_v27 }
 0x98f   :  { %12275 = vpow2.f32 %v2933_v34 }
 0x99c   :  { %v13308_v43 = vpop.eup %12275 }
 0x99d   :  { %v2945_v47 = vsel %vm1472_vm5, %v13308_v43, 0.0 }
 0x99e   :  { %2946 = vadd.xlane.f32.xlu1 %v2945_v47 }
 0x9bb   :  { %v2914_v38 = vpop.xlane.xlu1 %2913 }
 0x9bc   :  { %v2928_v48 = vsub.f32 %v2904_v61, %v2914_v38 }
 0x9be   :  { %v2935_v50 = vmul.f32 1.442695, %v2928_v48 }
 0x9c0   :  { %12277 = vpow2.f32 %v2935_v50 }
 0x9cb   :  { %v2920_v51 = vpop.xlane.xlu0 %2919 }
 0x9cc   :  { %v2930_v60 = vsub.f32 %v2906_v12, %v2920_v51 }
 0x9cd   :  { %v13312_v0 = vpop.eup %12277 }
 0x9ce   :  { %v2939_v8 = vmul.f32 1.442695, %v2930_v60  ;;  %v2948_v21 = vsel %vm1472_vm5, %v13312_v0, 0.0 }
 0x9cf   :  { %v2923_v39 = vpop.xlane.xlu1 %2922  ;;  %2949 = vadd.xlane.f32.xlu0 %v2948_v21  ;;  %v2917_v9 = vpop.xlane.xlu0 %2916 }
 0x9d0   :  { %12279 = vpow2.f32 %v2939_v8  ;;  %v2931_v5 = vsub.f32 %v2907_v22, %v2923_v39  ;;  %v2929_v10 = vsub.f32 %v2905_v45, %v2917_v9  ;;  %v184_v39 = vld [vmem:[%s15140_s5 + $0x10] sm:$0xff]  ;;  %v183_v9 = vld [vmem:[%s15140_s5 + $0x8] sm:$0xff] }
 0x9d2   :  { %v2941_v3 = vmul.f32 1.442695, %v2931_v5  ;;  %v2937_v11 = vmul.f32 1.442695, %v2929_v10 }
 0x9d3   :  { %v2926_v13 = vpop.xlane.xlu0 %2925 }
 0x9d4   :  { %12281 = vpow2.f32 %v2941_v3  ;;  %v2932_v25 = vsub.f32 %v2908_v19, %v2926_v13  ;;  %v182_v3 = vld [vmem:[%s15140_s5] sm:$0xff] }
 0x9d5   :  { %12283 = vpow2.f32 %v2937_v11 }
 0x9d6   :  { %v2943_v26 = vmul.f32 1.442695, %v2932_v25 }
 0x9d7   :  { %v2980_v61 = vpop.permute.xlu0 %2979 }
 0x9d8   :  { %11707 = vmatpush3.msk.msra.mxu0 %vm1557_vm4, %v2980_v61  ;;  %12285 = vpow2.f32 %v2943_v26 }
 0x9d9   :  { %11708 = vmatprep.subr.mxu0 %v12426_v1 }
 0x9dd   :  { %v13318_v12 = vpop.eup %12279 }
 0x9de   :  { %v2954_v16 = vsel %vm1472_vm5, %v13318_v12, 0.0 }
 0x9df   :  { %2955 = vadd.xlane.f32.xlu1 %v2954_v16 }
 0x9e1   :  { %v13322_v17 = vpop.eup %12281 }
 0x9e2   :  { %v12284_v22 = vpop.eup %12283  ;;  %v2957_v45 = vsel %vm1472_vm5, %v13322_v17, 0.0 }
 0x9e3   :  { %2958 = vadd.xlane.f32.xlu1 %v2957_v45  ;;  %v2951_v23 = vsel %vm1479_vm6, %v12284_v22, 0.0 }
 0x9e4   :  { %2952 = vadd.xlane.f32.xlu0 %v2951_v23 }
 0x9f4   :  { %2977 = vrot.lane.b32.xlu1 %v12841_v42, %s12439_s14 }
 0x9fa   :  { %2975 = vrot.lane.b32.xlu0 %v12815_v55, %s12439_s14  ;;  %v12286_v55 = vpop.eup %12285 }
 0x9fb   :  { %v2960_v42 = vsel %vm1479_vm6, %v12286_v55, 0.0 }
 0x9fe   :  { %3078 = vrot.lane.b32.xlu0 %v12852_v52, %s12439_s14 }
 0xa02   :  { %3076 = vrot.lane.b32.xlu0 %v12859_v58, %s12439_s14 }
 0xa06   :  { %3074 = vrot.lane.b32.xlu0 %v12854_v56, %s12439_s14 }
 0xa0a   :  { %3179 = vrot.lane.b32.xlu0 %v13191_v62, %s12440_s12 }
 0xa0e   :  { %3203 = vrot.lane.b32.xlu0 %v13288_v33, %s12441_s13 }
 0xa12   :  { %3181 = vrot.lane.b32.xlu0 %v13193_v14, %s12440_s12 }
 0xa16   :  { %3205 = vrot.lane.b32.xlu0 %v13290_v40, %s12441_s13 }
 0xa18   :  { %2961 = vadd.xlane.f32.xlu1 %v2960_v42 }
 0xa1a   :  { %3185 = vrot.lane.b32.xlu0 %v13198_v24, %s12440_s12 }
 0xa1e   :  { %3209 = vrot.lane.b32.xlu0 %v13295_v49, %s12441_s13 }
 0xa22   :  { %3183 = vrot.lane.b32.xlu0 %v13195_v15, %s12440_s12 }
 0xa27   :  { %v2947_v52 = vpop.xlane.xlu1 %2946 }
 0xa28   :  { %12287 = vrcp.f32 %v2947_v52 }
 0xa29   :  { %3187 = vrot.lane.b32.xlu1 %v13200_v7, %s12440_s12 }
 0xa35   :  { %v12288_v33 = vpop.eup %12287 }
 0xa36   :  { %v2969_v49 = vmul.f32 %v12288_v33, %v13308_v43 }
 0xa58   :  { %v2950_v56 = vpop.xlane.xlu0 %2949 }
 0xa59   :  { %12289 = vrcp.f32 %v2950_v56 }
 0xa66   :  { %v12290_v15 = vpop.eup %12289 }
 0xa67   :  { %v2970_v54 = vmul.f32 %v12290_v15, %v13312_v0  ;;  %v185_v0 = vld [vmem:[%s15140_s5 + $0x18] sm:$0xff] }
 0xa68   :  { %v2956_v58 = vpop.xlane.xlu1 %2955 }
 0xa69   :  { %12291 = vrcp.f32 %v2956_v58 }
 0xa6c   :  { %v2959_v62 = vpop.xlane.xlu1 %2958 }
 0xa6d   :  { %v2953_v14 = vpop.xlane.xlu0 %2952 }
 0xa6e   :  { %12293 = vrcp.f32 %v2953_v14 }
 0xa6f   :  { %12295 = vrcp.f32 %v2959_v62 }
 0xa70   :  { %v2978_v24 = vpop.permute.xlu1 %2977 }
 0xa71   :  { %v2976_v40 = vpop.permute.xlu0 %2975  ;;  %11709 = vmatpush3.msra.mxu0 %v2978_v24 }
 0xa72   :  { %11710 = vmatprep.subr.mxu0 %v12426_v1 }
 0xa73   :  { %11711 = vmatpush3.msra.mxu0 %v2976_v40 }
 0xa74   :  { %11713 = vmatmul.mubr.msk.f32.vlgmr.msra.gmra.mxu0 %vm1472_vm5, %v2969_v49  ;;  %11736 = vmatprep.subr.mxu0 %v12426_v1 }
 0xa75   :  { %v3079_v7 = vpop.permute.xlu0 %3078  ;;  %11715 = vmatprep.mubr.msk.f32.mxu0 %vm12427_vm2, %v12426_v1  ;;  %11737 = vmatpush3.msra.mxu0 %v185_v0 }
 0xa76   :  { %11722 = vmatpush3.msk.msra.mxu1 %vm1557_vm4, %v3079_v7  ;;  %v12292_v57 = vpop.eup %12291  ;;  %11738 = vmatprep.subr.mxu0 %v12426_v1 }
 0xa77   :  { %11723 = vmatprep.subr.mxu1 %v12426_v1  ;;  %v2972_v27 = vmul.f32 %v12292_v57, %v13318_v12  ;;  %11739 = vmatpush3.msra.mxu0 %v184_v39 }
 0xa78   :  { %11716 = vmatmul.mubr.msk.f32.gmra.mxu0 %vm1472_vm5, %v2970_v54  ;;  %11740 = vmatprep.subr.mxu0 %v12426_v1 }
 0xa79   :  { %v3077_v19 = vpop.permute.xlu0 %3076  ;;  %11718 = vmatprep.mubr.msk.f32.mxu0 %vm12427_vm2, %v12426_v1  ;;  %11741 = vmatpush3.msra.mxu0 %v183_v9 }
 0xa7a   :  { %11724 = vmatpush3.msra.mxu1 %v3077_v19  ;;  %11742 = vmatprep.subr.mxu0 %v12426_v1 }
 0xa7b   :  { %v12294_v28 = vpop.eup %12293  ;;  %11725 = vmatprep.subr.mxu1 %v12426_v1  ;;  %11743 = vmatpush3.msra.mxu0 %v182_v3 }
 0xa7c   :  { %v2971_v32 = vmul.f32 %v12294_v28, %v12284_v22  ;;  %v12296_v43 = vpop.eup %12295  ;;  %11782 = vmatprep.subr.mxu0 %v12426_v1 }
 0xa7d   :  { %v3075_v34 = vpop.permute.xlu0 %3074  ;;  %v2973_v47 = vmul.f32 %v12296_v43, %v13322_v17 }
 0xa7e   :  { %11719 = vmatmul.mubr.msk.f32.gmra.mxu0 %vm1472_vm5, %v2971_v32  ;;  %11726 = vmatpush3.msra.mxu1 %v3075_v34 }
 0xa7f   :  { %11728 = vmatmul.mubr.msk.f32.vlgmr.msra.gmra.mxu1 %vm1472_vm5, %v2972_v27  ;;  %11744 = vmatprep.mubr.msk.f32.mxu0 %vm12427_vm2, %v12426_v1 }
 0xa80   :  { %11730 = vmatprep.mubr.msk.f32.mxu1 %vm12427_vm2, %v12426_v1  ;;  %11759 = vmatprep.subr.mxu1 %v12426_v1 }
 0xa81   :  { %v3180_v16 = vpop.permute.xlu0 %3179 }
 0xa83   :  { %11731 = vmatmul.mubr.msk.f32.gmra.mxu1 %vm1472_vm5, %v2973_v47 }
 0xa84   :  { %11733 = vmatprep.mubr.msk.f32.mxu1 %vm12427_vm2, %v12426_v1 }
 0xa85   :  { %v3204_v17 = vpop.permute.xlu0 %3203 }
 0xa89   :  { %v3182_v22 = vpop.permute.xlu0 %3181 }
 0xa8a   :  { %v3246_v62 = vsel %vm1163_vm3, %v13051_v2, %v3182_v22 }
 0xa8d   :  { %v3206_v45 = vpop.permute.xlu0 %3205 }
 0xa8e   :  { %v3253_v14 = vsel %vm3251_vm7, %v3246_v62, %v3206_v45 }
 0xa91   :  { %v3186_v23 = vpop.permute.xlu0 %3185 }
 0xa92   :  { %v3248_v19 = vsel %vm1163_vm3, %v13055_v6, %v3186_v23 }
 0xa95   :  { %v3210_v25 = vpop.permute.xlu0 %3209 }
 0xa96   :  { %v3255_v47 = vsel %vm3251_vm7, %v3248_v19, %v3210_v25 }
 0xa99   :  { %v3184_v26 = vpop.permute.xlu0 %3183 }
 0xaa1   :  { %v2962_v38 = vpop.xlane.xlu1 %2961 }
 0xaa2   :  { %12297 = vrcp.f32 %v2962_v38  ;;  %v3247_v38 = vsel %vm1163_vm3, %v13053_v4, %v3184_v26 }
 0xaa5   :  { %v3188_v42 = vpop.permute.xlu1 %3187 }
 0xaaf   :  { %v12298_v48 = vpop.eup %12297 }
 0xab0   :  { %v2974_v50 = vmul.f32 %v12298_v48, %v12286_v55  ;;  %v3245_v55 = vsel %vm1163_vm3, %v13049_v63, %v3180_v16  ;;  %v3249_v48 = vsel %vm1163_vm3, %v13060_v18, %v3188_v42 }
 0xab2   :  { %11734 = vmatmul.mubr.msk.f32.gmra.mxu1 %vm1472_vm5, %v2974_v50 }
 0xab3   :  { %11767 = vmatprep.mubr.msk.f32.mxu1 %vm12427_vm2, %v12426_v1 }
 0xb34   :  { %v3060_v51 = vpop.f32.mrf.mxu0 }
 0xb35   :  { %3227 = vrot.lane.b32.xlu0 %v3060_v51, %s12442_s30 }
 0xb36   :  { %v11714_v60 = vpop.f32.mrf.mxu0 }
 0xb38   :  { %v3065_v8 = vpop.f32.mrf.mxu0 }
 0xb39   :  { %3207 = vrot.lane.b32.xlu0 %v13292_v44, %s12441_s13  ;;  %3229 = vrot.lane.b32.xlu1 %v3065_v8, %s12442_s30 }
 0xb3a   :  { %v11717_v21 = vpop.f32.mrf.mxu0 }
 0xb3d   :  { %3211 = vrot.lane.b32.xlu1 %v13297_v59, %s12441_s13 }
 0xb3e   :  { %v3070_v44 = vpop.f32.mrf.mxu0 }
 0xb3f   :  { %v3159_v5 = vpop.f32.mrf.mxu1 }
 0xb40   :  { %3233 = vrot.lane.b32.xlu0 %v3159_v5, %s12442_s30  ;;  %v11720_v10 = vpop.f32.mrf.mxu0 }
 0xb41   :  { %v11729_v11 = vpop.f32.mrf.mxu1 }
 0xb43   :  { %v3164_v13 = vpop.f32.mrf.mxu1 }
 0xb44   :  { %3235 = vrot.lane.b32.xlu1 %v3164_v13, %s12442_s30  ;;  %3231 = vrot.lane.b32.xlu0 %v3070_v44, %s12442_s30 }
 0xb45   :  { %v11732_v59 = vpop.f32.mrf.mxu1 }
 0xb48   :  { %3213 = vrot.lane.b32.xlu1 %v13300_v53, %s12441_s13  ;;  %3189 = vrot.lane.b32.xlu0 %v13204_v41, %s12440_s12  ;;  %v3252_v53 = vsel %vm3251_vm7, %v3245_v55, %v3204_v17 }
 0xb72   :  { %v3169_v61 = vpop.f32.mrf.mxu1 }
 0xb73   :  { %3237 = vrot.lane.b32.xlu0 %v3169_v61, %s12442_s30 }
 0xb74   :  { %v11735_v12 = vpop.f32.mrf.mxu1 }
 0xba7   :  { %v3228_v41 = vpop.permute.xlu0 %3227 }
 0xba8   :  { %v3259_v52 = vsel %vm3258_vm8, %v3252_v53, %v3228_v41 }
 0xba9   :  { %v3271_v56 = vcombine.high %v3259_v52, %v3259_v52  ;;  %v3278_v58 = vrot.slane %v3259_v52, %v12691_v46 }
 0xbab   :  { %v3285_v33 = vrot.slane %v3271_v56, %v12691_v46  ;;  %v3286_v24 = vcombine.high %v3278_v58, %v3278_v58  ;;  %v3230_v40 = vpop.permute.xlu1 %3229  ;;  %v3294_v15 = vrot.slane %v3278_v58, %v12691_v46  ;;  %v3208_v2 = vpop.permute.xlu0 %3207 }
 0xbac   :  { %v3260_v63 = vsel %vm3258_vm8, %v3253_v14, %v3230_v40  ;;  %v3254_v16 = vsel %vm3251_vm7, %v3247_v38, %v3208_v2 }
 0xbad   :  { %v3287_v49 = vcombine.high %v3285_v33, %v3285_v33  ;;  %v3308_v7 = vrot.slane %v3286_v24, %v12691_v46  ;;  %v3320_v54 = vcombine.high %v3260_v63, %v3260_v63  ;;  %v3301_v57 = vrot.slane %v3285_v33, %v12691_v46 }
 0xbae   :  { %v3327_v28 = vrot.slane %v3260_v63, %v12691_v46 }
 0xbaf   :  { %v3315_v32 = vrot.slane %v3287_v49, %v12691_v46  ;;  %v3501_v27 = vcombine.low %v3294_v15, %v3308_v7  ;;  %v10999_v34 = vcombine.high %v3294_v15, %v3308_v7  ;;  %v3334_v43 = vrot.slane %v3320_v54, %v12691_v46  ;;  %v3212_v44 = vpop.permute.xlu1 %3211 }
 0xbb0   :  { %v3335_v6 = vcombine.high %v3327_v28, %v3327_v28  ;;  %v3343_v21 = vrot.slane %v3327_v28, %v12691_v46  ;;  %v3256_v17 = vsel %vm3251_vm7, %v3249_v48, %v3212_v44 }
 0xbb1   :  { %v3503_v50 = vcombine.low %v3301_v57, %v3315_v32  ;;  %v11000_v51 = vcombine.high %v3301_v57, %v3315_v32  ;;  %v3511_v60 = vrot.slane %v3501_v27, %v12691_v46  ;;  %v3518_v0 = vrot.slane %v10999_v34, %v12691_v46 }
 0xbb2   :  { %v3336_v8 = vcombine.high %v3334_v43, %v3334_v43  ;;  %v3350_v39 = vrot.slane %v3334_v43, %v12691_v46  ;;  %v3357_v9 = vrot.slane %v3335_v6, %v12691_v46  ;;  %v3234_v5 = vpop.permute.xlu0 %3233 }
 0xbb3   :  { %v3525_v4 = vrot.slane %v3503_v50, %v12691_v46  ;;  %v3532_v18 = vrot.slane %v11000_v51, %v12691_v46  ;;  %v3533_v10 = vcombine.low %v3511_v60, %v3518_v0  ;;  %v3262_v3 = vsel %vm3258_vm8, %v3255_v47, %v3234_v5 }
 0xbb4   :  { %v3364_v11 = vrot.slane %v3336_v8, %v12691_v46  ;;  %v3550_v13 = vcombine.low %v3343_v21, %v3357_v9  ;;  %v11001_v59 = vcombine.high %v3343_v21, %v3357_v9  ;;  %v3383_v61 = vcombine.high %v3262_v3, %v3262_v3 }
 0xbb5   :  { %v3534_v12 = vcombine.low %v3525_v4, %v3532_v18  ;;  %v3390_v22 = vrot.slane %v3262_v3, %v12691_v46  ;;  %v3541_v45 = vrot.slane %v3533_v10, %v12691_v46 }
 0xbb6   :  { %v3552_v23 = vcombine.low %v3350_v39, %v3364_v11  ;;  %v11002_v25 = vcombine.high %v3350_v39, %v3364_v11  ;;  %v3560_v26 = vrot.slane %v3550_v13, %v12691_v46  ;;  %v3236_v55 = vpop.permute.xlu1 %3235  ;;  %v3397_v42 = vrot.slane %v3383_v61, %v12691_v46  ;;  %v3232_v56 = vpop.permute.xlu0 %3231 }
 0xbb7   :  { %v3548_v53 = vrot.slane %v3534_v12, %v12691_v46  ;;  %v3398_v41 = vcombine.high %v3390_v22, %v3390_v22  ;;  %v3406_v52 = vrot.slane %v3390_v22, %v12691_v46  ;;  %v3567_v58 = vrot.slane %v11001_v59, %v12691_v46 }
 0xbb8   :  { %v3574_v62 = vrot.slane %v3552_v23, %v12691_v46  ;;  %v3581_v14 = vrot.slane %v11002_v25, %v12691_v46  ;;  %v3263_v33 = vsel %vm3258_vm8, %v3256_v17, %v3236_v55  ;;  %v3399_v40 = vcombine.high %v3397_v42, %v3397_v42 }
 0xbb9   :  { %v3549_v24 = vcombine.low %v3541_v45, %v3548_v53  ;;  %v3413_v63 = vrot.slane %v3397_v42, %v12691_v46  ;;  %v3420_v49 = vrot.slane %v3398_v41, %v12691_v46  ;;  %v3428_v15 = vcombine.high %v3406_v52, %v3406_v52 }
 0xbba   :  { %v3432_v7 = vcombine.high %v3263_v33, %v3263_v33  ;;  %v3439_v54 = vrot.slane %v3263_v33, %v12691_v46  ;;  %v3261_v19 = vsel %vm3258_vm8, %v3254_v16, %v3232_v56  ;;  %v3427_v57 = vrot.slane %v3399_v40, %v12691_v46  ;;  %v3214_v40 = vpop.permute.xlu1 %3213 }
 0xbbb   :  { %v3429_v2 = vcombine.high %v3413_v63, %v3413_v63  ;;  %v3430_v28 = vcombine.high %v3420_v49, %v3420_v49  ;;  %v3375_v32 = vrot.slane %v3261_v19, %v12691_v46  ;;  %11745 = vmatmul.mubr.msk.f32.vlgmr.msra.gmra.mxu0 %vm42_vm0, %v3549_v24  ;;  %v3582_v27 = vcombine.low %v3560_v26, %v3567_v58  ;;  %v3190_v24 = vpop.permute.xlu0 %3189 }
 0xbbc   :  { %v3446_v34 = vrot.slane %v3432_v7, %v12691_v46  ;;  %v3447_v43 = vcombine.high %v3439_v54, %v3439_v54  ;;  %v3455_v47 = vrot.slane %v3439_v54, %v12691_v46  ;;  %11747 = vmatprep.mubr.msk.f32.mxu0 %vm12427_vm2, %v12426_v1  ;;  %v3431_v6 = vcombine.high %v3427_v57, %v3427_v57 }
 0xbbd   :  { %v3601_v38 = vcombine.low %v3430_v28, %v3413_v63  ;;  %v3602_v48 = vcombine.low %v3427_v57, %v3429_v2  ;;  %v3382_v50 = vrot.slane %v3375_v32, %v12691_v46  ;;  %v3600_v51 = vcombine.low %v3420_v49, %v3428_v15 }
 0xbbe   :  { %v3448_v60 = vcombine.high %v3446_v34, %v3446_v34  ;;  %v3462_v0 = vrot.slane %v3446_v34, %v12691_v46  ;;  %v3469_v8 = vrot.slane %v3447_v43, %v12691_v46  ;;  %v3477_v9 = vcombine.high %v3455_v47, %v3455_v47  ;;  %v188_v34 = vld [vmem:[%s15142_s7 + $0x8] sm:$0xff]  ;;  %v187_v43 = vld [vmem:[%s15142_s7] sm:$0xff] }
 0xbbf   :  { %v3623_v21 = vrot.slane %v3601_v38, %v12691_v46  ;;  %v3630_v39 = vrot.slane %v3602_v48, %v12691_v46  ;;  %v3648_v44 = vcombine.low %v3431_v6, %v3455_v47  ;;  %v3599_v10 = vcombine.low %v3382_v50, %v3406_v52  ;;  %v13524_v47 = vld [vmem:[%s15141_s6] ss:$0 sm:$0xff] }
 0xbc0   :  { %v3476_v5 = vrot.slane %v3448_v60, %v12691_v46  ;;  %v3478_v4 = vcombine.high %v3462_v0, %v3462_v0  ;;  %v3479_v18 = vcombine.high %v3469_v8, %v3469_v8  ;;  %v3649_v3 = vcombine.low %v3469_v8, %v3477_v9 }
 0xbc1   :  { %v3658_v11 = vrot.slane %v3648_v44, %v12691_v46  ;;  %v3583_v13 = vcombine.low %v3574_v62, %v3581_v14  ;;  %v3616_v59 = vrot.slane %v3600_v51, %v12691_v46  ;;  %v3609_v16 = vrot.slane %v3599_v10, %v12691_v46 }
 0xbc2   :  { %v3650_v61 = vcombine.low %v3479_v18, %v3462_v0  ;;  %v3651_v12 = vcombine.low %v3476_v5, %v3478_v4  ;;  %v3665_v17 = vrot.slane %v3649_v3, %v12691_v46  ;;  %v3590_v22 = vrot.slane %v3582_v27, %v12691_v46  ;;  %v189_v27 = vld [vmem:[%s15142_s7 + $0x10] sm:$0xff] }
 0xbc3   :  { %v3597_v45 = vrot.slane %v3583_v13, %v12691_v46  ;;  %v3632_v23 = vcombine.low %v3623_v21, %v3630_v39  ;;  %v3631_v55 = vcombine.low %v3609_v16, %v3616_v59  ;;  %v3250_v63 = vsel %vm1163_vm3, %v13062_v20, %v3190_v24  ;;  %v190_v20 = vld [vmem:[%s15142_s7 + $0x18] sm:$0xff] }
 0xbc4   :  { %v3672_v25 = vrot.slane %v3650_v61, %v12691_v46  ;;  %v3679_v26 = vrot.slane %v3651_v12, %v12691_v46  ;;  %v3680_v53 = vcombine.low %v3658_v11, %v3665_v17  ;;  %v3257_v49 = vsel %vm3251_vm7, %v3250_v63, %v3214_v40  ;;  %11760 = vmatpush3.msra.mxu1 %v190_v20 }
 0xbc5   :  { %v3598_v42 = vcombine.low %v3590_v22, %v3597_v45  ;;  %v3646_v41 = vrot.slane %v3632_v23, %v12691_v46  ;;  %v3639_v52 = vrot.slane %v3631_v55, %v12691_v46  ;;  %v3480_v19 = vcombine.high %v3476_v5, %v3476_v5  ;;  %11761 = vmatprep.subr.mxu1 %v12426_v1 }
 0xbc6   :  { %v3681_v56 = vcombine.low %v3672_v25, %v3679_v26  ;;  %v3688_v14 = vrot.slane %v3680_v53, %v12691_v46  ;;  %11762 = vmatpush3.msra.mxu1 %v189_v27 }
 0xbc7   :  { %11748 = vmatmul.mubr.msk.f32.gmra.mxu0 %vm42_vm0, %v3598_v42  ;;  %v3647_v58 = vcombine.low %v3639_v52, %v3646_v41  ;;  %11763 = vmatprep.subr.mxu1 %v12426_v1 }
 0xbc8   :  { %11750 = vmatprep.mubr.msk.f32.mxu0 %vm12427_vm2, %v12426_v1  ;;  %v3695_v62 = vrot.slane %v3681_v56, %v12691_v46  ;;  %11764 = vmatpush3.msra.mxu1 %v188_v34 }
 0xbc9   :  { %11765 = vmatprep.subr.mxu1 %v12426_v1 }
 0xbca   :  { %v3696_v33 = vcombine.low %v3688_v14, %v3695_v62  ;;  %11766 = vmatpush3.msra.mxu1 %v187_v43 }
 0xbcb   :  { %11751 = vmatmul.mubr.msk.f32.gmra.mxu0 %vm42_vm0, %v3647_v58  ;;  %11823 = vmatprep.subr.mxu1 %v12426_v1 }
 0xbcc   :  { %11753 = vmatprep.mubr.msk.f32.mxu0 %vm12427_vm2, %v12426_v1 }
 0xbcf   :  { %11754 = vmatmul.mubr.msk.f32.gmra.mxu0 %vm42_vm0, %v3696_v33 }
 0xbd0   :  { %11756 = vmatprep.mubr.msk.f32.mxu0 %vm12427_vm2, %v12426_v1 }
 0xbe5   :  { %v3238_v15 = vpop.permute.xlu0 %3237 }
 0xbe6   :  { %v3264_v7 = vsel %vm3258_vm8, %v3257_v49, %v3238_v15 }
 0xbe7   :  { %v3487_v54 = vrot.slane %v3264_v7, %v12691_v46 }
 0xbe9   :  { %v3494_v57 = vrot.slane %v3487_v54, %v12691_v46 }
 0xbeb   :  { %v3697_v2 = vcombine.low %v3480_v19, %v3494_v57 }
 0xbed   :  { %v3704_v28 = vrot.slane %v3697_v2, %v12691_v46 }
 0xbef   :  { %v3711_v32 = vrot.slane %v3704_v28, %v12691_v46 }
 0xbf1   :  { %11757 = vmatmul.mubr.msk.f32.gmra.mxu0 %vm42_vm0, %v3711_v32 }
 0xbf2   :  { %11808 = vmatprep.mubr.msk.f32.mxu0 %vm12427_vm2, %v12426_v1 }
 0xc7b   :  { %v3788_v38 = vpop.f32.mrf.mxu0 }
 0xc7c   :  { %v3789_v48 = vadd.f32 %v13524_v47, %v3788_v38 }
 0xc7d   :  { %v11746_v6 = vpop.f32.mrf.mxu0 }
 0xc7e   :  { %v3817_v50 = vcombine.high %v3789_v48, %v3789_v48  ;;  %v3824_v51 = vrot.slane %v3789_v48, %v12691_v46 }
 0xc80   :  { %v3831_v60 = vrot.slane %v3817_v50, %v12691_v46  ;;  %v3832_v0 = vcombine.high %v3824_v51, %v3824_v51  ;;  %v3840_v44 = vrot.slane %v3824_v51, %v12691_v46  ;;  %v204_v51 = vld [vmem:[%s15144_s9 + $0x60] sm:$0xf] }
 0xc81   :  { %11783 = vmatpush3.msk.msra.mxu0 %vm4913_vm9, %v204_v51 }
 0xc82   :  { %v3833_v8 = vcombine.high %v3831_v60, %v3831_v60  ;;  %v3854_v21 = vrot.slane %v3832_v0, %v12691_v46  ;;  %v3847_v39 = vrot.slane %v3831_v60, %v12691_v46  ;;  %v203_v60 = vld [vmem:[%s15144_s9 + $0x58] sm:$0xff]  ;;  %11784 = vmatprep.subr.mxu0 %v12426_v1 }
 0xc83   :  { %11785 = vmatpush3.msra.mxu0 %v203_v60 }
 0xc84   :  { %v3861_v9 = vrot.slane %v3833_v8, %v12691_v46  ;;  %v4035_v18 = vcombine.low %v3840_v44, %v3854_v21  ;;  %v11008_v10 = vcombine.high %v3840_v44, %v3854_v21  ;;  %v202_v21 = vld [vmem:[%s15144_s9 + $0x50] sm:$0xff]  ;;  %11786 = vmatprep.subr.mxu0 %v12426_v1 }
 0xc85   :  { %11787 = vmatpush3.msra.mxu0 %v202_v21 }
 0xc86   :  { %v4037_v5 = vcombine.low %v3847_v39, %v3861_v9  ;;  %v11009_v4 = vcombine.high %v3847_v39, %v3861_v9  ;;  %v4045_v17 = vrot.slane %v4035_v18, %v12691_v46  ;;  %v4052_v22 = vrot.slane %v11008_v10, %v12691_v46  ;;  %11788 = vmatprep.subr.mxu0 %v12426_v1 }
 0xc87   :  { %v3793_v3 = vpop.f32.mrf.mxu0 }
 0xc88   :  { %v3794_v11 = vadd.f32 %v13524_v47, %v3793_v3  ;;  %v4059_v13 = vrot.slane %v4037_v5, %v12691_v46  ;;  %v4066_v59 = vrot.slane %v11009_v4, %v12691_v46  ;;  %v4067_v56 = vcombine.low %v4045_v17, %v4052_v22 }
 0xc89   :  { %v11749_v61 = vpop.f32.mrf.mxu0 }
 0xc8a   :  { %v3866_v12 = vcombine.high %v3794_v11, %v3794_v11  ;;  %v3873_v16 = vrot.slane %v3794_v11, %v12691_v46  ;;  %v4068_v26 = vcombine.low %v4059_v13, %v4066_v59  ;;  %v4075_v2 = vrot.slane %v4067_v56, %v12691_v46  ;;  %v199_v59 = vld [vmem:[%s15144_s9 + $0x38] sm:$0xff] }
 0xc8b   :  { %v3798_v45 = vpop.f32.mrf.mxu0 }
 0xc8c   :  { %v3880_v23 = vrot.slane %v3866_v12, %v12691_v46  ;;  %v3881_v25 = vcombine.high %v3873_v16, %v3873_v16  ;;  %v3799_v55 = vadd.f32 %v13524_v47, %v3798_v45  ;;  %v3889_v41 = vrot.slane %v3873_v16, %v12691_v46  ;;  %v198_v16 = vld [vmem:[%s15144_s9 + $0x30] sm:$0xff] }
 0xc8d   :  { %v11752_v53 = vpop.f32.mrf.mxu0  ;;  %v4082_v63 = vrot.slane %v4068_v26, %v12691_v46 }
 0xc8e   :  { %v3882_v42 = vcombine.high %v3880_v23, %v3880_v23  ;;  %v3903_v52 = vrot.slane %v3881_v25, %v12691_v46  ;;  %v3922_v58 = vrot.slane %v3799_v55, %v12691_v46  ;;  %v3896_v14 = vrot.slane %v3880_v23, %v12691_v46  ;;  %v197_v25 = vld [vmem:[%s15144_s9 + $0x28] sm:$0xff] }
 0xc8f   :  { %v3803_v62 = vpop.f32.mrf.mxu0  ;;  %v4083_v34 = vcombine.low %v4075_v2, %v4082_v63  ;;  %v3915_v6 = vcombine.high %v3799_v55, %v3799_v55 }
 0xc90   :  { %v3910_v33 = vrot.slane %v3882_v42, %v12691_v46  ;;  %v4084_v24 = vcombine.low %v3889_v41, %v3903_v52  ;;  %v11010_v40 = vcombine.high %v3889_v41, %v3903_v52  ;;  %v13548_v49 = vrot.slane %v3922_v58, %v12691_v46  ;;  %v196_v42 = vld [vmem:[%s15144_s9 + $0x20] sm:$0xff] }
 0xc91   :  { %v11755_v15 = vpop.f32.mrf.mxu0  ;;  %v13567_v0 = vadd.f32 %v4083_v34, %v12655_v29  ;;  %v3929_v9 = vrot.slane %v3915_v6, %v12691_v46  ;;  %v201_v29 = vld [vmem:[%s15144_s9 + $0x48] sm:$0xff]  ;;  %v3930_v10 = vcombine.high %v3922_v58, %v3922_v58 }
 0xc92   :  { %v4086_v7 = vcombine.low %v3896_v14, %v3910_v33  ;;  %v11011_v54 = vcombine.high %v3896_v14, %v3910_v33  ;;  %v4094_v19 = vrot.slane %v4084_v24, %v12691_v46  ;;  %v4101_v57 = vrot.slane %v11010_v40, %v12691_v46  ;;  %11789 = vmatpush3.msra.mxu0 %v201_v29 }
 0xc93   :  { %v4139_v27 = vrot.slane %v13548_v49, %v12691_v46  ;;  %v4271_v5 = vsel %vm42_vm0, %v13567_v0, 0.0  ;;  %v3931_v3 = vcombine.high %v3929_v9, %v3929_v9  ;;  %11790 = vmatprep.subr.mxu0 %v12426_v1  ;;  %v3952_v17 = vrot.slane %v3930_v10, %v12691_v46 }
 0xc94   :  { %v4108_v28 = vrot.slane %v4086_v7, %v12691_v46  ;;  %v4115_v32 = vrot.slane %v11011_v54, %v12691_v46  ;;  %v4116_v20 = vcombine.low %v4094_v19, %v4101_v57  ;;  %v3945_v26 = vrot.slane %v3929_v9, %v12691_v46 }
 0xc95   :  { %v4146_v50 = vrot.slane %v4139_v27, %v12691_v46  ;;  %v3959_v22 = vrot.slane %v3931_v3, %v12691_v46  ;;  %v3962_v41 = vcombine.high %v3952_v17, %v3952_v17  ;;  %v3960_v14 = vcombine.high %v13548_v49, %v13548_v49 }
 0xc96   :  { %v4117_v43 = vcombine.low %v4108_v28, %v4115_v32  ;;  %v4124_v38 = vrot.slane %v4116_v20, %v12691_v46  ;;  %v3961_v33 = vcombine.high %v3945_v26, %v3945_v26 }
 0xc97   :  { %v13579_v44 = vadd.f32 %v4146_v50, %v12659_v31  ;;  %v200_v31 = vld [vmem:[%s15144_s9 + $0x40] sm:$0xff]  ;;  %v3963_v52 = vcombine.high %v3959_v22, %v3959_v22  ;;  %v4148_v15 = vcombine.low %v3962_v41, %v3945_v26  ;;  %v4147_v2 = vcombine.low %v3952_v17, %v3960_v14 }
 0xc98   :  { %v4131_v48 = vrot.slane %v4117_v43, %v12691_v46  ;;  %11791 = vmatpush3.msra.mxu0 %v200_v31  ;;  %v4149_v49 = vcombine.low %v3959_v22, %v3961_v33 }
 0xc99   :  { %v4274_v11 = vsel %vm45_vm1, %v13579_v44, 0.0  ;;  %11792 = vmatprep.subr.mxu0 %v12426_v1  ;;  %v4164_v27 = vrot.slane %v4148_v15, %v12691_v46  ;;  %v4157_v60 = vrot.slane %v4147_v2, %v12691_v46 }
 0xc9a   :  { %v4132_v8 = vcombine.low %v4124_v38, %v4131_v48  ;;  %11793 = vmatpush3.msra.mxu0 %v199_v59 }
 0xc9b   :  { %11794 = vmatprep.subr.mxu0 %v12426_v1  ;;  %v4179_v31 = vcombine.low %v4157_v60, %v4164_v27 }
 0xc9c   :  { %v13575_v39 = vadd.f32 %v4132_v8, %v12657_v30  ;;  %v3804_v30 = vadd.f32 %v13524_v47, %v3803_v62  ;;  %11795 = vmatpush3.msra.mxu0 %v198_v16  ;;  %v195_v62 = vld [vmem:[%s15144_s9 + $0x18] sm:$0xff]  ;;  %v4171_v8 = vrot.slane %v4149_v49, %v12691_v46 }
 0xc9d   :  { %11796 = vmatprep.subr.mxu0 %v12426_v1 }
 0xc9e   :  { %v4272_v4 = vsel %vm42_vm0, %v13575_v39, 0.0  ;;  %v3971_v61 = vrot.slane %v3804_v30, %v12691_v46  ;;  %v3964_v45 = vcombine.high %v3804_v30, %v3804_v30  ;;  %11797 = vmatpush3.msra.mxu0 %v197_v25 }
 0xc9f   :  { %v4273_v18 = vadd.f32 %v4272_v4, %v4271_v5  ;;  %11798 = vmatprep.subr.mxu0 %v12426_v1 }
 0xca0   :  { %v3979_v55 = vcombine.high %v3971_v61, %v3971_v61  ;;  %v3978_v56 = vrot.slane %v3964_v45, %v12691_v46  ;;  %v3987_v24 = vrot.slane %v3971_v61, %v12691_v46  ;;  %11799 = vmatpush3.msra.mxu0 %v196_v42 }
 0xca1   :  { %v4275_v13 = vadd.f32 %v4274_v11, %v4273_v18  ;;  %11800 = vmatprep.subr.mxu0 %v12426_v1 }
 0xca2   :  { %v4001_v40 = vrot.slane %v3979_v55, %v12691_v46  ;;  %v3980_v7 = vcombine.high %v3978_v56, %v3978_v56  ;;  %v4150_v54 = vcombine.low %v3963_v52, %v3987_v24  ;;  %11801 = vmatpush3.msra.mxu0 %v195_v62  ;;  %v3994_v57 = vrot.slane %v3978_v56, %v12691_v46 }
 0xca3   :  { %v4276_v12 = vrot.slane %v4275_v13, 4  ;;  %11802 = vmatprep.subr.mxu0 %v12426_v1  ;;  %v4009_v20 = vcombine.high %v3987_v24, %v3987_v24 }
 0xca4   :  { %v4011_v28 = vcombine.high %v4001_v40, %v4001_v40  ;;  %v4008_v34 = vrot.slane %v3980_v7, %v12691_v46  ;;  %v4178_v43 = vrot.slane %v4150_v54, %v12691_v46  ;;  %v4010_v50 = vcombine.high %v3994_v57, %v3994_v57 }
 0xca5   :  { %v4277_v23 = vadd.f32 %v4276_v12, %v4275_v13  ;;  %v4196_v30 = vcombine.low %v4001_v40, %v4009_v20 }
 0xca6   :  { %v4197_v21 = vcombine.low %v4011_v28, %v3994_v57  ;;  %v4180_v10 = vcombine.low %v4171_v8, %v4178_v43  ;;  %v4012_v59 = vcombine.high %v4008_v34, %v4008_v34 }
 0xca7   :  { %v4278_v53 = vrot.slane %v4277_v23, 2  ;;  %v4206_v45 = vrot.slane %v4196_v30, %v12691_v46 }
 0xca8   :  { %v4213_v12 = vrot.slane %v4197_v21, %v12691_v46  ;;  %v4194_v25 = vrot.slane %v4180_v10, %v12691_v46 }
 0xca9   :  { %v4279_v58 = vadd.f32 %v4278_v53, %v4277_v23  ;;  %v4187_v53 = vrot.slane %v4179_v31, %v12691_v46 }
 0xcaa   :  { %v4228_v52 = vcombine.low %v4206_v45, %v4213_v12 }
 0xcab   :  { %v4280_v63 = vrot.slane %v4279_v58, 1  ;;  %v4195_v14 = vcombine.low %v4187_v53, %v4194_v25 }
 0xcac   :  { %v4236_v40 = vrot.slane %v4228_v52, %v12691_v46 }
 0xcad   :  { %v4281_v19 = vadd.f32 %v4280_v63, %v4279_v58  ;;  %v13666_v54 = vadd.f32 %v4195_v14, %v12661_v35 }
 0xcaf   :  { %v4282_v32 = vmul.f32 0.05882353, %v4281_v19 }
 0xcb1   :  { %v13632_v38 = vsub.f32 %v13567_v0, %v4282_v32  ;;  %v13635_v48 = vsub.f32 %v13575_v39, %v4282_v32  ;;  %v13638_v6 = vsub.f32 %v13579_v44, %v4282_v32  ;;  %v3808_v51 = vpop.f32.mrf.mxu0  ;;  %v4305_v32 = vsel %vm42_vm0, %v13666_v54, 0.0 }
 0xcb2   :  { %v3809_v9 = vadd.f32 %v13524_v47, %v3808_v51  ;;  %v4198_v47 = vcombine.low %v4008_v34, %v4010_v50 }
 0xcb3   :  { %v4286_v29 = vmul.f32 %v13632_v38, %v13632_v38  ;;  %v4287_v5 = vmul.f32 %v13635_v48, %v13635_v48  ;;  %v4288_v4 = vmul.f32 %v13638_v6, %v13638_v6  ;;  %v11758_v18 = vpop.f32.mrf.mxu0 }
 0xcb4   :  { %v4019_v3 = vrot.slane %v3809_v9, %v12691_v46  ;;  %v4220_v42 = vrot.slane %v4198_v47, %v12691_v46 }
 0xcb5   :  { %v4289_v11 = vsel %vm42_vm0, %v4286_v29, 0.0  ;;  %v4290_v13 = vsel %vm42_vm0, %v4287_v5, 0.0  ;;  %v4292_v22 = vsel %vm45_vm1, %v4288_v4, 0.0 }
 0xcb6   :  { %v4291_v61 = vadd.f32 %v4290_v13, %v4289_v11  ;;  %v4020_v16 = vcombine.high %v4019_v3, %v4019_v3  ;;  %v4027_v17 = vrot.slane %v4019_v3, %v12691_v46 }
 0xcb8   :  { %v4293_v23 = vadd.f32 %v4292_v22, %v4291_v61  ;;  %v4034_v26 = vrot.slane %v4020_v16, %v12691_v46  ;;  %v4199_v55 = vcombine.low %v4012_v59, %v4027_v17 }
 0xcba   :  { %v4294_v41 = vrot.slane %v4293_v23, 4  ;;  %v4227_v56 = vrot.slane %v4199_v55, %v12691_v46  ;;  %v4251_v58 = vrot.slane %v4034_v26, %v12691_v46 }
 0xcbc   :  { %v4295_v62 = vadd.f32 %v4294_v41, %v4293_v23  ;;  %v4229_v33 = vcombine.low %v4220_v42, %v4227_v56  ;;  %v4258_v15 = vrot.slane %v4251_v58, %v12691_v46 }
 0xcbe   :  { %v4296_v24 = vrot.slane %v4295_v62, 2  ;;  %v4243_v63 = vrot.slane %v4229_v33, %v12691_v46  ;;  %v13672_v49 = vadd.f32 %v4258_v15, %v12665_v37 }
 0xcc0   :  { %v4297_v7 = vadd.f32 %v4296_v24, %v4295_v62  ;;  %v4244_v19 = vcombine.low %v4236_v40, %v4243_v63  ;;  %v4308_v35 = vsel %vm45_vm1, %v13672_v49, 0.0 }
 0xcc2   :  { %v4298_v57 = vrot.slane %v4297_v7, 1  ;;  %v13669_v2 = vadd.f32 %v4244_v19, %v12663_v36 }
 0xcc4   :  { %v4299_v28 = vadd.f32 %v4298_v57, %v4297_v7  ;;  %v4306_v20 = vsel %vm42_vm0, %v13669_v2, 0.0 }
 0xcc5   :  { %v4307_v27 = vadd.f32 %v4306_v20, %v4305_v32 }
 0xcc6   :  { %v4300_v34 = vmul.f32 0.0625, %v4299_v28 }
 0xcc7   :  { %v4309_v43 = vadd.f32 %v4308_v35, %v4307_v27 }
 0xcc8   :  { %12299 = vrsqrt.f32 %v4300_v34 }
 0xcc9   :  { %v4310_v50 = vrot.slane %v4309_v43, 4 }
 0xccb   :  { %v4311_v36 = vadd.f32 %v4310_v50, %v4309_v43 }
 0xccd   :  { %v4312_v51 = vrot.slane %v4311_v36, 2 }
 0xccf   :  { %v4313_v60 = vadd.f32 %v4312_v51, %v4311_v36 }
 0xcd1   :  { %v4314_v37 = vrot.slane %v4313_v60, 1 }
 0xcd3   :  { %v4315_v8 = vadd.f32 %v4314_v37, %v4313_v60 }
 0xcd5   :  { %v13680_v21 = vpop.eup %12299  ;;  %v4316_v9 = vmul.f32 0.05882353, %v4315_v8 }
 0xcd6   :  { %v4302_v29 = vmul.f32 %v13680_v21, %v13632_v38  ;;  %v4303_v5 = vmul.f32 %v13680_v21, %v13635_v48 }
 0xcd7   :  { %v13687_v4 = vsub.f32 %v13666_v54, %v4316_v9  ;;  %v13690_v30 = vsub.f32 %v13669_v2, %v4316_v9  ;;  %v13693_v18 = vsub.f32 %v13672_v49, %v4316_v9 }
 0xcd8   :  { %v4345_v31 = vcombine.high %v4302_v29, %v4302_v29  ;;  %v4352_v10 = vrot.slane %v4302_v29, %v12691_v46  ;;  %v4394_v3 = vcombine.high %v4303_v5, %v4303_v5  ;;  %v4401_v13 = vrot.slane %v4303_v5, %v12691_v46 }
 0xcd9   :  { %v4320_v11 = vmul.f32 %v13687_v4, %v13687_v4  ;;  %v4321_v38 = vmul.f32 %v13690_v30, %v13690_v30  ;;  %v4322_v48 = vmul.f32 %v13693_v18, %v13693_v18 }
 0xcda   :  { %v4359_v47 = vrot.slane %v4345_v31, %v12691_v46  ;;  %v4360_v59 = vcombine.high %v4352_v10, %v4352_v10  ;;  %v4408_v61 = vrot.slane %v4394_v3, %v12691_v46  ;;  %v4368_v17 = vrot.slane %v4352_v10, %v12691_v46 }
 0xcdb   :  { %v4323_v12 = vsel %vm42_vm0, %v4320_v11, 0.0  ;;  %v4324_v16 = vsel %vm42_vm0, %v4321_v38, 0.0  ;;  %v4409_v22 = vcombine.high %v4401_v13, %v4401_v13  ;;  %v4326_v23 = vsel %vm45_vm1, %v4322_v48, 0.0 }
 0xcdc   :  { %v4325_v45 = vadd.f32 %v4324_v16, %v4323_v12  ;;  %v4361_v25 = vcombine.high %v4359_v47, %v4359_v47  ;;  %v4382_v26 = vrot.slane %v4360_v59, %v12691_v46  ;;  %v4375_v55 = vrot.slane %v4359_v47, %v12691_v46 }
 0xcdd   :  { %v4410_v53 = vcombine.high %v4408_v61, %v4408_v61  ;;  %v4417_v42 = vrot.slane %v4401_v13, %v12691_v46  ;;  %v4431_v41 = vrot.slane %v4409_v22, %v12691_v46  ;;  %v4424_v14 = vrot.slane %v4408_v61, %v12691_v46 }
 0xcde   :  { %v4327_v52 = vadd.f32 %v4326_v23, %v4325_v45  ;;  %v4389_v56 = vrot.slane %v4361_v25, %v12691_v46  ;;  %v4575_v58 = vcombine.low %v4368_v17, %v4382_v26  ;;  %v11013_v62 = vcombine.high %v4368_v17, %v4382_v26 }
 0xcdf   :  { %v4438_v33 = vrot.slane %v4410_v53, %v12691_v46  ;;  %v4624_v24 = vcombine.low %v4417_v42, %v4431_v41  ;;  %v11015_v40 = vcombine.high %v4417_v42, %v4431_v41  ;;  %v4304_v59 = vmul.f32 %v13680_v21, %v13638_v6 }
 0xce0   :  { %v4328_v63 = vrot.slane %v4327_v52, 4  ;;  %v4577_v15 = vcombine.low %v4375_v55, %v4389_v56  ;;  %v11014_v7 = vcombine.high %v4375_v55, %v4389_v56  ;;  %v4585_v19 = vrot.slane %v4575_v58, %v12691_v46 }
 0xce1   :  { %v4592_v57 = vrot.slane %v11013_v62, %v12691_v46  ;;  %v4626_v28 = vcombine.low %v4424_v14, %v4438_v33  ;;  %v11016_v32 = vcombine.high %v4424_v14, %v4438_v33  ;;  %v4634_v20 = vrot.slane %v4624_v24, %v12691_v46 }
 0xce2   :  { %v4329_v27 = vadd.f32 %v4328_v63, %v4327_v52  ;;  %v4599_v34 = vrot.slane %v4577_v15, %v12691_v46  ;;  %v4606_v35 = vrot.slane %v11014_v7, %v12691_v46  ;;  %v4641_v43 = vrot.slane %v11015_v40, %v12691_v46 }
 0xce3   :  { %v4607_v50 = vcombine.low %v4585_v19, %v4592_v57  ;;  %v4648_v36 = vrot.slane %v4626_v28, %v12691_v46  ;;  %v4655_v51 = vrot.slane %v11016_v32, %v12691_v46  ;;  %v4449_v17 = vrot.slane %v4304_v59, %v12691_v46 }
 0xce4   :  { %v4330_v60 = vrot.slane %v4329_v27, 2  ;;  %v4608_v37 = vcombine.low %v4599_v34, %v4606_v35  ;;  %v4656_v31 = vcombine.low %v4634_v20, %v4641_v43 }
 0xce5   :  { %v4657_v8 = vcombine.low %v4648_v36, %v4655_v51  ;;  %v4615_v29 = vrot.slane %v4607_v50, %v12691_v46  ;;  %v4456_v21 = vrot.slane %v4449_v17, %v12691_v46 }
 0xce6   :  { %v4331_v9 = vadd.f32 %v4330_v60, %v4329_v27  ;;  %v4622_v5 = vrot.slane %v4608_v37, %v12691_v46  ;;  %v4664_v48 = vrot.slane %v4656_v31, %v12691_v46 }
 0xce7   :  { %v4671_v11 = vrot.slane %v4657_v8, %v12691_v46 }
 0xce8   :  { %v4332_v10 = vrot.slane %v4331_v9, 1  ;;  %v4623_v3 = vcombine.low %v4615_v29, %v4622_v5 }
 0xce9   :  { %v4672_v47 = vcombine.low %v4664_v48, %v4671_v11 }
 0xcea   :  { %v4333_v38 = vadd.f32 %v4332_v10, %v4331_v9  ;;  %11768 = vmatmul.mubr.msk.f32.vlgmr.msra.gmra.mxu1 %vm42_vm0, %v4623_v3 }
 0xceb   :  { %11770 = vmatprep.mubr.msk.f32.mxu1 %vm12427_vm2, %v12426_v1 }
 0xcec   :  { %v4334_v13 = vmul.f32 0.0625, %v4333_v38 }
 0xcee   :  { %12301 = vrsqrt.f32 %v4334_v13  ;;  %11771 = vmatmul.mubr.msk.f32.gmra.mxu1 %vm42_vm0, %v4672_v47 }
 0xcef   :  { %11773 = vmatprep.mubr.msk.f32.mxu1 %vm12427_vm2, %v12426_v1 }
 0xcfb   :  { %v12302_v61 = vpop.eup %12301 }
 0xcfc   :  { %v4336_v12 = vmul.f32 %v12302_v61, %v13687_v4  ;;  %v4337_v16 = vmul.f32 %v12302_v61, %v13690_v30  ;;  %v4338_v42 = vmul.f32 %v12302_v61, %v13693_v18 }
 0xcfe   :  { %v4457_v22 = vcombine.high %v4336_v12, %v4336_v12  ;;  %v4464_v45 = vrot.slane %v4336_v12, %v12691_v46  ;;  %v4506_v23 = vcombine.high %v4337_v16, %v4337_v16  ;;  %v4513_v25 = vrot.slane %v4337_v16, %v12691_v46 }
 0xcff   :  { %v4561_v36 = vrot.slane %v4338_v42, %v12691_v46 }
 0xd00   :  { %v4471_v26 = vrot.slane %v4457_v22, %v12691_v46  ;;  %v4472_v55 = vcombine.high %v4464_v45, %v4464_v45  ;;  %v4480_v53 = vrot.slane %v4464_v45, %v12691_v46  ;;  %v4520_v6 = vrot.slane %v4506_v23, %v12691_v46 }
 0xd01   :  { %v4521_v4 = vcombine.high %v4513_v25, %v4513_v25  ;;  %v4529_v30 = vrot.slane %v4513_v25, %v12691_v46  ;;  %v4568_v47 = vrot.slane %v4561_v36, %v12691_v46  ;;  %v194_v25 = vld [vmem:[%s15144_s9 + $0x10] sm:$0xff] }
 0xd02   :  { %v4473_v41 = vcombine.high %v4471_v26, %v4471_v26  ;;  %v4487_v52 = vrot.slane %v4471_v26, %v12691_v46  ;;  %v4494_v56 = vrot.slane %v4472_v55, %v12691_v46  ;;  %v4502_v58 = vcombine.high %v4480_v53, %v4480_v53  ;;  %v193_v26 = vld [vmem:[%s15144_s9 + $0x8] sm:$0xff]  ;;  %11803 = vmatpush3.msra.mxu0 %v194_v25  ;;  %v192_v55 = vld [vmem:[%s15144_s9] sm:$0xff] }
 0xd03   :  { %v4673_v62 = vcombine.low %v4456_v21, %v4480_v53  ;;  %v4522_v14 = vcombine.high %v4520_v6, %v4520_v6  ;;  %v4536_v33 = vrot.slane %v4520_v6, %v12691_v46  ;;  %v4543_v24 = vrot.slane %v4521_v4, %v12691_v46  ;;  %11804 = vmatprep.subr.mxu0 %v12426_v1  ;;  %v11012_v53 = vld [vmem:[%s15143_s8] ss:$0 sm:$0xff] }
 0xd04   :  { %v4501_v40 = vrot.slane %v4473_v41, %v12691_v46  ;;  %v4503_v63 = vcombine.high %v4487_v52, %v4487_v52  ;;  %v4504_v15 = vcombine.high %v4494_v56, %v4494_v56  ;;  %v4674_v7 = vcombine.low %v4494_v56, %v4502_v58  ;;  %11805 = vmatpush3.msra.mxu0 %v193_v26 }
 0xd05   :  { %v4683_v19 = vrot.slane %v4673_v62, %v12691_v46  ;;  %v4550_v18 = vrot.slane %v4522_v14, %v12691_v46  ;;  %v4551_v57 = vcombine.high %v4529_v30, %v4529_v30  ;;  %v4552_v28 = vcombine.high %v4536_v33, %v4536_v33  ;;  %11806 = vmatprep.subr.mxu0 %v12426_v1 }
 0xd06   :  { %v4675_v32 = vcombine.low %v4504_v15, %v4487_v52  ;;  %v4676_v20 = vcombine.low %v4501_v40, %v4503_v63  ;;  %v4690_v27 = vrot.slane %v4674_v7, %v12691_v46  ;;  %v4505_v34 = vcombine.high %v4501_v40, %v4501_v40  ;;  %11807 = vmatpush3.msra.mxu0 %v192_v55 }
 0xd07   :  { %v4553_v35 = vcombine.high %v4543_v24, %v4543_v24  ;;  %v4723_v43 = vcombine.low %v4543_v24, %v4551_v57  ;;  %v4725_v50 = vcombine.low %v4550_v18, %v4552_v28  ;;  %v4554_v3 = vcombine.high %v4550_v18, %v4550_v18  ;;  %11846 = vmatprep.subr.mxu0 %v12426_v1  ;;  %v11036_v28 = vld [vmem:[%s15138_s3 + $0x38] sm:$0xff] }
 0xd08   :  { %v4697_v51 = vrot.slane %v4675_v32, %v12691_v46  ;;  %v4704_v60 = vrot.slane %v4676_v20, %v12691_v46  ;;  %v4705_v37 = vcombine.low %v4683_v19, %v4690_v27  ;;  %v4722_v8 = vcombine.low %v4505_v34, %v4529_v30  ;;  %v11035_v32 = vld [vmem:[%s15138_s3 + $0x30] sm:$0xff]  ;;  %11824 = vmatpush3.msra.mxu1 %v11036_v28  ;;  %v11034_v20 = vld [vmem:[%s15138_s3 + $0x28] sm:$0xff]  ;;  %v11033_v27 = vld [vmem:[%s15138_s3 + $0x20] sm:$0xff] }
 0xd09   :  { %v4724_v9 = vcombine.low %v4553_v35, %v4536_v33  ;;  %v4753_v29 = vrot.slane %v4725_v50, %v12691_v46  ;;  %v4739_v10 = vrot.slane %v4723_v43, %v12691_v46  ;;  %v4771_v16 = vcombine.low %v4554_v3, %v4568_v47  ;;  %11825 = vmatprep.subr.mxu1 %v12426_v1  ;;  %v13827_v35 = vld [vmem:[%s15145_s10] ss:$0 sm:$0xff] }
 0xd0a   :  { %v4706_v5 = vcombine.low %v4697_v51, %v4704_v60  ;;  %v4732_v31 = vrot.slane %v4722_v8, %v12691_v46  ;;  %v4713_v38 = vrot.slane %v4705_v37, %v12691_v46  ;;  %11826 = vmatpush3.msra.mxu1 %v11035_v32 }
 0xd0b   :  { %v4746_v11 = vrot.slane %v4724_v9, %v12691_v46  ;;  %v4778_v45 = vrot.slane %v4771_v16, %v12691_v46  ;;  %11827 = vmatprep.subr.mxu1 %v12426_v1 }
 0xd0c   :  { %v4720_v48 = vrot.slane %v4706_v5, %v12691_v46  ;;  %v4754_v13 = vcombine.low %v4732_v31, %v4739_v10  ;;  %11828 = vmatpush3.msra.mxu1 %v11034_v20 }
 0xd0d   :  { %v4755_v59 = vcombine.low %v4746_v11, %v4753_v29  ;;  %v4785_v23 = vrot.slane %v4778_v45, %v12691_v46  ;;  %11829 = vmatprep.subr.mxu1 %v12426_v1 }
 0xd0e   :  { %v4721_v61 = vcombine.low %v4713_v38, %v4720_v48  ;;  %v4762_v12 = vrot.slane %v4754_v13, %v12691_v46  ;;  %11830 = vmatpush3.msra.mxu1 %v11033_v27 }
 0xd0f   :  { %v4769_v17 = vrot.slane %v4755_v59, %v12691_v46  ;;  %11861 = vmatprep.subr.mxu1 %v12426_v1 }
 0xd10   :  { %11774 = vmatmul.mubr.msk.f32.gmra.mxu1 %vm42_vm0, %v4721_v61 }
 0xd11   :  { %11776 = vmatprep.mubr.msk.f32.mxu1 %vm12427_vm2, %v12426_v1  ;;  %v4770_v22 = vcombine.low %v4762_v12, %v4769_v17 }
 0xd14   :  { %11777 = vmatmul.mubr.msk.f32.gmra.mxu1 %vm42_vm0, %v4770_v22 }
 0xd15   :  { %11779 = vmatprep.mubr.msk.f32.mxu1 %vm12427_vm2, %v12426_v1 }
 0xd18   :  { %11780 = vmatmul.mubr.msk.f32.gmra.mxu1 %vm42_vm0, %v4785_v23 }
 0xd19   :  { %11831 = vmatprep.mubr.msk.f32.mxu1 %vm12427_vm2, %v12426_v1 }
 0xdaa   :  { %v4862_v6 = vpop.f32.mrf.mxu1 }
 0xdab   :  { %v4863_v21 = vadd.f32 %v11012_v53, %v4862_v6 }
 0xdac   :  { %v11769_v4 = vpop.f32.mrf.mxu1 }
 0xdad   :  { %v4886_v30 = vmax.f32 %v4863_v21, 0.0 }
 0xdae   :  { %v4867_v42 = vpop.f32.mrf.mxu1 }
 0xdaf   :  { %v4868_v41 = vadd.f32 %v11012_v53, %v4867_v42  ;;  %11809 = vmatmul.mubr.msk.f32.vlgmr.msra.gmra.mxu0 %vm4897_vm10, %v4886_v30 }
 0xdb0   :  { %v11772_v52 = vpop.f32.mrf.mxu1  ;;  %11811 = vmatprep.mubr.msk.f32.mxu0 %vm12427_vm2, %v12426_v1 }
 0xdb1   :  { %v4887_v56 = vmax.f32 %v4868_v41, 0.0 }
 0xdb3   :  { %11812 = vmatmul.mubr.msk.f32.gmra.mxu0 %vm4897_vm10, %v4887_v56 }
 0xdb4   :  { %11814 = vmatprep.mubr.msk.f32.mxu0 %vm12427_vm2, %v12426_v1 }
 0xdd0   :  { %v4872_v58 = vpop.f32.mrf.mxu1 }
 0xdd1   :  { %v4873_v62 = vadd.f32 %v11012_v53, %v4872_v58 }
 0xdd2   :  { %v11775_v14 = vpop.f32.mrf.mxu1 }
 0xdd3   :  { %v4888_v33 = vmax.f32 %v4873_v62, 0.0 }
 0xdd4   :  { %v4877_v24 = vpop.f32.mrf.mxu1 }
 0xdd5   :  { %v4878_v40 = vadd.f32 %v11012_v53, %v4877_v24  ;;  %11815 = vmatmul.mubr.msk.f32.gmra.mxu0 %vm4897_vm10, %v4888_v33 }
 0xdd6   :  { %v11778_v63 = vpop.f32.mrf.mxu1  ;;  %11817 = vmatprep.mubr.msk.f32.mxu0 %vm12427_vm2, %v12426_v1 }
 0xdd7   :  { %v4889_v15 = vmax.f32 %v4878_v40, 0.0 }
 0xdd8   :  { %v4882_v7 = vpop.f32.mrf.mxu1 }
 0xdd9   :  { %v4883_v19 = vadd.f32 %v11012_v53, %v4882_v7  ;;  %11818 = vmatmul.mubr.msk.f32.gmra.mxu0 %vm4897_vm10, %v4889_v15 }
 0xdda   :  { %v11781_v18 = vpop.f32.mrf.mxu1  ;;  %11820 = vmatprep.mubr.msk.f32.mxu0 %vm12427_vm2, %v12426_v1 }
 0xddb   :  { %v4890_v57 = vmax.f32 %v4883_v19, 0.0 }
 0xddd   :  { %11821 = vmatmul.mubr.msk.f32.gmra.mxu0 %vm4897_vm10, %v4890_v57 }
 0xdde   :  { %11852 = vmatprep.mubr.msk.f32.mxu0 %vm12427_vm2, %v12426_v1 }
 0xe6f   :  { %v4983_v34 = vpop.f32.mrf.mxu0 }
 0xe70   :  { %v4984_v36 = vadd.f32 %v13827_v35, %v4983_v34 }
 0xe71   :  { %v11810_v43 = vpop.f32.mrf.mxu0 }
 0xe72   :  { %v5012_v8 = vcombine.high %v4984_v36, %v4984_v36  ;;  %v5019_v10 = vrot.slane %v4984_v36, %v12691_v46 }
 0xe73   :  { %v4988_v50 = vpop.f32.mrf.mxu0 }
 0xe74   :  { %v4989_v51 = vadd.f32 %v13827_v35, %v4988_v50  ;;  %v5026_v5 = vrot.slane %v5012_v8, %v12691_v46  ;;  %v5027_v48 = vcombine.high %v5019_v10, %v5019_v10  ;;  %v5035_v25 = vrot.slane %v5019_v10, %v12691_v46 }
 0xe75   :  { %v11813_v60 = vpop.f32.mrf.mxu0 }
 0xe76   :  { %v5061_v37 = vcombine.high %v4989_v51, %v4989_v51  ;;  %v5068_v29 = vrot.slane %v4989_v51, %v12691_v46  ;;  %v5028_v11 = vcombine.high %v5026_v5, %v5026_v5  ;;  %v5042_v17 = vrot.slane %v5026_v5, %v12691_v46 }
 0xe77   :  { %v5049_v22 = vrot.slane %v5027_v48, %v12691_v46 }
 0xe78   :  { %v5075_v9 = vrot.slane %v5061_v37, %v12691_v46  ;;  %v5076_v3 = vcombine.high %v5068_v29, %v5068_v29  ;;  %v5056_v59 = vrot.slane %v5028_v11, %v12691_v46  ;;  %v5084_v61 = vrot.slane %v5068_v29, %v12691_v46 }
 0xe79   :  { %v5230_v21 = vcombine.low %v5035_v25, %v5049_v22  ;;  %v11029_v4 = vcombine.high %v5035_v25, %v5049_v22 }
 0xe7a   :  { %v5077_v31 = vcombine.high %v5075_v9, %v5075_v9  ;;  %v5091_v13 = vrot.slane %v5075_v9, %v12691_v46  ;;  %v5098_v47 = vrot.slane %v5076_v3, %v12691_v46  ;;  %v5232_v26 = vcombine.low %v5042_v17, %v5056_v59 }
 0xe7b   :  { %v11030_v55 = vcombine.high %v5042_v17, %v5056_v59  ;;  %v5240_v58 = vrot.slane %v5230_v21, %v12691_v46  ;;  %v5247_v62 = vrot.slane %v11029_v4, %v12691_v46 }
 0xe7c   :  { %v5105_v38 = vrot.slane %v5077_v31, %v12691_v46  ;;  %v5279_v45 = vcombine.low %v5084_v61, %v5098_v47  ;;  %v11031_v23 = vcombine.high %v5084_v61, %v5098_v47  ;;  %v5254_v41 = vrot.slane %v5232_v26, %v12691_v46 }
 0xe7d   :  { %v5261_v52 = vrot.slane %v11030_v55, %v12691_v46  ;;  %v5262_v40 = vcombine.low %v5240_v58, %v5247_v62 }
 0xe7e   :  { %v5281_v12 = vcombine.low %v5091_v13, %v5105_v38  ;;  %v11032_v16 = vcombine.high %v5091_v13, %v5105_v38  ;;  %v5289_v30 = vrot.slane %v5279_v45, %v12691_v46  ;;  %v5296_v42 = vrot.slane %v11031_v23, %v12691_v46 }
 0xe7f   :  { %v5263_v33 = vcombine.low %v5254_v41, %v5261_v52  ;;  %v5270_v18 = vrot.slane %v5262_v40, %v12691_v46 }
 0xe80   :  { %v5303_v53 = vrot.slane %v5281_v12, %v12691_v46  ;;  %v5310_v6 = vrot.slane %v11032_v16, %v12691_v46  ;;  %v5311_v14 = vcombine.low %v5289_v30, %v5296_v42 }
 0xe81   :  { %v5277_v15 = vrot.slane %v5263_v33, %v12691_v46 }
 0xe82   :  { %v5312_v56 = vcombine.low %v5303_v53, %v5310_v6  ;;  %v5319_v63 = vrot.slane %v5311_v14, %v12691_v46 }
 0xe83   :  { %v5278_v32 = vcombine.low %v5270_v18, %v5277_v15 }
 0xe84   :  { %v5326_v24 = vrot.slane %v5312_v56, %v12691_v46 }
 0xe85   :  { %v13864_v8 = vadd.f32 %v5278_v32, %v13567_v0 }
 0xe86   :  { %v5327_v7 = vcombine.low %v5319_v63, %v5326_v24 }
 0xe87   :  { %v5503_v45 = vsel %vm42_vm0, %v13864_v8, 0.0 }
 0xe88   :  { %v13858_v34 = vadd.f32 %v5327_v7, %v13575_v39 }
 0xe8a   :  { %v5504_v31 = vsel %vm42_vm0, %v13858_v34, 0.0 }
 0xe8b   :  { %v5505_v21 = vadd.f32 %v5504_v31, %v5503_v45 }
 0xe95   :  { %v4993_v19 = vpop.f32.mrf.mxu0 }
 0xe96   :  { %v4994_v57 = vadd.f32 %v13827_v35, %v4993_v19 }
 0xe97   :  { %v11816_v28 = vpop.f32.mrf.mxu0 }
 0xe98   :  { %v5110_v20 = vcombine.high %v4994_v57, %v4994_v57  ;;  %v5117_v27 = vrot.slane %v4994_v57, %v12691_v46 }
 0xe99   :  { %v4998_v43 = vpop.f32.mrf.mxu0 }
 0xe9a   :  { %v5124_v50 = vrot.slane %v5110_v20, %v12691_v46  ;;  %v5125_v36 = vcombine.high %v5117_v27, %v5117_v27  ;;  %v5133_v51 = vrot.slane %v5117_v27, %v12691_v46  ;;  %v4999_v60 = vadd.f32 %v13827_v35, %v4998_v43 }
 0xe9b   :  { %v11819_v37 = vpop.f32.mrf.mxu0 }
 0xe9c   :  { %v5126_v9 = vcombine.high %v5124_v50, %v5124_v50  ;;  %v5140_v29 = vrot.slane %v5124_v50, %v12691_v46  ;;  %v5147_v5 = vrot.slane %v5125_v36, %v12691_v46  ;;  %v5334_v39 = vrot.slane %v5133_v51, %v12691_v46 }
 0xe9d   :  { %v5159_v10 = vcombine.high %v4999_v60, %v4999_v60  ;;  %v5166_v3 = vrot.slane %v4999_v60, %v12691_v46  ;;  %v5003_v11 = vpop.f32.mrf.mxu0  ;;  %v5155_v48 = vcombine.high %v5133_v51, %v5133_v51 }
 0xe9e   :  { %v5154_v38 = vrot.slane %v5126_v9, %v12691_v46  ;;  %v5156_v13 = vcombine.high %v5140_v29, %v5140_v29  ;;  %v5157_v0 = vcombine.high %v5147_v5, %v5147_v5  ;;  %v5341_v47 = vrot.slane %v5334_v39, %v12691_v46 }
 0xe9f   :  { %v5173_v59 = vrot.slane %v5159_v10, %v12691_v46  ;;  %v5174_v61 = vcombine.high %v5166_v3, %v5166_v3  ;;  %v5182_v12 = vrot.slane %v5166_v3, %v12691_v46  ;;  %v11822_v16 = vpop.f32.mrf.mxu0  ;;  %v5342_v6 = vcombine.low %v5147_v5, %v5155_v48 }
 0xea0   :  { %v5343_v17 = vcombine.low %v5157_v0, %v5140_v29  ;;  %v5344_v22 = vcombine.low %v5154_v38, %v5156_v13  ;;  %v5158_v23 = vcombine.high %v5154_v38, %v5154_v38  ;;  %v13879_v25 = vadd.f32 %v5341_v47, %v13579_v44 }
 0xea1   :  { %v5175_v26 = vcombine.high %v5173_v59, %v5173_v59  ;;  %v5189_v55 = vrot.slane %v5173_v59, %v12691_v46  ;;  %v5196_v53 = vrot.slane %v5174_v61, %v12691_v46  ;;  %v5204_v41 = vcombine.high %v5182_v12, %v5182_v12 }
 0xea2   :  { %v5345_v4 = vcombine.low %v5158_v23, %v5182_v12  ;;  %v5506_v30 = vsel %vm45_vm1, %v13879_v25, 0.0  ;;  %v5359_v56 = vrot.slane %v5343_v17, %v12691_v46  ;;  %v5366_v14 = vrot.slane %v5344_v22, %v12691_v46 }
 0xea3   :  { %v5203_v42 = vrot.slane %v5175_v26, %v12691_v46  ;;  %v5206_v52 = vcombine.high %v5196_v53, %v5196_v53  ;;  %v5507_v58 = vadd.f32 %v5506_v30, %v5505_v21  ;;  %v5205_v62 = vcombine.high %v5189_v55, %v5189_v55 }
 0xea4   :  { %v5373_v44 = vrot.slane %v5345_v4, %v12691_v46  ;;  %v5004_v24 = vadd.f32 %v13827_v35, %v5003_v11  ;;  %v5352_v40 = vrot.slane %v5342_v6, %v12691_v46  ;;  %v5391_v7 = vcombine.low %v5196_v53, %v5204_v41 }
 0xea5   :  { %v5392_v33 = vcombine.low %v5206_v52, %v5189_v55  ;;  %v5508_v63 = vrot.slane %v5507_v58, 4  ;;  %v5207_v19 = vcombine.high %v5203_v42, %v5203_v42  ;;  %v5393_v32 = vcombine.low %v5203_v42, %v5205_v62 }
 0xea6   :  { %v5375_v15 = vcombine.low %v5366_v14, %v5373_v44  ;;  %v5214_v18 = vrot.slane %v5004_v24, %v12691_v46  ;;  %v5374_v57 = vcombine.low %v5352_v40, %v5359_v56  ;;  %v5401_v35 = vrot.slane %v5391_v7, %v12691_v46 }
 0xea7   :  { %v5509_v28 = vadd.f32 %v5508_v63, %v5507_v58  ;;  %v5408_v20 = vrot.slane %v5392_v33, %v12691_v46  ;;  %v5415_v5 = vrot.slane %v5393_v32, %v12691_v46 }
 0xea8   :  { %v5215_v27 = vcombine.high %v5214_v18, %v5214_v18  ;;  %v5222_v43 = vrot.slane %v5214_v18, %v12691_v46  ;;  %v5389_v36 = vrot.slane %v5375_v15, %v12691_v46  ;;  %v5382_v37 = vrot.slane %v5374_v57, %v12691_v46 }
 0xea9   :  { %v5510_v50 = vrot.slane %v5509_v28, 2  ;;  %v5423_v29 = vcombine.low %v5401_v35, %v5408_v20 }
 0xeaa   :  { %v5229_v51 = vrot.slane %v5215_v27, %v12691_v46  ;;  %v5394_v60 = vcombine.low %v5207_v19, %v5222_v43  ;;  %v5390_v3 = vcombine.low %v5382_v37, %v5389_v36 }
 0xeab   :  { %v5511_v9 = vadd.f32 %v5510_v50, %v5509_v28  ;;  %v5431_v48 = vrot.slane %v5423_v29, %v12691_v46 }
 0xeac   :  { %v5422_v39 = vrot.slane %v5394_v60, %v12691_v46  ;;  %v5446_v31 = vrot.slane %v5229_v51, %v12691_v46  ;;  %v13905_v59 = vadd.f32 %v5390_v3, %v13666_v54 }
 0xead   :  { %v5512_v10 = vrot.slane %v5511_v9, 1 }
 0xeae   :  { %v5424_v11 = vcombine.low %v5415_v5, %v5422_v39  ;;  %v5453_v0 = vrot.slane %v5446_v31, %v12691_v46  ;;  %v5537_v55 = vsel %vm42_vm0, %v13905_v59, 0.0 }
 0xeaf   :  { %v5513_v38 = vadd.f32 %v5512_v10, %v5511_v9 }
 0xeb0   :  { %v5438_v13 = vrot.slane %v5424_v11, %v12691_v46  ;;  %v13916_v45 = vadd.f32 %v5453_v0, %v13672_v49 }
 0xeb1   :  { %v5514_v47 = vmul.f32 0.05882353, %v5513_v38 }
 0xeb2   :  { %v5439_v61 = vcombine.low %v5431_v48, %v5438_v13  ;;  %v5540_v49 = vsel %vm45_vm1, %v13916_v45, 0.0 }
 0xeb3   :  { %v5515_v12 = vsub.f32 %v13864_v8, %v5514_v47  ;;  %v5516_v16 = vsub.f32 %v13858_v34, %v5514_v47  ;;  %v13910_v17 = vsub.f32 %v13879_v25, %v5514_v47 }
 0xeb4   :  { %v13913_v22 = vadd.f32 %v5439_v61, %v13669_v2 }
 0xeb5   :  { %v5518_v23 = vmul.f32 %v5515_v12, %v5515_v12  ;;  %v5519_v26 = vmul.f32 %v5516_v16, %v5516_v16  ;;  %v5520_v54 = vmul.f32 %v13910_v17, %v13910_v17 }
 0xeb6   :  { %v5538_v53 = vsel %vm42_vm0, %v13913_v22, 0.0 }
 0xeb7   :  { %v5521_v6 = vsel %vm42_vm0, %v5518_v23, 0.0  ;;  %v5522_v21 = vsel %vm42_vm0, %v5519_v26, 0.0  ;;  %v5539_v2 = vadd.f32 %v5538_v53, %v5537_v55  ;;  %v5524_v30 = vsel %vm45_vm1, %v5520_v54, 0.0 }
 0xeb8   :  { %v5523_v4 = vadd.f32 %v5522_v21, %v5521_v6 }
 0xeb9   :  { %v5541_v42 = vadd.f32 %v5540_v49, %v5539_v2 }
 0xeba   :  { %v5525_v41 = vadd.f32 %v5524_v30, %v5523_v4 }
 0xebb   :  { %v5542_v52 = vrot.slane %v5541_v42, 4 }
 0xebc   :  { %v5526_v56 = vrot.slane %v5525_v41, 4 }
 0xebd   :  { %v5543_v58 = vadd.f32 %v5542_v52, %v5541_v42 }
 0xebe   :  { %v5527_v44 = vadd.f32 %v5526_v56, %v5525_v41 }
 0xebf   :  { %v5544_v62 = vrot.slane %v5543_v58, 2 }
 0xec0   :  { %v5528_v14 = vrot.slane %v5527_v44, 2 }
 0xec1   :  { %v5545_v33 = vadd.f32 %v5544_v62, %v5543_v58 }
 0xec2   :  { %v5529_v24 = vadd.f32 %v5528_v14, %v5527_v44 }
 0xec3   :  { %v5546_v40 = vrot.slane %v5545_v33, 1 }
 0xec4   :  { %v5530_v63 = vrot.slane %v5529_v24, 1 }
 0xec5   :  { %v5547_v15 = vadd.f32 %v5546_v40, %v5545_v33 }
 0xec6   :  { %v5531_v7 = vadd.f32 %v5530_v63, %v5529_v24 }
 0xec7   :  { %v5548_v19 = vmul.f32 0.05882353, %v5547_v15 }
 0xec8   :  { %v5532_v18 = vmul.f32 0.0625, %v5531_v7 }
 0xec9   :  { %v13930_v57 = vsub.f32 %v13905_v59, %v5548_v19  ;;  %v13933_v28 = vsub.f32 %v13913_v22, %v5548_v19  ;;  %v13936_v32 = vsub.f32 %v13916_v45, %v5548_v19 }
 0xeca   :  { %12303 = vrsqrt.f32 %v5532_v18 }
 0xecb   :  { %v5552_v20 = vmul.f32 %v13930_v57, %v13930_v57  ;;  %v5553_v27 = vmul.f32 %v13933_v28, %v13933_v28  ;;  %v5554_v43 = vmul.f32 %v13936_v32, %v13936_v32 }
 0xecd   :  { %v5555_v50 = vsel %vm42_vm0, %v5552_v20, 0.0  ;;  %v5556_v36 = vsel %vm42_vm0, %v5553_v27, 0.0  ;;  %v5558_v51 = vsel %vm45_vm1, %v5554_v43, 0.0 }
 0xece   :  { %v5557_v35 = vadd.f32 %v5556_v36, %v5555_v50 }
 0xed0   :  { %v5559_v60 = vadd.f32 %v5558_v51, %v5557_v35 }
 0xed2   :  { %v5560_v37 = vrot.slane %v5559_v60, 4 }
 0xed4   :  { %v5561_v9 = vadd.f32 %v5560_v37, %v5559_v60 }
 0xed6   :  { %v5562_v29 = vrot.slane %v5561_v9, 2 }
 0xed7   :  { %v12304_v5 = vpop.eup %12303 }
 0xed8   :  { %v5534_v39 = vmul.f32 %v12304_v5, %v5515_v12  ;;  %v5563_v31 = vadd.f32 %v5562_v29, %v5561_v9  ;;  %v5535_v10 = vmul.f32 %v12304_v5, %v5516_v16  ;;  %v5536_v37 = vmul.f32 %v12304_v5, %v13910_v17 }
 0xeda   :  { %v5577_v3 = vcombine.high %v5534_v39, %v5534_v39  ;;  %v5584_v11 = vrot.slane %v5534_v39, %v12691_v46  ;;  %v5564_v38 = vrot.slane %v5563_v31, 1  ;;  %v5626_v48 = vcombine.high %v5535_v10, %v5535_v10 }
 0xedb   :  { %v5633_v13 = vrot.slane %v5535_v10, %v12691_v46 }
 0xedc   :  { %v5565_v0 = vadd.f32 %v5564_v38, %v5563_v31  ;;  %v5591_v47 = vrot.slane %v5577_v3, %v12691_v46  ;;  %v5592_v61 = vcombine.high %v5584_v11, %v5584_v11  ;;  %v5640_v23 = vrot.slane %v5626_v48, %v12691_v46 }
 0xedd   :  { %v5641_v26 = vcombine.high %v5633_v13, %v5633_v13  ;;  %v5600_v12 = vrot.slane %v5584_v11, %v12691_v46  ;;  %v5649_v21 = vrot.slane %v5633_v13, %v12691_v46  ;;  %v5681_v3 = vrot.slane %v5536_v37, %v12691_v46 }
 0xede   :  { %v5566_v54 = vmul.f32 0.0625, %v5565_v0  ;;  %v5593_v55 = vcombine.high %v5591_v47, %v5591_v47  ;;  %v5614_v16 = vrot.slane %v5592_v61, %v12691_v46  ;;  %v5607_v53 = vrot.slane %v5591_v47, %v12691_v46 }
 0xedf   :  { %v5642_v6 = vcombine.high %v5640_v23, %v5640_v23  ;;  %v5663_v2 = vrot.slane %v5641_v26, %v12691_v46  ;;  %v5656_v42 = vrot.slane %v5640_v23, %v12691_v46  ;;  %v5688_v0 = vrot.slane %v5681_v3, %v12691_v46 }
 0xee0   :  { %12305 = vrsqrt.f32 %v5566_v54  ;;  %v5621_v4 = vrot.slane %v5593_v55, %v12691_v46  ;;  %v5807_v49 = vcombine.low %v5600_v12, %v5614_v16  ;;  %v11063_v30 = vcombine.high %v5600_v12, %v5614_v16 }
 0xee1   :  { %v5670_v41 = vrot.slane %v5642_v6, %v12691_v46  ;;  %v5856_v52 = vcombine.low %v5649_v21, %v5663_v2  ;;  %v11065_v56 = vcombine.high %v5649_v21, %v5663_v2 }
 0xee2   :  { %v5809_v58 = vcombine.low %v5607_v53, %v5621_v4  ;;  %v11064_v44 = vcombine.high %v5607_v53, %v5621_v4  ;;  %v5817_v62 = vrot.slane %v5807_v49, %v12691_v46  ;;  %v5824_v14 = vrot.slane %v11063_v30, %v12691_v46 }
 0xee3   :  { %v5858_v33 = vcombine.low %v5656_v42, %v5670_v41  ;;  %v11066_v24 = vcombine.high %v5656_v42, %v5670_v41  ;;  %v5866_v40 = vrot.slane %v5856_v52, %v12691_v46  ;;  %v5873_v19 = vrot.slane %v11065_v56, %v12691_v46 }
 0xee4   :  { %v5831_v63 = vrot.slane %v5809_v58, %v12691_v46  ;;  %v5838_v15 = vrot.slane %v11064_v44, %v12691_v46  ;;  %v5839_v7 = vcombine.low %v5817_v62, %v5824_v14 }
 0xee5   :  { %v5880_v18 = vrot.slane %v5858_v33, %v12691_v46  ;;  %v5887_v20 = vrot.slane %v11066_v24, %v12691_v46  ;;  %v5888_v35 = vcombine.low %v5866_v40, %v5873_v19 }
 0xee6   :  { %v5840_v27 = vcombine.low %v5831_v63, %v5838_v15  ;;  %v5847_v50 = vrot.slane %v5839_v7, %v12691_v46 }
 0xee7   :  { %v5889_v43 = vcombine.low %v5880_v18, %v5887_v20  ;;  %v5896_v9 = vrot.slane %v5888_v35, %v12691_v46 }
 0xee8   :  { %v5854_v36 = vrot.slane %v5840_v27, %v12691_v46 }
 0xee9   :  { %v5903_v60 = vrot.slane %v5889_v43, %v12691_v46 }
 0xeea   :  { %v5855_v51 = vcombine.low %v5847_v50, %v5854_v36 }
 0xeeb   :  { %v5904_v39 = vcombine.low %v5896_v9, %v5903_v60 }
 0xeec   :  { %11832 = vmatmul.mubr.msk.f32.vlgmr.msra.gmra.mxu1 %vm42_vm0, %v5855_v51 }
 0xeed   :  { %v12306_v29 = vpop.eup %12305  ;;  %11834 = vmatprep.mubr.msk.f32.mxu1 %vm12427_vm2, %v12426_v1 }
 0xeee   :  { %v5568_v31 = vmul.f32 %v12306_v29, %v13930_v57  ;;  %v5569_v10 = vmul.f32 %v12306_v29, %v13933_v28  ;;  %v5570_v23 = vmul.f32 %v12306_v29, %v13936_v32 }
 0xef0   :  { %11835 = vmatmul.mubr.msk.f32.gmra.mxu1 %vm42_vm0, %v5904_v39  ;;  %v5689_v11 = vcombine.high %v5568_v31, %v5568_v31  ;;  %v5696_v17 = vrot.slane %v5568_v31, %v12691_v46  ;;  %v5738_v5 = vcombine.high %v5569_v10, %v5569_v10  ;;  %v5745_v38 = vrot.slane %v5569_v10, %v12691_v46 }
 0xef1   :  { %11837 = vmatprep.mubr.msk.f32.mxu1 %vm12427_vm2, %v12426_v1  ;;  %v5793_v40 = vrot.slane %v5570_v23, %v12691_v46 }
 0xef2   :  { %v5703_v48 = vrot.slane %v5689_v11, %v12691_v46  ;;  %v5704_v13 = vcombine.high %v5696_v17, %v5696_v17  ;;  %v5712_v57 = vrot.slane %v5696_v17, %v12691_v46  ;;  %v5752_v28 = vrot.slane %v5738_v5, %v12691_v46 }
 0xef3   :  { %v5753_v47 = vcombine.high %v5745_v38, %v5745_v38  ;;  %v5761_v61 = vrot.slane %v5745_v38, %v12691_v46  ;;  %v5800_v9 = vrot.slane %v5793_v40, %v12691_v46  ;;  %v14023_v38 = vld [vmem:[%s15139_s4 + $0x1] ss:$0 sm:$0xff] }
 0xef4   :  { %v5705_v26 = vcombine.high %v5703_v48, %v5703_v48  ;;  %v5719_v54 = vrot.slane %v5703_v48, %v12691_v46  ;;  %v5726_v55 = vrot.slane %v5704_v13, %v12691_v46  ;;  %v5734_v12 = vcombine.high %v5712_v57, %v5712_v57 }
 0xef5   :  { %v5905_v16 = vcombine.low %v5688_v0, %v5712_v57  ;;  %v5754_v53 = vcombine.high %v5752_v28, %v5752_v28  ;;  %v5768_v6 = vrot.slane %v5752_v28, %v12691_v46  ;;  %v5775_v21 = vrot.slane %v5753_v47, %v12691_v46 }
 0xef6   :  { %v5733_v2 = vrot.slane %v5705_v26, %v12691_v46  ;;  %v5735_v4 = vcombine.high %v5719_v54, %v5719_v54  ;;  %v5736_v49 = vcombine.high %v5726_v55, %v5726_v55  ;;  %v5906_v30 = vcombine.low %v5726_v55, %v5734_v12 }
 0xef7   :  { %v5915_v42 = vrot.slane %v5905_v16, %v12691_v46  ;;  %v5782_v32 = vrot.slane %v5754_v53, %v12691_v46  ;;  %v5783_v41 = vcombine.high %v5761_v61, %v5761_v61  ;;  %v5784_v52 = vcombine.high %v5768_v6, %v5768_v6 }
 0xef8   :  { %v5907_v56 = vcombine.low %v5736_v49, %v5719_v54  ;;  %v5908_v58 = vcombine.low %v5733_v2, %v5735_v4  ;;  %v5922_v44 = vrot.slane %v5906_v30, %v12691_v46  ;;  %v5737_v62 = vcombine.high %v5733_v2, %v5733_v2 }
 0xef9   :  { %v5785_v14 = vcombine.high %v5775_v21, %v5775_v21  ;;  %v5955_v33 = vcombine.low %v5775_v21, %v5783_v41  ;;  %v5957_v24 = vcombine.low %v5782_v32, %v5784_v52  ;;  %v5786_v36 = vcombine.high %v5782_v32, %v5782_v32 }
 0xefa   :  { %v5929_v63 = vrot.slane %v5907_v56, %v12691_v46  ;;  %v5936_v15 = vrot.slane %v5908_v58, %v12691_v46  ;;  %v5937_v7 = vcombine.low %v5915_v42, %v5922_v44  ;;  %v5954_v19 = vcombine.low %v5737_v62, %v5761_v61 }
 0xefb   :  { %v5956_v18 = vcombine.low %v5785_v14, %v5768_v6  ;;  %v5985_v20 = vrot.slane %v5957_v24, %v12691_v46  ;;  %v5971_v50 = vrot.slane %v5955_v33, %v12691_v46  ;;  %v6003_v10 = vcombine.low %v5786_v36, %v5800_v9 }
 0xefc   :  { %v5938_v27 = vcombine.low %v5929_v63, %v5936_v15  ;;  %v5964_v43 = vrot.slane %v5954_v19, %v12691_v46  ;;  %v5945_v51 = vrot.slane %v5937_v7, %v12691_v46 }
 0xefd   :  { %v5978_v35 = vrot.slane %v5956_v18, %v12691_v46  ;;  %v6010_v17 = vrot.slane %v6003_v10, %v12691_v46 }
 0xefe   :  { %v5952_v60 = vrot.slane %v5938_v27, %v12691_v46  ;;  %v5986_v37 = vcombine.low %v5964_v43, %v5971_v50 }
 0xeff   :  { %v5987_v29 = vcombine.low %v5978_v35, %v5985_v20  ;;  %v6017_v5 = vrot.slane %v6010_v17, %v12691_v46 }
 0xf00   :  { %v5953_v39 = vcombine.low %v5945_v51, %v5952_v60  ;;  %v5994_v31 = vrot.slane %v5986_v37, %v12691_v46 }
 0xf01   :  { %v6001_v3 = vrot.slane %v5987_v29, %v12691_v46 }
 0xf02   :  { %11838 = vmatmul.mubr.msk.f32.gmra.mxu1 %vm42_vm0, %v5953_v39 }
 0xf03   :  { %11840 = vmatprep.mubr.msk.f32.mxu1 %vm12427_vm2, %v12426_v1  ;;  %v6002_v11 = vcombine.low %v5994_v31, %v6001_v3 }
 0xf06   :  { %11841 = vmatmul.mubr.msk.f32.gmra.mxu1 %vm42_vm0, %v6002_v11 }
 0xf07   :  { %11843 = vmatprep.mubr.msk.f32.mxu1 %vm12427_vm2, %v12426_v1 }
 0xf0a   :  { %11844 = vmatmul.mubr.msk.f32.gmra.mxu1 %vm42_vm0, %v6017_v5 }
 0xf0b   :  { %11867 = vmatprep.mubr.msk.f32.mxu1 %vm12427_vm2, %v12426_v1 }
 0xfac   :  { %v6094_v48 = vpop.f32.mrf.mxu1 }
 0xfad   :  { %v6095_v13 = vadd.f32 %v14023_v38, %v6094_v48 }
 0xfae   :  { %v11833_v57 = vpop.f32.mrf.mxu1 }
 0xfaf   :  { %v6123_v28 = vcombine.high %v6095_v13, %v6095_v13  ;;  %v6130_v55 = vrot.slane %v6095_v13, %v12691_v46 }
 0xfb0   :  { %v6099_v0 = vpop.f32.mrf.mxu1 }
 0xfb1   :  { %v6137_v47 = vrot.slane %v6123_v28, %v12691_v46  ;;  %v6100_v61 = vadd.f32 %v14023_v38, %v6099_v0  ;;  %v6138_v4 = vcombine.high %v6130_v55, %v6130_v55  ;;  %v6146_v7 = vrot.slane %v6130_v55, %v12691_v46 }
 0xfb2   :  { %v11836_v23 = vpop.f32.mrf.mxu1 }
 0xfb3   :  { %v6172_v26 = vcombine.high %v6100_v61, %v6100_v61  ;;  %v6179_v54 = vrot.slane %v6100_v61, %v12691_v46  ;;  %v6139_v12 = vcombine.high %v6137_v47, %v6137_v47  ;;  %v6153_v52 = vrot.slane %v6137_v47, %v12691_v46 }
 0xfb4   :  { %v6160_v14 = vrot.slane %v6138_v4, %v12691_v46 }
 0xfb5   :  { %v6186_v16 = vrot.slane %v6172_v26, %v12691_v46  ;;  %v6187_v53 = vcombine.high %v6179_v54, %v6179_v54  ;;  %v6195_v21 = vrot.slane %v6179_v54, %v12691_v46  ;;  %v6167_v49 = vrot.slane %v6139_v12, %v12691_v46 }
 0xfb6   :  { %v6341_v18 = vcombine.low %v6146_v7, %v6160_v14  ;;  %v11072_v20 = vcombine.high %v6146_v7, %v6160_v14 }
 0xfb7   :  { %v6188_v6 = vcombine.high %v6186_v16, %v6186_v16  ;;  %v6209_v2 = vrot.slane %v6187_v53, %v12691_v46  ;;  %v6202_v30 = vrot.slane %v6186_v16, %v12691_v46  ;;  %v6343_v33 = vcombine.low %v6153_v52, %v6167_v49 }
 0xfb8   :  { %v11073_v24 = vcombine.high %v6153_v52, %v6167_v49  ;;  %v6351_v9 = vrot.slane %v6341_v18, %v12691_v46  ;;  %v6358_v29 = vrot.slane %v11072_v20, %v12691_v46 }
 0xfb9   :  { %v6216_v42 = vrot.slane %v6188_v6, %v12691_v46  ;;  %v6390_v32 = vcombine.low %v6195_v21, %v6209_v2  ;;  %v11074_v41 = vcombine.high %v6195_v21, %v6209_v2  ;;  %v6365_v27 = vrot.slane %v6343_v33, %v12691_v46 }
 0xfba   :  { %v6372_v43 = vrot.slane %v11073_v24, %v12691_v46  ;;  %v6373_v57 = vcombine.low %v6351_v9, %v6358_v29 }
 0xfbb   :  { %v6392_v56 = vcombine.low %v6202_v30, %v6216_v42  ;;  %v11075_v58 = vcombine.high %v6202_v30, %v6216_v42  ;;  %v6400_v44 = vrot.slane %v6390_v32, %v12691_v46  ;;  %v6407_v62 = vrot.slane %v11074_v41, %v12691_v46 }
 0xfbc   :  { %v6374_v10 = vcombine.low %v6365_v27, %v6372_v43  ;;  %v6381_v42 = vrot.slane %v6373_v57, %v12691_v46 }
 0xfbd   :  { %v6414_v40 = vrot.slane %v6392_v56, %v12691_v46  ;;  %v6421_v63 = vrot.slane %v11075_v58, %v12691_v46  ;;  %v6422_v15 = vcombine.low %v6400_v44, %v6407_v62 }
 0xfbe   :  { %v6388_v61 = vrot.slane %v6374_v10, %v12691_v46 }
 0xfbf   :  { %v6423_v19 = vcombine.low %v6414_v40, %v6421_v63  ;;  %v6430_v50 = vrot.slane %v6422_v15, %v12691_v46 }
 0xfc0   :  { %v14074_v62 = vcombine.low %v6381_v42, %v6388_v61 }
 0xfc1   :  { %v6437_v36 = vrot.slane %v6423_v19, %v12691_v46 }
 0xfc2   :  { %v6104_v35 = vpop.f32.mrf.mxu1 }
 0xfc3   :  { %v6105_v51 = vadd.f32 %v14023_v38, %v6104_v35  ;;  %v14048_v60 = vcombine.low %v6430_v50, %v6437_v36 }
 0xfc4   :  { %v11839_v37 = vpop.f32.mrf.mxu1 }
 0xfc5   :  { %v6221_v39 = vcombine.high %v6105_v51, %v6105_v51  ;;  %v6228_v31 = vrot.slane %v6105_v51, %v12691_v46  ;;  %6455 = vrot.lane.b32.xlu0 %v14048_v60, %s12429_s20 }
 0xfc6   :  { %v6109_v3 = vpop.f32.mrf.mxu1 }
 0xfc7   :  { %v6235_v11 = vrot.slane %v6221_v39, %v12691_v46  ;;  %v6236_v17 = vcombine.high %v6228_v31, %v6228_v31  ;;  %v6244_v5 = vrot.slane %v6228_v31, %v12691_v46  ;;  %v6110_v48 = vadd.f32 %v14023_v38, %v6109_v3 }
 0xfc8   :  { %v11842_v13 = vpop.f32.mrf.mxu1 }
 0xfc9   :  { %v6237_v28 = vcombine.high %v6235_v11, %v6235_v11  ;;  %v6251_v0 = vrot.slane %v6235_v11, %v12691_v46  ;;  %v6258_v47 = vrot.slane %v6236_v17, %v12691_v46  ;;  %v6445_v23 = vrot.slane %v6244_v5, %v12691_v46 }
 0xfca   :  { %v6270_v26 = vcombine.high %v6110_v48, %v6110_v48  ;;  %v6277_v54 = vrot.slane %v6110_v48, %v12691_v46  ;;  %v6114_v55 = vpop.f32.mrf.mxu1  ;;  %v6266_v16 = vcombine.high %v6244_v5, %v6244_v5 }
 0xfcb   :  { %v6265_v12 = vrot.slane %v6237_v28, %v12691_v46  ;;  %v6267_v53 = vcombine.high %v6251_v0, %v6251_v0  ;;  %v6268_v6 = vcombine.high %v6258_v47, %v6258_v47  ;;  %v14065_v21 = vrot.slane %v6445_v23, %v12691_v46 }
 0xfcc   :  { %v6284_v2 = vrot.slane %v6270_v26, %v12691_v46  ;;  %v6285_v4 = vcombine.high %v6277_v54, %v6277_v54  ;;  %v6293_v49 = vrot.slane %v6277_v54, %v12691_v46  ;;  %v11845_v30 = vpop.f32.mrf.mxu1  ;;  %v6115_v24 = vadd.f32 %v14023_v38, %v6114_v55 }
 0xfcd   :  { %v6552_v32 = vcombine.low %v6268_v6, %v6251_v0  ;;  %v6269_v41 = vcombine.high %v6265_v12, %v6265_v12  ;;  %6457 = vrot.lane.b32.xlu1 %v14065_v21, %s12429_s20  ;;  %v6553_v14 = vcombine.low %v6265_v12, %v6267_v53  ;;  %v6551_v40 = vcombine.low %v6258_v47, %v6266_v16 }
 0xfce   :  { %v6286_v52 = vcombine.high %v6284_v2, %v6284_v2  ;;  %v6300_v56 = vrot.slane %v6284_v2, %v12691_v46  ;;  %v6307_v58 = vrot.slane %v6285_v4, %v12691_v46  ;;  %v6315_v44 = vcombine.high %v6293_v49, %v6293_v49 }
 0xfcf   :  { %v6554_v33 = vcombine.low %v6269_v41, %v6293_v49  ;;  %v6325_v20 = vrot.slane %v6115_v24, %v12691_v46  ;;  %v6568_v27 = vrot.slane %v6552_v32, %v12691_v46  ;;  %v6575_v36 = vrot.slane %v6553_v14, %v12691_v46 }
 0xfd0   :  { %v6314_v63 = vrot.slane %v6286_v52, %v12691_v46  ;;  %v6316_v15 = vcombine.high %v6300_v56, %v6300_v56  ;;  %v6317_v7 = vcombine.high %v6307_v58, %v6307_v58  ;;  %v6600_v18 = vcombine.low %v6307_v58, %v6315_v44 }
 0xfd1   :  { %v6582_v19 = vrot.slane %v6554_v33, %v12691_v46  ;;  %6453 = vrot.lane.b32.xlu1 %v14074_v62, %s12429_s20  ;;  %v6326_v35 = vcombine.high %v6325_v20, %v6325_v20  ;;  %v6333_v51 = vrot.slane %v6325_v20, %v12691_v46  ;;  %v6561_v37 = vrot.slane %v6551_v40, %v12691_v46 }
 0xfd2   :  { %v6601_v43 = vcombine.low %v6317_v7, %v6300_v56  ;;  %v6318_v50 = vcombine.high %v6314_v63, %v6314_v63  ;;  %v6602_v38 = vcombine.low %v6314_v63, %v6316_v15  ;;  %v6610_v39 = vrot.slane %v6600_v18, %v12691_v46 }
 0xfd3   :  { %v6584_v29 = vcombine.low %v6575_v36, %v6582_v19  ;;  %v6340_v31 = vrot.slane %v6326_v35, %v12691_v46  ;;  %v6583_v3 = vcombine.low %v6561_v37, %v6568_v27 }
 0xfd4   :  { %v6617_v9 = vrot.slane %v6601_v43, %v12691_v46  ;;  %v6603_v10 = vcombine.low %v6318_v50, %v6333_v51  ;;  %v6624_v17 = vrot.slane %v6602_v38, %v12691_v46 }
 0xfd5   :  { %v6655_v48 = vrot.slane %v6340_v31, %v12691_v46  ;;  %v6598_v13 = vrot.slane %v6584_v29, %v12691_v46  ;;  %v6591_v0 = vrot.slane %v6583_v3, %v12691_v46 }
 0xfd6   :  { %v6632_v11 = vcombine.low %v6610_v39, %v6617_v9  ;;  %v6631_v5 = vrot.slane %v6603_v10, %v12691_v46 }
 0xfd7   :  { %v14094_v28 = vrot.slane %v6655_v48, %v12691_v46  ;;  %v14101_v23 = vcombine.low %v6591_v0, %v6598_v13 }
 0xfd8   :  { %v6633_v57 = vcombine.low %v6624_v17, %v6631_v5  ;;  %v6640_v47 = vrot.slane %v6632_v11, %v12691_v46 }
 0xfd9   :  { %6667 = vrot.lane.b32.xlu0 %v14094_v28, %s12429_s20 }
 0xfda   :  { %v6647_v61 = vrot.slane %v6633_v57, %v12691_v46 }
 0xfdc   :  { %v14103_v26 = vcombine.low %v6640_v47, %v6647_v61 }
 0xfdd   :  { %6663 = vrot.lane.b32.xlu0 %v14101_v23, %s12429_s20 }
 0xfde   :  { %6665 = vrot.lane.b32.xlu1 %v14103_v26, %s12429_s20 }
 0xfe1   :  { %6837 = vrot.lane.b32.xlu0 %v14065_v21, %s12430_s24 }
 0xfe2   :  { %6835 = vrot.lane.b32.xlu1 %v14048_v60, %s12430_s24 }
 0xfe5   :  { %7041 = vrot.lane.b32.xlu0 %v14065_v21, %s12431_s0 }
 0xfe6   :  { %6833 = vrot.lane.b32.xlu1 %v14074_v62, %s12430_s24 }
 0xfe9   :  { %6934 = vrot.lane.b32.xlu0 %v14103_v26, %s12430_s24 }
 0xfea   :  { %6936 = vrot.lane.b32.xlu1 %v14094_v28, %s12430_s24 }
 0xfee   :  { %7039 = vrot.lane.b32.xlu1 %v14048_v60, %s12431_s0 }
0x1037   :  { %v6456_v55 = vpop.permute.xlu0 %6455 }
0x103f   :  { %v6458_v54 = vpop.permute.xlu1 %6457 }
0x1040   :  { %11847 = vmatpush3.xpose.msk.msra.mxu0 %vm1163_vm3, %v6458_v54 }
0x1041   :  { %11848 = vmatprep.subr.mxu0 %v12426_v1 }
0x1043   :  { %v6454_v12 = vpop.permute.xlu1 %6453 }
0x1044   :  { %11849 = vmatpush3.xpose.msk.msra.mxu0 %vm1163_vm3, %v6456_v55 }
0x1045   :  { %11850 = vmatprep.subr.mxu0 %v12426_v1 }
0x1048   :  { %11851 = vmatpush3.xpose.msk.msra.mxu0 %vm1163_vm3, %v6454_v12 }
0x1049   :  { %11876 = vmatprep.subr.mxu0 %v12426_v1 }
0x104b   :  { %11853 = vmatmul.mubr.msk.f32.vlgmr.msra.gmra.mxu0 %vm1163_vm3, %v14074_v62  ;;  %v6668_v16 = vpop.permute.xlu0 %6667 }
0x104c   :  { %11855 = vmatprep.mubr.msk.f32.mxu0 %vm12427_vm2, %v12426_v1  ;;  %11862 = vmatpush3.xpose.msk.msra.mxu1 %vm1163_vm3, %v6668_v16 }
0x104d   :  { %11863 = vmatprep.subr.mxu1 %v12426_v1 }
0x104f   :  { %11856 = vmatmul.mubr.msk.f32.gmra.mxu0 %vm1163_vm3, %v14048_v60  ;;  %v6664_v53 = vpop.permute.xlu0 %6663 }
0x1050   :  { %v6666_v6 = vpop.permute.xlu1 %6665  ;;  %11858 = vmatprep.mubr.msk.f32.mxu0 %vm12427_vm2, %v12426_v1 }
0x1051   :  { %11864 = vmatpush3.xpose.msk.msra.mxu1 %vm1163_vm3, %v6666_v6 }
0x1052   :  { %11865 = vmatprep.subr.mxu1 %v12426_v1 }
0x1053   :  { %11859 = vmatmul.mubr.msk.f32.gmra.mxu0 %vm1163_vm3, %v14065_v21  ;;  %v6838_v2 = vpop.permute.xlu0 %6837 }
0x1054   :  { %v6836_v4 = vpop.permute.xlu1 %6835  ;;  %11882 = vmatprep.mubr.msk.f32.mxu0 %vm12427_vm2, %v12426_v1  ;;  %11877 = vmatpush3.msk.msra.mxu0 %vm1557_vm4, %v6838_v2 }
0x1055   :  { %11866 = vmatpush3.xpose.msk.msra.mxu1 %vm1163_vm3, %v6664_v53  ;;  %11878 = vmatprep.subr.mxu0 %v12426_v1 }
0x1056   :  { %11891 = vmatprep.subr.mxu1 %v12426_v1  ;;  %11879 = vmatpush3.msra.mxu0 %v6836_v4 }
0x1057   :  { %v14149_v49 = vpop.permute.xlu0 %7041  ;;  %11880 = vmatprep.subr.mxu0 %v12426_v1 }
0x1058   :  { %v6834_v30 = vpop.permute.xlu1 %6833  ;;  %11868 = vmatmul.mubr.msk.f32.vlgmr.msra.gmra.mxu1 %vm1163_vm3, %v14101_v23 }
0x1059   :  { %11881 = vmatpush3.msra.mxu0 %v6834_v30  ;;  %11870 = vmatprep.mubr.msk.f32.mxu1 %vm12427_vm2, %v12426_v1 }
0x105a   :  { %11906 = vmatprep.subr.mxu0 %v12426_v1 }
0x105b   :  { %v6935_v32 = vpop.permute.xlu0 %6934 }
0x105c   :  { %v6937_v42 = vpop.permute.xlu1 %6936  ;;  %11871 = vmatmul.mubr.msk.f32.gmra.mxu1 %vm1163_vm3, %v14103_v26 }
0x105d   :  { %11892 = vmatpush3.msk.msra.mxu1 %vm1557_vm4, %v6937_v42  ;;  %11873 = vmatprep.mubr.msk.f32.mxu1 %vm12427_vm2, %v12426_v1 }
0x105e   :  { %11893 = vmatprep.subr.mxu1 %v12426_v1 }
0x105f   :  { %11894 = vmatpush3.msra.mxu1 %v6935_v32 }
0x1060   :  { %11874 = vmatmul.mubr.msk.f32.gmra.mxu1 %vm1163_vm3, %v14094_v28  ;;  %11895 = vmatprep.subr.mxu1 %v12426_v1  ;;  %v14180_v29 = vpop.permute.xlu1 %7039 }
0x1061   :  { %11897 = vmatprep.mubr.msk.f32.mxu1 %vm12427_vm2, %v12426_v1 }
0x110b   :  { %v6537_v41 = vpop.f32.mrf.mxu0 }
0x110c   :  { %v6761_v52 = vmul.f32 0.35355338, %v6537_v41 }
0x110d   :  { %v11854_v56 = vpop.f32.mrf.mxu0 }
0x110e   :  { %v6767_v58 = vsel %vm1472_vm5, %v6761_v52, -inf }
0x110f   :  { %6768 = vmax.xlane.f32.xlu1 %v6767_v58  ;;  %v6542_v44 = vpop.f32.mrf.mxu0 }
0x1110   :  { %v6762_v14 = vmul.f32 0.35355338, %v6542_v44 }
0x1111   :  { %v11857_v33 = vpop.f32.mrf.mxu0 }
0x1112   :  { %v6770_v24 = vsel %vm1472_vm5, %v6762_v14, -inf }
0x1113   :  { %6771 = vmax.xlane.f32.xlu0 %v6770_v24  ;;  %v6547_v40 = vpop.f32.mrf.mxu0 }
0x1114   :  { %v6763_v63 = vmul.f32 0.35355338, %v6547_v40 }
0x1115   :  { %v11860_v15 = vpop.f32.mrf.mxu0 }
0x1116   :  { %v6773_v7 = vsel %vm1479_vm6, %v6763_v63, -inf }
0x1117   :  { %6774 = vmax.xlane.f32.xlu0 %v6773_v7 }
0x1118   :  { %v6747_v19 = vpop.f32.mrf.mxu1 }
0x1119   :  { %v6764_v18 = vmul.f32 0.35355338, %v6747_v19 }
0x111a   :  { %v11869_v20 = vpop.f32.mrf.mxu1 }
0x111b   :  { %v6776_v27 = vsel %vm1472_vm5, %v6764_v18, -inf }
0x111c   :  { %v6752_v43 = vpop.f32.mrf.mxu1  ;;  %6777 = vmax.xlane.f32.xlu1 %v6776_v27 }
0x111d   :  { %v6765_v50 = vmul.f32 0.35355338, %v6752_v43 }
0x111e   :  { %v11872_v36 = vpop.f32.mrf.mxu1 }
0x111f   :  { %v6779_v38 = vsel %vm1472_vm5, %v6765_v50, -inf }
0x1120   :  { %v6757_v35 = vpop.f32.mrf.mxu1  ;;  %6780 = vmax.xlane.f32.xlu0 %v6779_v38 }
0x1121   :  { %v6766_v37 = vmul.f32 0.35355338, %v6757_v35 }
0x1122   :  { %v11875_v51 = vpop.f32.mrf.mxu1 }
0x1123   :  { %v6782_v9 = vsel %vm1479_vm6, %v6766_v37, -inf }
0x112d   :  { %7037 = vrot.lane.b32.xlu1 %v14074_v62, %s12431_s0 }
0x1136   :  { %6932 = vrot.lane.b32.xlu0 %v14101_v23, %s12430_s24 }
0x1151   :  { %6783 = vmax.xlane.f32.xlu1 %v6782_v9 }
0x1162   :  { %7031 = vrot.lane.b32.xlu1 %v14074_v62, %s12432_s22 }
0x1198   :  { %v6769_v39 = vpop.xlane.xlu1 %6768 }
0x1199   :  { %v6785_v31 = vsub.f32 %v6761_v52, %v6769_v39 }
0x119b   :  { %v6791_v10 = vmul.f32 1.442695, %v6785_v31 }
0x119c   :  { %v6772_v3 = vpop.xlane.xlu0 %6771 }
0x119d   :  { %12307 = vpow2.f32 %v6791_v10  ;;  %v6786_v11 = vsub.f32 %v6762_v14, %v6772_v3 }
0x119f   :  { %v6793_v17 = vmul.f32 1.442695, %v6786_v11 }
0x11a0   :  { %v6775_v5 = vpop.xlane.xlu0 %6774 }
0x11a1   :  { %12309 = vpow2.f32 %v6793_v17  ;;  %v6787_v6 = vsub.f32 %v6763_v63, %v6775_v5 }
0x11a3   :  { %v6795_v2 = vmul.f32 1.442695, %v6787_v6 }
0x11a5   :  { %v6778_v48 = vpop.xlane.xlu1 %6777 }
0x11a6   :  { %v6788_v13 = vsub.f32 %v6764_v18, %v6778_v48 }
0x11a8   :  { %v6797_v57 = vmul.f32 1.442695, %v6788_v13 }
0x11a9   :  { %v6781_v0 = vpop.xlane.xlu0 %6780  ;;  %v7038_v42 = vpop.permute.xlu1 %7037 }
0x11aa   :  { %v12308_v47 = vpop.eup %12307  ;;  %12311 = vpow2.f32 %v6797_v57  ;;  %v6789_v4 = vsub.f32 %v6765_v50, %v6781_v0 }
0x11ab   :  { %v6803_v61 = vsel %vm1472_vm5, %v12308_v47, 0.0  ;;  %12313 = vpow2.f32 %v6795_v2 }
0x11ac   :  { %6804 = vadd.xlane.f32.xlu0 %v6803_v61  ;;  %v6799_v30 = vmul.f32 1.442695, %v6789_v4 }
0x11ad   :  { %v6933_v54 = vpop.permute.xlu0 %6932 }
0x11ae   :  { %v12310_v55 = vpop.eup %12309  ;;  %11896 = vmatpush3.msra.mxu1 %v6933_v54  ;;  %12315 = vpow2.f32 %v6799_v30 }
0x11af   :  { %v6806_v12 = vsel %vm1472_vm5, %v12310_v55, 0.0  ;;  %11921 = vmatprep.subr.mxu1 %v12426_v1 }
0x11b0   :  { %6807 = vadd.xlane.f32.xlu1 %v6806_v12 }
0x11b7   :  { %v12312_v16 = vpop.eup %12311 }
0x11b8   :  { %v6812_v53 = vsel %vm1472_vm5, %v12312_v16, 0.0  ;;  %v14192_v52 = vpop.eup %12313 }
0x11b9   :  { %6813 = vadd.xlane.f32.xlu1 %v6812_v53  ;;  %v6809_v58 = vsel %vm1479_vm6, %v14192_v52, 0.0 }
0x11bb   :  { %v14196_v44 = vpop.eup %12315 }
0x11bc   :  { %v6815_v14 = vsel %vm1472_vm5, %v14196_v44, 0.0 }
0x11c2   :  { %7145 = vrot.lane.b32.xlu0 %v14094_v28, %s12431_s0 }
0x11ca   :  { %7033 = vrot.lane.b32.xlu1 %v14048_v60, %s12432_s22 }
0x11ce   :  { %7035 = vrot.lane.b32.xlu1 %v14065_v21, %s12432_s22 }
0x11da   :  { %v6784_v32 = vpop.xlane.xlu1 %6783 }
0x11db   :  { %v6790_v41 = vsub.f32 %v6766_v37, %v6784_v32 }
0x11dd   :  { %v6801_v56 = vmul.f32 1.442695, %v6790_v41 }
0x11de   :  { %v7032_v40 = vpop.permute.xlu1 %7031 }
0x11df   :  { %12317 = vpow2.f32 %v6801_v56 }
0x11e1   :  { %6810 = vadd.xlane.f32.xlu0 %v6809_v58 }
0x11e5   :  { %6816 = vadd.xlane.f32.xlu0 %v6815_v14 }
0x11ec   :  { %v14200_v33 = vpop.eup %12317 }
0x11ed   :  { %v6818_v24 = vsel %vm1479_vm6, %v14200_v33, 0.0 }
0x11f2   :  { %6819 = vadd.xlane.f32.xlu1 %v6818_v24 }
0x11fb   :  { %7143 = vrot.lane.b32.xlu0 %v14103_v26, %s12431_s0 }
0x11ff   :  { %7141 = vrot.lane.b32.xlu0 %v14101_v23, %s12431_s0 }
0x1203   :  { %7137 = vrot.lane.b32.xlu1 %v14103_v26, %s12432_s22  ;;  %7135 = vrot.lane.b32.xlu0 %v14101_v23, %s12432_s22 }
0x1207   :  { %7313 = vrot.lane.b32.xlu1 %v14048_v60, %s12433_s21  ;;  %7139 = vrot.lane.b32.xlu0 %v14094_v28, %s12432_s22 }
0x120b   :  { %7311 = vrot.lane.b32.xlu1 %v14074_v62, %s12433_s21  ;;  %7315 = vrot.lane.b32.xlu0 %v14065_v21, %s12433_s21 }
0x120f   :  { %7414 = vrot.lane.b32.xlu1 %v14094_v28, %s12433_s21  ;;  %7519 = vrot.lane.b32.xlu0 %v14065_v21, %s12434_s16 }
0x1213   :  { %7517 = vrot.lane.b32.xlu1 %v14048_v60, %s12434_s16  ;;  %7412 = vrot.lane.b32.xlu0 %v14103_v26, %s12433_s21 }
0x1235   :  { %v6805_v63 = vpop.xlane.xlu0 %6804 }
0x1236   :  { %12319 = vrcp.f32 %v6805_v63 }
0x1239   :  { %v6808_v15 = vpop.xlane.xlu1 %6807  ;;  %v7146_v50 = vpop.permute.xlu0 %7145 }
0x123a   :  { %12321 = vrcp.f32 %v6808_v15 }
0x1242   :  { %v6814_v7 = vpop.xlane.xlu1 %6813 }
0x1243   :  { %v12320_v19 = vpop.eup %12319  ;;  %12323 = vrcp.f32 %v6814_v7 }
0x1244   :  { %v6827_v18 = vmul.f32 %v12320_v19, %v12308_v47 }
0x1246   :  { %11883 = vmatmul.mubr.msk.f32.vlgmr.msra.gmra.mxu0 %vm1472_vm5, %v6827_v18  ;;  %v7034_v35 = vpop.permute.xlu1 %7033 }
0x1247   :  { %v12322_v20 = vpop.eup %12321  ;;  %11907 = vmatpush3.xpose.msk.msra.mxu0 %vm1163_vm3, %v14149_v49  ;;  %11885 = vmatprep.mubr.msk.f32.mxu0 %vm12427_vm2, %v12426_v1 }
0x1248   :  { %11908 = vmatprep.subr.mxu0 %v12426_v1  ;;  %v6828_v27 = vmul.f32 %v12322_v20, %v12310_v55 }
0x124a   :  { %11886 = vmatmul.mubr.msk.f32.gmra.mxu0 %vm1472_vm5, %v6828_v27  ;;  %v7036_v9 = vpop.permute.xlu1 %7035 }
0x124b   :  { %11909 = vmatpush3.xpose.msk.msra.mxu0 %vm1163_vm3, %v14180_v29  ;;  %11888 = vmatprep.mubr.msk.f32.mxu0 %vm12427_vm2, %v12426_v1 }
0x124c   :  { %11910 = vmatprep.subr.mxu0 %v12426_v1 }
0x124f   :  { %11911 = vmatpush3.xpose.msk.msra.mxu0 %vm1163_vm3, %v7038_v42 }
0x1250   :  { %v12324_v43 = vpop.eup %12323  ;;  %11936 = vmatprep.subr.mxu0 %v12426_v1 }
0x1251   :  { %v6830_v49 = vmul.f32 %v12324_v43, %v12312_v16 }
0x1253   :  { %11898 = vmatmul.mubr.msk.f32.vlgmr.msra.gmra.mxu1 %vm1472_vm5, %v6830_v49 }
0x1254   :  { %11922 = vmatpush3.xpose.msk.msra.mxu1 %vm1163_vm3, %v7146_v50  ;;  %11900 = vmatprep.mubr.msk.f32.mxu1 %vm12427_vm2, %v12426_v1 }
0x1255   :  { %11923 = vmatprep.subr.mxu1 %v12426_v1 }
0x126a   :  { %v6811_v36 = vpop.xlane.xlu0 %6810 }
0x126b   :  { %12325 = vrcp.f32 %v6811_v36 }
0x126e   :  { %v6817_v38 = vpop.xlane.xlu0 %6816 }
0x126f   :  { %12327 = vrcp.f32 %v6817_v38 }
0x1272   :  { %v7144_v51 = vpop.permute.xlu0 %7143 }
0x1273   :  { %11924 = vmatpush3.xpose.msk.msra.mxu1 %vm1163_vm3, %v7144_v51 }
0x1274   :  { %11925 = vmatprep.subr.mxu1 %v12426_v1 }
0x1276   :  { %v7142_v37 = vpop.permute.xlu0 %7141 }
0x1277   :  { %11926 = vmatpush3.xpose.msk.msra.mxu1 %vm1163_vm3, %v7142_v37 }
0x1278   :  { %v12326_v29 = vpop.eup %12325  ;;  %11951 = vmatprep.subr.mxu1 %v12426_v1 }
0x1279   :  { %v6829_v39 = vmul.f32 %v12326_v29, %v14192_v52 }
0x127a   :  { %v7136_v31 = vpop.permute.xlu0 %7135 }
0x127b   :  { %v6820_v10 = vpop.xlane.xlu1 %6819  ;;  %11889 = vmatmul.mubr.msk.f32.gmra.mxu0 %vm1472_vm5, %v6829_v39 }
0x127c   :  { %v12328_v3 = vpop.eup %12327  ;;  %12329 = vrcp.f32 %v6820_v10  ;;  %11912 = vmatprep.mubr.msk.f32.mxu0 %vm12427_vm2, %v12426_v1 }
0x127d   :  { %v6831_v11 = vmul.f32 %v12328_v3, %v14196_v44 }
0x127e   :  { %v7140_v17 = vpop.permute.xlu0 %7139 }
0x127f   :  { %v7138_v5 = vpop.permute.xlu1 %7137  ;;  %11901 = vmatmul.mubr.msk.f32.gmra.mxu1 %vm1472_vm5, %v6831_v11  ;;  %11913 = vmatmul.mubr.msk.f32.vlgmr.msra.gmra.mxu0 %vm1163_vm3, %v7032_v40 }
0x1280   :  { %11915 = vmatprep.mubr.msk.f32.mxu0 %vm12427_vm2, %v12426_v1  ;;  %11903 = vmatprep.mubr.msk.f32.mxu1 %vm12427_vm2, %v12426_v1 }
0x1282   :  { %v7316_v48 = vpop.permute.xlu0 %7315 }
0x1283   :  { %v7314_v13 = vpop.permute.xlu1 %7313  ;;  %11916 = vmatmul.mubr.msk.f32.gmra.mxu0 %vm1163_vm3, %v7034_v35 }
0x1284   :  { %11937 = vmatpush3.msk.msra.mxu0 %vm1557_vm4, %v7316_v48  ;;  %11918 = vmatprep.mubr.msk.f32.mxu0 %vm12427_vm2, %v12426_v1 }
0x1285   :  { %11938 = vmatprep.subr.mxu0 %v12426_v1 }
0x1286   :  { %11939 = vmatpush3.msra.mxu0 %v7314_v13  ;;  %v14273_v61 = vpop.permute.xlu0 %7519 }
0x1287   :  { %v7312_v57 = vpop.permute.xlu1 %7311  ;;  %11940 = vmatprep.subr.mxu0 %v12426_v1  ;;  %11919 = vmatmul.mubr.msk.f32.gmra.mxu0 %vm1163_vm3, %v7036_v9 }
0x1288   :  { %11941 = vmatpush3.msra.mxu0 %v7312_v57  ;;  %11942 = vmatprep.mubr.msk.f32.mxu0 %vm12427_vm2, %v12426_v1 }
0x1289   :  { %v12330_v0 = vpop.eup %12329  ;;  %11966 = vmatprep.subr.mxu0 %v12426_v1 }
0x128a   :  { %v6832_v47 = vmul.f32 %v12330_v0, %v14200_v33  ;;  %v7413_v55 = vpop.permute.xlu0 %7412 }
0x128b   :  { %v7415_v54 = vpop.permute.xlu1 %7414 }
0x128c   :  { %11904 = vmatmul.mubr.msk.f32.gmra.mxu1 %vm1472_vm5, %v6832_v47 }
0x128d   :  { %11927 = vmatprep.mubr.msk.f32.mxu1 %vm12427_vm2, %v12426_v1 }
0x1290   :  { %11928 = vmatmul.mubr.msk.f32.vlgmr.msra.gmra.mxu1 %vm1163_vm3, %v7136_v31  ;;  %v14314_v31 = vpop.permute.xlu1 %7517 }
0x1291   :  { %11952 = vmatpush3.msk.msra.mxu1 %vm1557_vm4, %v7415_v54  ;;  %11930 = vmatprep.mubr.msk.f32.mxu1 %vm12427_vm2, %v12426_v1 }
0x1292   :  { %11953 = vmatprep.subr.mxu1 %v12426_v1 }
0x1293   :  { %11954 = vmatpush3.msra.mxu1 %v7413_v55 }
0x1294   :  { %11931 = vmatmul.mubr.msk.f32.gmra.mxu1 %vm1163_vm3, %v7138_v5  ;;  %11955 = vmatprep.subr.mxu1 %v12426_v1 }
0x1295   :  { %11933 = vmatprep.mubr.msk.f32.mxu1 %vm12427_vm2, %v12426_v1 }
0x1298   :  { %11934 = vmatmul.mubr.msk.f32.gmra.mxu1 %vm1163_vm3, %v7140_v17 }
0x1299   :  { %11957 = vmatprep.mubr.msk.f32.mxu1 %vm12427_vm2, %v12426_v1 }
0x1306   :  { %v14290_v12 = vpop.f32.mrf.mxu0 }
0x1308   :  { %v11884_v16 = vpop.f32.mrf.mxu0 }
0x130a   :  { %v14292_v53 = vpop.f32.mrf.mxu0 }
0x130c   :  { %v11887_v6 = vpop.f32.mrf.mxu0 }
0x1313   :  { %v14294_v2 = vpop.f32.mrf.mxu1 }
0x1315   :  { %v11899_v4 = vpop.f32.mrf.mxu1 }
0x133b   :  { %v14296_v30 = vpop.f32.mrf.mxu0 }
0x133d   :  { %v11890_v42 = vpop.f32.mrf.mxu0 }
0x133f   :  { %v14298_v32 = vpop.f32.mrf.mxu1  ;;  %v7121_v41 = vpop.f32.mrf.mxu0 }
0x1340   :  { %v7239_v52 = vmul.f32 0.35355338, %v7121_v41 }
0x1341   :  { %v11902_v56 = vpop.f32.mrf.mxu1  ;;  %v11914_v58 = vpop.f32.mrf.mxu0 }
0x1342   :  { %v7245_v44 = vsel %vm1472_vm5, %v7239_v52, -inf }
0x1343   :  { %7246 = vmax.xlane.f32.xlu1 %v7245_v44  ;;  %v7126_v14 = vpop.f32.mrf.mxu0 }
0x1344   :  { %v7240_v33 = vmul.f32 0.35355338, %v7126_v14 }
0x1345   :  { %v11917_v24 = vpop.f32.mrf.mxu0 }
0x1346   :  { %v7248_v40 = vsel %vm1472_vm5, %v7240_v33, -inf }
0x1347   :  { %7249 = vmax.xlane.f32.xlu0 %v7248_v40  ;;  %v7131_v63 = vpop.f32.mrf.mxu0 }
0x1348   :  { %v7241_v15 = vmul.f32 0.35355338, %v7131_v63 }
0x1349   :  { %v11920_v7 = vpop.f32.mrf.mxu0 }
0x134a   :  { %v7251_v19 = vsel %vm1479_vm6, %v7241_v15, -inf }
0x134b   :  { %7252 = vmax.xlane.f32.xlu0 %v7251_v19 }
0x134c   :  { %v14303_v18 = vpop.f32.mrf.mxu1 }
0x134e   :  { %v11905_v20 = vpop.f32.mrf.mxu1 }
0x1350   :  { %v7225_v27 = vpop.f32.mrf.mxu1 }
0x1351   :  { %v7242_v43 = vmul.f32 0.35355338, %v7225_v27 }
0x1352   :  { %v11929_v49 = vpop.f32.mrf.mxu1 }
0x1353   :  { %v7254_v50 = vsel %vm1472_vm5, %v7242_v43, -inf }
0x1354   :  { %v7230_v36 = vpop.f32.mrf.mxu1  ;;  %7255 = vmax.xlane.f32.xlu1 %v7254_v50 }
0x1355   :  { %v7243_v38 = vmul.f32 0.35355338, %v7230_v36 }
0x1356   :  { %v11932_v35 = vpop.f32.mrf.mxu1 }
0x1357   :  { %v7257_v51 = vsel %vm1472_vm5, %v7243_v38, -inf }
0x1358   :  { %v7235_v37 = vpop.f32.mrf.mxu1  ;;  %7258 = vmax.xlane.f32.xlu0 %v7257_v51 }
0x1359   :  { %v7244_v29 = vmul.f32 0.35355338, %v7235_v37 }
0x135a   :  { %v11935_v9 = vpop.f32.mrf.mxu1 }
0x135b   :  { %v7260_v39 = vsel %vm1479_vm6, %v7244_v29, -inf }
0x1365   :  { %7515 = vrot.lane.b32.xlu1 %v14074_v62, %s12434_s16 }
0x136e   :  { %7410 = vrot.lane.b32.xlu0 %v14101_v23, %s12433_s21 }
0x1389   :  { %7261 = vmax.xlane.f32.xlu1 %v7260_v39 }
0x139a   :  { %7509 = vrot.lane.b32.xlu1 %v14074_v62, %s12435_s23 }
0x13cc   :  { %v7247_v10 = vpop.xlane.xlu1 %7246 }
0x13cd   :  { %v7263_v3 = vsub.f32 %v7239_v52, %v7247_v10 }
0x13cf   :  { %v7269_v11 = vmul.f32 1.442695, %v7263_v3 }
0x13d0   :  { %v7250_v17 = vpop.xlane.xlu0 %7249 }
0x13d1   :  { %12331 = vpow2.f32 %v7269_v11  ;;  %v7264_v5 = vsub.f32 %v7240_v33, %v7250_v17 }
0x13d3   :  { %v7271_v48 = vmul.f32 1.442695, %v7264_v5 }
0x13d4   :  { %v7253_v13 = vpop.xlane.xlu0 %7252 }
0x13d5   :  { %12333 = vpow2.f32 %v7271_v48  ;;  %v7265_v56 = vsub.f32 %v7241_v15, %v7253_v13 }
0x13d7   :  { %v7273_v58 = vmul.f32 1.442695, %v7265_v56 }
0x13dd   :  { %v7256_v57 = vpop.xlane.xlu1 %7255 }
0x13de   :  { %v12332_v0 = vpop.eup %12331  ;;  %v7266_v47 = vsub.f32 %v7242_v43, %v7256_v57 }
0x13df   :  { %v7281_v54 = vsel %vm1472_vm5, %v12332_v0, 0.0 }
0x13e0   :  { %v7275_v55 = vmul.f32 1.442695, %v7266_v47  ;;  %7282 = vadd.xlane.f32.xlu0 %v7281_v54 }
0x13e1   :  { %v7259_v16 = vpop.xlane.xlu0 %7258  ;;  %v7516_v33 = vpop.permute.xlu1 %7515 }
0x13e2   :  { %v12334_v6 = vpop.eup %12333  ;;  %12335 = vpow2.f32 %v7275_v55  ;;  %v7267_v44 = vsub.f32 %v7243_v38, %v7259_v16 }
0x13e3   :  { %v7284_v4 = vsel %vm1472_vm5, %v12334_v6, 0.0  ;;  %12337 = vpow2.f32 %v7273_v58 }
0x13e4   :  { %7285 = vadd.xlane.f32.xlu1 %v7284_v4  ;;  %v7277_v14 = vmul.f32 1.442695, %v7267_v44 }
0x13e5   :  { %v7411_v42 = vpop.permute.xlu0 %7410 }
0x13e6   :  { %11956 = vmatpush3.msra.mxu1 %v7411_v42  ;;  %12339 = vpow2.f32 %v7277_v14 }
0x13e7   :  { %11981 = vmatprep.subr.mxu1 %v12426_v1 }
0x13ef   :  { %v12336_v41 = vpop.eup %12335 }
0x13f0   :  { %v7290_v52 = vsel %vm1472_vm5, %v12336_v41, 0.0  ;;  %v14326_v24 = vpop.eup %12337 }
0x13f1   :  { %7291 = vadd.xlane.f32.xlu1 %v7290_v52  ;;  %v7287_v7 = vsel %vm1479_vm6, %v14326_v24, 0.0 }
0x13f3   :  { %v14330_v15 = vpop.eup %12339 }
0x13f4   :  { %v7293_v20 = vsel %vm1472_vm5, %v14330_v15, 0.0 }
0x13f6   :  { %7623 = vrot.lane.b32.xlu0 %v14094_v28, %s12434_s16 }
0x1402   :  { %7511 = vrot.lane.b32.xlu1 %v14048_v60, %s12435_s23 }
0x1406   :  { %7513 = vrot.lane.b32.xlu1 %v14065_v21, %s12435_s23 }
0x1412   :  { %v7262_v40 = vpop.xlane.xlu1 %7261 }
0x1413   :  { %v7268_v63 = vsub.f32 %v7244_v29, %v7262_v40 }
0x1415   :  { %v7279_v19 = vmul.f32 1.442695, %v7268_v63  ;;  %7288 = vadd.xlane.f32.xlu0 %v7287_v7 }
0x1416   :  { %v7510_v49 = vpop.permute.xlu1 %7509 }
0x1417   :  { %12341 = vpow2.f32 %v7279_v19 }
0x1419   :  { %7294 = vadd.xlane.f32.xlu0 %v7293_v20 }
0x1424   :  { %v14334_v27 = vpop.eup %12341 }
0x1425   :  { %v7296_v43 = vsel %vm1479_vm6, %v14334_v27, 0.0 }
0x142a   :  { %7297 = vadd.xlane.f32.xlu1 %v7296_v43 }
0x142f   :  { %7621 = vrot.lane.b32.xlu0 %v14103_v26, %s12434_s16 }
0x1433   :  { %7619 = vrot.lane.b32.xlu0 %v14101_v23, %s12434_s16 }
0x1437   :  { %7613 = vrot.lane.b32.xlu0 %v14101_v23, %s12435_s23 }
0x143b   :  { %7615 = vrot.lane.b32.xlu1 %v14103_v26, %s12435_s23  ;;  %7617 = vrot.lane.b32.xlu0 %v14094_v28, %s12435_s23 }
0x143f   :  { %7791 = vrot.lane.b32.xlu1 %v14048_v60, %s12436_s25  ;;  %7793 = vrot.lane.b32.xlu0 %v14065_v21, %s12436_s25 }
0x1443   :  { %7789 = vrot.lane.b32.xlu1 %v14074_v62, %s12436_s25  ;;  %7997 = vrot.lane.b32.xlu0 %v14065_v21, %s12437_s28 }
0x1447   :  { %7892 = vrot.lane.b32.xlu1 %v14094_v28, %s12436_s25  ;;  %7890 = vrot.lane.b32.xlu0 %v14103_v26, %s12436_s25 }
0x144b   :  { %7995 = vrot.lane.b32.xlu1 %v14048_v60, %s12437_s28 }
0x1469   :  { %v7283_v50 = vpop.xlane.xlu0 %7282 }
0x146a   :  { %12343 = vrcp.f32 %v7283_v50 }
0x146d   :  { %v7286_v36 = vpop.xlane.xlu1 %7285  ;;  %v7624_v39 = vpop.permute.xlu0 %7623 }
0x146e   :  { %12345 = vrcp.f32 %v7286_v36 }
0x1477   :  { %v12344_v38 = vpop.eup %12343 }
0x1478   :  { %v7305_v35 = vmul.f32 %v12344_v38, %v12332_v0 }
0x147a   :  { %v7292_v51 = vpop.xlane.xlu1 %7291  ;;  %11943 = vmatmul.mubr.msk.f32.vlgmr.msra.gmra.mxu0 %vm1472_vm5, %v7305_v35 }
0x147b   :  { %v12346_v37 = vpop.eup %12345  ;;  %12347 = vrcp.f32 %v7292_v51  ;;  %11967 = vmatpush3.xpose.msk.msra.mxu0 %vm1163_vm3, %v14273_v61  ;;  %11945 = vmatprep.mubr.msk.f32.mxu0 %vm12427_vm2, %v12426_v1 }
0x147c   :  { %11968 = vmatprep.subr.mxu0 %v12426_v1  ;;  %v7306_v9 = vmul.f32 %v12346_v37, %v12334_v6 }
0x147e   :  { %11946 = vmatmul.mubr.msk.f32.gmra.mxu0 %vm1472_vm5, %v7306_v9  ;;  %v7512_v11 = vpop.permute.xlu1 %7511 }
0x147f   :  { %11969 = vmatpush3.xpose.msk.msra.mxu0 %vm1163_vm3, %v14314_v31  ;;  %11948 = vmatprep.mubr.msk.f32.mxu0 %vm12427_vm2, %v12426_v1 }
0x1480   :  { %11970 = vmatprep.subr.mxu0 %v12426_v1 }
0x1482   :  { %v7514_v57 = vpop.permute.xlu1 %7513 }
0x1483   :  { %11971 = vmatpush3.xpose.msk.msra.mxu0 %vm1163_vm3, %v7516_v33 }
0x1484   :  { %11996 = vmatprep.subr.mxu0 %v12426_v1 }
0x1488   :  { %v12348_v61 = vpop.eup %12347 }
0x1489   :  { %v7308_v29 = vmul.f32 %v12348_v61, %v12336_v41 }
0x148b   :  { %11958 = vmatmul.mubr.msk.f32.vlgmr.msra.gmra.mxu1 %vm1472_vm5, %v7308_v29 }
0x148c   :  { %11982 = vmatpush3.xpose.msk.msra.mxu1 %vm1163_vm3, %v7624_v39  ;;  %11960 = vmatprep.mubr.msk.f32.mxu1 %vm12427_vm2, %v12426_v1 }
0x148d   :  { %11983 = vmatprep.subr.mxu1 %v12426_v1 }
0x149e   :  { %v7289_v31 = vpop.xlane.xlu0 %7288 }
0x149f   :  { %12349 = vrcp.f32 %v7289_v31 }
0x14a2   :  { %v7295_v10 = vpop.xlane.xlu0 %7294 }
0x14a3   :  { %12351 = vrcp.f32 %v7295_v10 }
0x14a6   :  { %v7622_v3 = vpop.permute.xlu0 %7621 }
0x14a7   :  { %11984 = vmatpush3.xpose.msk.msra.mxu1 %vm1163_vm3, %v7622_v3 }
0x14a8   :  { %11985 = vmatprep.subr.mxu1 %v12426_v1 }
0x14aa   :  { %v7620_v17 = vpop.permute.xlu0 %7619 }
0x14ab   :  { %11986 = vmatpush3.xpose.msk.msra.mxu1 %vm1163_vm3, %v7620_v17 }
0x14ac   :  { %v12350_v5 = vpop.eup %12349  ;;  %12011 = vmatprep.subr.mxu1 %v12426_v1 }
0x14ad   :  { %v7307_v48 = vmul.f32 %v12350_v5, %v14326_v24 }
0x14ae   :  { %v7614_v13 = vpop.permute.xlu0 %7613 }
0x14af   :  { %11949 = vmatmul.mubr.msk.f32.gmra.mxu0 %vm1472_vm5, %v7307_v48 }
0x14b0   :  { %v12352_v0 = vpop.eup %12351  ;;  %11972 = vmatprep.mubr.msk.f32.mxu0 %vm12427_vm2, %v12426_v1 }
0x14b1   :  { %v7309_v47 = vmul.f32 %v12352_v0, %v14330_v15 }
0x14b2   :  { %v7618_v54 = vpop.permute.xlu0 %7617 }
0x14b3   :  { %v7298_v55 = vpop.xlane.xlu1 %7297  ;;  %11961 = vmatmul.mubr.msk.f32.gmra.mxu1 %vm1472_vm5, %v7309_v47  ;;  %11973 = vmatmul.mubr.msk.f32.vlgmr.msra.gmra.mxu0 %vm1163_vm3, %v7510_v49 }
0x14b4   :  { %12353 = vrcp.f32 %v7298_v55  ;;  %11975 = vmatprep.mubr.msk.f32.mxu0 %vm12427_vm2, %v12426_v1  ;;  %11963 = vmatprep.mubr.msk.f32.mxu1 %vm12427_vm2, %v12426_v1 }
0x14b6   :  { %v7794_v16 = vpop.permute.xlu0 %7793 }
0x14b7   :  { %v7616_v6 = vpop.permute.xlu1 %7615  ;;  %11976 = vmatmul.mubr.msk.f32.gmra.mxu0 %vm1163_vm3, %v7512_v11 }
0x14b8   :  { %11997 = vmatpush3.msk.msra.mxu0 %vm1557_vm4, %v7794_v16  ;;  %11978 = vmatprep.mubr.msk.f32.mxu0 %vm12427_vm2, %v12426_v1 }
0x14b9   :  { %11998 = vmatprep.subr.mxu0 %v12426_v1 }
0x14ba   :  { %v14407_v56 = vpop.permute.xlu0 %7997 }
0x14bb   :  { %v7792_v4 = vpop.permute.xlu1 %7791  ;;  %11979 = vmatmul.mubr.msk.f32.gmra.mxu0 %vm1163_vm3, %v7514_v57 }
0x14bc   :  { %11999 = vmatpush3.msra.mxu0 %v7792_v4  ;;  %12002 = vmatprep.mubr.msk.f32.mxu0 %vm12427_vm2, %v12426_v1 }
0x14bd   :  { %12000 = vmatprep.subr.mxu0 %v12426_v1 }
0x14be   :  { %v7891_v44 = vpop.permute.xlu0 %7890 }
0x14bf   :  { %v7790_v42 = vpop.permute.xlu1 %7789 }
0x14c0   :  { %12001 = vmatpush3.msra.mxu0 %v7790_v42 }
0x14c1   :  { %v12354_v41 = vpop.eup %12353  ;;  %12026 = vmatprep.subr.mxu0 %v12426_v1 }
0x14c2   :  { %v7310_v52 = vmul.f32 %v12354_v41, %v14334_v27 }
0x14c3   :  { %v7893_v58 = vpop.permute.xlu1 %7892 }
0x14c4   :  { %11964 = vmatmul.mubr.msk.f32.gmra.mxu1 %vm1472_vm5, %v7310_v52 }
0x14c5   :  { %11987 = vmatprep.mubr.msk.f32.mxu1 %vm12427_vm2, %v12426_v1 }
0x14c8   :  { %11988 = vmatmul.mubr.msk.f32.vlgmr.msra.gmra.mxu1 %vm1163_vm3, %v7614_v13 }
0x14c9   :  { %12012 = vmatpush3.msk.msra.mxu1 %vm1557_vm4, %v7893_v58  ;;  %11990 = vmatprep.mubr.msk.f32.mxu1 %vm12427_vm2, %v12426_v1 }
0x14ca   :  { %12013 = vmatprep.subr.mxu1 %v12426_v1 }
0x14cb   :  { %12014 = vmatpush3.msra.mxu1 %v7891_v44 }
0x14cc   :  { %11991 = vmatmul.mubr.msk.f32.gmra.mxu1 %vm1163_vm3, %v7616_v6  ;;  %12015 = vmatprep.subr.mxu1 %v12426_v1  ;;  %v14448_v6 = vpop.permute.xlu1 %7995 }
0x14cd   :  { %11993 = vmatprep.mubr.msk.f32.mxu1 %vm12427_vm2, %v12426_v1 }
0x14d0   :  { %11994 = vmatmul.mubr.msk.f32.gmra.mxu1 %vm1163_vm3, %v7618_v54 }
0x14d1   :  { %12017 = vmatprep.mubr.msk.f32.mxu1 %vm12427_vm2, %v12426_v1 }
0x153a   :  { %v14424_v14 = vpop.f32.mrf.mxu0 }
0x153c   :  { %v11944_v33 = vpop.f32.mrf.mxu0 }
0x153e   :  { %v14426_v24 = vpop.f32.mrf.mxu0 }
0x1540   :  { %v11947_v40 = vpop.f32.mrf.mxu0 }
0x154b   :  { %v14428_v63 = vpop.f32.mrf.mxu1 }
0x154d   :  { %v11959_v7 = vpop.f32.mrf.mxu1 }
0x156f   :  { %v14430_v15 = vpop.f32.mrf.mxu0 }
0x1571   :  { %v11950_v19 = vpop.f32.mrf.mxu0 }
0x1573   :  { %v14432_v20 = vpop.f32.mrf.mxu1  ;;  %v7599_v27 = vpop.f32.mrf.mxu0 }
0x1574   :  { %v7717_v43 = vmul.f32 0.35355338, %v7599_v27 }
0x1575   :  { %v11962_v49 = vpop.f32.mrf.mxu1  ;;  %v11974_v50 = vpop.f32.mrf.mxu0 }
0x1576   :  { %v7723_v36 = vsel %vm1472_vm5, %v7717_v43, -inf }
0x1577   :  { %7724 = vmax.xlane.f32.xlu1 %v7723_v36  ;;  %v7604_v38 = vpop.f32.mrf.mxu0 }
0x1578   :  { %v7718_v35 = vmul.f32 0.35355338, %v7604_v38 }
0x1579   :  { %v11977_v51 = vpop.f32.mrf.mxu0 }
0x157a   :  { %v7726_v37 = vsel %vm1472_vm5, %v7718_v35, -inf }
0x157b   :  { %7727 = vmax.xlane.f32.xlu0 %v7726_v37  ;;  %v7609_v9 = vpop.f32.mrf.mxu0 }
0x157c   :  { %v7719_v61 = vmul.f32 0.35355338, %v7609_v9 }
0x157d   :  { %v11980_v29 = vpop.f32.mrf.mxu0 }
0x157e   :  { %v7729_v39 = vsel %vm1479_vm6, %v7719_v61, -inf }
0x157f   :  { %7730 = vmax.xlane.f32.xlu0 %v7729_v39 }
0x1584   :  { %v14437_v31 = vpop.f32.mrf.mxu1 }
0x1586   :  { %v11965_v10 = vpop.f32.mrf.mxu1 }
0x1588   :  { %v7703_v3 = vpop.f32.mrf.mxu1 }
0x1589   :  { %v7720_v11 = vmul.f32 0.35355338, %v7703_v3 }
0x158a   :  { %v11989_v17 = vpop.f32.mrf.mxu1 }
0x158b   :  { %v7732_v5 = vsel %vm1472_vm5, %v7720_v11, -inf }
0x158c   :  { %v7708_v48 = vpop.f32.mrf.mxu1  ;;  %7733 = vmax.xlane.f32.xlu1 %v7732_v5 }
0x158d   :  { %v7721_v13 = vmul.f32 0.35355338, %v7708_v48 }
0x158e   :  { %v11992_v57 = vpop.f32.mrf.mxu1 }
0x158f   :  { %v7735_v0 = vsel %vm1472_vm5, %v7721_v13, -inf }
0x1590   :  { %v7713_v47 = vpop.f32.mrf.mxu1  ;;  %7736 = vmax.xlane.f32.xlu0 %v7735_v0 }
0x1591   :  { %v7722_v55 = vmul.f32 0.35355338, %v7713_v47 }
0x1592   :  { %v11995_v54 = vpop.f32.mrf.mxu1 }
0x1593   :  { %v7738_v16 = vsel %vm1479_vm6, %v7722_v55, -inf }
0x159d   :  { %7993 = vrot.lane.b32.xlu1 %v14074_v62, %s12437_s28 }
0x15a6   :  { %7888 = vrot.lane.b32.xlu0 %v14101_v23, %s12436_s25 }
0x15c1   :  { %7739 = vmax.xlane.f32.xlu1 %v7738_v16 }
0x15d2   :  { %7987 = vrot.lane.b32.xlu1 %v14074_v62, %s12438_s26 }
0x1600   :  { %v7725_v4 = vpop.xlane.xlu1 %7724 }
0x1601   :  { %v7741_v42 = vsub.f32 %v7717_v43, %v7725_v4 }
0x1603   :  { %v7747_v41 = vmul.f32 1.442695, %v7741_v42 }
0x1604   :  { %v7728_v52 = vpop.xlane.xlu0 %7727 }
0x1605   :  { %12355 = vpow2.f32 %v7747_v41  ;;  %v7742_v58 = vsub.f32 %v7718_v35, %v7728_v52 }
0x1607   :  { %v7749_v44 = vmul.f32 1.442695, %v7742_v58 }
0x1608   :  { %v7731_v7 = vpop.xlane.xlu0 %7730 }
0x1609   :  { %12357 = vpow2.f32 %v7749_v44  ;;  %v7743_v37 = vsub.f32 %v7719_v61, %v7731_v7 }
0x160b   :  { %v7751_v9 = vmul.f32 1.442695, %v7743_v37 }
0x1612   :  { %v12356_v33 = vpop.eup %12355 }
0x1613   :  { %v7759_v40 = vsel %vm1472_vm5, %v12356_v33, 0.0 }
0x1614   :  { %7760 = vadd.xlane.f32.xlu0 %v7759_v40 }
0x1615   :  { %v7734_v19 = vpop.xlane.xlu1 %7733 }
0x1616   :  { %v12358_v27 = vpop.eup %12357  ;;  %v7744_v49 = vsub.f32 %v7720_v11, %v7734_v19 }
0x1617   :  { %v7762_v50 = vsel %vm1472_vm5, %v12358_v27, 0.0 }
0x1618   :  { %v7753_v36 = vmul.f32 1.442695, %v7744_v49  ;;  %7763 = vadd.xlane.f32.xlu1 %v7762_v50 }
0x1619   :  { %v7737_v38 = vpop.xlane.xlu0 %7736  ;;  %v7994_v3 = vpop.permute.xlu1 %7993 }
0x161a   :  { %12359 = vpow2.f32 %v7753_v36  ;;  %v7745_v29 = vsub.f32 %v7721_v13, %v7737_v38 }
0x161b   :  { %12361 = vpow2.f32 %v7751_v9 }
0x161c   :  { %v7755_v39 = vmul.f32 1.442695, %v7745_v29 }
0x161d   :  { %v7889_v43 = vpop.permute.xlu0 %7888 }
0x161e   :  { %12016 = vmatpush3.msra.mxu1 %v7889_v43  ;;  %12363 = vpow2.f32 %v7755_v39 }
0x161f   :  { %12041 = vmatprep.subr.mxu1 %v12426_v1 }
0x1627   :  { %v12360_v35 = vpop.eup %12359 }
0x1628   :  { %v7768_v51 = vsel %vm1472_vm5, %v12360_v35, 0.0  ;;  %v12362_v10 = vpop.eup %12361 }
0x1629   :  { %7769 = vadd.xlane.f32.xlu1 %v7768_v51  ;;  %v7765_v11 = vsel %vm1479_vm6, %v12362_v10, 0.0 }
0x162a   :  { %8101 = vrot.lane.b32.xlu0 %v14094_v28, %s12437_s28 }
0x162b   :  { %v12364_v17 = vpop.eup %12363 }
0x162c   :  { %v7771_v61 = vsel %vm1472_vm5, %v12364_v17, 0.0 }
0x163a   :  { %7989 = vrot.lane.b32.xlu1 %v14048_v60, %s12438_s26 }
0x163e   :  { %8091 = vrot.lane.b32.xlu1 %v14101_v23, %s12438_s26 }
0x1649   :  { %7766 = vadd.xlane.f32.xlu0 %v7765_v11 }
0x164a   :  { %v7740_v5 = vpop.xlane.xlu1 %7739 }
0x164b   :  { %v7746_v48 = vsub.f32 %v7722_v55, %v7740_v5 }
0x164d   :  { %v7757_v13 = vmul.f32 1.442695, %v7746_v48  ;;  %7772 = vadd.xlane.f32.xlu0 %v7771_v61 }
0x164e   :  { %v7988_v47 = vpop.permute.xlu1 %7987 }
0x164f   :  { %12365 = vpow2.f32 %v7757_v13 }
0x165c   :  { %v14462_v57 = vpop.eup %12365 }
0x165d   :  { %v7774_v0 = vsel %vm1479_vm6, %v14462_v57, 0.0 }
0x1662   :  { %7775 = vadd.xlane.f32.xlu1 %v7774_v0 }
0x1663   :  { %8099 = vrot.lane.b32.xlu0 %v14103_v26, %s12437_s28 }
0x1667   :  { %8097 = vrot.lane.b32.xlu0 %v14101_v23, %s12437_s28 }
0x166b   :  { %7991 = vrot.lane.b32.xlu0 %v14065_v21, %s12438_s26 }
0x166f   :  { %8095 = vrot.lane.b32.xlu0 %v14094_v28, %s12438_s26 }
0x1673   :  { %8093 = vrot.lane.b32.xlu1 %v14103_v26, %s12438_s26 }
0x169d   :  { %v7761_v54 = vpop.xlane.xlu0 %7760 }
0x169e   :  { %12367 = vrcp.f32 %v7761_v54 }
0x16a1   :  { %v7764_v55 = vpop.xlane.xlu1 %7763  ;;  %v8102_v44 = vpop.permute.xlu0 %8101 }
0x16a2   :  { %12369 = vrcp.f32 %v7764_v55 }
0x16ab   :  { %v12368_v16 = vpop.eup %12367 }
0x16ac   :  { %v7783_v4 = vmul.f32 %v12368_v16, %v12356_v33 }
0x16ae   :  { %12003 = vmatmul.mubr.msk.f32.vlgmr.msra.gmra.mxu0 %vm1472_vm5, %v7783_v4 }
0x16af   :  { %v12370_v42 = vpop.eup %12369  ;;  %12027 = vmatpush3.xpose.msk.msra.mxu0 %vm1163_vm3, %v14407_v56  ;;  %12005 = vmatprep.mubr.msk.f32.mxu0 %vm12427_vm2, %v12426_v1 }
0x16b0   :  { %12028 = vmatprep.subr.mxu0 %v12426_v1  ;;  %v7784_v41 = vmul.f32 %v12370_v42, %v12358_v27 }
0x16b2   :  { %v7770_v52 = vpop.xlane.xlu1 %7769  ;;  %12006 = vmatmul.mubr.msk.f32.gmra.mxu0 %vm1472_vm5, %v7784_v41 }
0x16b3   :  { %12371 = vrcp.f32 %v7770_v52  ;;  %12029 = vmatpush3.xpose.msk.msra.mxu0 %vm1163_vm3, %v14448_v6  ;;  %12008 = vmatprep.mubr.msk.f32.mxu0 %vm12427_vm2, %v12426_v1 }
0x16b4   :  { %12030 = vmatprep.subr.mxu0 %v12426_v1 }
0x16b6   :  { %v7990_v27 = vpop.permute.xlu1 %7989 }
0x16b7   :  { %12031 = vmatpush3.xpose.msk.msra.mxu0 %vm1163_vm3, %v7994_v3 }
0x16b8   :  { %12056 = vmatprep.subr.mxu0 %v12426_v1 }
0x16ba   :  { %v8092_v38 = vpop.permute.xlu1 %8091 }
0x16c0   :  { %v12372_v56 = vpop.eup %12371 }
0x16c1   :  { %v7786_v58 = vmul.f32 %v12372_v56, %v12360_v35 }
0x16c3   :  { %12018 = vmatmul.mubr.msk.f32.vlgmr.msra.gmra.mxu1 %vm1472_vm5, %v7786_v58 }
0x16c4   :  { %12042 = vmatpush3.xpose.msk.msra.mxu1 %vm1163_vm3, %v8102_v44  ;;  %12020 = vmatprep.mubr.msk.f32.mxu1 %vm12427_vm2, %v12426_v1 }
0x16c5   :  { %12043 = vmatprep.subr.mxu1 %v12426_v1 }
0x16d2   :  { %v7767_v6 = vpop.xlane.xlu0 %7766 }
0x16d3   :  { %12373 = vrcp.f32 %v7767_v6 }
0x16d6   :  { %v7773_v33 = vpop.xlane.xlu0 %7772 }
0x16d7   :  { %12375 = vrcp.f32 %v7773_v33 }
0x16da   :  { %v8100_v40 = vpop.permute.xlu0 %8099 }
0x16db   :  { %12044 = vmatpush3.xpose.msk.msra.mxu1 %vm1163_vm3, %v8100_v40 }
0x16dc   :  { %12045 = vmatprep.subr.mxu1 %v12426_v1 }
0x16de   :  { %v8098_v7 = vpop.permute.xlu0 %8097 }
0x16df   :  { %12046 = vmatpush3.xpose.msk.msra.mxu1 %vm1163_vm3, %v8098_v7 }
0x16e0   :  { %v12374_v19 = vpop.eup %12373  ;;  %12071 = vmatprep.subr.mxu1 %v12426_v1 }
0x16e1   :  { %v7785_v49 = vmul.f32 %v12374_v19, %v12362_v10 }
0x16e2   :  { %v7992_v35 = vpop.permute.xlu0 %7991 }
0x16e3   :  { %12009 = vmatmul.mubr.msk.f32.gmra.mxu0 %vm1472_vm5, %v7785_v49 }
0x16e4   :  { %v12376_v50 = vpop.eup %12375  ;;  %12032 = vmatprep.mubr.msk.f32.mxu0 %vm12427_vm2, %v12426_v1 }
0x16e5   :  { %v7787_v36 = vmul.f32 %v12376_v50, %v12364_v17 }
0x16e6   :  { %v8096_v29 = vpop.permute.xlu0 %8095 }
0x16e7   :  { %12021 = vmatmul.mubr.msk.f32.gmra.mxu1 %vm1472_vm5, %v7787_v36  ;;  %12033 = vmatmul.mubr.msk.f32.vlgmr.msra.gmra.mxu0 %vm1163_vm3, %v7988_v47 }
0x16e8   :  { %12035 = vmatprep.mubr.msk.f32.mxu0 %vm12427_vm2, %v12426_v1  ;;  %12023 = vmatprep.mubr.msk.f32.mxu1 %vm12427_vm2, %v12426_v1 }
0x16eb   :  { %v7776_v43 = vpop.xlane.xlu1 %7775  ;;  %12036 = vmatmul.mubr.msk.f32.gmra.mxu0 %vm1163_vm3, %v7990_v27 }
0x16ec   :  { %12377 = vrcp.f32 %v7776_v43  ;;  %12038 = vmatprep.mubr.msk.f32.mxu0 %vm12427_vm2, %v12426_v1 }
0x16ef   :  { %12039 = vmatmul.mubr.msk.f32.gmra.mxu0 %vm1163_vm3, %v7992_v35  ;;  %v8094_v9 = vpop.permute.xlu1 %8093 }
0x16f0   :  { %12062 = vmatprep.mubr.msk.f32.mxu0 %vm12427_vm2, %v12426_v1 }
0x16f9   :  { %v12378_v51 = vpop.eup %12377 }
0x16fa   :  { %v7788_v37 = vmul.f32 %v12378_v51, %v14462_v57 }
0x16fc   :  { %12024 = vmatmul.mubr.msk.f32.gmra.mxu1 %vm1472_vm5, %v7788_v37 }
0x16fd   :  { %12047 = vmatprep.mubr.msk.f32.mxu1 %vm12427_vm2, %v12426_v1 }
0x1700   :  { %12048 = vmatmul.mubr.msk.f32.vlgmr.msra.gmra.mxu1 %vm1163_vm3, %v8092_v38 }
0x1701   :  { %12050 = vmatprep.mubr.msk.f32.mxu1 %vm12427_vm2, %v12426_v1 }
0x1704   :  { %12051 = vmatmul.mubr.msk.f32.gmra.mxu1 %vm1163_vm3, %v8094_v9 }
0x1705   :  { %12053 = vmatprep.mubr.msk.f32.mxu1 %vm12427_vm2, %v12426_v1 }
0x1708   :  { %12054 = vmatmul.mubr.msk.f32.gmra.mxu1 %vm1163_vm3, %v8096_v29 }
0x1709   :  { %12077 = vmatprep.mubr.msk.f32.mxu1 %vm12427_vm2, %v12426_v1 }
0x176e   :  { %v14527_v39 = vpop.f32.mrf.mxu0 }
0x1770   :  { %v12004_v10 = vpop.f32.mrf.mxu0 }
0x1772   :  { %v14529_v3 = vpop.f32.mrf.mxu0 }
0x1774   :  { %v12007_v11 = vpop.f32.mrf.mxu0 }
0x1783   :  { %v14531_v17 = vpop.f32.mrf.mxu1 }
0x1785   :  { %v12019_v5 = vpop.f32.mrf.mxu1 }
0x17a3   :  { %v14533_v48 = vpop.f32.mrf.mxu0 }
0x17a5   :  { %v12010_v61 = vpop.f32.mrf.mxu0 }
0x17a7   :  { %v14535_v13 = vpop.f32.mrf.mxu1  ;;  %v8077_v57 = vpop.f32.mrf.mxu0 }
0x17a8   :  { %v8195_v0 = vmul.f32 0.35355338, %v8077_v57 }
0x17a9   :  { %v12022_v47 = vpop.f32.mrf.mxu1  ;;  %v12034_v54 = vpop.f32.mrf.mxu0 }
0x17aa   :  { %v8201_v55 = vsel %vm1472_vm5, %v8195_v0, -inf }
0x17ab   :  { %8202 = vmax.xlane.f32.xlu1 %v8201_v55  ;;  %v8082_v16 = vpop.f32.mrf.mxu0 }
0x17ac   :  { %v8196_v4 = vmul.f32 0.35355338, %v8082_v16 }
0x17ad   :  { %v12037_v42 = vpop.f32.mrf.mxu0 }
0x17ae   :  { %v8204_v41 = vsel %vm1472_vm5, %v8196_v4, -inf }
0x17af   :  { %8205 = vmax.xlane.f32.xlu0 %v8204_v41  ;;  %v8087_v52 = vpop.f32.mrf.mxu0 }
0x17b0   :  { %v8197_v56 = vmul.f32 0.35355338, %v8087_v52 }
0x17b1   :  { %v12040_v58 = vpop.f32.mrf.mxu0 }
0x17b2   :  { %v8207_v44 = vsel %vm1479_vm6, %v8197_v56, -inf }
0x17b3   :  { %8208 = vmax.xlane.f32.xlu1 %v8207_v44 }
0x17bc   :  { %v14540_v6 = vpop.f32.mrf.mxu1 }
0x17be   :  { %v12025_v33 = vpop.f32.mrf.mxu1 }
0x17c0   :  { %v8181_v40 = vpop.f32.mrf.mxu1 }
0x17c1   :  { %v8198_v7 = vmul.f32 0.35355338, %v8181_v40 }
0x17c2   :  { %v12049_v19 = vpop.f32.mrf.mxu1 }
0x17c3   :  { %v8210_v27 = vsel %vm1472_vm5, %v8198_v7, -inf }
0x17c4   :  { %v8186_v49 = vpop.f32.mrf.mxu1  ;;  %8211 = vmax.xlane.f32.xlu0 %v8210_v27 }
0x17c5   :  { %v8199_v50 = vmul.f32 0.35355338, %v8186_v49 }
0x17c6   :  { %v12052_v36 = vpop.f32.mrf.mxu1 }
0x17c7   :  { %v8213_v38 = vsel %vm1472_vm5, %v8199_v50, -inf }
0x17c8   :  { %v8191_v43 = vpop.f32.mrf.mxu1  ;;  %8214 = vmax.xlane.f32.xlu0 %v8213_v38 }
0x17c9   :  { %v8200_v35 = vmul.f32 0.35355338, %v8191_v43 }
0x17ca   :  { %v12055_v51 = vpop.f32.mrf.mxu1 }
0x17cb   :  { %v8216_v37 = vsel %vm1479_vm6, %v8200_v35, -inf }
0x17cc   :  { %8217 = vmax.xlane.f32.xlu1 %v8216_v37 }
0x1834   :  { %v8203_v9 = vpop.xlane.xlu1 %8202 }
0x1835   :  { %v8219_v29 = vsub.f32 %v8195_v0, %v8203_v9 }
0x1837   :  { %v8225_v10 = vmul.f32 1.442695, %v8219_v29 }
0x1838   :  { %v8206_v11 = vpop.xlane.xlu0 %8205 }
0x1839   :  { %12379 = vpow2.f32 %v8225_v10  ;;  %v8220_v5 = vsub.f32 %v8196_v4, %v8206_v11 }
0x183b   :  { %v8227_v61 = vmul.f32 1.442695, %v8220_v5 }
0x183c   :  { %v8209_v57 = vpop.xlane.xlu1 %8208 }
0x183d   :  { %12381 = vpow2.f32 %v8227_v61  ;;  %v8221_v47 = vsub.f32 %v8197_v56, %v8209_v57 }
0x183f   :  { %v8229_v54 = vmul.f32 1.442695, %v8221_v47 }
0x1841   :  { %12383 = vpow2.f32 %v8229_v54 }
0x1846   :  { %v12380_v55 = vpop.eup %12379 }
0x1847   :  { %v8237_v16 = vsel %vm1472_vm5, %v12380_v55, 0.0 }
0x1848   :  { %8238 = vadd.xlane.f32.xlu0 %v8237_v16  ;;  %v11041_v16 = vld [vmem:[%s15140_s5 + $0x38] sm:$0xff] }
0x184a   :  { %v14546_v42 = vpop.eup %12381 }
0x184b   :  { %v8240_v41 = vsel %vm1472_vm5, %v14546_v42, 0.0 }
0x184c   :  { %8241 = vadd.xlane.f32.xlu1 %v8240_v41  ;;  %v11040_v41 = vld [vmem:[%s15140_s5 + $0x30] sm:$0xff] }
0x184d   :  { %v8212_v52 = vpop.xlane.xlu0 %8211 }
0x184e   :  { %v14550_v0 = vpop.eup %12383  ;;  %v8222_v56 = vsub.f32 %v8198_v7, %v8212_v52 }
0x184f   :  { %v8243_v4 = vsel %vm1479_vm6, %v14550_v0, 0.0 }
0x1850   :  { %8244 = vadd.xlane.f32.xlu1 %v8243_v4  ;;  %v8231_v44 = vmul.f32 1.442695, %v8222_v56  ;;  %v11039_v4 = vld [vmem:[%s15140_s5 + $0x28] sm:$0xff]  ;;  %v11038_v56 = vld [vmem:[%s15140_s5 + $0x20] sm:$0xff] }
0x1851   :  { %v8215_v58 = vpop.xlane.xlu0 %8214 }
0x1852   :  { %v8223_v33 = vsub.f32 %v8199_v50, %v8215_v58  ;;  %12385 = vpow2.f32 %v8231_v44 }
0x1854   :  { %v8233_v19 = vmul.f32 1.442695, %v8223_v33 }
0x1855   :  { %v8218_v40 = vpop.xlane.xlu1 %8217 }
0x1856   :  { %v8224_v27 = vsub.f32 %v8200_v35, %v8218_v40  ;;  %12387 = vpow2.f32 %v8233_v19 }
0x1858   :  { %v8235_v49 = vmul.f32 1.442695, %v8224_v27 }
0x185a   :  { %12389 = vpow2.f32 %v8235_v49 }
0x185e   :  { %8269 = vrot.lane.b32.xlu0 %v14048_v60, %s12439_s14 }
0x185f   :  { %v14558_v36 = vpop.eup %12385 }
0x1860   :  { %v8246_v60 = vsel %vm1472_vm5, %v14558_v36, 0.0 }
0x1861   :  { %8271 = vrot.lane.b32.xlu1 %v14065_v21, %s12439_s14 }
0x1863   :  { %v14562_v38 = vpop.eup %12387 }
0x1864   :  { %v8249_v21 = vsel %vm1472_vm5, %v14562_v38, 0.0 }
0x1867   :  { %v14566_v7 = vpop.eup %12389 }
0x1868   :  { %v8252_v50 = vsel %vm1479_vm6, %v14566_v7, 0.0 }
0x187d   :  { %8247 = vadd.xlane.f32.xlu0 %v8246_v60 }
0x1881   :  { %8250 = vadd.xlane.f32.xlu0 %v8249_v21 }
0x1885   :  { %8253 = vadd.xlane.f32.xlu1 %v8252_v50 }
0x1896   :  { %8497 = vrot.lane.b32.xlu1 %v14529_v3, %s12441_s13 }
0x1897   :  { %8267 = vrot.lane.b32.xlu0 %v14074_v62, %s12439_s14 }
0x189a   :  { %8475 = vrot.lane.b32.xlu1 %v14430_v15, %s12440_s12 }
0x189b   :  { %8370 = vrot.lane.b32.xlu0 %v14094_v28, %s12439_s14 }
0x189e   :  { %8499 = vrot.lane.b32.xlu1 %v14533_v48, %s12441_s13 }
0x189f   :  { %8368 = vrot.lane.b32.xlu0 %v14103_v26, %s12439_s14 }
0x18a3   :  { %8366 = vrot.lane.b32.xlu0 %v14101_v23, %s12439_s14 }
0x18a7   :  { %8471 = vrot.lane.b32.xlu0 %v14424_v14, %s12440_s12 }
0x18ab   :  { %8495 = vrot.lane.b32.xlu0 %v14527_v39, %s12441_s13 }
0x18af   :  { %8473 = vrot.lane.b32.xlu0 %v14426_v24, %s12440_s12 }
0x18b3   :  { %8477 = vrot.lane.b32.xlu0 %v14428_v63, %s12440_s12 }
0x18b7   :  { %8501 = vrot.lane.b32.xlu0 %v14531_v17, %s12441_s13 }
0x18bb   :  { %8479 = vrot.lane.b32.xlu0 %v14432_v20, %s12440_s12 }
0x18bf   :  { %8503 = vrot.lane.b32.xlu0 %v14535_v13, %s12441_s13 }
0x18d1   :  { %v8239_v28 = vpop.xlane.xlu0 %8238 }
0x18d2   :  { %12391 = vrcp.f32 %v8239_v28 }
0x18d5   :  { %v8242_v62 = vpop.xlane.xlu1 %8241  ;;  %v8270_v14 = vpop.permute.xlu0 %8269 }
0x18d6   :  { %12393 = vrcp.f32 %v8242_v62 }
0x18d9   :  { %v8245_v23 = vpop.xlane.xlu1 %8244 }
0x18da   :  { %12395 = vrcp.f32 %v8245_v23 }
0x18dd   :  { %v8272_v26 = vpop.permute.xlu1 %8271 }
0x18de   :  { %12057 = vmatpush3.msk.msra.mxu0 %vm1557_vm4, %v8272_v26 }
0x18df   :  { %12058 = vmatprep.subr.mxu0 %v12426_v1  ;;  %v12392_v15 = vpop.eup %12391 }
0x18e0   :  { %12059 = vmatpush3.msra.mxu0 %v8270_v14  ;;  %v8261_v20 = vmul.f32 %v12392_v15, %v12380_v55 }
0x18e1   :  { %12060 = vmatprep.subr.mxu0 %v12426_v1 }
0x18e3   :  { %v12394_v3 = vpop.eup %12393 }
0x18e4   :  { %v8262_v13 = vmul.f32 %v12394_v3, %v14546_v42 }
0x18e7   :  { %v12396_v43 = vpop.eup %12395 }
0x18e8   :  { %v8263_v51 = vmul.f32 %v12396_v43, %v14550_v0 }
0x1906   :  { %v8248_v24 = vpop.xlane.xlu0 %8247 }
0x1907   :  { %12397 = vrcp.f32 %v8248_v24 }
0x190a   :  { %v8251_v63 = vpop.xlane.xlu0 %8250 }
0x190b   :  { %12399 = vrcp.f32 %v8251_v63 }
0x190e   :  { %v8268_v39 = vpop.permute.xlu0 %8267  ;;  %v8254_v17 = vpop.xlane.xlu1 %8253 }
0x190f   :  { %12061 = vmatpush3.msra.mxu0 %v8268_v39  ;;  %12401 = vrcp.f32 %v8254_v17 }
0x1910   :  { %12063 = vmatmul.mubr.msk.f32.vlgmr.msra.gmra.mxu0 %vm1472_vm5, %v8261_v20  ;;  %12086 = vmatprep.subr.mxu0 %v12426_v1 }
0x1911   :  { %12065 = vmatprep.mubr.msk.f32.mxu0 %vm12427_vm2, %v12426_v1  ;;  %12087 = vmatpush3.msra.mxu0 %v11041_v16 }
0x1912   :  { %v8371_v48 = vpop.permute.xlu0 %8370  ;;  %12088 = vmatprep.subr.mxu0 %v12426_v1  ;;  %v8498_v21 = vpop.permute.xlu1 %8497 }
0x1913   :  { %12072 = vmatpush3.msk.msra.mxu1 %vm1557_vm4, %v8371_v48  ;;  %12089 = vmatpush3.msra.mxu0 %v11040_v41 }
0x1914   :  { %12066 = vmatmul.mubr.msk.f32.gmra.mxu0 %vm1472_vm5, %v8262_v13  ;;  %12073 = vmatprep.subr.mxu1 %v12426_v1  ;;  %v12398_v37 = vpop.eup %12397 }
0x1915   :  { %12068 = vmatprep.mubr.msk.f32.mxu0 %vm12427_vm2, %v12426_v1  ;;  %v8264_v9 = vmul.f32 %v12398_v37, %v14558_v36  ;;  %12090 = vmatprep.subr.mxu0 %v12426_v1 }
0x1916   :  { %v8369_v35 = vpop.permute.xlu0 %8368  ;;  %12091 = vmatpush3.msra.mxu0 %v11039_v4  ;;  %v8476_v50 = vpop.permute.xlu1 %8475 }
0x1917   :  { %12074 = vmatpush3.msra.mxu1 %v8369_v35  ;;  %12092 = vmatprep.subr.mxu0 %v12426_v1 }
0x1918   :  { %12069 = vmatmul.mubr.msk.f32.gmra.mxu0 %vm1472_vm5, %v8263_v51  ;;  %12075 = vmatprep.subr.mxu1 %v12426_v1  ;;  %v12400_v10 = vpop.eup %12399 }
0x1919   :  { %12094 = vmatprep.mubr.msk.f32.mxu0 %vm12427_vm2, %v12426_v1  ;;  %v8265_v11 = vmul.f32 %v12400_v10, %v14562_v38  ;;  %12093 = vmatpush3.msra.mxu0 %v11038_v56 }
0x191a   :  { %v8367_v29 = vpop.permute.xlu0 %8366  ;;  %12132 = vmatprep.subr.mxu0 %v12426_v1  ;;  %v8500_v63 = vpop.permute.xlu1 %8499 }
0x191b   :  { %12076 = vmatpush3.msra.mxu1 %v8367_v29 }
0x191c   :  { %12078 = vmatmul.mubr.msk.f32.vlgmr.msra.gmra.mxu1 %vm1472_vm5, %v8264_v9  ;;  %12109 = vmatprep.subr.mxu1 %v12426_v1  ;;  %v12402_v5 = vpop.eup %12401 }
0x191d   :  { %12080 = vmatprep.mubr.msk.f32.mxu1 %vm12427_vm2, %v12426_v1  ;;  %v8266_v61 = vmul.f32 %v12402_v5, %v14566_v7 }
0x191e   :  { %v8472_v27 = vpop.permute.xlu0 %8471 }
0x191f   :  { %v8537_v62 = vsel %vm1163_vm3, %v14290_v12, %v8472_v27  ;;  %v8539_v12 = vsel %vm1163_vm3, %v14296_v30, %v8476_v50 }
0x1920   :  { %12081 = vmatmul.mubr.msk.f32.gmra.mxu1 %vm1472_vm5, %v8265_v11  ;;  %v8545_v35 = vsel %vm3251_vm7, %v8539_v12, %v8500_v63 }
0x1921   :  { %12083 = vmatprep.mubr.msk.f32.mxu1 %vm12427_vm2, %v12426_v1 }
0x1922   :  { %v8496_v49 = vpop.permute.xlu0 %8495 }
0x1923   :  { %v8543_v28 = vsel %vm3251_vm7, %v8537_v62, %v8496_v49 }
0x1924   :  { %12084 = vmatmul.mubr.msk.f32.gmra.mxu1 %vm1472_vm5, %v8266_v61 }
0x1925   :  { %12117 = vmatprep.mubr.msk.f32.mxu1 %vm12427_vm2, %v12426_v1 }
0x1926   :  { %v8474_v36 = vpop.permute.xlu0 %8473 }
0x192a   :  { %v8478_v60 = vpop.permute.xlu0 %8477 }
0x192b   :  { %v8540_v51 = vsel %vm1163_vm3, %v14294_v2, %v8478_v60 }
0x19d0   :  { %v8352_v57 = vpop.f32.mrf.mxu0 }
0x19d1   :  { %8519 = vrot.lane.b32.xlu0 %v8352_v57, %s12442_s30 }
0x19d2   :  { %v12064_v47 = vpop.f32.mrf.mxu0 }
0x19d4   :  { %v8357_v54 = vpop.f32.mrf.mxu0 }
0x19d5   :  { %8521 = vrot.lane.b32.xlu0 %v8357_v54, %s12442_s30 }
0x19d6   :  { %v12067_v55 = vpop.f32.mrf.mxu0 }
0x19d8   :  { %v8362_v42 = vpop.f32.mrf.mxu0 }
0x19d9   :  { %8523 = vrot.lane.b32.xlu1 %v8362_v42, %s12442_s30 }
0x19da   :  { %v12070_v0 = vpop.f32.mrf.mxu0 }
0x19dc   :  { %v8451_v52 = vpop.f32.mrf.mxu1 }
0x19dd   :  { %8525 = vrot.lane.b32.xlu0 %v8451_v52, %s12442_s30  ;;  %8481 = vrot.lane.b32.xlu1 %v14437_v31, %s12440_s12  ;;  %v8502_v31 = vpop.permute.xlu0 %8501 }
0x19de   :  { %v12079_v58 = vpop.f32.mrf.mxu1  ;;  %v8546_v61 = vsel %vm3251_vm7, %v8540_v51, %v8502_v31 }
0x19e0   :  { %v8456_v44 = vpop.f32.mrf.mxu1 }
0x19e1   :  { %8527 = vrot.lane.b32.xlu0 %v8456_v44, %s12442_s30  ;;  %v8480_v38 = vpop.permute.xlu0 %8479 }
0x19e2   :  { %v12082_v33 = vpop.f32.mrf.mxu1  ;;  %v8541_v52 = vsel %vm1163_vm3, %v14298_v32, %v8480_v38 }
0x19e4   :  { %v8461_v40 = vpop.f32.mrf.mxu1 }
0x19e5   :  { %8505 = vrot.lane.b32.xlu0 %v14540_v6, %s12441_s13  ;;  %8529 = vrot.lane.b32.xlu1 %v8461_v40, %s12442_s30  ;;  %v8504_v7 = vpop.permute.xlu0 %8503  ;;  %v8538_v6 = vsel %vm1163_vm3, %v14292_v53, %v8474_v36 }
0x19e6   :  { %v12085_v19 = vpop.f32.mrf.mxu1  ;;  %v8544_v39 = vsel %vm3251_vm7, %v8538_v6, %v8498_v21  ;;  %v8547_v36 = vsel %vm3251_vm7, %v8541_v52, %v8504_v7 }
0x1a43   :  { %v8520_v23 = vpop.permute.xlu0 %8519 }
0x1a44   :  { %v8549_v26 = vsel %vm3258_vm8, %v8543_v28, %v8520_v23 }
0x1a45   :  { %v8561_v14 = vcombine.high %v8549_v26, %v8549_v26  ;;  %v8568_v24 = vrot.slane %v8549_v26, %v12691_v46 }
0x1a47   :  { %v8575_v15 = vrot.slane %v8561_v14, %v12691_v46  ;;  %v8576_v20 = vcombine.high %v8568_v24, %v8568_v24  ;;  %v8522_v3 = vpop.permute.xlu0 %8521  ;;  %v8584_v53 = vrot.slane %v8568_v24, %v12691_v46 }
0x1a48   :  { %v8550_v17 = vsel %vm3258_vm8, %v8544_v39, %v8522_v3 }
0x1a49   :  { %v8577_v48 = vcombine.high %v8575_v15, %v8575_v15  ;;  %v8598_v13 = vrot.slane %v8576_v20, %v12691_v46  ;;  %v8610_v43 = vcombine.high %v8550_v17, %v8550_v17  ;;  %v8591_v37 = vrot.slane %v8575_v15, %v12691_v46 }
0x1a4a   :  { %v8617_v9 = vrot.slane %v8550_v17, %v12691_v46 }
0x1a4b   :  { %v8605_v29 = vrot.slane %v8577_v48, %v12691_v46  ;;  %v8791_v30 = vcombine.low %v8584_v53, %v8598_v13  ;;  %v11157_v10 = vcombine.high %v8584_v53, %v8598_v13  ;;  %v8624_v11 = vrot.slane %v8610_v43, %v12691_v46  ;;  %v8524_v5 = vpop.permute.xlu1 %8523 }
0x1a4c   :  { %v8625_v57 = vcombine.high %v8617_v9, %v8617_v9  ;;  %v8551_v47 = vsel %vm3258_vm8, %v8545_v35, %v8524_v5  ;;  %v8633_v41 = vrot.slane %v8617_v9, %v12691_v46 }
0x1a4d   :  { %v8793_v54 = vcombine.low %v8591_v37, %v8605_v29  ;;  %v11158_v55 = vcombine.high %v8591_v37, %v8605_v29  ;;  %v8801_v2 = vrot.slane %v8791_v30, %v12691_v46  ;;  %v8808_v16 = vrot.slane %v11157_v10, %v12691_v46 }
0x1a4e   :  { %v8626_v42 = vcombine.high %v8624_v11, %v8624_v11  ;;  %v8647_v0 = vrot.slane %v8625_v57, %v12691_v46  ;;  %v8665_v4 = vrot.slane %v8551_v47, %v12691_v46  ;;  %v8640_v40 = vrot.slane %v8624_v11, %v12691_v46 }
0x1a4f   :  { %v8815_v56 = vrot.slane %v8793_v54, %v12691_v46  ;;  %v8822_v58 = vrot.slane %v11158_v55, %v12691_v46  ;;  %v8823_v44 = vcombine.low %v8801_v2, %v8808_v16  ;;  %v8526_v33 = vpop.permute.xlu0 %8525  ;;  %v8482_v32 = vpop.permute.xlu1 %8481 }
0x1a50   :  { %v8654_v19 = vrot.slane %v8626_v42, %v12691_v46  ;;  %v8840_v27 = vcombine.low %v8633_v41, %v8647_v0  ;;  %v11159_v49 = vcombine.high %v8633_v41, %v8647_v0  ;;  %v8672_v31 = vrot.slane %v8665_v4, %v12691_v46 }
0x1a51   :  { %v8824_v60 = vcombine.low %v8815_v56, %v8822_v58  ;;  %v8552_v21 = vsel %vm3258_vm8, %v8546_v61, %v8526_v33  ;;  %v8831_v23 = vrot.slane %v8823_v44, %v12691_v46  ;;  %v8542_v15 = vsel %vm1163_vm3, %v14303_v18, %v8482_v32 }
0x1a52   :  { %v8842_v38 = vcombine.low %v8640_v40, %v8654_v19  ;;  %v11160_v50 = vcombine.high %v8640_v40, %v8654_v19  ;;  %v8850_v62 = vrot.slane %v8840_v27, %v12691_v46  ;;  %v8857_v28 = vrot.slane %v11159_v49, %v12691_v46 }
0x1a53   :  { %v8838_v6 = vrot.slane %v8824_v60, %v12691_v46  ;;  %v8673_v26 = vcombine.high %v8552_v21, %v8552_v21  ;;  %v8680_v14 = vrot.slane %v8552_v21, %v12691_v46  ;;  %v8528_v7 = vpop.permute.xlu0 %8527 }
0x1a54   :  { %v8864_v24 = vrot.slane %v8842_v38, %v12691_v46  ;;  %v8871_v63 = vrot.slane %v11160_v50, %v12691_v46  ;;  %v8553_v20 = vsel %vm3258_vm8, %v8547_v36, %v8528_v7  ;;  %v8872_v48 = vcombine.low %v8850_v62, %v8857_v28 }
0x1a55   :  { %v8839_v39 = vcombine.low %v8831_v23, %v8838_v6  ;;  %v8687_v3 = vrot.slane %v8673_v26, %v12691_v46  ;;  %v8688_v12 = vcombine.high %v8680_v14, %v8680_v14  ;;  %v8696_v17 = vrot.slane %v8680_v14, %v12691_v46 }
0x1a56   :  { %v8873_v53 = vcombine.low %v8864_v24, %v8871_v63  ;;  %v8722_v13 = vcombine.high %v8553_v20, %v8553_v20  ;;  %v8729_v43 = vrot.slane %v8553_v20, %v12691_v46  ;;  %v8880_v6 = vrot.slane %v8872_v48, %v12691_v46 }
0x1a57   :  { %v8689_v35 = vcombine.high %v8687_v3, %v8687_v3  ;;  %v8703_v51 = vrot.slane %v8687_v3, %v12691_v46  ;;  %v8710_v37 = vrot.slane %v8688_v12, %v12691_v46  ;;  %v8718_v9 = vcombine.high %v8696_v17, %v8696_v17  ;;  %12095 = vmatmul.mubr.msk.f32.vlgmr.msra.gmra.mxu0 %vm42_vm0, %v8839_v39  ;;  %v8506_v4 = vpop.permute.xlu0 %8505  ;;  %v8530_v49 = vpop.permute.xlu1 %8529 }
0x1a58   :  { %v8889_v18 = vcombine.low %v8672_v31, %v8696_v17  ;;  %v8736_v29 = vrot.slane %v8722_v13, %v12691_v46  ;;  %v8737_v30 = vcombine.high %v8729_v43, %v8729_v43  ;;  %v8745_v10 = vrot.slane %v8729_v43, %v12691_v46  ;;  %12097 = vmatprep.mubr.msk.f32.mxu0 %vm12427_vm2, %v12426_v1 }
0x1a59   :  { %v8717_v11 = vrot.slane %v8689_v35, %v12691_v46  ;;  %v8719_v5 = vcombine.high %v8703_v51, %v8703_v51  ;;  %v8720_v61 = vcombine.high %v8710_v37, %v8710_v37  ;;  %v8890_v57 = vcombine.low %v8710_v37, %v8718_v9  ;;  %v11045_v37 = vld [vmem:[%s15142_s7 + $0x30] sm:$0xff]  ;;  %v11044_v9 = vld [vmem:[%s15142_s7 + $0x28] sm:$0xff] }
0x1a5a   :  { %v8899_v47 = vrot.slane %v8889_v18, %v12691_v46  ;;  %v8738_v54 = vcombine.high %v8736_v29, %v8736_v29  ;;  %v8752_v55 = vrot.slane %v8736_v29, %v12691_v46  ;;  %v8759_v2 = vrot.slane %v8737_v30, %v12691_v46  ;;  %v11043_v18 = vld [vmem:[%s15142_s7 + $0x20] sm:$0xff] }
0x1a5b   :  { %v8891_v16 = vcombine.low %v8720_v61, %v8703_v51  ;;  %v8892_v42 = vcombine.low %v8717_v11, %v8719_v5  ;;  %v8906_v41 = vrot.slane %v8890_v57, %v12691_v46  ;;  %v8721_v0 = vcombine.high %v8717_v11, %v8717_v11  ;;  %v11046_v51 = vld [vmem:[%s15142_s7 + $0x38] sm:$0xff]  ;;  %v14766_v29 = vld [vmem:[%s15141_s6 + $0x1] ss:$0 sm:$0xff] }
0x1a5c   :  { %v8766_v52 = vrot.slane %v8738_v54, %v12691_v46  ;;  %v8767_v56 = vcombine.high %v8745_v10, %v8745_v10  ;;  %v8768_v58 = vcombine.high %v8752_v55, %v8752_v55  ;;  %v8769_v44 = vcombine.high %v8759_v2, %v8759_v2  ;;  %12110 = vmatpush3.msra.mxu1 %v11046_v51 }
0x1a5d   :  { %v8913_v33 = vrot.slane %v8891_v16, %v12691_v46  ;;  %v8920_v40 = vrot.slane %v8892_v42, %v12691_v46  ;;  %v8921_v19 = vcombine.low %v8899_v47, %v8906_v41  ;;  %v8938_v27 = vcombine.low %v8721_v0, %v8745_v10  ;;  %12111 = vmatprep.subr.mxu1 %v12426_v1 }
0x1a5e   :  { %v8939_v36 = vcombine.low %v8759_v2, %v8767_v56  ;;  %v8940_v60 = vcombine.low %v8769_v44, %v8752_v55  ;;  %v8941_v31 = vcombine.low %v8766_v52, %v8768_v58  ;;  %v8548_v21 = vsel %vm3251_vm7, %v8542_v15, %v8506_v4  ;;  %12112 = vmatpush3.msra.mxu1 %v11045_v37  ;;  %v11060_v4 = vld [vmem:[%s15144_s9 + $0xc8] sm:$0xf]  ;;  %v11058_v44 = vld [vmem:[%s15144_s9 + $0xb8] sm:$0xff] }
0x1a5f   :  { %v8922_v32 = vcombine.low %v8913_v33, %v8920_v40  ;;  %v8948_v38 = vrot.slane %v8938_v27, %v12691_v46  ;;  %v8554_v23 = vsel %vm3258_vm8, %v8548_v21, %v8530_v49  ;;  %v8887_v14 = vrot.slane %v8873_v53, %v12691_v46  ;;  %12113 = vmatprep.subr.mxu1 %v12426_v1  ;;  %v11057_v49 = vld [vmem:[%s15144_s9 + $0xb0] sm:$0xff]  ;;  %v11056_v21 = vld [vmem:[%s15144_s9 + $0xa8] sm:$0xff] }
0x1a60   :  { %v8955_v50 = vrot.slane %v8939_v36, %v12691_v46  ;;  %v8962_v62 = vrot.slane %v8940_v60, %v12691_v46  ;;  %v8969_v28 = vrot.slane %v8941_v31, %v12691_v46  ;;  %v8777_v26 = vrot.slane %v8554_v23, %v12691_v46  ;;  %12114 = vmatpush3.msra.mxu1 %v11044_v9  ;;  %v11052_v9 = vld [vmem:[%s15144_s9 + $0x88] sm:$0xff] }
0x1a61   :  { %v8936_v7 = vrot.slane %v8922_v32, %v12691_v46  ;;  %v8929_v24 = vrot.slane %v8921_v19, %v12691_v46  ;;  %v8770_v20 = vcombine.high %v8766_v52, %v8766_v52  ;;  %v8888_v3 = vcombine.low %v8880_v6, %v8887_v14  ;;  %12115 = vmatprep.subr.mxu1 %v12426_v1  ;;  %v11059_v52 = vld [vmem:[%s15144_s9 + $0xc0] sm:$0xff] }
0x1a62   :  { %v8971_v63 = vcombine.low %v8962_v62, %v8969_v28  ;;  %v8970_v15 = vcombine.low %v8948_v38, %v8955_v50  ;;  %v8784_v39 = vrot.slane %v8777_v26, %v12691_v46  ;;  %12116 = vmatpush3.msra.mxu1 %v11043_v18  ;;  %12133 = vmatpush3.msk.msra.mxu0 %vm4913_vm9, %v11060_v4  ;;  %v11055_v28 = vld [vmem:[%s15144_s9 + $0xa0] sm:$0xff] }
0x1a63   :  { %12098 = vmatmul.mubr.msk.f32.gmra.mxu0 %vm42_vm0, %v8888_v3  ;;  %v8937_v12 = vcombine.low %v8929_v24, %v8936_v7  ;;  %12134 = vmatprep.subr.mxu0 %v12426_v1  ;;  %v11054_v7 = vld [vmem:[%s15144_s9 + $0x98] sm:$0xff] }
0x1a64   :  { %v8985_v17 = vrot.slane %v8971_v63, %v12691_v46  ;;  %12100 = vmatprep.mubr.msk.f32.mxu0 %vm12427_vm2, %v12426_v1  ;;  %v8978_v48 = vrot.slane %v8970_v15, %v12691_v46  ;;  %v8987_v53 = vcombine.low %v8770_v20, %v8784_v39  ;;  %12135 = vmatpush3.msra.mxu0 %v11059_v52 }
0x1a65   :  { %12136 = vmatprep.subr.mxu0 %v12426_v1 }
0x1a66   :  { %v8986_v13 = vcombine.low %v8978_v48, %v8985_v17  ;;  %v8994_v43 = vrot.slane %v8987_v53, %v12691_v46  ;;  %12137 = vmatpush3.msra.mxu0 %v11058_v44 }
0x1a67   :  { %12101 = vmatmul.mubr.msk.f32.gmra.mxu0 %vm42_vm0, %v8937_v12  ;;  %12138 = vmatprep.subr.mxu0 %v12426_v1  ;;  %v11053_v12 = vld [vmem:[%s15144_s9 + $0x90] sm:$0xff] }
0x1a68   :  { %12103 = vmatprep.mubr.msk.f32.mxu0 %vm12427_vm2, %v12426_v1  ;;  %v9001_v35 = vrot.slane %v8994_v43, %v12691_v46  ;;  %12139 = vmatpush3.msra.mxu0 %v11057_v49 }
0x1a69   :  { %12140 = vmatprep.subr.mxu0 %v12426_v1 }
0x1a6a   :  { %12141 = vmatpush3.msra.mxu0 %v11056_v21 }
0x1a6b   :  { %12104 = vmatmul.mubr.msk.f32.gmra.mxu0 %vm42_vm0, %v8986_v13  ;;  %12142 = vmatprep.subr.mxu0 %v12426_v1 }
0x1a6c   :  { %12106 = vmatprep.mubr.msk.f32.mxu0 %vm12427_vm2, %v12426_v1  ;;  %12143 = vmatpush3.msra.mxu0 %v11055_v28 }
0x1a6d   :  { %12144 = vmatprep.subr.mxu0 %v12426_v1 }
0x1a6e   :  { %12145 = vmatpush3.msra.mxu0 %v11054_v7 }
0x1a6f   :  { %12107 = vmatmul.mubr.msk.f32.gmra.mxu0 %vm42_vm0, %v9001_v35  ;;  %12146 = vmatprep.subr.mxu0 %v12426_v1 }
0x1a70   :  { %12158 = vmatprep.mubr.msk.f32.mxu0 %vm12427_vm2, %v12426_v1  ;;  %12147 = vmatpush3.msra.mxu0 %v11053_v12 }
0x1a71   :  { %12148 = vmatprep.subr.mxu0 %v12426_v1 }
0x1a72   :  { %12149 = vmatpush3.msra.mxu0 %v11052_v9 }
0x1a73   :  { %12150 = vmatprep.subr.mxu0 %v12426_v1 }
0x1b17   :  { %v9078_v30 = vpop.f32.mrf.mxu0 }
0x1b18   :  { %v9079_v10 = vadd.f32 %v14766_v29, %v9078_v30 }
0x1b19   :  { %v12096_v11 = vpop.f32.mrf.mxu0 }
0x1b1a   :  { %v9107_v5 = vcombine.high %v9079_v10, %v9079_v10  ;;  %v9114_v61 = vrot.slane %v9079_v10, %v12691_v46 }
0x1b1c   :  { %v9121_v57 = vrot.slane %v9107_v5, %v12691_v46  ;;  %v9122_v47 = vcombine.high %v9114_v61, %v9114_v61  ;;  %v9130_v55 = vrot.slane %v9114_v61, %v12691_v46 }
0x1b1e   :  { %v9123_v54 = vcombine.high %v9121_v57, %v9121_v57  ;;  %v9144_v2 = vrot.slane %v9122_v47, %v12691_v46  ;;  %v9137_v16 = vrot.slane %v9121_v57, %v12691_v46 }
0x1b20   :  { %v9151_v42 = vrot.slane %v9123_v54, %v12691_v46  ;;  %v9325_v41 = vcombine.low %v9130_v55, %v9144_v2  ;;  %v11166_v0 = vcombine.high %v9130_v55, %v9144_v2  ;;  %v11051_v55 = vld [vmem:[%s15144_s9 + $0x80] sm:$0xff] }
0x1b21   :  { %12151 = vmatpush3.msra.mxu0 %v11051_v55 }
0x1b22   :  { %v9327_v56 = vcombine.low %v9137_v16, %v9151_v42  ;;  %v11167_v58 = vcombine.high %v9137_v16, %v9151_v42  ;;  %v9335_v33 = vrot.slane %v9325_v41, %v12691_v46  ;;  %v9342_v40 = vrot.slane %v11166_v0, %v12691_v46  ;;  %12152 = vmatprep.subr.mxu0 %v12426_v1 }
0x1b23   :  { %v9083_v36 = vpop.f32.mrf.mxu0 }
0x1b24   :  { %v9349_v19 = vrot.slane %v9327_v56, %v12691_v46  ;;  %v9356_v27 = vrot.slane %v11167_v58, %v12691_v46  ;;  %v9084_v31 = vadd.f32 %v14766_v29, %v9083_v36  ;;  %v9357_v32 = vcombine.low %v9335_v33, %v9342_v40 }
0x1b25   :  { %v12099_v38 = vpop.f32.mrf.mxu0 }
0x1b26   :  { %v9358_v60 = vcombine.low %v9349_v19, %v9356_v27  ;;  %v9156_v50 = vcombine.high %v9084_v31, %v9084_v31  ;;  %v9163_v62 = vrot.slane %v9084_v31, %v12691_v46  ;;  %v9365_v24 = vrot.slane %v9357_v32, %v12691_v46 }
0x1b27   :  { %v9088_v6 = vpop.f32.mrf.mxu0 }
0x1b28   :  { %v9372_v23 = vrot.slane %v9358_v60, %v12691_v46  ;;  %v9170_v26 = vrot.slane %v9156_v50, %v12691_v46  ;;  %v9171_v14 = vcombine.high %v9163_v62, %v9163_v62  ;;  %v9089_v63 = vadd.f32 %v14766_v29, %v9088_v6 }
0x1b29   :  { %v12102_v15 = vpop.f32.mrf.mxu0  ;;  %v9179_v39 = vrot.slane %v9163_v62, %v12691_v46 }
0x1b2a   :  { %v9172_v20 = vcombine.high %v9170_v26, %v9170_v26  ;;  %v9193_v3 = vrot.slane %v9171_v14, %v12691_v46  ;;  %v9373_v17 = vcombine.low %v9365_v24, %v9372_v23  ;;  %v9205_v48 = vcombine.high %v9089_v63, %v9089_v63 }
0x1b2b   :  { %v9212_v53 = vrot.slane %v9089_v63, %v12691_v46  ;;  %v9093_v13 = vpop.f32.mrf.mxu0  ;;  %v9186_v43 = vrot.slane %v9170_v26, %v12691_v46 }
0x1b2c   :  { %v9200_v35 = vrot.slane %v9172_v20, %v12691_v46  ;;  %v9374_v51 = vcombine.low %v9179_v39, %v9193_v3  ;;  %v11168_v37 = vcombine.high %v9179_v39, %v9193_v3  ;;  %v9219_v18 = vrot.slane %v9205_v48, %v12691_v46 }
0x1b2d   :  { %v9220_v30 = vcombine.high %v9212_v53, %v9212_v53  ;;  %v9228_v10 = vrot.slane %v9212_v53, %v12691_v46  ;;  %v9094_v11 = vadd.f32 %v14766_v29, %v9093_v13  ;;  %v12105_v5 = vpop.f32.mrf.mxu0  ;;  %v14841_v44 = vadd.f32 %v9373_v17, %v13864_v8 }
0x1b2e   :  { %v9376_v61 = vcombine.low %v9186_v43, %v9200_v35  ;;  %v11169_v57 = vcombine.high %v9186_v43, %v9200_v35  ;;  %v9384_v47 = vrot.slane %v9374_v51, %v12691_v46  ;;  %v9391_v54 = vrot.slane %v11168_v37, %v12691_v46 }
0x1b2f   :  { %v9221_v2 = vcombine.high %v9219_v18, %v9219_v18  ;;  %v9235_v16 = vrot.slane %v9219_v18, %v12691_v46  ;;  %v9242_v42 = vrot.slane %v9220_v30, %v12691_v46  ;;  %v9250_v41 = vcombine.high %v9228_v10, %v9228_v10  ;;  %v9098_v0 = vpop.f32.mrf.mxu0 }
0x1b30   :  { %v9398_v4 = vrot.slane %v9376_v61, %v12691_v46  ;;  %v9405_v52 = vrot.slane %v11169_v57, %v12691_v46  ;;  %v9406_v56 = vcombine.low %v9384_v47, %v9391_v54  ;;  %v9429_v58 = vrot.slane %v9228_v10, %v12691_v46 }
0x1b31   :  { %v9249_v33 = vrot.slane %v9221_v2, %v12691_v46  ;;  %v9251_v40 = vcombine.high %v9235_v16, %v9235_v16  ;;  %v9252_v19 = vcombine.high %v9242_v42, %v9242_v42  ;;  %v12108_v27 = vpop.f32.mrf.mxu0  ;;  %v9437_v60 = vcombine.low %v9242_v42, %v9250_v41 }
0x1b32   :  { %v9407_v49 = vcombine.low %v9398_v4, %v9405_v52  ;;  %v9436_v36 = vrot.slane %v9429_v58, %v12691_v46  ;;  %v9254_v31 = vcombine.high %v9094_v11, %v9094_v11  ;;  %v9414_v21 = vrot.slane %v9406_v56, %v12691_v46 }
0x1b33   :  { %v9438_v32 = vcombine.low %v9252_v19, %v9235_v16  ;;  %v9439_v8 = vcombine.low %v9249_v33, %v9251_v40  ;;  %v9261_v50 = vrot.slane %v9094_v11, %v12691_v46  ;;  %v9561_v23 = vsel %vm42_vm0, %v14841_v44, 0.0 }
0x1b34   :  { %v9421_v38 = vrot.slane %v9407_v49, %v12691_v46  ;;  %v9268_v62 = vrot.slane %v9254_v31, %v12691_v46  ;;  %v14851_v28 = vadd.f32 %v9436_v36, %v13879_v25  ;;  %v9253_v6 = vcombine.high %v9249_v33, %v9249_v33 }
0x1b35   :  { %v9099_v26 = vadd.f32 %v14766_v29, %v9098_v0  ;;  %v9447_v7 = vrot.slane %v9437_v60, %v12691_v46  ;;  %v9269_v24 = vcombine.high %v9261_v50, %v9261_v50  ;;  %v9454_v15 = vrot.slane %v9438_v32, %v12691_v46 }
0x1b36   :  { %v9422_v14 = vcombine.low %v9414_v21, %v9421_v38  ;;  %v9270_v63 = vcombine.high %v9268_v62, %v9268_v62  ;;  %v9277_v20 = vrot.slane %v9261_v50, %v12691_v46  ;;  %v9284_v39 = vrot.slane %v9268_v62, %v12691_v46 }
0x1b37   :  { %v9309_v25 = vrot.slane %v9099_v26, %v12691_v46  ;;  %v9291_v12 = vrot.slane %v9269_v24, %v12691_v46  ;;  %v9461_v17 = vrot.slane %v9439_v8, %v12691_v46  ;;  %v9564_v48 = vsel %vm45_vm1, %v14851_v28, 0.0 }
0x1b38   :  { %v14862_v3 = vadd.f32 %v9422_v14, %v13858_v34  ;;  %v9298_v29 = vrot.slane %v9270_v63, %v12691_v46  ;;  %v9299_v53 = vcombine.high %v9277_v20, %v9277_v20  ;;  %v9300_v13 = vcombine.high %v9284_v39, %v9284_v39 }
0x1b39   :  { %v9440_v43 = vcombine.low %v9253_v6, %v9277_v20  ;;  %v9301_v51 = vcombine.high %v9291_v12, %v9291_v12  ;;  %v9310_v9 = vcombine.high %v9309_v25, %v9309_v25  ;;  %v9469_v34 = vcombine.low %v9447_v7, %v9454_v15 }
0x1b3a   :  { %v9562_v35 = vsel %vm42_vm0, %v14862_v3, 0.0  ;;  %v9302_v37 = vcombine.high %v9298_v29, %v9298_v29  ;;  %v9486_v10 = vcombine.low %v9291_v12, %v9299_v53  ;;  %v9488_v5 = vcombine.low %v9298_v29, %v9300_v13 }
0x1b3b   :  { %v9563_v18 = vadd.f32 %v9562_v35, %v9561_v23  ;;  %v9468_v30 = vrot.slane %v9440_v43, %v12691_v46  ;;  %v9487_v11 = vcombine.low %v9301_v51, %v9284_v39  ;;  %v9317_v61 = vrot.slane %v9309_v25, %v12691_v46 }
0x1b3c   :  { %v9324_v57 = vrot.slane %v9310_v9, %v12691_v46  ;;  %v9496_v55 = vrot.slane %v9486_v10, %v12691_v46  ;;  %v9477_v42 = vrot.slane %v9469_v34, %v12691_v46  ;;  %v9510_v52 = vrot.slane %v9488_v5, %v12691_v46 }
0x1b3d   :  { %v9565_v47 = vadd.f32 %v9564_v48, %v9563_v18  ;;  %v9470_v54 = vcombine.low %v9461_v17, %v9468_v30  ;;  %v9503_v2 = vrot.slane %v9487_v11, %v12691_v46  ;;  %v9489_v16 = vcombine.low %v9302_v37, %v9317_v61 }
0x1b3e   :  { %v9541_v58 = vrot.slane %v9324_v57, %v12691_v46 }
0x1b3f   :  { %v9566_v41 = vrot.slane %v9565_v47, 4  ;;  %v9484_v0 = vrot.slane %v9470_v54, %v12691_v46  ;;  %v9518_v4 = vcombine.low %v9496_v55, %v9503_v2  ;;  %v9517_v56 = vrot.slane %v9489_v16, %v12691_v46 }
0x1b40   :  { %v9548_v60 = vrot.slane %v9541_v58, %v12691_v46 }
0x1b41   :  { %v9567_v33 = vadd.f32 %v9566_v41, %v9565_v47  ;;  %v9485_v40 = vcombine.low %v9477_v42, %v9484_v0  ;;  %v9519_v19 = vcombine.low %v9510_v52, %v9517_v56  ;;  %v9526_v49 = vrot.slane %v9518_v4, %v12691_v46 }
0x1b42   :  { %v14891_v50 = vadd.f32 %v9548_v60, %v13916_v45 }
0x1b43   :  { %v9568_v27 = vrot.slane %v9567_v33, 2  ;;  %v9533_v36 = vrot.slane %v9519_v19, %v12691_v46  ;;  %v14885_v21 = vadd.f32 %v9485_v40, %v13905_v59 }
0x1b44   :  { %v9598_v59 = vsel %vm45_vm1, %v14891_v50, 0.0 }
0x1b45   :  { %v9569_v31 = vadd.f32 %v9568_v27, %v9567_v33  ;;  %v9534_v32 = vcombine.low %v9526_v49, %v9533_v36  ;;  %v9595_v23 = vsel %vm42_vm0, %v14885_v21, 0.0 }
0x1b47   :  { %v9570_v38 = vrot.slane %v9569_v31, 1  ;;  %v14888_v8 = vadd.f32 %v9534_v32, %v13913_v22 }
0x1b49   :  { %v9571_v62 = vadd.f32 %v9570_v38, %v9569_v31  ;;  %v9596_v6 = vsel %vm42_vm0, %v14888_v8, 0.0 }
0x1b4a   :  { %v9597_v14 = vadd.f32 %v9596_v6, %v9595_v23 }
0x1b4b   :  { %v9572_v26 = vmul.f32 0.05882353, %v9571_v62 }
0x1b4c   :  { %v9599_v45 = vadd.f32 %v9598_v59, %v9597_v14 }
0x1b4d   :  { %v9573_v7 = vsub.f32 %v14841_v44, %v9572_v26  ;;  %v9574_v22 = vsub.f32 %v14862_v3, %v9572_v26  ;;  %v9575_v24 = vsub.f32 %v14851_v28, %v9572_v26 }
0x1b4e   :  { %v9600_v39 = vrot.slane %v9599_v45, 4 }
0x1b4f   :  { %v9576_v63 = vmul.f32 %v9573_v7, %v9573_v7  ;;  %v9577_v15 = vmul.f32 %v9574_v22, %v9574_v22  ;;  %v9578_v20 = vmul.f32 %v9575_v24, %v9575_v24 }
0x1b50   :  { %v9601_v29 = vadd.f32 %v9600_v39, %v9599_v45 }
0x1b51   :  { %v9579_v25 = vsel %vm42_vm0, %v9576_v63, 0.0  ;;  %v9580_v12 = vsel %vm42_vm0, %v9577_v15, 0.0  ;;  %v9582_v48 = vsel %vm45_vm1, %v9578_v20, 0.0 }
0x1b52   :  { %v9581_v17 = vadd.f32 %v9580_v12, %v9579_v25  ;;  %v9602_v53 = vrot.slane %v9601_v29, 2 }
0x1b54   :  { %v9583_v13 = vadd.f32 %v9582_v48, %v9581_v17  ;;  %v9603_v43 = vadd.f32 %v9602_v53, %v9601_v29 }
0x1b56   :  { %v9584_v35 = vrot.slane %v9583_v13, 4  ;;  %v9604_v51 = vrot.slane %v9603_v43, 1 }
0x1b58   :  { %v9585_v37 = vadd.f32 %v9584_v35, %v9583_v13  ;;  %v9605_v9 = vadd.f32 %v9604_v51, %v9603_v43 }
0x1b5a   :  { %v9586_v34 = vrot.slane %v9585_v37, 2  ;;  %v9606_v18 = vmul.f32 0.05882353, %v9605_v9 }
0x1b5c   :  { %v9587_v30 = vadd.f32 %v9586_v34, %v9585_v37  ;;  %v14906_v10 = vsub.f32 %v14885_v21, %v9606_v18  ;;  %v14909_v11 = vsub.f32 %v14888_v8, %v9606_v18  ;;  %v14912_v5 = vsub.f32 %v14891_v50, %v9606_v18 }
0x1b5e   :  { %v9588_v61 = vrot.slane %v9587_v30, 1  ;;  %v9610_v57 = vmul.f32 %v14906_v10, %v14906_v10  ;;  %v9611_v47 = vmul.f32 %v14909_v11, %v14909_v11  ;;  %v9612_v54 = vmul.f32 %v14912_v5, %v14912_v5 }
0x1b60   :  { %v9589_v55 = vadd.f32 %v9588_v61, %v9587_v30  ;;  %v9613_v2 = vsel %vm42_vm0, %v9610_v57, 0.0  ;;  %v9614_v16 = vsel %vm42_vm0, %v9611_v47, 0.0  ;;  %v9616_v0 = vsel %vm45_vm1, %v9612_v54, 0.0 }
0x1b61   :  { %v9615_v41 = vadd.f32 %v9614_v16, %v9613_v2 }
0x1b62   :  { %v9590_v42 = vmul.f32 0.0625, %v9589_v55 }
0x1b63   :  { %v9617_v4 = vadd.f32 %v9616_v0, %v9615_v41 }
0x1b64   :  { %12403 = vrsqrt.f32 %v9590_v42 }
0x1b65   :  { %v9618_v52 = vrot.slane %v9617_v4, 4 }
0x1b67   :  { %v9619_v56 = vadd.f32 %v9618_v52, %v9617_v4 }
0x1b69   :  { %v9620_v58 = vrot.slane %v9619_v56, 2 }
0x1b6b   :  { %v9621_v33 = vadd.f32 %v9620_v58, %v9619_v56 }
0x1b6d   :  { %v9622_v40 = vrot.slane %v9621_v33, 1 }
0x1b6f   :  { %v9623_v19 = vadd.f32 %v9622_v40, %v9621_v33 }
0x1b71   :  { %v12404_v27 = vpop.eup %12403  ;;  %v9624_v36 = vmul.f32 0.0625, %v9623_v19 }
0x1b72   :  { %v9592_v49 = vmul.f32 %v12404_v27, %v9573_v7  ;;  %v9593_v60 = vmul.f32 %v12404_v27, %v9574_v22  ;;  %v9594_v63 = vmul.f32 %v12404_v27, %v9575_v24 }
0x1b73   :  { %12405 = vrsqrt.f32 %v9624_v36 }
0x1b74   :  { %v9635_v31 = vcombine.high %v9592_v49, %v9592_v49  ;;  %v9642_v32 = vrot.slane %v9592_v49, %v12691_v46  ;;  %v9684_v38 = vcombine.high %v9593_v60, %v9593_v60  ;;  %v9691_v62 = vrot.slane %v9593_v60, %v12691_v46 }
0x1b75   :  { %v9739_v16 = vrot.slane %v9594_v63, %v12691_v46 }
0x1b76   :  { %v9649_v23 = vrot.slane %v9635_v31, %v12691_v46  ;;  %v9650_v6 = vcombine.high %v9642_v32, %v9642_v32  ;;  %v9698_v26 = vrot.slane %v9684_v38, %v12691_v46  ;;  %v9699_v14 = vcombine.high %v9691_v62, %v9691_v62 }
0x1b77   :  { %v9658_v45 = vrot.slane %v9642_v32, %v12691_v46  ;;  %v9707_v15 = vrot.slane %v9691_v62, %v12691_v46  ;;  %v9746_v49 = vrot.slane %v9739_v16, %v12691_v46 }
0x1b78   :  { %v9651_v59 = vcombine.high %v9649_v23, %v9649_v23  ;;  %v9672_v7 = vrot.slane %v9650_v6, %v12691_v46  ;;  %v9700_v22 = vcombine.high %v9698_v26, %v9698_v26  ;;  %v9721_v20 = vrot.slane %v9699_v14, %v12691_v46 }
0x1b79   :  { %v9665_v39 = vrot.slane %v9649_v23, %v12691_v46  ;;  %v9714_v17 = vrot.slane %v9698_v26, %v12691_v46 }
0x1b7a   :  { %v9679_v25 = vrot.slane %v9651_v59, %v12691_v46  ;;  %v9865_v12 = vcombine.low %v9658_v45, %v9672_v7  ;;  %v11171_v29 = vcombine.high %v9658_v45, %v9672_v7  ;;  %v9728_v48 = vrot.slane %v9700_v22, %v12691_v46 }
0x1b7b   :  { %v9914_v53 = vcombine.low %v9707_v15, %v9721_v20  ;;  %v11173_v13 = vcombine.high %v9707_v15, %v9721_v20 }
0x1b7c   :  { %v9867_v43 = vcombine.low %v9665_v39, %v9679_v25  ;;  %v11172_v35 = vcombine.high %v9665_v39, %v9679_v25  ;;  %v9875_v24 = vrot.slane %v9865_v12, %v12691_v46  ;;  %v9882_v51 = vrot.slane %v11171_v29, %v12691_v46 }
0x1b7d   :  { %v9916_v37 = vcombine.low %v9714_v17, %v9728_v48  ;;  %v11174_v9 = vcombine.high %v9714_v17, %v9728_v48  ;;  %v9924_v34 = vrot.slane %v9914_v53, %v12691_v46  ;;  %v9931_v18 = vrot.slane %v11173_v13, %v12691_v46 }
0x1b7e   :  { %v9889_v30 = vrot.slane %v9867_v43, %v12691_v46  ;;  %v9896_v61 = vrot.slane %v11172_v35, %v12691_v46  ;;  %v9897_v57 = vcombine.low %v9875_v24, %v9882_v51 }
0x1b7f   :  { %v9938_v47 = vrot.slane %v9916_v37, %v12691_v46  ;;  %v9945_v54 = vrot.slane %v11174_v9, %v12691_v46  ;;  %v9946_v42 = vcombine.low %v9924_v34, %v9931_v18 }
0x1b80   :  { %v9898_v55 = vcombine.low %v9889_v30, %v9896_v61  ;;  %v12406_v2 = vpop.eup %12405  ;;  %v9905_v4 = vrot.slane %v9897_v57, %v12691_v46 }
0x1b81   :  { %v9947_v41 = vcombine.low %v9938_v47, %v9945_v54  ;;  %v9627_v0 = vmul.f32 %v12406_v2, %v14909_v11  ;;  %v9626_v56 = vmul.f32 %v12406_v2, %v14906_v10  ;;  %v9954_v36 = vrot.slane %v9946_v42, %v12691_v46 }
0x1b82   :  { %v9912_v52 = vrot.slane %v9898_v55, %v12691_v46  ;;  %v9628_v38 = vmul.f32 %v12406_v2, %v14912_v5 }
0x1b83   :  { %v9961_v58 = vrot.slane %v9947_v41, %v12691_v46  ;;  %v9796_v33 = vcombine.high %v9627_v0, %v9627_v0  ;;  %v9747_v19 = vcombine.high %v9626_v56, %v9626_v56  ;;  %v9754_v27 = vrot.slane %v9626_v56, %v12691_v46 }
0x1b84   :  { %v9913_v40 = vcombine.low %v9905_v4, %v9912_v52  ;;  %v9803_v60 = vrot.slane %v9627_v0, %v12691_v46  ;;  %v9851_v9 = vrot.slane %v9628_v38, %v12691_v46 }
0x1b85   :  { %v9761_v11 = vrot.slane %v9747_v19, %v12691_v46  ;;  %v9762_v31 = vcombine.high %v9754_v27, %v9754_v27  ;;  %v9770_v10 = vrot.slane %v9754_v27, %v12691_v46  ;;  %v9810_v32 = vrot.slane %v9796_v33, %v12691_v46 }
0x1b86   :  { %12118 = vmatmul.mubr.msk.f32.vlgmr.msra.gmra.mxu1 %vm42_vm0, %v9913_v40  ;;  %v9962_v62 = vcombine.low %v9954_v36, %v9961_v58  ;;  %v9811_v23 = vcombine.high %v9803_v60, %v9803_v60  ;;  %v9819_v6 = vrot.slane %v9803_v60, %v12691_v46  ;;  %v9858_v52 = vrot.slane %v9851_v9, %v12691_v46  ;;  %v11050_v60 = vld [vmem:[%s15144_s9 + $0x78] sm:$0xff] }
0x1b87   :  { %12120 = vmatprep.mubr.msk.f32.mxu1 %vm12427_vm2, %v12426_v1  ;;  %v9763_v26 = vcombine.high %v9761_v11, %v9761_v11  ;;  %v9777_v14 = vrot.slane %v9761_v11, %v12691_v46  ;;  %v9784_v59 = vrot.slane %v9762_v31, %v12691_v46  ;;  %v9792_v45 = vcombine.high %v9770_v10, %v9770_v10  ;;  %v11049_v11 = vld [vmem:[%s15144_s9 + $0x70] sm:$0xff]  ;;  %v11048_v31 = vld [vmem:[%s15144_s9 + $0x68] sm:$0xff] }
0x1b88   :  { %v9963_v7 = vcombine.low %v9746_v49, %v9770_v10  ;;  %v9812_v63 = vcombine.high %v9810_v32, %v9810_v32  ;;  %v9826_v22 = vrot.slane %v9810_v32, %v12691_v46  ;;  %v9833_v15 = vrot.slane %v9811_v23, %v12691_v46  ;;  %12153 = vmatpush3.msra.mxu0 %v11050_v60  ;;  %v11170_v10 = vld [vmem:[%s15143_s8 + $0x1] ss:$0 sm:$0xff] }
0x1b89   :  { %v9791_v5 = vrot.slane %v9763_v26, %v12691_v46  ;;  %v9793_v20 = vcombine.high %v9777_v14, %v9777_v14  ;;  %v9794_v39 = vcombine.high %v9784_v59, %v9784_v59  ;;  %v9964_v25 = vcombine.low %v9784_v59, %v9792_v45  ;;  %12154 = vmatprep.subr.mxu0 %v12426_v1 }
0x1b8a   :  { %12121 = vmatmul.mubr.msk.f32.gmra.mxu1 %vm42_vm0, %v9962_v62  ;;  %v9973_v12 = vrot.slane %v9963_v7, %v12691_v46  ;;  %v9840_v29 = vrot.slane %v9812_v63, %v12691_v46  ;;  %v9841_v17 = vcombine.high %v9819_v6, %v9819_v6  ;;  %v9842_v48 = vcombine.high %v9826_v22, %v9826_v22 }
0x1b8b   :  { %12123 = vmatprep.mubr.msk.f32.mxu1 %vm12427_vm2, %v12426_v1  ;;  %v9965_v53 = vcombine.low %v9794_v39, %v9777_v14  ;;  %v9966_v13 = vcombine.low %v9791_v5, %v9793_v20  ;;  %v9980_v43 = vrot.slane %v9964_v25, %v12691_v46  ;;  %v9795_v35 = vcombine.high %v9791_v5, %v9791_v5 }
0x1b8c   :  { %v9843_v24 = vcombine.high %v9833_v15, %v9833_v15  ;;  %v10013_v51 = vcombine.low %v9833_v15, %v9841_v17  ;;  %v10015_v37 = vcombine.low %v9840_v29, %v9842_v48  ;;  %v9844_v16 = vcombine.high %v9840_v29, %v9840_v29  ;;  %12155 = vmatpush3.msra.mxu0 %v11049_v11  ;;  %v15023_v48 = vld [vmem:[%s15145_s10 + $0x1] ss:$0 sm:$0xff] }
0x1b8d   :  { %v9987_v34 = vrot.slane %v9965_v53, %v12691_v46  ;;  %v9994_v18 = vrot.slane %v9966_v13, %v12691_v46  ;;  %v9995_v30 = vcombine.low %v9973_v12, %v9980_v43  ;;  %v10012_v61 = vcombine.low %v9795_v35, %v9819_v6  ;;  %12156 = vmatprep.subr.mxu0 %v12426_v1 }
0x1b8e   :  { %v10014_v57 = vcombine.low %v9843_v24, %v9826_v22  ;;  %v10043_v47 = vrot.slane %v10015_v37, %v12691_v46  ;;  %v10029_v2 = vrot.slane %v10013_v51, %v12691_v46  ;;  %v10061_v40 = vcombine.low %v9844_v16, %v9858_v52  ;;  %12157 = vmatpush3.msra.mxu0 %v11048_v31 }
0x1b8f   :  { %v9996_v54 = vcombine.low %v9987_v34, %v9994_v18  ;;  %v10022_v55 = vrot.slane %v10012_v61, %v12691_v46  ;;  %v10003_v41 = vrot.slane %v9995_v30, %v12691_v46 }
0x1b90   :  { %v10036_v42 = vrot.slane %v10014_v57, %v12691_v46  ;;  %v10068_v49 = vrot.slane %v10061_v40, %v12691_v46 }
0x1b91   :  { %v10010_v0 = vrot.slane %v9996_v54, %v12691_v46  ;;  %v10044_v4 = vcombine.low %v10022_v55, %v10029_v2 }
0x1b92   :  { %v10045_v56 = vcombine.low %v10036_v42, %v10043_v47  ;;  %v10075_v36 = vrot.slane %v10068_v49, %v12691_v46 }
0x1b93   :  { %v10011_v58 = vcombine.low %v10003_v41, %v10010_v0  ;;  %v10052_v33 = vrot.slane %v10044_v4, %v12691_v46 }
0x1b94   :  { %v10059_v19 = vrot.slane %v10045_v56, %v12691_v46 }
0x1b95   :  { %12124 = vmatmul.mubr.msk.f32.gmra.mxu1 %vm42_vm0, %v10011_v58 }
0x1b96   :  { %12126 = vmatprep.mubr.msk.f32.mxu1 %vm12427_vm2, %v12426_v1  ;;  %v10060_v27 = vcombine.low %v10052_v33, %v10059_v19 }
0x1b99   :  { %12127 = vmatmul.mubr.msk.f32.gmra.mxu1 %vm42_vm0, %v10060_v27 }
0x1b9a   :  { %12129 = vmatprep.mubr.msk.f32.mxu1 %vm12427_vm2, %v12426_v1 }
0x1b9d   :  { %12130 = vmatmul.mubr.msk.f32.gmra.mxu1 %vm42_vm0, %v10075_v36 }
0x1c46   :  { %v10152_v32 = vpop.f32.mrf.mxu1 }
0x1c47   :  { %v10153_v38 = vadd.f32 %v11170_v10, %v10152_v32 }
0x1c48   :  { %v12119_v62 = vpop.f32.mrf.mxu1 }
0x1c49   :  { %v10176_v23 = vmax.f32 %v10153_v38, 0.0 }
0x1c4a   :  { %v10157_v6 = vpop.f32.mrf.mxu1 }
0x1c4b   :  { %v10158_v26 = vadd.f32 %v11170_v10, %v10157_v6  ;;  %12159 = vmatmul.mubr.msk.f32.vlgmr.msra.gmra.mxu0 %vm4897_vm10, %v10176_v23 }
0x1c4c   :  { %v12122_v14 = vpop.f32.mrf.mxu1  ;;  %12161 = vmatprep.mubr.msk.f32.mxu0 %vm12427_vm2, %v12426_v1 }
0x1c4d   :  { %v10177_v59 = vmax.f32 %v10158_v26, 0.0 }
0x1c4f   :  { %12162 = vmatmul.mubr.msk.f32.gmra.mxu0 %vm4897_vm10, %v10177_v59 }
0x1c50   :  { %12164 = vmatprep.mubr.msk.f32.mxu0 %vm12427_vm2, %v12426_v1 }
0x1c55   :  { %v10162_v45 = vpop.f32.mrf.mxu1 }
0x1c56   :  { %v10163_v7 = vadd.f32 %v11170_v10, %v10162_v45 }
0x1c57   :  { %v12125_v63 = vpop.f32.mrf.mxu1 }
0x1c58   :  { %v10178_v22 = vmax.f32 %v10163_v7, 0.0 }
0x1c59   :  { %v10167_v15 = vpop.f32.mrf.mxu1 }
0x1c5a   :  { %v10168_v5 = vadd.f32 %v11170_v10, %v10167_v15  ;;  %12165 = vmatmul.mubr.msk.f32.gmra.mxu0 %vm4897_vm10, %v10178_v22 }
0x1c5b   :  { %v12128_v20 = vpop.f32.mrf.mxu1  ;;  %12167 = vmatprep.mubr.msk.f32.mxu0 %vm12427_vm2, %v12426_v1 }
0x1c5c   :  { %v10179_v39 = vmax.f32 %v10168_v5, 0.0 }
0x1c5d   :  { %v10172_v25 = vpop.f32.mrf.mxu1 }
0x1c5e   :  { %v10173_v12 = vadd.f32 %v11170_v10, %v10172_v25  ;;  %12168 = vmatmul.mubr.msk.f32.gmra.mxu0 %vm4897_vm10, %v10179_v39 }
0x1c5f   :  { %v12131_v29 = vpop.f32.mrf.mxu1  ;;  %12170 = vmatprep.mubr.msk.f32.mxu0 %vm12427_vm2, %v12426_v1 }
0x1c60   :  { %v10180_v17 = vmax.f32 %v10173_v12, 0.0 }
0x1c62   :  { %12171 = vmatmul.mubr.msk.f32.gmra.mxu0 %vm4897_vm10, %v10180_v17 }
0x1d0b   :  { %v10271_v53 = vpop.f32.mrf.mxu0 }
0x1d0c   :  { %v10272_v13 = vadd.f32 %v15023_v48, %v10271_v53 }
0x1d0d   :  { %v12160_v43 = vpop.f32.mrf.mxu0 }
0x1d0e   :  { %v10300_v35 = vcombine.high %v10272_v13, %v10272_v13  ;;  %v10307_v24 = vrot.slane %v10272_v13, %v12691_v46 }
0x1d0f   :  { %v10276_v51 = vpop.f32.mrf.mxu0 }
0x1d10   :  { %v10314_v37 = vrot.slane %v10300_v35, %v12691_v46  ;;  %v10315_v9 = vcombine.high %v10307_v24, %v10307_v24  ;;  %v10277_v1 = vadd.f32 %v15023_v48, %v10276_v51  ;;  %v10323_v30 = vrot.slane %v10307_v24, %v12691_v46 }
0x1d11   :  { %v12163_v34 = vpop.f32.mrf.mxu0 }
0x1d12   :  { %v10316_v18 = vcombine.high %v10314_v37, %v10314_v37  ;;  %v10337_v61 = vrot.slane %v10315_v9, %v12691_v46  ;;  %v10349_v57 = vcombine.high %v10277_v1, %v10277_v1  ;;  %v10330_v47 = vrot.slane %v10314_v37, %v12691_v46 }
0x1d13   :  { %v10356_v54 = vrot.slane %v10277_v1, %v12691_v46 }
0x1d14   :  { %v10344_v55 = vrot.slane %v10316_v18, %v12691_v46  ;;  %v10518_v2 = vcombine.low %v10323_v30, %v10337_v61  ;;  %v11187_v16 = vcombine.high %v10323_v30, %v10337_v61  ;;  %v10363_v42 = vrot.slane %v10349_v57, %v12691_v46 }
0x1d15   :  { %v10364_v41 = vcombine.high %v10356_v54, %v10356_v54  ;;  %v10372_v33 = vrot.slane %v10356_v54, %v12691_v46 }
0x1d16   :  { %v10520_v0 = vcombine.low %v10330_v47, %v10344_v55  ;;  %v11188_v4 = vcombine.high %v10330_v47, %v10344_v55  ;;  %v10528_v52 = vrot.slane %v10518_v2, %v12691_v46  ;;  %v10535_v56 = vrot.slane %v11187_v16, %v12691_v46 }
0x1d17   :  { %v10365_v58 = vcombine.high %v10363_v42, %v10363_v42  ;;  %v10386_v40 = vrot.slane %v10364_v41, %v12691_v46  ;;  %v10379_v36 = vrot.slane %v10363_v42, %v12691_v46 }
0x1d18   :  { %v10542_v19 = vrot.slane %v10520_v0, %v12691_v46  ;;  %v10549_v27 = vrot.slane %v11188_v4, %v12691_v46  ;;  %v10550_v49 = vcombine.low %v10528_v52, %v10535_v56 }
0x1d19   :  { %v10393_v60 = vrot.slane %v10365_v58, %v12691_v46  ;;  %v10567_v11 = vcombine.low %v10372_v33, %v10386_v40  ;;  %v11189_v31 = vcombine.high %v10372_v33, %v10386_v40 }
0x1d1a   :  { %v10551_v10 = vcombine.low %v10542_v19, %v10549_v27  ;;  %v10281_v6 = vpop.f32.mrf.mxu0  ;;  %v10558_v26 = vrot.slane %v10550_v49, %v12691_v46 }
0x1d1b   :  { %v10569_v32 = vcombine.low %v10379_v36, %v10393_v60  ;;  %v11190_v38 = vcombine.high %v10379_v36, %v10393_v60  ;;  %v10577_v62 = vrot.slane %v10567_v11, %v12691_v46  ;;  %v10584_v23 = vrot.slane %v11189_v31, %v12691_v46 }
0x1d1c   :  { %v10565_v14 = vrot.slane %v10551_v10, %v12691_v46  ;;  %v10282_v59 = vadd.f32 %v15023_v48, %v10281_v6  ;;  %v12166_v22 = vpop.f32.mrf.mxu0 }
0x1d1d   :  { %v10591_v45 = vrot.slane %v10569_v32, %v12691_v46  ;;  %v10598_v7 = vrot.slane %v11190_v38, %v12691_v46  ;;  %v10599_v63 = vcombine.low %v10577_v62, %v10584_v23 }
0x1d1e   :  { %v10566_v15 = vcombine.low %v10558_v26, %v10565_v14  ;;  %v10398_v5 = vcombine.high %v10282_v59, %v10282_v59  ;;  %v10405_v20 = vrot.slane %v10282_v59, %v12691_v46  ;;  %v10286_v25 = vpop.f32.mrf.mxu0 }
0x1d1f   :  { %v10600_v39 = vcombine.low %v10591_v45, %v10598_v7  ;;  %v10607_v13 = vrot.slane %v10599_v63, %v12691_v46  ;;  %v10287_v35 = vadd.f32 %v15023_v48, %v10286_v25 }
0x1d20   :  { %v10412_v12 = vrot.slane %v10398_v5, %v12691_v46  ;;  %v10413_v29 = vcombine.high %v10405_v20, %v10405_v20  ;;  %v10421_v17 = vrot.slane %v10405_v20, %v12691_v46  ;;  %v15054_v53 = vadd.f32 %v10566_v15, %v14841_v44  ;;  %v12169_v24 = vpop.f32.mrf.mxu0 }
0x1d21   :  { %v10614_v43 = vrot.slane %v10600_v39, %v12691_v46  ;;  %v10447_v30 = vcombine.high %v10287_v35, %v10287_v35  ;;  %v10454_v2 = vrot.slane %v10287_v35, %v12691_v46 }
0x1d22   :  { %v10414_v51 = vcombine.high %v10412_v12, %v10412_v12  ;;  %v10428_v37 = vrot.slane %v10412_v12, %v12691_v46  ;;  %v10435_v9 = vrot.slane %v10413_v29, %v12691_v46  ;;  %v10443_v1 = vcombine.high %v10421_v17, %v10421_v17  ;;  %v10291_v61 = vpop.f32.mrf.mxu0 }
0x1d23   :  { %v10615_v34 = vcombine.low %v10607_v13, %v10614_v43  ;;  %v10622_v18 = vrot.slane %v10421_v17, %v12691_v46  ;;  %v10461_v16 = vrot.slane %v10447_v30, %v12691_v46  ;;  %v10754_v4 = vsel %vm42_vm0, %v15054_v53, 0.0 }
0x1d24   :  { %v10442_v44 = vrot.slane %v10414_v51, %v12691_v46  ;;  %v10444_v57 = vcombine.high %v10428_v37, %v10428_v37  ;;  %v10445_v47 = vcombine.high %v10435_v9, %v10435_v9  ;;  %v12172_v42 = vpop.f32.mrf.mxu0  ;;  %v10630_v41 = vcombine.low %v10435_v9, %v10443_v1 }
0x1d25   :  { %v15064_v54 = vadd.f32 %v10615_v34, %v14862_v3  ;;  %v10629_v55 = vrot.slane %v10622_v18, %v12691_v46  ;;  %v10462_v3 = vcombine.high %v10454_v2, %v10454_v2  ;;  %v10463_v33 = vcombine.high %v10461_v16, %v10461_v16 }
0x1d26   :  { %v10631_v0 = vcombine.low %v10445_v47, %v10428_v37  ;;  %v10446_v52 = vcombine.high %v10442_v44, %v10442_v44  ;;  %v10632_v40 = vcombine.low %v10442_v44, %v10444_v57  ;;  %v10470_v27 = vrot.slane %v10454_v2, %v12691_v46 }
0x1d27   :  { %v10750_v56 = vadd.f32 %v10629_v55, %v14851_v28  ;;  %v10755_v58 = vsel %vm42_vm0, %v15064_v54, 0.0  ;;  %v10477_v49 = vrot.slane %v10461_v16, %v12691_v46  ;;  %v10484_v60 = vrot.slane %v10462_v3, %v12691_v46 }
0x1d28   :  { %v10756_v19 = vadd.f32 %v10755_v58, %v10754_v4  ;;  %v10491_v11 = vrot.slane %v10463_v33, %v12691_v46  ;;  %v10647_v31 = vrot.slane %v10631_v0, %v12691_v46  ;;  %v10492_v10 = vcombine.high %v10470_v27, %v10470_v27 }
0x1d29   :  { %v10757_v36 = vsel %vm45_vm1, %v10750_v56, 0.0  ;;  %v10493_v32 = vcombine.high %v10477_v49, %v10477_v49  ;;  %v10494_v38 = vcombine.high %v10484_v60, %v10484_v60  ;;  %v10633_v62 = vcombine.low %v10446_v52, %v10470_v27 }
0x1d2a   :  { %v10758_v28 = vadd.f32 %v10757_v36, %v10756_v19  ;;  %v10292_v23 = vadd.f32 %v15023_v48, %v10291_v61  ;;  %v10640_v6 = vrot.slane %v10630_v41, %v12691_v46  ;;  %v10654_v14 = vrot.slane %v10632_v40, %v12691_v46 }
0x1d2b   :  { %v10495_v59 = vcombine.high %v10491_v11, %v10491_v11  ;;  %v10661_v45 = vrot.slane %v10633_v62, %v12691_v46  ;;  %v10679_v7 = vcombine.low %v10484_v60, %v10492_v10  ;;  %v10680_v63 = vcombine.low %v10494_v38, %v10477_v49 }
0x1d2c   :  { %v10759_v26 = vrot.slane %v10758_v28, 4  ;;  %v10502_v22 = vrot.slane %v10292_v23, %v12691_v46  ;;  %v10662_v15 = vcombine.low %v10640_v6, %v10647_v31  ;;  %v10681_v20 = vcombine.low %v10491_v11, %v10493_v32 }
0x1d2d   :  { %v10663_v39 = vcombine.low %v10654_v14, %v10661_v45  ;;  %v10696_v25 = vrot.slane %v10680_v63, %v12691_v46  ;;  %v10689_v13 = vrot.slane %v10679_v7, %v12691_v46 }
0x1d2e   :  { %v10760_v5 = vadd.f32 %v10759_v26, %v10758_v28  ;;  %v10503_v12 = vcombine.high %v10502_v22, %v10502_v22  ;;  %v10510_v48 = vrot.slane %v10502_v22, %v12691_v46  ;;  %v10670_v24 = vrot.slane %v10662_v15, %v12691_v46 }
0x1d2f   :  { %v10677_v17 = vrot.slane %v10663_v39, %v12691_v46  ;;  %v10711_v37 = vcombine.low %v10689_v13, %v10696_v25  ;;  %v10703_v9 = vrot.slane %v10681_v20, %v12691_v46 }
0x1d30   :  { %v10761_v29 = vrot.slane %v10760_v5, 2  ;;  %v10517_v43 = vrot.slane %v10503_v12, %v12691_v46  ;;  %v10682_v35 = vcombine.low %v10495_v59, %v10510_v48 }
0x1d31   :  { %v10678_v30 = vcombine.low %v10670_v24, %v10677_v17  ;;  %v10719_v57 = vrot.slane %v10711_v37, %v12691_v46 }
0x1d32   :  { %v10762_v51 = vadd.f32 %v10761_v29, %v10760_v5  ;;  %v10710_v1 = vrot.slane %v10682_v35, %v12691_v46  ;;  %v10734_v34 = vrot.slane %v10517_v43, %v12691_v46 }
0x1d33   :  { %v10751_v16 = vadd.f32 %v10678_v30, %v14885_v21 }
0x1d34   :  { %v10763_v18 = vrot.slane %v10762_v51, 1  ;;  %v10712_v61 = vcombine.low %v10703_v9, %v10710_v1  ;;  %v10741_v55 = vrot.slane %v10734_v34, %v12691_v46 }
0x1d35   :  { %v10788_v19 = vsel %vm42_vm0, %v10751_v16, 0.0 }
0x1d36   :  { %v10764_v44 = vadd.f32 %v10763_v18, %v10762_v51  ;;  %v10726_v47 = vrot.slane %v10712_v61, %v12691_v46  ;;  %v10753_v58 = vadd.f32 %v10741_v55, %v14891_v50 }
0x1d38   :  { %v10765_v2 = vmul.f32 0.05882353, %v10764_v44  ;;  %v10727_v42 = vcombine.low %v10719_v57, %v10726_v47 }
0x1d3a   :  { %v10766_v41 = vsub.f32 %v15054_v53, %v10765_v2  ;;  %v10767_v0 = vsub.f32 %v15064_v54, %v10765_v2  ;;  %v10768_v4 = vsub.f32 %v10750_v56, %v10765_v2  ;;  %v10752_v52 = vadd.f32 %v10727_v42, %v14888_v8 }
0x1d3b   :  { %v10791_v54 = vsel %vm45_vm1, %v10753_v58, 0.0 }
0x1d3c   :  { %v10769_v3 = vmul.f32 %v10766_v41, %v10766_v41  ;;  %v10770_v33 = vmul.f32 %v10767_v0, %v10767_v0  ;;  %v10771_v40 = vmul.f32 %v10768_v4, %v10768_v4  ;;  %v10789_v46 = vsel %vm42_vm0, %v10752_v52, 0.0 }
0x1d3d   :  { %v10790_v49 = vadd.f32 %v10789_v46, %v10788_v19 }
0x1d3e   :  { %v10772_v27 = vsel %vm42_vm0, %v10769_v3, 0.0  ;;  %v10773_v21 = vsel %vm42_vm0, %v10770_v33, 0.0  ;;  %v10775_v56 = vsel %vm45_vm1, %v10771_v40, 0.0 }
0x1d3f   :  { %v10774_v53 = vadd.f32 %v10773_v21, %v10772_v27  ;;  %v10792_v8 = vadd.f32 %v10791_v54, %v10790_v49 }
0x1d41   :  { %v10776_v36 = vadd.f32 %v10775_v56, %v10774_v53  ;;  %v10793_v50 = vrot.slane %v10792_v8, 4 }
0x1d43   :  { %v10777_v60 = vrot.slane %v10776_v36, 4  ;;  %v10794_v11 = vadd.f32 %v10793_v50, %v10792_v8 }
0x1d45   :  { %v10778_v31 = vadd.f32 %v10777_v60, %v10776_v36  ;;  %v10795_v28 = vrot.slane %v10794_v11, 2 }
0x1d47   :  { %v10779_v10 = vrot.slane %v10778_v31, 2  ;;  %v10796_v32 = vadd.f32 %v10795_v28, %v10794_v11 }
0x1d49   :  { %v10780_v38 = vadd.f32 %v10779_v10, %v10778_v31  ;;  %v10797_v62 = vrot.slane %v10796_v32, 1 }
0x1d4b   :  { %v10781_v23 = vrot.slane %v10780_v38, 1  ;;  %v10798_v6 = vadd.f32 %v10797_v62, %v10796_v32 }
0x1d4d   :  { %v10782_v26 = vadd.f32 %v10781_v23, %v10780_v38  ;;  %v10799_v14 = vmul.f32 0.05882353, %v10798_v6 }
0x1d4f   :  { %v10783_v59 = vmul.f32 0.0625, %v10782_v26  ;;  %v10800_v45 = vsub.f32 %v10751_v16, %v10799_v14  ;;  %v10801_v7 = vsub.f32 %v10752_v52, %v10799_v14  ;;  %v10802_v63 = vsub.f32 %v10753_v58, %v10799_v14 }
0x1d51   :  { %12407 = vrsqrt.f32 %v10783_v59  ;;  %v10803_v22 = vmul.f32 %v10800_v45, %v10800_v45  ;;  %v10804_v15 = vmul.f32 %v10801_v7, %v10801_v7  ;;  %v10805_v5 = vmul.f32 %v10802_v63, %v10802_v63 }
0x1d53   :  { %v10806_v20 = vsel %vm42_vm0, %v10803_v22, 0.0  ;;  %v10807_v39 = vsel %vm42_vm0, %v10804_v15, 0.0  ;;  %v10809_v12 = vsel %vm45_vm1, %v10805_v5, 0.0 }
0x1d54   :  { %v10808_v25 = vadd.f32 %v10807_v39, %v10806_v20 }
0x1d56   :  { %v10810_v48 = vadd.f32 %v10809_v12, %v10808_v25 }
0x1d58   :  { %v10811_v29 = vrot.slane %v10810_v48, 4 }
0x1d5a   :  { %v10812_v17 = vadd.f32 %v10811_v29, %v10810_v48 }
0x1d5c   :  { %v10813_v13 = vrot.slane %v10812_v17, 2 }
0x1d5e   :  { %v12408_v43 = vpop.eup %12407  ;;  %v10814_v37 = vadd.f32 %v10813_v13, %v10812_v17 }
0x1d5f   :  { %v10785_v35 = vmul.f32 %v12408_v43, %v10766_v41  ;;  %v10786_v24 = vmul.f32 %v12408_v43, %v10767_v0  ;;  %v10787_v51 = vmul.f32 %v12408_v43, %v10768_v4 }
0x1d60   :  { %v10815_v9 = vrot.slane %v10814_v37, 1 }
0x1d61   :  { %10822 = vst.msk [vmem:[%s15146_s11] sm:$0xff] %vm42_vm0, %v10785_v35  ;;  %10823 = vst.msk [vmem:[%s15146_s11 + $0x8] sm:$0xff] %vm42_vm0, %v10786_v24 }
0x1d62   :  { %10824 = vst.msk [vmem:[%s15146_s11 + $0x10] sm:$0x1] %vm45_vm1, %v10787_v51  ;;  %v10816_v1 = vadd.f32 %v10815_v9, %v10814_v37 }
0x1d64   :  { %v10817_v34 = vmul.f32 0.0625, %v10816_v1 }
0x1d66   :  { %12409 = vrsqrt.f32 %v10817_v34 }
0x1d73   :  { %v12410_v18 = vpop.eup %12409 }
0x1d74   :  { %v10819_v30 = vmul.f32 %v12410_v18, %v10800_v45  ;;  %v10820_v61 = vmul.f32 %v12410_v18, %v10801_v7  ;;  %v10821_v44 = vmul.f32 %v12410_v18, %v10802_v63 }
0x1d76   :  { %10825 = vst.msk [vmem:[%s15146_s11 + $0x18] sm:$0xff] %vm42_vm0, %v10819_v30  ;;  %10826 = vst.msk [vmem:[%s15146_s11 + $0x20] sm:$0xff] %vm42_vm0, %v10820_v61 }
0x1d77   :  { %10827 = vst.msk [vmem:[%s15146_s11 + $0x28] sm:$0x1] %vm45_vm1, %v10821_v44 }

</bundles_post_ra>
